<compile_context>
chip_gen: v6e
topology: v6e:2x2x1
jax: 0.10.0
libtpu: 0.0.40
codegen_flags: <defaults>
</compile_context>

<pallas_src>
import jax
import jax.numpy as jnp
from jax import lax
from jax.experimental import pallas as pl
from jax.experimental.pallas import tpu as pltpu

# Small, forward-consistent shapes (original: vocab=100000, emb_dim=100).
VOCAB = 100
EMB_DIM = 32            # nn.LSTM(emb_dim, emb_dim, ...) -> hidden == emb_dim
HIDDEN = 2 * EMB_DIM    # MLP width (concat of p/q last hidden states)
SEQ = 8
BATCH = 4
PAD_B = 8               # batch padded to the 8-sublane width
NUM_LAYERS = 3
NUM_GATES = 4           # PyTorch gate order: i, f, g, o


# ----------------------------------------------------------------------------
# Pallas kernels
# ----------------------------------------------------------------------------
def _lstm_pair_kernel(x_ref, wih_ref, whh_ref, b_ref, len_ref, out_ref,
                      seq_ref, proj_ref):
    """One 3-layer LSTM (p or q, selected by grid index) + last-step gather.

    x_ref:    [S, Bp, E]    time-major embedded input
    wih_ref:  [L, 4, E, E]  input->hidden weights, per layer / gate (x @ W)
    whh_ref:  [L, 4, E, E]  hidden->hidden weights, per layer / gate
    b_ref:    [L, 4, 1, E]  b_ih + b_hh, per layer / gate
    len_ref:  [Bp, 1] i32   valid length per batch row
    out_ref:  [Bp, E]       top-layer hidden state at t = len - 1
    seq_ref:  [S, Bp, E]    scratch: current layer's output sequence
    proj_ref: [S, 4*Bp, E]  scratch: hoisted input projection (+bias);
                            gate g occupies sublane rows [g*Bp, (g+1)*Bp)
    """
    S, Bp, E = seq_ref.shape

    for layer in range(NUM_LAYERS):
        # --- hoisted input projection: bulk matmuls, off the critical path ---
        x_seq = x_ref[...] if layer == 0 else seq_ref[...]       # [S, Bp, E]
        x_flat = x_seq.reshape(S * Bp, E)
        wih_l = wih_ref[layer]                                   # [4, E, E]
        whh_l = whh_ref[layer]                                   # [4, E, E]
        b_l = b_ref[layer]                                       # [4, 1, E]
        for g in range(NUM_GATES):
            pg = jnp.dot(x_flat, wih_l[g],
                         preferred_element_type=jnp.float32) + b_l[g]
            proj_ref[:, g * Bp:(g + 1) * Bp, :] = pg.reshape(S, Bp, E)

        # --- serial recurrence: only h @ Whh per gate remains inside ---
        def step(t, carry, whh_l=whh_l):
            h, c = carry
            xp = proj_ref[t]                                     # [4*Bp, E]
            i_g = jax.nn.sigmoid(
                xp[0 * Bp:1 * Bp]
                + jnp.dot(h, whh_l[0], preferred_element_type=jnp.float32))
            f_g = jax.nn.sigmoid(
                xp[1 * Bp:2 * Bp]
                + jnp.dot(h, whh_l[1], preferred_element_type=jnp.float32))
            g_g = jnp.tanh(
                xp[2 * Bp:3 * Bp]
                + jnp.dot(h, whh_l[2], preferred_element_type=jnp.float32))
            o_g = jax.nn.sigmoid(
                xp[3 * Bp:4 * Bp]
                + jnp.dot(h, whh_l[3], preferred_element_type=jnp.float32))
            c_new = f_g * c + i_g * g_g
            h_new = o_g * jnp.tanh(c_new)
            seq_ref[t] = h_new
            return (h_new, c_new)

        zero = jnp.zeros((Bp, E), jnp.float32)
        lax.fori_loop(0, S, step, (zero, zero), unroll=True)
        # TODO(synk): PyTorch applies dropout(p=0.1) between LSTM layers in
        # train mode; inference-mode identity here.

    # --- gather h at t = len-1 for every batch row (vectorized select) ---
    t_ids = lax.broadcasted_iota(jnp.int32, (S, Bp, 1), 0)
    sel = ((t_ids + 1) == len_ref[...]).astype(jnp.float32)      # [S, Bp, 1]
    out_ref[...] = jnp.sum(seq_ref[...] * sel, axis=0)           # [Bp, E]


def _head_kernel(h_ref, w1_ref, b1_ref, w2_ref, b2_ref, w3_ref, b3_ref,
                 wf_ref, bf_ref, out_ref):
    """concat(p_last, q_last) -> 3x(Linear+Tanh) -> Linear(2) -> Softmax.

    h_ref: [2, Bp, E]; w1/w2/w3: [2E, 2E]; wf: [2E, 2]; biases [1, *].
    The concat is folded into the first Linear as a split matmul:
    [p|q] @ W1 = p @ W1[:E] + q @ W1[E:]  (no lane concat needed).
    """
    E = h_ref.shape[-1]
    p_last = h_ref[0]                                            # [Bp, E]
    q_last = h_ref[1]
    y = jnp.tanh(
        jnp.dot(p_last, w1_ref[:E, :], preferred_element_type=jnp.float32)
        + jnp.dot(q_last, w1_ref[E:, :], preferred_element_type=jnp.float32)
        + b1_ref[...])
    y = jnp.tanh(jnp.dot(y, w2_ref[...], preferred_element_type=jnp.float32)
                 + b2_ref[...])
    y = jnp.tanh(jnp.dot(y, w3_ref[...], preferred_element_type=jnp.float32)
                 + b3_ref[...])
    logits = (jnp.dot(y, wf_ref[...], preferred_element_type=jnp.float32)
              + bf_ref[...])                                     # [Bp, 2]
    m = jnp.max(logits, axis=-1, keepdims=True)
    e = jnp.exp(logits - m)
    out_ref[...] = e / jnp.sum(e, axis=-1, keepdims=True)


# ----------------------------------------------------------------------------
# Pallas wrappers
# ----------------------------------------------------------------------------
def lstm_pair(x, wih, whh, b, lens):
    """x: [2, S, Bp, E]; wih/whh: [2, L, 4, E, E]; b: [2, L, 4, 1, E];
    lens: [2, Bp, 1] int32  ->  [2, Bp, E] last hidden states (p, q)."""
    _, S, Bp, E = x.shape
    L, G = wih.shape[1], wih.shape[2]
    grid_spec = pltpu.PrefetchScalarGridSpec(
        num_scalar_prefetch=0,
        grid=(2,),
        in_specs=[
            pl.BlockSpec((None, S, Bp, E), lambda i: (i, 0, 0, 0)),
            pl.BlockSpec((None, L, G, E, E), lambda i: (i, 0, 0, 0, 0)),
            pl.BlockSpec((None, L, G, E, E), lambda i: (i, 0, 0, 0, 0)),
            pl.BlockSpec((None, L, G, 1, E), lambda i: (i, 0, 0, 0, 0)),
            pl.BlockSpec((None, Bp, 1), lambda i: (i, 0, 0)),
        ],
        out_specs=pl.BlockSpec((None, Bp, E), lambda i: (i, 0, 0)),
        scratch_shapes=[
            pltpu.VMEM((S, Bp, E), jnp.float32),       # inter-layer sequence
            pltpu.VMEM((S, G * Bp, E), jnp.float32),   # hoisted projections
        ],
    )
    return pl.pallas_call(
        _lstm_pair_kernel,
        out_shape=jax.ShapeDtypeStruct((2, Bp, E), jnp.float32),
        grid_spec=grid_spec,
        compiler_params=pltpu.CompilerParams(
            dimension_semantics=("parallel",)),   # p/q split across TCs on v7x
    )(x, wih, whh, b, lens)


def mlp_head(hlast, w1, b1, w2, b2, w3, b3, wf, bf):
    Bp = hlast.shape[1]
    vmem = pl.BlockSpec(memory_space=pltpu.MemorySpace.VMEM)
    return pl.pallas_call(
        _head_kernel,
        out_shape=jax.ShapeDtypeStruct((Bp, 2), jnp.float32),
        in_specs=[vmem] * 9,
        out_specs=vmem,
    )(hlast, w1, b1, w2, b2, w3, b3, wf, bf)


# ----------------------------------------------------------------------------
# Parameter init (deterministic, PyTorch-default-like uniform ranges)
# ----------------------------------------------------------------------------
def _uniform(key, shape, bound):
    return jax.random.uniform(key, shape, jnp.float32, -bound, bound)


def init_params(key):
    keys = jax.random.split(key, 6)
    emb = jax.random.normal(keys[0], (VOCAB, EMB_DIM), jnp.float32)
    emb = emb.at[0].set(0.0)                       # padding_idx=0

    # Stacked LSTM weights for the two LSTMs (p, q), laid out as
    # [lstm, layer, gate(i,f,g,o), in, out] for x @ W matmuls in the kernel.
    bound = 1.0 / jnp.sqrt(jnp.float32(EMB_DIM))
    k = jax.random.split(keys[1], 4)
    wih = _uniform(k[0], (2, NUM_LAYERS, NUM_GATES, EMB_DIM, EMB_DIM), bound)
    whh = _uniform(k[1], (2, NUM_LAYERS, NUM_GATES, EMB_DIM, EMB_DIM), bound)
    bih = _uniform(k[2], (2, NUM_LAYERS, NUM_GATES, 1, EMB_DIM), bound)
    bhh = _uniform(k[3], (2, NUM_LAYERS, NUM_GATES, 1, EMB_DIM), bound)

    def linear(kk, fan_in, fan_out):
        bnd = 1.0 / jnp.sqrt(jnp.float32(fan_in))
        kw, kb = jax.random.split(kk)
        return _uniform(kw, (fan_in, fan_out), bnd), _uniform(kb, (1, fan_out), bnd)

    k_lin = jax.random.split(keys[2], 4)
    return {
        "emb": emb,
        "lstm_wih": wih,
        "lstm_whh": whh,
        "lstm_b": bih + bhh,
        "lin1": linear(k_lin[0], HIDDEN, HIDDEN),
        "lin2": linear(k_lin[1], HIDDEN, HIDDEN),
        "lin3": linear(k_lin[2], HIDDEN, HIDDEN),
        "fc": linear(k_lin[3], HIDDEN, 2),
    }


# ----------------------------------------------------------------------------
# Forward pass (embedding + padding glue in JAX, hot paths in Pallas)
# ----------------------------------------------------------------------------
def embed(emb_w, ids):
    """nn.Embedding(max_norm=1.0, norm_type=2, padding_idx=0) lookup."""
    # TODO(synk): at real size (100000 x 100 table, ~40 MiB) keep the table in
    # HBM (memory_space=pl.ANY) and DMA-gather rows in-kernel instead.
    v = emb_w[ids]                                            # [B, S, E]
    n = jnp.sqrt(jnp.sum(v * v, axis=-1, keepdims=True))
    scale = jnp.where(n > 1.0, 1.0 / (n + 1e-7), 1.0)
    return v * scale


@jax.jit
def match_model_forward(params, p_ids, q_ids, p_len, q_len):
    B, S = p_ids.shape
    p = embed(params["emb"], p_ids)                           # [B, S, E]
    q = embed(params["emb"], q_ids)

    # Stack p/q, pad batch 4 -> 8 (sublane width), go time-major [2, S, Bp, E].
    x = jnp.stack([p, q], axis=0)                             # [2, B, S, E]
    x = jnp.pad(x, ((0, 0), (0, PAD_B - B), (0, 0), (0, 0)))
    x = jnp.transpose(x, (0, 2, 1, 3))                        # [2, S, Bp, E]

    lens = jnp.stack([p_len, q_len], axis=0).astype(jnp.int32)   # [2, B]
    lens = jnp.pad(lens, ((0, 0), (0, PAD_B - B)), constant_values=1)
    lens = lens[..., None]                                    # [2, Bp, 1]

    hlast = lstm_pair(x, params["lstm_wih"], params["lstm_whh"],
                      params["lstm_b"], lens)                 # [2, Bp, E]

    (w1, b1), (w2, b2), (w3, b3), (wf, bf) = (
        params["lin1"], params["lin2"], params["lin3"], params["fc"])
    y = mlp_head(hlast, w1, b1, w2, b2, w3, b3, wf, bf)       # [Bp, 2]
    return y[:B]


# ----------------------------------------------------------------------------
if __name__ == "__main__":
    key = jax.random.PRNGKey(0)
    k_param, k_p, k_q, k_pl, k_ql = jax.random.split(key, 5)

    params = init_params(k_param)

    p_ids = jax.random.randint(k_p, (BATCH, SEQ), 1, VOCAB, dtype=jnp.int32)
    q_ids = jax.random.randint(k_q, (BATCH, SEQ), 1, VOCAB, dtype=jnp.int32)
    p_len = jax.random.randint(k_pl, (BATCH,), 1, SEQ + 1, dtype=jnp.int32)
    q_len = jax.random.randint(k_ql, (BATCH,), 1, SEQ + 1, dtype=jnp.int32)

    y = match_model_forward(params, p_ids, q_ids, p_len, q_len)
    y = jax.block_until_ready(y)

    assert y.shape == (BATCH, 2)
    assert bool(jnp.all(jnp.isfinite(y)))
    # softmax rows sum to 1
    assert bool(jnp.allclose(jnp.sum(y, axis=-1), 1.0, atol=1e-5))
    print("KERNEL_OK")
</pallas_src>

<mosaic_0001>
module attributes {stable_mosaic.version = 11 : i64} {
  func.func @_head_kernel(%arg0: memref<2x8x32xf32, #tpu.memory_space<vmem>>, %arg1: memref<64x64xf32, #tpu.memory_space<vmem>>, %arg2: memref<1x64xf32, #tpu.memory_space<vmem>>, %arg3: memref<64x64xf32, #tpu.memory_space<vmem>>, %arg4: memref<1x64xf32, #tpu.memory_space<vmem>>, %arg5: memref<64x64xf32, #tpu.memory_space<vmem>>, %arg6: memref<1x64xf32, #tpu.memory_space<vmem>>, %arg7: memref<64x2xf32, #tpu.memory_space<vmem>>, %arg8: memref<1x2xf32, #tpu.memory_space<vmem>>, %arg9: memref<8x2xf32, #tpu.memory_space<vmem>>) attributes {dimension_semantics = [], scalar_prefetch = 0 : i64, scratch_operands = 0 : i64, tpu.core_type = #tpu.core_type<tc>} {
    %c0 = arith.constant 0 : index
    %c0_0 = arith.constant 0 : index
    %c0_1 = arith.constant 0 : index
    %0 = vector.load %arg0[%c0, %c0_0, %c0_1] : memref<2x8x32xf32, #tpu.memory_space<vmem>>, vector<1x8x32xf32>
    %1 = vector.shape_cast %0 : vector<1x8x32xf32> to vector<8x32xf32>
    %c1 = arith.constant 1 : index
    %c0_2 = arith.constant 0 : index
    %c0_3 = arith.constant 0 : index
    %2 = vector.load %arg0[%c1, %c0_2, %c0_3] : memref<2x8x32xf32, #tpu.memory_space<vmem>>, vector<1x8x32xf32>
    %3 = vector.shape_cast %2 : vector<1x8x32xf32> to vector<8x32xf32>
    %c0_4 = arith.constant 0 : index
    %c0_5 = arith.constant 0 : index
    %4 = vector.load %arg1[%c0_4, %c0_5] : memref<64x64xf32, #tpu.memory_space<vmem>>, vector<32x64xf32>
    %cst = arith.constant dense<0.000000e+00> : vector<8x64xf32>
    %5 = tpu.matmul %1, %4, %cst {dimension_numbers = #tpu.dot_dimension_numbers<[1], [0], [0], [1], [0, 0, 1, 1], [], []>} : vector<8x32xf32>, vector<32x64xf32>, vector<8x64xf32> -> vector<8x64xf32>
    %c32 = arith.constant 32 : index
    %c0_6 = arith.constant 0 : index
    %6 = vector.load %arg1[%c32, %c0_6] : memref<64x64xf32, #tpu.memory_space<vmem>>, vector<32x64xf32>
    %cst_7 = arith.constant dense<0.000000e+00> : vector<8x64xf32>
    %7 = tpu.matmul %3, %6, %cst_7 {dimension_numbers = #tpu.dot_dimension_numbers<[1], [0], [0], [1], [0, 0, 1, 1], [], []>} : vector<8x32xf32>, vector<32x64xf32>, vector<8x64xf32> -> vector<8x64xf32>
    %8 = arith.addf %5, %7 : vector<8x64xf32>
    %c0_8 = arith.constant 0 : index
    %c0_9 = arith.constant 0 : index
    %9 = vector.load %arg2[%c0_8, %c0_9] : memref<1x64xf32, #tpu.memory_space<vmem>>, vector<1x64xf32>
    %10 = vector.broadcast %9 : vector<1x64xf32> to vector<8x64xf32>
    %11 = arith.addf %8, %10 : vector<8x64xf32>
    %12 = math.tanh %11 : vector<8x64xf32>
    %c0_10 = arith.constant 0 : index
    %c0_11 = arith.constant 0 : index
    %13 = vector.load %arg3[%c0_10, %c0_11] : memref<64x64xf32, #tpu.memory_space<vmem>>, vector<64x64xf32>
    %cst_12 = arith.constant dense<0.000000e+00> : vector<8x64xf32>
    %14 = tpu.matmul %12, %13, %cst_12 {dimension_numbers = #tpu.dot_dimension_numbers<[1], [0], [0], [1], [0, 0, 1, 1], [], []>} : vector<8x64xf32>, vector<64x64xf32>, vector<8x64xf32> -> vector<8x64xf32>
    %c0_13 = arith.constant 0 : index
    %c0_14 = arith.constant 0 : index
    %15 = vector.load %arg4[%c0_13, %c0_14] : memref<1x64xf32, #tpu.memory_space<vmem>>, vector<1x64xf32>
    %16 = vector.broadcast %15 : vector<1x64xf32> to vector<8x64xf32>
    %17 = arith.addf %14, %16 : vector<8x64xf32>
    %18 = math.tanh %17 : vector<8x64xf32>
    %c0_15 = arith.constant 0 : index
    %c0_16 = arith.constant 0 : index
    %19 = vector.load %arg5[%c0_15, %c0_16] : memref<64x64xf32, #tpu.memory_space<vmem>>, vector<64x64xf32>
    %cst_17 = arith.constant dense<0.000000e+00> : vector<8x64xf32>
    %20 = tpu.matmul %18, %19, %cst_17 {dimension_numbers = #tpu.dot_dimension_numbers<[1], [0], [0], [1], [0, 0, 1, 1], [], []>} : vector<8x64xf32>, vector<64x64xf32>, vector<8x64xf32> -> vector<8x64xf32>
    %c0_18 = arith.constant 0 : index
    %c0_19 = arith.constant 0 : index
    %21 = vector.load %arg6[%c0_18, %c0_19] : memref<1x64xf32, #tpu.memory_space<vmem>>, vector<1x64xf32>
    %22 = vector.broadcast %21 : vector<1x64xf32> to vector<8x64xf32>
    %23 = arith.addf %20, %22 : vector<8x64xf32>
    %24 = math.tanh %23 : vector<8x64xf32>
    %c0_20 = arith.constant 0 : index
    %c0_21 = arith.constant 0 : index
    %25 = vector.load %arg7[%c0_20, %c0_21] : memref<64x2xf32, #tpu.memory_space<vmem>>, vector<64x2xf32>
    %cst_22 = arith.constant dense<0.000000e+00> : vector<8x2xf32>
    %26 = tpu.matmul %24, %25, %cst_22 {dimension_numbers = #tpu.dot_dimension_numbers<[1], [0], [0], [1], [0, 0, 1, 1], [], []>} : vector<8x64xf32>, vector<64x2xf32>, vector<8x2xf32> -> vector<8x2xf32>
    %c0_23 = arith.constant 0 : index
    %c0_24 = arith.constant 0 : index
    %27 = vector.load %arg8[%c0_23, %c0_24] : memref<1x2xf32, #tpu.memory_space<vmem>>, vector<1x2xf32>
    %28 = vector.broadcast %27 : vector<1x2xf32> to vector<8x2xf32>
    %29 = arith.addf %26, %28 : vector<8x2xf32>
    %cst_25 = arith.constant dense<0xFF800000> : vector<8xf32>
    %30 = vector.multi_reduction <maximumf>, %29, %cst_25 [1] : vector<8x2xf32> to vector<8xf32>
    %31 = vector.shape_cast %30 : vector<8xf32> to vector<8x1xf32>
    %32 = vector.broadcast %31 : vector<8x1xf32> to vector<8x2xf32>
    %33 = arith.subf %29, %32 : vector<8x2xf32>
    %34 = math.exp %33 : vector<8x2xf32>
    %cst_26 = arith.constant dense<0.000000e+00> : vector<8xf32>
    %35 = vector.multi_reduction <add>, %34, %cst_26 [1] : vector<8x2xf32> to vector<8xf32>
    %36 = vector.shape_cast %35 : vector<8xf32> to vector<8x1xf32>
    %37 = vector.broadcast %36 : vector<8x1xf32> to vector<8x2xf32>
    %38 = arith.divf %34, %37 : vector<8x2xf32>
    %c0_27 = arith.constant 0 : index
    %c0_28 = arith.constant 0 : index
    %39 = vector.load %arg9[%c0_27, %c0_28] : memref<8x2xf32, #tpu.memory_space<vmem>>, vector<8x2xf32>
    tpu.vector_store %arg9[%c0_27, %c0_28], %38 {strides = array<i32>} : memref<8x2xf32, #tpu.memory_space<vmem>>, vector<8x2xf32>,
    return
  }
}

module attributes {stable_mosaic.version = 11 : i64} {
  func.func @_lstm_pair_kernel(%arg0: i32, %arg1: memref<1x8x8x32xf32, #tpu.memory_space<vmem>>, %arg2: memref<1x3x4x32x32xf32, #tpu.memory_space<vmem>>, %arg3: memref<1x3x4x32x32xf32, #tpu.memory_space<vmem>>, %arg4: memref<1x3x4x1x32xf32, #tpu.memory_space<vmem>>, %arg5: memref<1x8x1xi32, #tpu.memory_space<vmem>>, %arg6: memref<1x8x32xf32, #tpu.memory_space<vmem>>, %arg7: memref<8x8x32xf32, #tpu.memory_space<vmem>>, %arg8: memref<8x32x32xf32, #tpu.memory_space<vmem>>) attributes {dimension_semantics = [#tpu.dimension_semantics<parallel>], iteration_bounds = array<i64: 2>, scalar_prefetch = 0 : i64, scratch_operands = 2 : i64, tpu.core_type = #tpu.core_type<tc>, window_params = [{transform_indices = @transform_0, window_bounds = array<i64: 1, 8, 8, 32>}, {transform_indices = @transform_1, window_bounds = array<i64: 1, 3, 4, 32, 32>}, {transform_indices = @transform_2, window_bounds = array<i64: 1, 3, 4, 32, 32>}, {transform_indices = @transform_3, window_bounds = array<i64: 1, 3, 4, 1, 32>}, {transform_indices = @transform_4, window_bounds = array<i64: 1, 8, 1>}, {transform_indices = @transform_5, window_bounds = array<i64: 1, 8, 32>}]} {
    %c0 = arith.constant 0 : index
    %c0_0 = arith.constant 0 : index
    %c0_1 = arith.constant 0 : index
    %c0_2 = arith.constant 0 : index
    %0 = vector.load %arg1[%c0, %c0_0, %c0_1, %c0_2] : memref<1x8x8x32xf32, #tpu.memory_space<vmem>>, vector<1x8x8x32xf32>
    %1 = vector.shape_cast %0 : vector<1x8x8x32xf32> to vector<8x8x32xf32>
    %2 = vector.shape_cast %1 : vector<8x8x32xf32> to vector<64x32xf32>
    %c0_3 = arith.constant 0 : index
    %c0_4 = arith.constant 0 : index
    %c0_5 = arith.constant 0 : index
    %c0_6 = arith.constant 0 : index
    %c0_7 = arith.constant 0 : index
    %3 = vector.load %arg2[%c0_3, %c0_4, %c0_5, %c0_6, %c0_7] : memref<1x3x4x32x32xf32, #tpu.memory_space<vmem>>, vector<1x1x4x32x32xf32>
    %4 = vector.shape_cast %3 : vector<1x1x4x32x32xf32> to vector<4x32x32xf32>
    %c0_8 = arith.constant 0 : index
    %c0_9 = arith.constant 0 : index
    %c0_10 = arith.constant 0 : index
    %c0_11 = arith.constant 0 : index
    %c0_12 = arith.constant 0 : index
    %5 = vector.load %arg3[%c0_8, %c0_9, %c0_10, %c0_11, %c0_12] : memref<1x3x4x32x32xf32, #tpu.memory_space<vmem>>, vector<1x1x4x32x32xf32>
    %6 = vector.shape_cast %5 : vector<1x1x4x32x32xf32> to vector<4x32x32xf32>
    %c0_13 = arith.constant 0 : index
    %c0_14 = arith.constant 0 : index
    %c0_15 = arith.constant 0 : index
    %c0_16 = arith.constant 0 : index
    %c0_17 = arith.constant 0 : index
    %7 = vector.load %arg4[%c0_13, %c0_14, %c0_15, %c0_16, %c0_17] : memref<1x3x4x1x32xf32, #tpu.memory_space<vmem>>, vector<1x1x4x1x32xf32>
    %8 = vector.shape_cast %7 : vector<1x1x4x1x32xf32> to vector<4x1x32xf32>
    %9 = vector.extract_strided_slice %4 {offsets = [0, 0, 0], sizes = [1, 32, 32], strides = [1, 1, 1]} : vector<4x32x32xf32> to vector<1x32x32xf32>
    %10 = vector.shape_cast %9 : vector<1x32x32xf32> to vector<32x32xf32>
    %cst = arith.constant dense<0.000000e+00> : vector<64x32xf32>
    %11 = tpu.matmul %2, %10, %cst {dimension_numbers = #tpu.dot_dimension_numbers<[1], [0], [0], [1], [0, 0, 1, 1], [], []>} : vector<64x32xf32>, vector<32x32xf32>, vector<64x32xf32> -> vector<64x32xf32>
    %12 = vector.extract_strided_slice %8 {offsets = [0, 0, 0], sizes = [1, 1, 32], strides = [1, 1, 1]} : vector<4x1x32xf32> to vector<1x1x32xf32>
    %13 = vector.shape_cast %12 : vector<1x1x32xf32> to vector<1x32xf32>
    %14 = vector.broadcast %13 : vector<1x32xf32> to vector<64x32xf32>
    %15 = arith.addf %11, %14 : vector<64x32xf32>
    %16 = vector.shape_cast %15 : vector<64x32xf32> to vector<8x8x32xf32>
    %c0_18 = arith.constant 0 : index
    %c0_19 = arith.constant 0 : index
    %c0_20 = arith.constant 0 : index
    %17 = vector.load %arg8[%c0_18, %c0_19, %c0_20] : memref<8x32x32xf32, #tpu.memory_space<vmem>>, vector<8x8x32xf32>
    tpu.vector_store %arg8[%c0_18, %c0_19, %c0_20], %16 {strides = array<i32>} : memref<8x32x32xf32, #tpu.memory_space<vmem>>, vector<8x8x32xf32>,
    %18 = vector.extract_strided_slice %4 {offsets = [1, 0, 0], sizes = [1, 32, 32], strides = [1, 1, 1]} : vector<4x32x32xf32> to vector<1x32x32xf32>
    %19 = vector.shape_cast %18 : vector<1x32x32xf32> to vector<32x32xf32>
    %cst_21 = arith.constant dense<0.000000e+00> : vector<64x32xf32>
    %20 = tpu.matmul %2, %19, %cst_21 {dimension_numbers = #tpu.dot_dimension_numbers<[1], [0], [0], [1], [0, 0, 1, 1], [], []>} : vector<64x32xf32>, vector<32x32xf32>, vector<64x32xf32> -> vector<64x32xf32>
    %21 = vector.extract_strided_slice %8 {offsets = [1, 0, 0], sizes = [1, 1, 32], strides = [1, 1, 1]} : vector<4x1x32xf32> to vector<1x1x32xf32>
    %22 = vector.shape_cast %21 : vector<1x1x32xf32> to vector<1x32xf32>
    %23 = vector.broadcast %22 : vector<1x32xf32> to vector<64x32xf32>
    %24 = arith.addf %20, %23 : vector<64x32xf32>
    %25 = vector.shape_cast %24 : vector<64x32xf32> to vector<8x8x32xf32>
    %c0_22 = arith.constant 0 : index
    %c8 = arith.constant 8 : index
    %c0_23 = arith.constant 0 : index
    %26 = vector.load %arg8[%c0_22, %c8, %c0_23] : memref<8x32x32xf32, #tpu.memory_space<vmem>>, vector<8x8x32xf32>
    tpu.vector_store %arg8[%c0_22, %c8, %c0_23], %25 {strides = array<i32>} : memref<8x32x32xf32, #tpu.memory_space<vmem>>, vector<8x8x32xf32>,
    %27 = vector.extract_strided_slice %4 {offsets = [2, 0, 0], sizes = [1, 32, 32], strides = [1, 1, 1]} : vector<4x32x32xf32> to vector<1x32x32xf32>
    %28 = vector.shape_cast %27 : vector<1x32x32xf32> to vector<32x32xf32>
    %cst_24 = arith.constant dense<0.000000e+00> : vector<64x32xf32>
    %29 = tpu.matmul %2, %28, %cst_24 {dimension_numbers = #tpu.dot_dimension_numbers<[1], [0], [0], [1], [0, 0, 1, 1], [], []>} : vector<64x32xf32>, vector<32x32xf32>, vector<64x32xf32> -> vector<64x32xf32>
    %30 = vector.extract_strided_slice %8 {offsets = [2, 0, 0], sizes = [1, 1, 32], strides = [1, 1, 1]} : vector<4x1x32xf32> to vector<1x1x32xf32>
    %31 = vector.shape_cast %30 : vector<1x1x32xf32> to vector<1x32xf32>
    %32 = vector.broadcast %31 : vector<1x32xf32> to vector<64x32xf32>
    %33 = arith.addf %29, %32 : vector<64x32xf32>
    %34 = vector.shape_cast %33 : vector<64x32xf32> to vector<8x8x32xf32>
    %c0_25 = arith.constant 0 : index
    %c16 = arith.constant 16 : index
    %c0_26 = arith.constant 0 : index
    %35 = vector.load %arg8[%c0_25, %c16, %c0_26] : memref<8x32x32xf32, #tpu.memory_space<vmem>>, vector<8x8x32xf32>
    tpu.vector_store %arg8[%c0_25, %c16, %c0_26], %34 {strides = array<i32>} : memref<8x32x32xf32, #tpu.memory_space<vmem>>, vector<8x8x32xf32>,
    %36 = vector.extract_strided_slice %4 {offsets = [3, 0, 0], sizes = [1, 32, 32], strides = [1, 1, 1]} : vector<4x32x32xf32> to vector<1x32x32xf32>
    %37 = vector.shape_cast %36 : vector<1x32x32xf32> to vector<32x32xf32>
    %cst_27 = arith.constant dense<0.000000e+00> : vector<64x32xf32>
    %38 = tpu.matmul %2, %37, %cst_27 {dimension_numbers = #tpu.dot_dimension_numbers<[1], [0], [0], [1], [0, 0, 1, 1], [], []>} : vector<64x32xf32>, vector<32x32xf32>, vector<64x32xf32> -> vector<64x32xf32>
    %39 = vector.extract_strided_slice %8 {offsets = [3, 0, 0], sizes = [1, 1, 32], strides = [1, 1, 1]} : vector<4x1x32xf32> to vector<1x1x32xf32>
    %40 = vector.shape_cast %39 : vector<1x1x32xf32> to vector<1x32xf32>
    %41 = vector.broadcast %40 : vector<1x32xf32> to vector<64x32xf32>
    %42 = arith.addf %38, %41 : vector<64x32xf32>
    %43 = vector.shape_cast %42 : vector<64x32xf32> to vector<8x8x32xf32>
    %c0_28 = arith.constant 0 : index
    %c24 = arith.constant 24 : index
    %c0_29 = arith.constant 0 : index
    %44 = vector.load %arg8[%c0_28, %c24, %c0_29] : memref<8x32x32xf32, #tpu.memory_space<vmem>>, vector<8x8x32xf32>
    tpu.vector_store %arg8[%c0_28, %c24, %c0_29], %43 {strides = array<i32>} : memref<8x32x32xf32, #tpu.memory_space<vmem>>, vector<8x8x32xf32>,
    %cst_30 = arith.constant 0.000000e+00 : f32
    %45 = vector.broadcast %cst_30 : f32 to vector<8x32xf32>
    %c0_i32 = arith.constant 0 : i32
    %46 = arith.index_cast %c0_i32 : i32 to index
    %c0_31 = arith.constant 0 : index
    %c0_32 = arith.constant 0 : index
    %47 = vector.load %arg8[%46, %c0_31, %c0_32] : memref<8x32x32xf32, #tpu.memory_space<vmem>>, vector<1x32x32xf32>
    %48 = vector.shape_cast %47 : vector<1x32x32xf32> to vector<32x32xf32>
    %49 = vector.extract_strided_slice %48 {offsets = [0, 0], sizes = [8, 32], strides = [1, 1]} : vector<32x32xf32> to vector<8x32xf32>
    %50 = vector.extract_strided_slice %6 {offsets = [0, 0, 0], sizes = [1, 32, 32], strides = [1, 1, 1]} : vector<4x32x32xf32> to vector<1x32x32xf32>
    %51 = vector.shape_cast %50 : vector<1x32x32xf32> to vector<32x32xf32>
    %cst_33 = arith.constant dense<0.000000e+00> : vector<8x32xf32>
    %52 = tpu.matmul %45, %51, %cst_33 {dimension_numbers = #tpu.dot_dimension_numbers<[1], [0], [0], [1], [0, 0, 1, 1], [], []>} : vector<8x32xf32>, vector<32x32xf32>, vector<8x32xf32> -> vector<8x32xf32>
    %53 = arith.addf %49, %52 : vector<8x32xf32>
    %54 = arith.negf %53 : vector<8x32xf32>
    %55 = math.exp %54 : vector<8x32xf32>
    %cst_34 = arith.constant 1.000000e+00 : f32
    %56 = vector.broadcast %cst_34 : f32 to vector<8x32xf32>
    %57 = arith.addf %56, %55 : vector<8x32xf32>
    %58 = arith.divf %56, %57 : vector<8x32xf32>
    %59 = vector.extract_strided_slice %48 {offsets = [8, 0], sizes = [8, 32], strides = [1, 1]} : vector<32x32xf32> to vector<8x32xf32>
    %60 = vector.extract_strided_slice %6 {offsets = [1, 0, 0], sizes = [1, 32, 32], strides = [1, 1, 1]} : vector<4x32x32xf32> to vector<1x32x32xf32>
    %61 = vector.shape_cast %60 : vector<1x32x32xf32> to vector<32x32xf32>
    %cst_35 = arith.constant dense<0.000000e+00> : vector<8x32xf32>
    %62 = tpu.matmul %45, %61, %cst_35 {dimension_numbers = #tpu.dot_dimension_numbers<[1], [0], [0], [1], [0, 0, 1, 1], [], []>} : vector<8x32xf32>, vector<32x32xf32>, vector<8x32xf32> -> vector<8x32xf32>
    %63 = arith.addf %59, %62 : vector<8x32xf32>
    %64 = arith.negf %63 : vector<8x32xf32>
    %65 = math.exp %64 : vector<8x32xf32>
    %cst_36 = arith.constant 1.000000e+00 : f32
    %66 = vector.broadcast %cst_36 : f32 to vector<8x32xf32>
    %67 = arith.addf %66, %65 : vector<8x32xf32>
    %68 = arith.divf %66, %67 : vector<8x32xf32>
    %69 = vector.extract_strided_slice %48 {offsets = [16, 0], sizes = [8, 32], strides = [1, 1]} : vector<32x32xf32> to vector<8x32xf32>
    %70 = vector.extract_strided_slice %6 {offsets = [2, 0, 0], sizes = [1, 32, 32], strides = [1, 1, 1]} : vector<4x32x32xf32> to vector<1x32x32xf32>
    %71 = vector.shape_cast %70 : vector<1x32x32xf32> to vector<32x32xf32>
    %cst_37 = arith.constant dense<0.000000e+00> : vector<8x32xf32>
    %72 = tpu.matmul %45, %71, %cst_37 {dimension_numbers = #tpu.dot_dimension_numbers<[1], [0], [0], [1], [0, 0, 1, 1], [], []>} : vector<8x32xf32>, vector<32x32xf32>, vector<8x32xf32> -> vector<8x32xf32>
    %73 = arith.addf %69, %72 : vector<8x32xf32>
    %74 = math.tanh %73 : vector<8x32xf32>
    %75 = vector.extract_strided_slice %48 {offsets = [24, 0], sizes = [8, 32], strides = [1, 1]} : vector<32x32xf32> to vector<8x32xf32>
    %76 = vector.extract_strided_slice %6 {offsets = [3, 0, 0], sizes = [1, 32, 32], strides = [1, 1, 1]} : vector<4x32x32xf32> to vector<1x32x32xf32>
    %77 = vector.shape_cast %76 : vector<1x32x32xf32> to vector<32x32xf32>
    %cst_38 = arith.constant dense<0.000000e+00> : vector<8x32xf32>
    %78 = tpu.matmul %45, %77, %cst_38 {dimension_numbers = #tpu.dot_dimension_numbers<[1], [0], [0], [1], [0, 0, 1, 1], [], []>} : vector<8x32xf32>, vector<32x32xf32>, vector<8x32xf32> -> vector<8x32xf32>
    %79 = arith.addf %75, %78 : vector<8x32xf32>
    %80 = arith.negf %79 : vector<8x32xf32>
    %81 = math.exp %80 : vector<8x32xf32>
    %cst_39 = arith.constant 1.000000e+00 : f32
    %82 = vector.broadcast %cst_39 : f32 to vector<8x32xf32>
    %83 = arith.addf %82, %81 : vector<8x32xf32>
    %84 = arith.divf %82, %83 : vector<8x32xf32>
    %85 = arith.mulf %68, %45 : vector<8x32xf32>
    %86 = arith.mulf %58, %74 : vector<8x32xf32>
    %87 = arith.addf %85, %86 : vector<8x32xf32>
    %88 = math.tanh %87 : vector<8x32xf32>
    %89 = arith.mulf %84, %88 : vector<8x32xf32>
    %90 = arith.index_cast %c0_i32 : i32 to index
    %c0_40 = arith.constant 0 : index
    %c0_41 = arith.constant 0 : index
    %91 = vector.load %arg7[%90, %c0_40, %c0_41] : memref<8x8x32xf32, #tpu.memory_space<vmem>>, vector<1x8x32xf32>
    %92 = vector.shape_cast %91 : vector<1x8x32xf32> to vector<8x32xf32>
    %93 = vector.shape_cast %89 : vector<8x32xf32> to vector<1x8x32xf32>
    tpu.vector_store %arg7[%90, %c0_40, %c0_41], %93 {strides = array<i32>} : memref<8x8x32xf32, #tpu.memory_space<vmem>>, vector<1x8x32xf32>,
    %c1_i32 = arith.constant 1 : i32
    %94 = arith.index_cast %c1_i32 : i32 to index
    %c0_42 = arith.constant 0 : index
    %c0_43 = arith.constant 0 : index
    %95 = vector.load %arg8[%94, %c0_42, %c0_43] : memref<8x32x32xf32, #tpu.memory_space<vmem>>, vector<1x32x32xf32>
    %96 = vector.shape_cast %95 : vector<1x32x32xf32> to vector<32x32xf32>
    %97 = vector.extract_strided_slice %96 {offsets = [0, 0], sizes = [8, 32], strides = [1, 1]} : vector<32x32xf32> to vector<8x32xf32>
    %98 = vector.extract_strided_slice %6 {offsets = [0, 0, 0], sizes = [1, 32, 32], strides = [1, 1, 1]} : vector<4x32x32xf32> to vector<1x32x32xf32>
    %99 = vector.shape_cast %98 : vector<1x32x32xf32> to vector<32x32xf32>
    %cst_44 = arith.constant dense<0.000000e+00> : vector<8x32xf32>
    %100 = tpu.matmul %89, %99, %cst_44 {dimension_numbers = #tpu.dot_dimension_numbers<[1], [0], [0], [1], [0, 0, 1, 1], [], []>} : vector<8x32xf32>, vector<32x32xf32>, vector<8x32xf32> -> vector<8x32xf32>
    %101 = arith.addf %97, %100 : vector<8x32xf32>
    %102 = arith.negf %101 : vector<8x32xf32>
    %103 = math.exp %102 : vector<8x32xf32>
    %cst_45 = arith.constant 1.000000e+00 : f32
    %104 = vector.broadcast %cst_45 : f32 to vector<8x32xf32>
    %105 = arith.addf %104, %103 : vector<8x32xf32>
    %106 = arith.divf %104, %105 : vector<8x32xf32>
    %107 = vector.extract_strided_slice %96 {offsets = [8, 0], sizes = [8, 32], strides = [1, 1]} : vector<32x32xf32> to vector<8x32xf32>
    %108 = vector.extract_strided_slice %6 {offsets = [1, 0, 0], sizes = [1, 32, 32], strides = [1, 1, 1]} : vector<4x32x32xf32> to vector<1x32x32xf32>
    %109 = vector.shape_cast %108 : vector<1x32x32xf32> to vector<32x32xf32>
    %cst_46 = arith.constant dense<0.000000e+00> : vector<8x32xf32>
    %110 = tpu.matmul %89, %109, %cst_46 {dimension_numbers = #tpu.dot_dimension_numbers<[1], [0], [0], [1], [0, 0, 1, 1], [], []>} : vector<8x32xf32>, vector<32x32xf32>, vector<8x32xf32> -> vector<8x32xf32>
    %111 = arith.addf %107, %110 : vector<8x32xf32>
    %112 = arith.negf %111 : vector<8x32xf32>
    %113 = math.exp %112 : vector<8x32xf32>
    %cst_47 = arith.constant 1.000000e+00 : f32
    %114 = vector.broadcast %cst_47 : f32 to vector<8x32xf32>
    %115 = arith.addf %114, %113 : vector<8x32xf32>
    %116 = arith.divf %114, %115 : vector<8x32xf32>
    %117 = vector.extract_strided_slice %96 {offsets = [16, 0], sizes = [8, 32], strides = [1, 1]} : vector<32x32xf32> to vector<8x32xf32>
    %118 = vector.extract_strided_slice %6 {offsets = [2, 0, 0], sizes = [1, 32, 32], strides = [1, 1, 1]} : vector<4x32x32xf32> to vector<1x32x32xf32>
    %119 = vector.shape_cast %118 : vector<1x32x32xf32> to vector<32x32xf32>
    %cst_48 = arith.constant dense<0.000000e+00> : vector<8x32xf32>
    %120 = tpu.matmul %89, %119, %cst_48 {dimension_numbers = #tpu.dot_dimension_numbers<[1], [0], [0], [1], [0, 0, 1, 1], [], []>} : vector<8x32xf32>, vector<32x32xf32>, vector<8x32xf32> -> vector<8x32xf32>
    %121 = arith.addf %117, %120 : vector<8x32xf32>
    %122 = math.tanh %121 : vector<8x32xf32>
    %123 = vector.extract_strided_slice %96 {offsets = [24, 0], sizes = [8, 32], strides = [1, 1]} : vector<32x32xf32> to vector<8x32xf32>
    %124 = vector.extract_strided_slice %6 {offsets = [3, 0, 0], sizes = [1, 32, 32], strides = [1, 1, 1]} : vector<4x32x32xf32> to vector<1x32x32xf32>
    %125 = vector.shape_cast %124 : vector<1x32x32xf32> to vector<32x32xf32>
    %cst_49 = arith.constant dense<0.000000e+00> : vector<8x32xf32>
    %126 = tpu.matmul %89, %125, %cst_49 {dimension_numbers = #tpu.dot_dimension_numbers<[1], [0], [0], [1], [0, 0, 1, 1], [], []>} : vector<8x32xf32>, vector<32x32xf32>, vector<8x32xf32> -> vector<8x32xf32>
    %127 = arith.addf %123, %126 : vector<8x32xf32>
    %128 = arith.negf %127 : vector<8x32xf32>
    %129 = math.exp %128 : vector<8x32xf32>
    %cst_50 = arith.constant 1.000000e+00 : f32
    %130 = vector.broadcast %cst_50 : f32 to vector<8x32xf32>
    %131 = arith.addf %130, %129 : vector<8x32xf32>
    %132 = arith.divf %130, %131 : vector<8x32xf32>
    %133 = arith.mulf %116, %87 : vector<8x32xf32>
    %134 = arith.mulf %106, %122 : vector<8x32xf32>
    %135 = arith.addf %133, %134 : vector<8x32xf32>
    %136 = math.tanh %135 : vector<8x32xf32>
    %137 = arith.mulf %132, %136 : vector<8x32xf32>
    %138 = arith.index_cast %c1_i32 : i32 to index
    %c0_51 = arith.constant 0 : index
    %c0_52 = arith.constant 0 : index
    %139 = vector.load %arg7[%138, %c0_51, %c0_52] : memref<8x8x32xf32, #tpu.memory_space<vmem>>, vector<1x8x32xf32>
    %140 = vector.shape_cast %139 : vector<1x8x32xf32> to vector<8x32xf32>
    %141 = vector.shape_cast %137 : vector<8x32xf32> to vector<1x8x32xf32>
    tpu.vector_store %arg7[%138, %c0_51, %c0_52], %141 {strides = array<i32>} : memref<8x8x32xf32, #tpu.memory_space<vmem>>, vector<1x8x32xf32>,
    %c2_i32 = arith.constant 2 : i32
    %142 = arith.index_cast %c2_i32 : i32 to index
    %c0_53 = arith.constant 0 : index
    %c0_54 = arith.constant 0 : index
    %143 = vector.load %arg8[%142, %c0_53, %c0_54] : memref<8x32x32xf32, #tpu.memory_space<vmem>>, vector<1x32x32xf32>
    %144 = vector.shape_cast %143 : vector<1x32x32xf32> to vector<32x32xf32>
    %145 = vector.extract_strided_slice %144 {offsets = [0, 0], sizes = [8, 32], strides = [1, 1]} : vector<32x32xf32> to vector<8x32xf32>
    %146 = vector.extract_strided_slice %6 {offsets = [0, 0, 0], sizes = [1, 32, 32], strides = [1, 1, 1]} : vector<4x32x32xf32> to vector<1x32x32xf32>
    %147 = vector.shape_cast %146 : vector<1x32x32xf32> to vector<32x32xf32>
    %cst_55 = arith.constant dense<0.000000e+00> : vector<8x32xf32>
    %148 = tpu.matmul %137, %147, %cst_55 {dimension_numbers = #tpu.dot_dimension_numbers<[1], [0], [0], [1], [0, 0, 1, 1], [], []>} : vector<8x32xf32>, vector<32x32xf32>, vector<8x32xf32> -> vector<8x32xf32>
    %149 = arith.addf %145, %148 : vector<8x32xf32>
    %150 = arith.negf %149 : vector<8x32xf32>
    %151 = math.exp %150 : vector<8x32xf32>
    %cst_56 = arith.constant 1.000000e+00 : f32
    %152 = vector.broadcast %cst_56 : f32 to vector<8x32xf32>
    %153 = arith.addf %152, %151 : vector<8x32xf32>
    %154 = arith.divf %152, %153 : vector<8x32xf32>
    %155 = vector.extract_strided_slice %144 {offsets = [8, 0], sizes = [8, 32], strides = [1, 1]} : vector<32x32xf32> to vector<8x32xf32>
    %156 = vector.extract_strided_slice %6 {offsets = [1, 0, 0], sizes = [1, 32, 32], strides = [1, 1, 1]} : vector<4x32x32xf32> to vector<1x32x32xf32>
    %157 = vector.shape_cast %156 : vector<1x32x32xf32> to vector<32x32xf32>
    %cst_57 = arith.constant dense<0.000000e+00> : vector<8x32xf32>
    %158 = tpu.matmul %137, %157, %cst_57 {dimension_numbers = #tpu.dot_dimension_numbers<[1], [0], [0], [1], [0, 0, 1, 1], [], []>} : vector<8x32xf32>, vector<32x32xf32>, vector<8x32xf32> -> vector<8x32xf32>
    %159 = arith.addf %155, %158 : vector<8x32xf32>
    %160 = arith.negf %159 : vector<8x32xf32>
    %161 = math.exp %160 : vector<8x32xf32>
    %cst_58 = arith.constant 1.000000e+00 : f32
    %162 = vector.broadcast %cst_58 : f32 to vector<8x32xf32>
    %163 = arith.addf %162, %161 : vector<8x32xf32>
    %164 = arith.divf %162, %163 : vector<8x32xf32>
    %165 = vector.extract_strided_slice %144 {offsets = [16, 0], sizes = [8, 32], strides = [1, 1]} : vector<32x32xf32> to vector<8x32xf32>
    %166 = vector.extract_strided_slice %6 {offsets = [2, 0, 0], sizes = [1, 32, 32], strides = [1, 1, 1]} : vector<4x32x32xf32> to vector<1x32x32xf32>
    %167 = vector.shape_cast %166 : vector<1x32x32xf32> to vector<32x32xf32>
    %cst_59 = arith.constant dense<0.000000e+00> : vector<8x32xf32>
    %168 = tpu.matmul %137, %167, %cst_59 {dimension_numbers = #tpu.dot_dimension_numbers<[1], [0], [0], [1], [0, 0, 1, 1], [], []>} : vector<8x32xf32>, vector<32x32xf32>, vector<8x32xf32> -> vector<8x32xf32>
    %169 = arith.addf %165, %168 : vector<8x32xf32>
    %170 = math.tanh %169 : vector<8x32xf32>
    %171 = vector.extract_strided_slice %144 {offsets = [24, 0], sizes = [8, 32], strides = [1, 1]} : vector<32x32xf32> to vector<8x32xf32>
    %172 = vector.extract_strided_slice %6 {offsets = [3, 0, 0], sizes = [1, 32, 32], strides = [1, 1, 1]} : vector<4x32x32xf32> to vector<1x32x32xf32>
    %173 = vector.shape_cast %172 : vector<1x32x32xf32> to vector<32x32xf32>
    %cst_60 = arith.constant dense<0.000000e+00> : vector<8x32xf32>
    %174 = tpu.matmul %137, %173, %cst_60 {dimension_numbers = #tpu.dot_dimension_numbers<[1], [0], [0], [1], [0, 0, 1, 1], [], []>} : vector<8x32xf32>, vector<32x32xf32>, vector<8x32xf32> -> vector<8x32xf32>
    %175 = arith.addf %171, %174 : vector<8x32xf32>
    %176 = arith.negf %175 : vector<8x32xf32>
    %177 = math.exp %176 : vector<8x32xf32>
    %cst_61 = arith.constant 1.000000e+00 : f32
    %178 = vector.broadcast %cst_61 : f32 to vector<8x32xf32>
    %179 = arith.addf %178, %177 : vector<8x32xf32>
    %180 = arith.divf %178, %179 : vector<8x32xf32>
    %181 = arith.mulf %164, %135 : vector<8x32xf32>
    %182 = arith.mulf %154, %170 : vector<8x32xf32>
    %183 = arith.addf %181, %182 : vector<8x32xf32>
    %184 = math.tanh %183 : vector<8x32xf32>
    %185 = arith.mulf %180, %184 : vector<8x32xf32>
    %186 = arith.index_cast %c2_i32 : i32 to index
    %c0_62 = arith.constant 0 : index
    %c0_63 = arith.constant 0 : index
    %187 = vector.load %arg7[%186, %c0_62, %c0_63] : memref<8x8x32xf32, #tpu.memory_space<vmem>>, vector<1x8x32xf32>
    %188 = vector.shape_cast %187 : vector<1x8x32xf32> to vector<8x32xf32>
    %189 = vector.shape_cast %185 : vector<8x32xf32> to vector<1x8x32xf32>
    tpu.vector_store %arg7[%186, %c0_62, %c0_63], %189 {strides = array<i32>} : memref<8x8x32xf32, #tpu.memory_space<vmem>>, vector<1x8x32xf32>,
    %c3_i32 = arith.constant 3 : i32
    %190 = arith.index_cast %c3_i32 : i32 to index
    %c0_64 = arith.constant 0 : index
    %c0_65 = arith.constant 0 : index
    %191 = vector.load %arg8[%190, %c0_64, %c0_65] : memref<8x32x32xf32, #tpu.memory_space<vmem>>, vector<1x32x32xf32>
    %192 = vector.shape_cast %191 : vector<1x32x32xf32> to vector<32x32xf32>
    %193 = vector.extract_strided_slice %192 {offsets = [0, 0], sizes = [8, 32], strides = [1, 1]} : vector<32x32xf32> to vector<8x32xf32>
    %194 = vector.extract_strided_slice %6 {offsets = [0, 0, 0], sizes = [1, 32, 32], strides = [1, 1, 1]} : vector<4x32x32xf32> to vector<1x32x32xf32>
    %195 = vector.shape_cast %194 : vector<1x32x32xf32> to vector<32x32xf32>
    %cst_66 = arith.constant dense<0.000000e+00> : vector<8x32xf32>
    %196 = tpu.matmul %185, %195, %cst_66 {dimension_numbers = #tpu.dot_dimension_numbers<[1], [0], [0], [1], [0, 0, 1, 1], [], []>} : vector<8x32xf32>, vector<32x32xf32>, vector<8x32xf32> -> vector<8x32xf32>
    %197 = arith.addf %193, %196 : vector<8x32xf32>
    %198 = arith.negf %197 : vector<8x32xf32>
    %199 = math.exp %198 : vector<8x32xf32>
    %cst_67 = arith.constant 1.000000e+00 : f32
    %200 = vector.broadcast %cst_67 : f32 to vector<8x32xf32>
    %201 = arith.addf %200, %199 : vector<8x32xf32>
    %202 = arith.divf %200, %201 : vector<8x32xf32>
    %203 = vector.extract_strided_slice %192 {offsets = [8, 0], sizes = [8, 32], strides = [1, 1]} : vector<32x32xf32> to vector<8x32xf32>
    %204 = vector.extract_strided_slice %6 {offsets = [1, 0, 0], sizes = [1, 32, 32], strides = [1, 1, 1]} : vector<4x32x32xf32> to vector<1x32x32xf32>
    %205 = vector.shape_cast %204 : vector<1x32x32xf32> to vector<32x32xf32>
    %cst_68 = arith.constant dense<0.000000e+00> : vector<8x32xf32>
    %206 = tpu.matmul %185, %205, %cst_68 {dimension_numbers = #tpu.dot_dimension_numbers<[1], [0], [0], [1], [0, 0, 1, 1], [], []>} : vector<8x32xf32>, vector<32x32xf32>, vector<8x32xf32> -> vector<8x32xf32>
    %207 = arith.addf %203, %206 : vector<8x32xf32>
    %208 = arith.negf %207 : vector<8x32xf32>
    %209 = math.exp %208 : vector<8x32xf32>
    %cst_69 = arith.constant 1.000000e+00 : f32
    %210 = vector.broadcast %cst_69 : f32 to vector<8x32xf32>
    %211 = arith.addf %210, %209 : vector<8x32xf32>
    %212 = arith.divf %210, %211 : vector<8x32xf32>
    %213 = vector.extract_strided_slice %192 {offsets = [16, 0], sizes = [8, 32], strides = [1, 1]} : vector<32x32xf32> to vector<8x32xf32>
    %214 = vector.extract_strided_slice %6 {offsets = [2, 0, 0], sizes = [1, 32, 32], strides = [1, 1, 1]} : vector<4x32x32xf32> to vector<1x32x32xf32>
    %215 = vector.shape_cast %214 : vector<1x32x32xf32> to vector<32x32xf32>
    %cst_70 = arith.constant dense<0.000000e+00> : vector<8x32xf32>
    %216 = tpu.matmul %185, %215, %cst_70 {dimension_numbers = #tpu.dot_dimension_numbers<[1], [0], [0], [1], [0, 0, 1, 1], [], []>} : vector<8x32xf32>, vector<32x32xf32>, vector<8x32xf32> -> vector<8x32xf32>
    %217 = arith.addf %213, %216 : vector<8x32xf32>
    %218 = math.tanh %217 : vector<8x32xf32>
    %219 = vector.extract_strided_slice %192 {offsets = [24, 0], sizes = [8, 32], strides = [1, 1]} : vector<32x32xf32> to vector<8x32xf32>
    %220 = vector.extract_strided_slice %6 {offsets = [3, 0, 0], sizes = [1, 32, 32], strides = [1, 1, 1]} : vector<4x32x32xf32> to vector<1x32x32xf32>
    %221 = vector.shape_cast %220 : vector<1x32x32xf32> to vector<32x32xf32>
    %cst_71 = arith.constant dense<0.000000e+00> : vector<8x32xf32>
    %222 = tpu.matmul %185, %221, %cst_71 {dimension_numbers = #tpu.dot_dimension_numbers<[1], [0], [0], [1], [0, 0, 1, 1], [], []>} : vector<8x32xf32>, vector<32x32xf32>, vector<8x32xf32> -> vector<8x32xf32>
    %223 = arith.addf %219, %222 : vector<8x32xf32>
    %224 = arith.negf %223 : vector<8x32xf32>
    %225 = math.exp %224 : vector<8x32xf32>
    %cst_72 = arith.constant 1.000000e+00 : f32
    %226 = vector.broadcast %cst_72 : f32 to vector<8x32xf32>
    %227 = arith.addf %226, %225 : vector<8x32xf32>
    %228 = arith.divf %226, %227 : vector<8x32xf32>
    %229 = arith.mulf %212, %183 : vector<8x32xf32>
    %230 = arith.mulf %202, %218 : vector<8x32xf32>
    %231 = arith.addf %229, %230 : vector<8x32xf32>
    %232 = math.tanh %231 : vector<8x32xf32>
    %233 = arith.mulf %228, %232 : vector<8x32xf32>
    %234 = arith.index_cast %c3_i32 : i32 to index
    %c0_73 = arith.constant 0 : index
    %c0_74 = arith.constant 0 : index
    %235 = vector.load %arg7[%234, %c0_73, %c0_74] : memref<8x8x32xf32, #tpu.memory_space<vmem>>, vector<1x8x32xf32>
    %236 = vector.shape_cast %235 : vector<1x8x32xf32> to vector<8x32xf32>
    %237 = vector.shape_cast %233 : vector<8x32xf32> to vector<1x8x32xf32>
    tpu.vector_store %arg7[%234, %c0_73, %c0_74], %237 {strides = array<i32>} : memref<8x8x32xf32, #tpu.memory_space<vmem>>, vector<1x8x32xf32>,
    %c4_i32 = arith.constant 4 : i32
    %238 = arith.index_cast %c4_i32 : i32 to index
    %c0_75 = arith.constant 0 : index
    %c0_76 = arith.constant 0 : index
    %239 = vector.load %arg8[%238, %c0_75, %c0_76] : memref<8x32x32xf32, #tpu.memory_space<vmem>>, vector<1x32x32xf32>
    %240 = vector.shape_cast %239 : vector<1x32x32xf32> to vector<32x32xf32>
    %241 = vector.extract_strided_slice %240 {offsets = [0, 0], sizes = [8, 32], strides = [1, 1]} : vector<32x32xf32> to vector<8x32xf32>
    %242 = vector.extract_strided_slice %6 {offsets = [0, 0, 0], sizes = [1, 32, 32], strides = [1, 1, 1]} : vector<4x32x32xf32> to vector<1x32x32xf32>
    %243 = vector.shape_cast %242 : vector<1x32x32xf32> to vector<32x32xf32>
    %cst_77 = arith.constant dense<0.000000e+00> : vector<8x32xf32>
    %244 = tpu.matmul %233, %243, %cst_77 {dimension_numbers = #tpu.dot_dimension_numbers<[1], [0], [0], [1], [0, 0, 1, 1], [], []>} : vector<8x32xf32>, vector<32x32xf32>, vector<8x32xf32> -> vector<8x32xf32>
    %245 = arith.addf %241, %244 : vector<8x32xf32>
    %246 = arith.negf %245 : vector<8x32xf32>
    %247 = math.exp %246 : vector<8x32xf32>
    %cst_78 = arith.constant 1.000000e+00 : f32
    %248 = vector.broadcast %cst_78 : f32 to vector<8x32xf32>
    %249 = arith.addf %248, %247 : vector<8x32xf32>
    %250 = arith.divf %248, %249 : vector<8x32xf32>
    %251 = vector.extract_strided_slice %240 {offsets = [8, 0], sizes = [8, 32], strides = [1, 1]} : vector<32x32xf32> to vector<8x32xf32>
    %252 = vector.extract_strided_slice %6 {offsets = [1, 0, 0], sizes = [1, 32, 32], strides = [1, 1, 1]} : vector<4x32x32xf32> to vector<1x32x32xf32>
    %253 = vector.shape_cast %252 : vector<1x32x32xf32> to vector<32x32xf32>
    %cst_79 = arith.constant dense<0.000000e+00> : vector<8x32xf32>
    %254 = tpu.matmul %233, %253, %cst_79 {dimension_numbers = #tpu.dot_dimension_numbers<[1], [0], [0], [1], [0, 0, 1, 1], [], []>} : vector<8x32xf32>, vector<32x32xf32>, vector<8x32xf32> -> vector<8x32xf32>
    %255 = arith.addf %251, %254 : vector<8x32xf32>
    %256 = arith.negf %255 : vector<8x32xf32>
    %257 = math.exp %256 : vector<8x32xf32>
    %cst_80 = arith.constant 1.000000e+00 : f32
    %258 = vector.broadcast %cst_80 : f32 to vector<8x32xf32>
    %259 = arith.addf %258, %257 : vector<8x32xf32>
    %260 = arith.divf %258, %259 : vector<8x32xf32>
    %261 = vector.extract_strided_slice %240 {offsets = [16, 0], sizes = [8, 32], strides = [1, 1]} : vector<32x32xf32> to vector<8x32xf32>
    %262 = vector.extract_strided_slice %6 {offsets = [2, 0, 0], sizes = [1, 32, 32], strides = [1, 1, 1]} : vector<4x32x32xf32> to vector<1x32x32xf32>
    %263 = vector.shape_cast %262 : vector<1x32x32xf32> to vector<32x32xf32>
    %cst_81 = arith.constant dense<0.000000e+00> : vector<8x32xf32>
    %264 = tpu.matmul %233, %263, %cst_81 {dimension_numbers = #tpu.dot_dimension_numbers<[1], [0], [0], [1], [0, 0, 1, 1], [], []>} : vector<8x32xf32>, vector<32x32xf32>, vector<8x32xf32> -> vector<8x32xf32>
    %265 = arith.addf %261, %264 : vector<8x32xf32>
    %266 = math.tanh %265 : vector<8x32xf32>
    %267 = vector.extract_strided_slice %240 {offsets = [24, 0], sizes = [8, 32], strides = [1, 1]} : vector<32x32xf32> to vector<8x32xf32>
    %268 = vector.extract_strided_slice %6 {offsets = [3, 0, 0], sizes = [1, 32, 32], strides = [1, 1, 1]} : vector<4x32x32xf32> to vector<1x32x32xf32>
    %269 = vector.shape_cast %268 : vector<1x32x32xf32> to vector<32x32xf32>
    %cst_82 = arith.constant dense<0.000000e+00> : vector<8x32xf32>
    %270 = tpu.matmul %233, %269, %cst_82 {dimension_numbers = #tpu.dot_dimension_numbers<[1], [0], [0], [1], [0, 0, 1, 1], [], []>} : vector<8x32xf32>, vector<32x32xf32>, vector<8x32xf32> -> vector<8x32xf32>
    %271 = arith.addf %267, %270 : vector<8x32xf32>
    %272 = arith.negf %271 : vector<8x32xf32>
    %273 = math.exp %272 : vector<8x32xf32>
    %cst_83 = arith.constant 1.000000e+00 : f32
    %274 = vector.broadcast %cst_83 : f32 to vector<8x32xf32>
    %275 = arith.addf %274, %273 : vector<8x32xf32>
    %276 = arith.divf %274, %275 : vector<8x32xf32>
    %277 = arith.mulf %260, %231 : vector<8x32xf32>
    %278 = arith.mulf %250, %266 : vector<8x32xf32>
    %279 = arith.addf %277, %278 : vector<8x32xf32>
    %280 = math.tanh %279 : vector<8x32xf32>
    %281 = arith.mulf %276, %280 : vector<8x32xf32>
    %282 = arith.index_cast %c4_i32 : i32 to index
    %c0_84 = arith.constant 0 : index
    %c0_85 = arith.constant 0 : index
    %283 = vector.load %arg7[%282, %c0_84, %c0_85] : memref<8x8x32xf32, #tpu.memory_space<vmem>>, vector<1x8x32xf32>
    %284 = vector.shape_cast %283 : vector<1x8x32xf32> to vector<8x32xf32>
    %285 = vector.shape_cast %281 : vector<8x32xf32> to vector<1x8x32xf32>
    tpu.vector_store %arg7[%282, %c0_84, %c0_85], %285 {strides = array<i32>} : memref<8x8x32xf32, #tpu.memory_space<vmem>>, vector<1x8x32xf32>,
    %c5_i32 = arith.constant 5 : i32
    %286 = arith.index_cast %c5_i32 : i32 to index
    %c0_86 = arith.constant 0 : index
    %c0_87 = arith.constant 0 : index
    %287 = vector.load %arg8[%286, %c0_86, %c0_87] : memref<8x32x32xf32, #tpu.memory_space<vmem>>, vector<1x32x32xf32>
    %288 = vector.shape_cast %287 : vector<1x32x32xf32> to vector<32x32xf32>
    %289 = vector.extract_strided_slice %288 {offsets = [0, 0], sizes = [8, 32], strides = [1, 1]} : vector<32x32xf32> to vector<8x32xf32>
    %290 = vector.extract_strided_slice %6 {offsets = [0, 0, 0], sizes = [1, 32, 32], strides = [1, 1, 1]} : vector<4x32x32xf32> to vector<1x32x32xf32>
    %291 = vector.shape_cast %290 : vector<1x32x32xf32> to vector<32x32xf32>
    %cst_88 = arith.constant dense<0.000000e+00> : vector<8x32xf32>
    %292 = tpu.matmul %281, %291, %cst_88 {dimension_numbers = #tpu.dot_dimension_numbers<[1], [0], [0], [1], [0, 0, 1, 1], [], []>} : vector<8x32xf32>, vector<32x32xf32>, vector<8x32xf32> -> vector<8x32xf32>
    %293 = arith.addf %289, %292 : vector<8x32xf32>
    %294 = arith.negf %293 : vector<8x32xf32>
    %295 = math.exp %294 : vector<8x32xf32>
    %cst_89 = arith.constant 1.000000e+00 : f32
    %296 = vector.broadcast %cst_89 : f32 to vector<8x32xf32>
    %297 = arith.addf %296, %295 : vector<8x32xf32>
    %298 = arith.divf %296, %297 : vector<8x32xf32>
    %299 = vector.extract_strided_slice %288 {offsets = [8, 0], sizes = [8, 32], strides = [1, 1]} : vector<32x32xf32> to vector<8x32xf32>
    %300 = vector.extract_strided_slice %6 {offsets = [1, 0, 0], sizes = [1, 32, 32], strides = [1, 1, 1]} : vector<4x32x32xf32> to vector<1x32x32xf32>
    %301 = vector.shape_cast %300 : vector<1x32x32xf32> to vector<32x32xf32>
    %cst_90 = arith.constant dense<0.000000e+00> : vector<8x32xf32>
    %302 = tpu.matmul %281, %301, %cst_90 {dimension_numbers = #tpu.dot_dimension_numbers<[1], [0], [0], [1], [0, 0, 1, 1], [], []>} : vector<8x32xf32>, vector<32x32xf32>, vector<8x32xf32> -> vector<8x32xf32>
    %303 = arith.addf %299, %302 : vector<8x32xf32>
    %304 = arith.negf %303 : vector<8x32xf32>
    %305 = math.exp %304 : vector<8x32xf32>
    %cst_91 = arith.constant 1.000000e+00 : f32
    %306 = vector.broadcast %cst_91 : f32 to vector<8x32xf32>
    %307 = arith.addf %306, %305 : vector<8x32xf32>
    %308 = arith.divf %306, %307 : vector<8x32xf32>
    %309 = vector.extract_strided_slice %288 {offsets = [16, 0], sizes = [8, 32], strides = [1, 1]} : vector<32x32xf32> to vector<8x32xf32>
    %310 = vector.extract_strided_slice %6 {offsets = [2, 0, 0], sizes = [1, 32, 32], strides = [1, 1, 1]} : vector<4x32x32xf32> to vector<1x32x32xf32>
    %311 = vector.shape_cast %310 : vector<1x32x32xf32> to vector<32x32xf32>
    %cst_92 = arith.constant dense<0.000000e+00> : vector<8x32xf32>
    %312 = tpu.matmul %281, %311, %cst_92 {dimension_numbers = #tpu.dot_dimension_numbers<[1], [0], [0], [1], [0, 0, 1, 1], [], []>} : vector<8x32xf32>, vector<32x32xf32>, vector<8x32xf32> -> vector<8x32xf32>
    %313 = arith.addf %309, %312 : vector<8x32xf32>
    %314 = math.tanh %313 : vector<8x32xf32>
    %315 = vector.extract_strided_slice %288 {offsets = [24, 0], sizes = [8, 32], strides = [1, 1]} : vector<32x32xf32> to vector<8x32xf32>
    %316 = vector.extract_strided_slice %6 {offsets = [3, 0, 0], sizes = [1, 32, 32], strides = [1, 1, 1]} : vector<4x32x32xf32> to vector<1x32x32xf32>
    %317 = vector.shape_cast %316 : vector<1x32x32xf32> to vector<32x32xf32>
    %cst_93 = arith.constant dense<0.000000e+00> : vector<8x32xf32>
    %318 = tpu.matmul %281, %317, %cst_93 {dimension_numbers = #tpu.dot_dimension_numbers<[1], [0], [0], [1], [0, 0, 1, 1], [], []>} : vector<8x32xf32>, vector<32x32xf32>, vector<8x32xf32> -> vector<8x32xf32>
    %319 = arith.addf %315, %318 : vector<8x32xf32>
    %320 = arith.negf %319 : vector<8x32xf32>
    %321 = math.exp %320 : vector<8x32xf32>
    %cst_94 = arith.constant 1.000000e+00 : f32
    %322 = vector.broadcast %cst_94 : f32 to vector<8x32xf32>
    %323 = arith.addf %322, %321 : vector<8x32xf32>
    %324 = arith.divf %322, %323 : vector<8x32xf32>
    %325 = arith.mulf %308, %279 : vector<8x32xf32>
    %326 = arith.mulf %298, %314 : vector<8x32xf32>
    %327 = arith.addf %325, %326 : vector<8x32xf32>
    %328 = math.tanh %327 : vector<8x32xf32>
    %329 = arith.mulf %324, %328 : vector<8x32xf32>
    %330 = arith.index_cast %c5_i32 : i32 to index
    %c0_95 = arith.constant 0 : index
    %c0_96 = arith.constant 0 : index
    %331 = vector.load %arg7[%330, %c0_95, %c0_96] : memref<8x8x32xf32, #tpu.memory_space<vmem>>, vector<1x8x32xf32>
    %332 = vector.shape_cast %331 : vector<1x8x32xf32> to vector<8x32xf32>
    %333 = vector.shape_cast %329 : vector<8x32xf32> to vector<1x8x32xf32>
    tpu.vector_store %arg7[%330, %c0_95, %c0_96], %333 {strides = array<i32>} : memref<8x8x32xf32, #tpu.memory_space<vmem>>, vector<1x8x32xf32>,
    %c6_i32 = arith.constant 6 : i32
    %334 = arith.index_cast %c6_i32 : i32 to index
    %c0_97 = arith.constant 0 : index
    %c0_98 = arith.constant 0 : index
    %335 = vector.load %arg8[%334, %c0_97, %c0_98] : memref<8x32x32xf32, #tpu.memory_space<vmem>>, vector<1x32x32xf32>
    %336 = vector.shape_cast %335 : vector<1x32x32xf32> to vector<32x32xf32>
    %337 = vector.extract_strided_slice %336 {offsets = [0, 0], sizes = [8, 32], strides = [1, 1]} : vector<32x32xf32> to vector<8x32xf32>
    %338 = vector.extract_strided_slice %6 {offsets = [0, 0, 0], sizes = [1, 32, 32], strides = [1, 1, 1]} : vector<4x32x32xf32> to vector<1x32x32xf32>
    %339 = vector.shape_cast %338 : vector<1x32x32xf32> to vector<32x32xf32>
    %cst_99 = arith.constant dense<0.000000e+00> : vector<8x32xf32>
    %340 = tpu.matmul %329, %339, %cst_99 {dimension_numbers = #tpu.dot_dimension_numbers<[1], [0], [0], [1], [0, 0, 1, 1], [], []>} : vector<8x32xf32>, vector<32x32xf32>, vector<8x32xf32> -> vector<8x32xf32>
    %341 = arith.addf %337, %340 : vector<8x32xf32>
    %342 = arith.negf %341 : vector<8x32xf32>
    %343 = math.exp %342 : vector<8x32xf32>
    %cst_100 = arith.constant 1.000000e+00 : f32
    %344 = vector.broadcast %cst_100 : f32 to vector<8x32xf32>
    %345 = arith.addf %344, %343 : vector<8x32xf32>
    %346 = arith.divf %344, %345 : vector<8x32xf32>
    %347 = vector.extract_strided_slice %336 {offsets = [8, 0], sizes = [8, 32], strides = [1, 1]} : vector<32x32xf32> to vector<8x32xf32>
    %348 = vector.extract_strided_slice %6 {offsets = [1, 0, 0], sizes = [1, 32, 32], strides = [1, 1, 1]} : vector<4x32x32xf32> to vector<1x32x32xf32>
    %349 = vector.shape_cast %348 : vector<1x32x32xf32> to vector<32x32xf32>
    %cst_101 = arith.constant dense<0.000000e+00> : vector<8x32xf32>
    %350 = tpu.matmul %329, %349, %cst_101 {dimension_numbers = #tpu.dot_dimension_numbers<[1], [0], [0], [1], [0, 0, 1, 1], [], []>} : vector<8x32xf32>, vector<32x32xf32>, vector<8x32xf32> -> vector<8x32xf32>
    %351 = arith.addf %347, %350 : vector<8x32xf32>
    %352 = arith.negf %351 : vector<8x32xf32>
    %353 = math.exp %352 : vector<8x32xf32>
    %cst_102 = arith.constant 1.000000e+00 : f32
    %354 = vector.broadcast %cst_102 : f32 to vector<8x32xf32>
    %355 = arith.addf %354, %353 : vector<8x32xf32>
    %356 = arith.divf %354, %355 : vector<8x32xf32>
    %357 = vector.extract_strided_slice %336 {offsets = [16, 0], sizes = [8, 32], strides = [1, 1]} : vector<32x32xf32> to vector<8x32xf32>
    %358 = vector.extract_strided_slice %6 {offsets = [2, 0, 0], sizes = [1, 32, 32], strides = [1, 1, 1]} : vector<4x32x32xf32> to vector<1x32x32xf32>
    %359 = vector.shape_cast %358 : vector<1x32x32xf32> to vector<32x32xf32>
    %cst_103 = arith.constant dense<0.000000e+00> : vector<8x32xf32>
    %360 = tpu.matmul %329, %359, %cst_103 {dimension_numbers = #tpu.dot_dimension_numbers<[1], [0], [0], [1], [0, 0, 1, 1], [], []>} : vector<8x32xf32>, vector<32x32xf32>, vector<8x32xf32> -> vector<8x32xf32>
    %361 = arith.addf %357, %360 : vector<8x32xf32>
    %362 = math.tanh %361 : vector<8x32xf32>
    %363 = vector.extract_strided_slice %336 {offsets = [24, 0], sizes = [8, 32], strides = [1, 1]} : vector<32x32xf32> to vector<8x32xf32>
    %364 = vector.extract_strided_slice %6 {offsets = [3, 0, 0], sizes = [1, 32, 32], strides = [1, 1, 1]} : vector<4x32x32xf32> to vector<1x32x32xf32>
    %365 = vector.shape_cast %364 : vector<1x32x32xf32> to vector<32x32xf32>
    %cst_104 = arith.constant dense<0.000000e+00> : vector<8x32xf32>
    %366 = tpu.matmul %329, %365, %cst_104 {dimension_numbers = #tpu.dot_dimension_numbers<[1], [0], [0], [1], [0, 0, 1, 1], [], []>} : vector<8x32xf32>, vector<32x32xf32>, vector<8x32xf32> -> vector<8x32xf32>
    %367 = arith.addf %363, %366 : vector<8x32xf32>
    %368 = arith.negf %367 : vector<8x32xf32>
    %369 = math.exp %368 : vector<8x32xf32>
    %cst_105 = arith.constant 1.000000e+00 : f32
    %370 = vector.broadcast %cst_105 : f32 to vector<8x32xf32>
    %371 = arith.addf %370, %369 : vector<8x32xf32>
    %372 = arith.divf %370, %371 : vector<8x32xf32>
    %373 = arith.mulf %356, %327 : vector<8x32xf32>
    %374 = arith.mulf %346, %362 : vector<8x32xf32>
    %375 = arith.addf %373, %374 : vector<8x32xf32>
    %376 = math.tanh %375 : vector<8x32xf32>
    %377 = arith.mulf %372, %376 : vector<8x32xf32>
    %378 = arith.index_cast %c6_i32 : i32 to index
    %c0_106 = arith.constant 0 : index
    %c0_107 = arith.constant 0 : index
    %379 = vector.load %arg7[%378, %c0_106, %c0_107] : memref<8x8x32xf32, #tpu.memory_space<vmem>>, vector<1x8x32xf32>
    %380 = vector.shape_cast %379 : vector<1x8x32xf32> to vector<8x32xf32>
    %381 = vector.shape_cast %377 : vector<8x32xf32> to vector<1x8x32xf32>
    tpu.vector_store %arg7[%378, %c0_106, %c0_107], %381 {strides = array<i32>} : memref<8x8x32xf32, #tpu.memory_space<vmem>>, vector<1x8x32xf32>,
    %c7_i32 = arith.constant 7 : i32
    %382 = arith.index_cast %c7_i32 : i32 to index
    %c0_108 = arith.constant 0 : index
    %c0_109 = arith.constant 0 : index
    %383 = vector.load %arg8[%382, %c0_108, %c0_109] : memref<8x32x32xf32, #tpu.memory_space<vmem>>, vector<1x32x32xf32>
    %384 = vector.shape_cast %383 : vector<1x32x32xf32> to vector<32x32xf32>
    %385 = vector.extract_strided_slice %384 {offsets = [0, 0], sizes = [8, 32], strides = [1, 1]} : vector<32x32xf32> to vector<8x32xf32>
    %386 = vector.extract_strided_slice %6 {offsets = [0, 0, 0], sizes = [1, 32, 32], strides = [1, 1, 1]} : vector<4x32x32xf32> to vector<1x32x32xf32>
    %387 = vector.shape_cast %386 : vector<1x32x32xf32> to vector<32x32xf32>
    %cst_110 = arith.constant dense<0.000000e+00> : vector<8x32xf32>
    %388 = tpu.matmul %377, %387, %cst_110 {dimension_numbers = #tpu.dot_dimension_numbers<[1], [0], [0], [1], [0, 0, 1, 1], [], []>} : vector<8x32xf32>, vector<32x32xf32>, vector<8x32xf32> -> vector<8x32xf32>
    %389 = arith.addf %385, %388 : vector<8x32xf32>
    %390 = arith.negf %389 : vector<8x32xf32>
    %391 = math.exp %390 : vector<8x32xf32>
    %cst_111 = arith.constant 1.000000e+00 : f32
    %392 = vector.broadcast %cst_111 : f32 to vector<8x32xf32>
    %393 = arith.addf %392, %391 : vector<8x32xf32>
    %394 = arith.divf %392, %393 : vector<8x32xf32>
    %395 = vector.extract_strided_slice %384 {offsets = [8, 0], sizes = [8, 32], strides = [1, 1]} : vector<32x32xf32> to vector<8x32xf32>
    %396 = vector.extract_strided_slice %6 {offsets = [1, 0, 0], sizes = [1, 32, 32], strides = [1, 1, 1]} : vector<4x32x32xf32> to vector<1x32x32xf32>
    %397 = vector.shape_cast %396 : vector<1x32x32xf32> to vector<32x32xf32>
    %cst_112 = arith.constant dense<0.000000e+00> : vector<8x32xf32>
    %398 = tpu.matmul %377, %397, %cst_112 {dimension_numbers = #tpu.dot_dimension_numbers<[1], [0], [0], [1], [0, 0, 1, 1], [], []>} : vector<8x32xf32>, vector<32x32xf32>, vector<8x32xf32> -> vector<8x32xf32>
    %399 = arith.addf %395, %398 : vector<8x32xf32>
    %400 = arith.negf %399 : vector<8x32xf32>
    %401 = math.exp %400 : vector<8x32xf32>
    %cst_113 = arith.constant 1.000000e+00 : f32
    %402 = vector.broadcast %cst_113 : f32 to vector<8x32xf32>
    %403 = arith.addf %402, %401 : vector<8x32xf32>
    %404 = arith.divf %402, %403 : vector<8x32xf32>
    %405 = vector.extract_strided_slice %384 {offsets = [16, 0], sizes = [8, 32], strides = [1, 1]} : vector<32x32xf32> to vector<8x32xf32>
    %406 = vector.extract_strided_slice %6 {offsets = [2, 0, 0], sizes = [1, 32, 32], strides = [1, 1, 1]} : vector<4x32x32xf32> to vector<1x32x32xf32>
    %407 = vector.shape_cast %406 : vector<1x32x32xf32> to vector<32x32xf32>
    %cst_114 = arith.constant dense<0.000000e+00> : vector<8x32xf32>
    %408 = tpu.matmul %377, %407, %cst_114 {dimension_numbers = #tpu.dot_dimension_numbers<[1], [0], [0], [1], [0, 0, 1, 1], [], []>} : vector<8x32xf32>, vector<32x32xf32>, vector<8x32xf32> -> vector<8x32xf32>
    %409 = arith.addf %405, %408 : vector<8x32xf32>
    %410 = math.tanh %409 : vector<8x32xf32>
    %411 = vector.extract_strided_slice %384 {offsets = [24, 0], sizes = [8, 32], strides = [1, 1]} : vector<32x32xf32> to vector<8x32xf32>
    %412 = vector.extract_strided_slice %6 {offsets = [3, 0, 0], sizes = [1, 32, 32], strides = [1, 1, 1]} : vector<4x32x32xf32> to vector<1x32x32xf32>
    %413 = vector.shape_cast %412 : vector<1x32x32xf32> to vector<32x32xf32>
    %cst_115 = arith.constant dense<0.000000e+00> : vector<8x32xf32>
    %414 = tpu.matmul %377, %413, %cst_115 {dimension_numbers = #tpu.dot_dimension_numbers<[1], [0], [0], [1], [0, 0, 1, 1], [], []>} : vector<8x32xf32>, vector<32x32xf32>, vector<8x32xf32> -> vector<8x32xf32>
    %415 = arith.addf %411, %414 : vector<8x32xf32>
    %416 = arith.negf %415 : vector<8x32xf32>
    %417 = math.exp %416 : vector<8x32xf32>
    %cst_116 = arith.constant 1.000000e+00 : f32
    %418 = vector.broadcast %cst_116 : f32 to vector<8x32xf32>
    %419 = arith.addf %418, %417 : vector<8x32xf32>
    %420 = arith.divf %418, %419 : vector<8x32xf32>
    %421 = arith.mulf %404, %375 : vector<8x32xf32>
    %422 = arith.mulf %394, %410 : vector<8x32xf32>
    %423 = arith.addf %421, %422 : vector<8x32xf32>
    %424 = math.tanh %423 : vector<8x32xf32>
    %425 = arith.mulf %420, %424 : vector<8x32xf32>
    %426 = arith.index_cast %c7_i32 : i32 to index
    %c0_117 = arith.constant 0 : index
    %c0_118 = arith.constant 0 : index
    %427 = vector.load %arg7[%426, %c0_117, %c0_118] : memref<8x8x32xf32, #tpu.memory_space<vmem>>, vector<1x8x32xf32>
    %428 = vector.shape_cast %427 : vector<1x8x32xf32> to vector<8x32xf32>
    %429 = vector.shape_cast %425 : vector<8x32xf32> to vector<1x8x32xf32>
    tpu.vector_store %arg7[%426, %c0_117, %c0_118], %429 {strides = array<i32>} : memref<8x8x32xf32, #tpu.memory_space<vmem>>, vector<1x8x32xf32>,
    %c8_i32 = arith.constant 8 : i32
    %c0_119 = arith.constant 0 : index
    %c0_120 = arith.constant 0 : index
    %c0_121 = arith.constant 0 : index
    %430 = vector.load %arg7[%c0_119, %c0_120, %c0_121] : memref<8x8x32xf32, #tpu.memory_space<vmem>>, vector<8x8x32xf32>
    %431 = vector.shape_cast %430 : vector<8x8x32xf32> to vector<64x32xf32>
    %c0_122 = arith.constant 0 : index
    %c1 = arith.constant 1 : index
    %c0_123 = arith.constant 0 : index
    %c0_124 = arith.constant 0 : index
    %c0_125 = arith.constant 0 : index
    %432 = vector.load %arg2[%c0_122, %c1, %c0_123, %c0_124, %c0_125] : memref<1x3x4x32x32xf32, #tpu.memory_space<vmem>>, vector<1x1x4x32x32xf32>
    %433 = vector.shape_cast %432 : vector<1x1x4x32x32xf32> to vector<4x32x32xf32>
    %c0_126 = arith.constant 0 : index
    %c1_127 = arith.constant 1 : index
    %c0_128 = arith.constant 0 : index
    %c0_129 = arith.constant 0 : index
    %c0_130 = arith.constant 0 : index
    %434 = vector.load %arg3[%c0_126, %c1_127, %c0_128, %c0_129, %c0_130] : memref<1x3x4x32x32xf32, #tpu.memory_space<vmem>>, vector<1x1x4x32x32xf32>
    %435 = vector.shape_cast %434 : vector<1x1x4x32x32xf32> to vector<4x32x32xf32>
    %c0_131 = arith.constant 0 : index
    %c1_132 = arith.constant 1 : index
    %c0_133 = arith.constant 0 : index
    %c0_134 = arith.constant 0 : index
    %c0_135 = arith.constant 0 : index
    %436 = vector.load %arg4[%c0_131, %c1_132, %c0_133, %c0_134, %c0_135] : memref<1x3x4x1x32xf32, #tpu.memory_space<vmem>>, vector<1x1x4x1x32xf32>
    %437 = vector.shape_cast %436 : vector<1x1x4x1x32xf32> to vector<4x1x32xf32>
    %438 = vector.extract_strided_slice %433 {offsets = [0, 0, 0], sizes = [1, 32, 32], strides = [1, 1, 1]} : vector<4x32x32xf32> to vector<1x32x32xf32>
    %439 = vector.shape_cast %438 : vector<1x32x32xf32> to vector<32x32xf32>
    %cst_136 = arith.constant dense<0.000000e+00> : vector<64x32xf32>
    %440 = tpu.matmul %431, %439, %cst_136 {dimension_numbers = #tpu.dot_dimension_numbers<[1], [0], [0], [1], [0, 0, 1, 1], [], []>} : vector<64x32xf32>, vector<32x32xf32>, vector<64x32xf32> -> vector<64x32xf32>
    %441 = vector.extract_strided_slice %437 {offsets = [0, 0, 0], sizes = [1, 1, 32], strides = [1, 1, 1]} : vector<4x1x32xf32> to vector<1x1x32xf32>
    %442 = vector.shape_cast %441 : vector<1x1x32xf32> to vector<1x32xf32>
    %443 = vector.broadcast %442 : vector<1x32xf32> to vector<64x32xf32>
    %444 = arith.addf %440, %443 : vector<64x32xf32>
    %445 = vector.shape_cast %444 : vector<64x32xf32> to vector<8x8x32xf32>
    %c0_137 = arith.constant 0 : index
    %c0_138 = arith.constant 0 : index
    %c0_139 = arith.constant 0 : index
    %446 = vector.load %arg8[%c0_137, %c0_138, %c0_139] : memref<8x32x32xf32, #tpu.memory_space<vmem>>, vector<8x8x32xf32>
    tpu.vector_store %arg8[%c0_137, %c0_138, %c0_139], %445 {strides = array<i32>} : memref<8x32x32xf32, #tpu.memory_space<vmem>>, vector<8x8x32xf32>,
    %447 = vector.extract_strided_slice %433 {offsets = [1, 0, 0], sizes = [1, 32, 32], strides = [1, 1, 1]} : vector<4x32x32xf32> to vector<1x32x32xf32>
    %448 = vector.shape_cast %447 : vector<1x32x32xf32> to vector<32x32xf32>
    %cst_140 = arith.constant dense<0.000000e+00> : vector<64x32xf32>
    %449 = tpu.matmul %431, %448, %cst_140 {dimension_numbers = #tpu.dot_dimension_numbers<[1], [0], [0], [1], [0, 0, 1, 1], [], []>} : vector<64x32xf32>, vector<32x32xf32>, vector<64x32xf32> -> vector<64x32xf32>
    %450 = vector.extract_strided_slice %437 {offsets = [1, 0, 0], sizes = [1, 1, 32], strides = [1, 1, 1]} : vector<4x1x32xf32> to vector<1x1x32xf32>
    %451 = vector.shape_cast %450 : vector<1x1x32xf32> to vector<1x32xf32>
    %452 = vector.broadcast %451 : vector<1x32xf32> to vector<64x32xf32>
    %453 = arith.addf %449, %452 : vector<64x32xf32>
    %454 = vector.shape_cast %453 : vector<64x32xf32> to vector<8x8x32xf32>
    %c0_141 = arith.constant 0 : index
    %c8_142 = arith.constant 8 : index
    %c0_143 = arith.constant 0 : index
    %455 = vector.load %arg8[%c0_141, %c8_142, %c0_143] : memref<8x32x32xf32, #tpu.memory_space<vmem>>, vector<8x8x32xf32>
    tpu.vector_store %arg8[%c0_141, %c8_142, %c0_143], %454 {strides = array<i32>} : memref<8x32x32xf32, #tpu.memory_space<vmem>>, vector<8x8x32xf32>,
    %456 = vector.extract_strided_slice %433 {offsets = [2, 0, 0], sizes = [1, 32, 32], strides = [1, 1, 1]} : vector<4x32x32xf32> to vector<1x32x32xf32>
    %457 = vector.shape_cast %456 : vector<1x32x32xf32> to vector<32x32xf32>
    %cst_144 = arith.constant dense<0.000000e+00> : vector<64x32xf32>
    %458 = tpu.matmul %431, %457, %cst_144 {dimension_numbers = #tpu.dot_dimension_numbers<[1], [0], [0], [1], [0, 0, 1, 1], [], []>} : vector<64x32xf32>, vector<32x32xf32>, vector<64x32xf32> -> vector<64x32xf32>
    %459 = vector.extract_strided_slice %437 {offsets = [2, 0, 0], sizes = [1, 1, 32], strides = [1, 1, 1]} : vector<4x1x32xf32> to vector<1x1x32xf32>
    %460 = vector.shape_cast %459 : vector<1x1x32xf32> to vector<1x32xf32>
    %461 = vector.broadcast %460 : vector<1x32xf32> to vector<64x32xf32>
    %462 = arith.addf %458, %461 : vector<64x32xf32>
    %463 = vector.shape_cast %462 : vector<64x32xf32> to vector<8x8x32xf32>
    %c0_145 = arith.constant 0 : index
    %c16_146 = arith.constant 16 : index
    %c0_147 = arith.constant 0 : index
    %464 = vector.load %arg8[%c0_145, %c16_146, %c0_147] : memref<8x32x32xf32, #tpu.memory_space<vmem>>, vector<8x8x32xf32>
    tpu.vector_store %arg8[%c0_145, %c16_146, %c0_147], %463 {strides = array<i32>} : memref<8x32x32xf32, #tpu.memory_space<vmem>>, vector<8x8x32xf32>,
    %465 = vector.extract_strided_slice %433 {offsets = [3, 0, 0], sizes = [1, 32, 32], strides = [1, 1, 1]} : vector<4x32x32xf32> to vector<1x32x32xf32>
    %466 = vector.shape_cast %465 : vector<1x32x32xf32> to vector<32x32xf32>
    %cst_148 = arith.constant dense<0.000000e+00> : vector<64x32xf32>
    %467 = tpu.matmul %431, %466, %cst_148 {dimension_numbers = #tpu.dot_dimension_numbers<[1], [0], [0], [1], [0, 0, 1, 1], [], []>} : vector<64x32xf32>, vector<32x32xf32>, vector<64x32xf32> -> vector<64x32xf32>
    %468 = vector.extract_strided_slice %437 {offsets = [3, 0, 0], sizes = [1, 1, 32], strides = [1, 1, 1]} : vector<4x1x32xf32> to vector<1x1x32xf32>
    %469 = vector.shape_cast %468 : vector<1x1x32xf32> to vector<1x32xf32>
    %470 = vector.broadcast %469 : vector<1x32xf32> to vector<64x32xf32>
    %471 = arith.addf %467, %470 : vector<64x32xf32>
    %472 = vector.shape_cast %471 : vector<64x32xf32> to vector<8x8x32xf32>
    %c0_149 = arith.constant 0 : index
    %c24_150 = arith.constant 24 : index
    %c0_151 = arith.constant 0 : index
    %473 = vector.load %arg8[%c0_149, %c24_150, %c0_151] : memref<8x32x32xf32, #tpu.memory_space<vmem>>, vector<8x8x32xf32>
    tpu.vector_store %arg8[%c0_149, %c24_150, %c0_151], %472 {strides = array<i32>} : memref<8x32x32xf32, #tpu.memory_space<vmem>>, vector<8x8x32xf32>,
    %cst_152 = arith.constant 0.000000e+00 : f32
    %474 = vector.broadcast %cst_152 : f32 to vector<8x32xf32>
    %c0_i32_153 = arith.constant 0 : i32
    %475 = arith.index_cast %c0_i32_153 : i32 to index
    %c0_154 = arith.constant 0 : index
    %c0_155 = arith.constant 0 : index
    %476 = vector.load %arg8[%475, %c0_154, %c0_155] : memref<8x32x32xf32, #tpu.memory_space<vmem>>, vector<1x32x32xf32>
    %477 = vector.shape_cast %476 : vector<1x32x32xf32> to vector<32x32xf32>
    %478 = vector.extract_strided_slice %477 {offsets = [0, 0], sizes = [8, 32], strides = [1, 1]} : vector<32x32xf32> to vector<8x32xf32>
    %479 = vector.extract_strided_slice %435 {offsets = [0, 0, 0], sizes = [1, 32, 32], strides = [1, 1, 1]} : vector<4x32x32xf32> to vector<1x32x32xf32>
    %480 = vector.shape_cast %479 : vector<1x32x32xf32> to vector<32x32xf32>
    %cst_156 = arith.constant dense<0.000000e+00> : vector<8x32xf32>
    %481 = tpu.matmul %474, %480, %cst_156 {dimension_numbers = #tpu.dot_dimension_numbers<[1], [0], [0], [1], [0, 0, 1, 1], [], []>} : vector<8x32xf32>, vector<32x32xf32>, vector<8x32xf32> -> vector<8x32xf32>
    %482 = arith.addf %478, %481 : vector<8x32xf32>
    %483 = arith.negf %482 : vector<8x32xf32>
    %484 = math.exp %483 : vector<8x32xf32>
    %cst_157 = arith.constant 1.000000e+00 : f32
    %485 = vector.broadcast %cst_157 : f32 to vector<8x32xf32>
    %486 = arith.addf %485, %484 : vector<8x32xf32>
    %487 = arith.divf %485, %486 : vector<8x32xf32>
    %488 = vector.extract_strided_slice %477 {offsets = [8, 0], sizes = [8, 32], strides = [1, 1]} : vector<32x32xf32> to vector<8x32xf32>
    %489 = vector.extract_strided_slice %435 {offsets = [1, 0, 0], sizes = [1, 32, 32], strides = [1, 1, 1]} : vector<4x32x32xf32> to vector<1x32x32xf32>
    %490 = vector.shape_cast %489 : vector<1x32x32xf32> to vector<32x32xf32>
    %cst_158 = arith.constant dense<0.000000e+00> : vector<8x32xf32>
    %491 = tpu.matmul %474, %490, %cst_158 {dimension_numbers = #tpu.dot_dimension_numbers<[1], [0], [0], [1], [0, 0, 1, 1], [], []>} : vector<8x32xf32>, vector<32x32xf32>, vector<8x32xf32> -> vector<8x32xf32>
    %492 = arith.addf %488, %491 : vector<8x32xf32>
    %493 = arith.negf %492 : vector<8x32xf32>
    %494 = math.exp %493 : vector<8x32xf32>
    %cst_159 = arith.constant 1.000000e+00 : f32
    %495 = vector.broadcast %cst_159 : f32 to vector<8x32xf32>
    %496 = arith.addf %495, %494 : vector<8x32xf32>
    %497 = arith.divf %495, %496 : vector<8x32xf32>
    %498 = vector.extract_strided_slice %477 {offsets = [16, 0], sizes = [8, 32], strides = [1, 1]} : vector<32x32xf32> to vector<8x32xf32>
    %499 = vector.extract_strided_slice %435 {offsets = [2, 0, 0], sizes = [1, 32, 32], strides = [1, 1, 1]} : vector<4x32x32xf32> to vector<1x32x32xf32>
    %500 = vector.shape_cast %499 : vector<1x32x32xf32> to vector<32x32xf32>
    %cst_160 = arith.constant dense<0.000000e+00> : vector<8x32xf32>
    %501 = tpu.matmul %474, %500, %cst_160 {dimension_numbers = #tpu.dot_dimension_numbers<[1], [0], [0], [1], [0, 0, 1, 1], [], []>} : vector<8x32xf32>, vector<32x32xf32>, vector<8x32xf32> -> vector<8x32xf32>
    %502 = arith.addf %498, %501 : vector<8x32xf32>
    %503 = math.tanh %502 : vector<8x32xf32>
    %504 = vector.extract_strided_slice %477 {offsets = [24, 0], sizes = [8, 32], strides = [1, 1]} : vector<32x32xf32> to vector<8x32xf32>
    %505 = vector.extract_strided_slice %435 {offsets = [3, 0, 0], sizes = [1, 32, 32], strides = [1, 1, 1]} : vector<4x32x32xf32> to vector<1x32x32xf32>
    %506 = vector.shape_cast %505 : vector<1x32x32xf32> to vector<32x32xf32>
    %cst_161 = arith.constant dense<0.000000e+00> : vector<8x32xf32>
    %507 = tpu.matmul %474, %506, %cst_161 {dimension_numbers = #tpu.dot_dimension_numbers<[1], [0], [0], [1], [0, 0, 1, 1], [], []>} : vector<8x32xf32>, vector<32x32xf32>, vector<8x32xf32> -> vector<8x32xf32>
    %508 = arith.addf %504, %507 : vector<8x32xf32>
    %509 = arith.negf %508 : vector<8x32xf32>
    %510 = math.exp %509 : vector<8x32xf32>
    %cst_162 = arith.constant 1.000000e+00 : f32
    %511 = vector.broadcast %cst_162 : f32 to vector<8x32xf32>
    %512 = arith.addf %511, %510 : vector<8x32xf32>
    %513 = arith.divf %511, %512 : vector<8x32xf32>
    %514 = arith.mulf %497, %474 : vector<8x32xf32>
    %515 = arith.mulf %487, %503 : vector<8x32xf32>
    %516 = arith.addf %514, %515 : vector<8x32xf32>
    %517 = math.tanh %516 : vector<8x32xf32>
    %518 = arith.mulf %513, %517 : vector<8x32xf32>
    %519 = arith.index_cast %c0_i32_153 : i32 to index
    %c0_163 = arith.constant 0 : index
    %c0_164 = arith.constant 0 : index
    %520 = vector.load %arg7[%519, %c0_163, %c0_164] : memref<8x8x32xf32, #tpu.memory_space<vmem>>, vector<1x8x32xf32>
    %521 = vector.shape_cast %520 : vector<1x8x32xf32> to vector<8x32xf32>
    %522 = vector.shape_cast %518 : vector<8x32xf32> to vector<1x8x32xf32>
    tpu.vector_store %arg7[%519, %c0_163, %c0_164], %522 {strides = array<i32>} : memref<8x8x32xf32, #tpu.memory_space<vmem>>, vector<1x8x32xf32>,
    %c1_i32_165 = arith.constant 1 : i32
    %523 = arith.index_cast %c1_i32_165 : i32 to index
    %c0_166 = arith.constant 0 : index
    %c0_167 = arith.constant 0 : index
    %524 = vector.load %arg8[%523, %c0_166, %c0_167] : memref<8x32x32xf32, #tpu.memory_space<vmem>>, vector<1x32x32xf32>
    %525 = vector.shape_cast %524 : vector<1x32x32xf32> to vector<32x32xf32>
    %526 = vector.extract_strided_slice %525 {offsets = [0, 0], sizes = [8, 32], strides = [1, 1]} : vector<32x32xf32> to vector<8x32xf32>
    %527 = vector.extract_strided_slice %435 {offsets = [0, 0, 0], sizes = [1, 32, 32], strides = [1, 1, 1]} : vector<4x32x32xf32> to vector<1x32x32xf32>
    %528 = vector.shape_cast %527 : vector<1x32x32xf32> to vector<32x32xf32>
    %cst_168 = arith.constant dense<0.000000e+00> : vector<8x32xf32>
    %529 = tpu.matmul %518, %528, %cst_168 {dimension_numbers = #tpu.dot_dimension_numbers<[1], [0], [0], [1], [0, 0, 1, 1], [], []>} : vector<8x32xf32>, vector<32x32xf32>, vector<8x32xf32> -> vector<8x32xf32>
    %530 = arith.addf %526, %529 : vector<8x32xf32>
    %531 = arith.negf %530 : vector<8x32xf32>
    %532 = math.exp %531 : vector<8x32xf32>
    %cst_169 = arith.constant 1.000000e+00 : f32
    %533 = vector.broadcast %cst_169 : f32 to vector<8x32xf32>
    %534 = arith.addf %533, %532 : vector<8x32xf32>
    %535 = arith.divf %533, %534 : vector<8x32xf32>
    %536 = vector.extract_strided_slice %525 {offsets = [8, 0], sizes = [8, 32], strides = [1, 1]} : vector<32x32xf32> to vector<8x32xf32>
    %537 = vector.extract_strided_slice %435 {offsets = [1, 0, 0], sizes = [1, 32, 32], strides = [1, 1, 1]} : vector<4x32x32xf32> to vector<1x32x32xf32>
    %538 = vector.shape_cast %537 : vector<1x32x32xf32> to vector<32x32xf32>
    %cst_170 = arith.constant dense<0.000000e+00> : vector<8x32xf32>
    %539 = tpu.matmul %518, %538, %cst_170 {dimension_numbers = #tpu.dot_dimension_numbers<[1], [0], [0], [1], [0, 0, 1, 1], [], []>} : vector<8x32xf32>, vector<32x32xf32>, vector<8x32xf32> -> vector<8x32xf32>
    %540 = arith.addf %536, %539 : vector<8x32xf32>
    %541 = arith.negf %540 : vector<8x32xf32>
    %542 = math.exp %541 : vector<8x32xf32>
    %cst_171 = arith.constant 1.000000e+00 : f32
    %543 = vector.broadcast %cst_171 : f32 to vector<8x32xf32>
    %544 = arith.addf %543, %542 : vector<8x32xf32>
    %545 = arith.divf %543, %544 : vector<8x32xf32>
    %546 = vector.extract_strided_slice %525 {offsets = [16, 0], sizes = [8, 32], strides = [1, 1]} : vector<32x32xf32> to vector<8x32xf32>
    %547 = vector.extract_strided_slice %435 {offsets = [2, 0, 0], sizes = [1, 32, 32], strides = [1, 1, 1]} : vector<4x32x32xf32> to vector<1x32x32xf32>
    %548 = vector.shape_cast %547 : vector<1x32x32xf32> to vector<32x32xf32>
    %cst_172 = arith.constant dense<0.000000e+00> : vector<8x32xf32>
    %549 = tpu.matmul %518, %548, %cst_172 {dimension_numbers = #tpu.dot_dimension_numbers<[1], [0], [0], [1], [0, 0, 1, 1], [], []>} : vector<8x32xf32>, vector<32x32xf32>, vector<8x32xf32> -> vector<8x32xf32>
    %550 = arith.addf %546, %549 : vector<8x32xf32>
    %551 = math.tanh %550 : vector<8x32xf32>
    %552 = vector.extract_strided_slice %525 {offsets = [24, 0], sizes = [8, 32], strides = [1, 1]} : vector<32x32xf32> to vector<8x32xf32>
    %553 = vector.extract_strided_slice %435 {offsets = [3, 0, 0], sizes = [1, 32, 32], strides = [1, 1, 1]} : vector<4x32x32xf32> to vector<1x32x32xf32>
    %554 = vector.shape_cast %553 : vector<1x32x32xf32> to vector<32x32xf32>
    %cst_173 = arith.constant dense<0.000000e+00> : vector<8x32xf32>
    %555 = tpu.matmul %518, %554, %cst_173 {dimension_numbers = #tpu.dot_dimension_numbers<[1], [0], [0], [1], [0, 0, 1, 1], [], []>} : vector<8x32xf32>, vector<32x32xf32>, vector<8x32xf32> -> vector<8x32xf32>
    %556 = arith.addf %552, %555 : vector<8x32xf32>
    %557 = arith.negf %556 : vector<8x32xf32>
    %558 = math.exp %557 : vector<8x32xf32>
    %cst_174 = arith.constant 1.000000e+00 : f32
    %559 = vector.broadcast %cst_174 : f32 to vector<8x32xf32>
    %560 = arith.addf %559, %558 : vector<8x32xf32>
    %561 = arith.divf %559, %560 : vector<8x32xf32>
    %562 = arith.mulf %545, %516 : vector<8x32xf32>
    %563 = arith.mulf %535, %551 : vector<8x32xf32>
    %564 = arith.addf %562, %563 : vector<8x32xf32>
    %565 = math.tanh %564 : vector<8x32xf32>
    %566 = arith.mulf %561, %565 : vector<8x32xf32>
    %567 = arith.index_cast %c1_i32_165 : i32 to index
    %c0_175 = arith.constant 0 : index
    %c0_176 = arith.constant 0 : index
    %568 = vector.load %arg7[%567, %c0_175, %c0_176] : memref<8x8x32xf32, #tpu.memory_space<vmem>>, vector<1x8x32xf32>
    %569 = vector.shape_cast %568 : vector<1x8x32xf32> to vector<8x32xf32>
    %570 = vector.shape_cast %566 : vector<8x32xf32> to vector<1x8x32xf32>
    tpu.vector_store %arg7[%567, %c0_175, %c0_176], %570 {strides = array<i32>} : memref<8x8x32xf32, #tpu.memory_space<vmem>>, vector<1x8x32xf32>,
    %c2_i32_177 = arith.constant 2 : i32
    %571 = arith.index_cast %c2_i32_177 : i32 to index
    %c0_178 = arith.constant 0 : index
    %c0_179 = arith.constant 0 : index
    %572 = vector.load %arg8[%571, %c0_178, %c0_179] : memref<8x32x32xf32, #tpu.memory_space<vmem>>, vector<1x32x32xf32>
    %573 = vector.shape_cast %572 : vector<1x32x32xf32> to vector<32x32xf32>
    %574 = vector.extract_strided_slice %573 {offsets = [0, 0], sizes = [8, 32], strides = [1, 1]} : vector<32x32xf32> to vector<8x32xf32>
    %575 = vector.extract_strided_slice %435 {offsets = [0, 0, 0], sizes = [1, 32, 32], strides = [1, 1, 1]} : vector<4x32x32xf32> to vector<1x32x32xf32>
    %576 = vector.shape_cast %575 : vector<1x32x32xf32> to vector<32x32xf32>
    %cst_180 = arith.constant dense<0.000000e+00> : vector<8x32xf32>
    %577 = tpu.matmul %566, %576, %cst_180 {dimension_numbers = #tpu.dot_dimension_numbers<[1], [0], [0], [1], [0, 0, 1, 1], [], []>} : vector<8x32xf32>, vector<32x32xf32>, vector<8x32xf32> -> vector<8x32xf32>
    %578 = arith.addf %574, %577 : vector<8x32xf32>
    %579 = arith.negf %578 : vector<8x32xf32>
    %580 = math.exp %579 : vector<8x32xf32>
    %cst_181 = arith.constant 1.000000e+00 : f32
    %581 = vector.broadcast %cst_181 : f32 to vector<8x32xf32>
    %582 = arith.addf %581, %580 : vector<8x32xf32>
    %583 = arith.divf %581, %582 : vector<8x32xf32>
    %584 = vector.extract_strided_slice %573 {offsets = [8, 0], sizes = [8, 32], strides = [1, 1]} : vector<32x32xf32> to vector<8x32xf32>
    %585 = vector.extract_strided_slice %435 {offsets = [1, 0, 0], sizes = [1, 32, 32], strides = [1, 1, 1]} : vector<4x32x32xf32> to vector<1x32x32xf32>
    %586 = vector.shape_cast %585 : vector<1x32x32xf32> to vector<32x32xf32>
    %cst_182 = arith.constant dense<0.000000e+00> : vector<8x32xf32>
    %587 = tpu.matmul %566, %586, %cst_182 {dimension_numbers = #tpu.dot_dimension_numbers<[1], [0], [0], [1], [0, 0, 1, 1], [], []>} : vector<8x32xf32>, vector<32x32xf32>, vector<8x32xf32> -> vector<8x32xf32>
    %588 = arith.addf %584, %587 : vector<8x32xf32>
    %589 = arith.negf %588 : vector<8x32xf32>
    %590 = math.exp %589 : vector<8x32xf32>
    %cst_183 = arith.constant 1.000000e+00 : f32
    %591 = vector.broadcast %cst_183 : f32 to vector<8x32xf32>
    %592 = arith.addf %591, %590 : vector<8x32xf32>
    %593 = arith.divf %591, %592 : vector<8x32xf32>
    %594 = vector.extract_strided_slice %573 {offsets = [16, 0], sizes = [8, 32], strides = [1, 1]} : vector<32x32xf32> to vector<8x32xf32>
    %595 = vector.extract_strided_slice %435 {offsets = [2, 0, 0], sizes = [1, 32, 32], strides = [1, 1, 1]} : vector<4x32x32xf32> to vector<1x32x32xf32>
    %596 = vector.shape_cast %595 : vector<1x32x32xf32> to vector<32x32xf32>
    %cst_184 = arith.constant dense<0.000000e+00> : vector<8x32xf32>
    %597 = tpu.matmul %566, %596, %cst_184 {dimension_numbers = #tpu.dot_dimension_numbers<[1], [0], [0], [1], [0, 0, 1, 1], [], []>} : vector<8x32xf32>, vector<32x32xf32>, vector<8x32xf32> -> vector<8x32xf32>
    %598 = arith.addf %594, %597 : vector<8x32xf32>
    %599 = math.tanh %598 : vector<8x32xf32>
    %600 = vector.extract_strided_slice %573 {offsets = [24, 0], sizes = [8, 32], strides = [1, 1]} : vector<32x32xf32> to vector<8x32xf32>
    %601 = vector.extract_strided_slice %435 {offsets = [3, 0, 0], sizes = [1, 32, 32], strides = [1, 1, 1]} : vector<4x32x32xf32> to vector<1x32x32xf32>
    %602 = vector.shape_cast %601 : vector<1x32x32xf32> to vector<32x32xf32>
    %cst_185 = arith.constant dense<0.000000e+00> : vector<8x32xf32>
    %603 = tpu.matmul %566, %602, %cst_185 {dimension_numbers = #tpu.dot_dimension_numbers<[1], [0], [0], [1], [0, 0, 1, 1], [], []>} : vector<8x32xf32>, vector<32x32xf32>, vector<8x32xf32> -> vector<8x32xf32>
    %604 = arith.addf %600, %603 : vector<8x32xf32>
    %605 = arith.negf %604 : vector<8x32xf32>
    %606 = math.exp %605 : vector<8x32xf32>
    %cst_186 = arith.constant 1.000000e+00 : f32
    %607 = vector.broadcast %cst_186 : f32 to vector<8x32xf32>
    %608 = arith.addf %607, %606 : vector<8x32xf32>
    %609 = arith.divf %607, %608 : vector<8x32xf32>
    %610 = arith.mulf %593, %564 : vector<8x32xf32>
    %611 = arith.mulf %583, %599 : vector<8x32xf32>
    %612 = arith.addf %610, %611 : vector<8x32xf32>
    %613 = math.tanh %612 : vector<8x32xf32>
    %614 = arith.mulf %609, %613 : vector<8x32xf32>
    %615 = arith.index_cast %c2_i32_177 : i32 to index
    %c0_187 = arith.constant 0 : index
    %c0_188 = arith.constant 0 : index
    %616 = vector.load %arg7[%615, %c0_187, %c0_188] : memref<8x8x32xf32, #tpu.memory_space<vmem>>, vector<1x8x32xf32>
    %617 = vector.shape_cast %616 : vector<1x8x32xf32> to vector<8x32xf32>
    %618 = vector.shape_cast %614 : vector<8x32xf32> to vector<1x8x32xf32>
    tpu.vector_store %arg7[%615, %c0_187, %c0_188], %618 {strides = array<i32>} : memref<8x8x32xf32, #tpu.memory_space<vmem>>, vector<1x8x32xf32>,
    %c3_i32_189 = arith.constant 3 : i32
    %619 = arith.index_cast %c3_i32_189 : i32 to index
    %c0_190 = arith.constant 0 : index
    %c0_191 = arith.constant 0 : index
    %620 = vector.load %arg8[%619, %c0_190, %c0_191] : memref<8x32x32xf32, #tpu.memory_space<vmem>>, vector<1x32x32xf32>
    %621 = vector.shape_cast %620 : vector<1x32x32xf32> to vector<32x32xf32>
    %622 = vector.extract_strided_slice %621 {offsets = [0, 0], sizes = [8, 32], strides = [1, 1]} : vector<32x32xf32> to vector<8x32xf32>
    %623 = vector.extract_strided_slice %435 {offsets = [0, 0, 0], sizes = [1, 32, 32], strides = [1, 1, 1]} : vector<4x32x32xf32> to vector<1x32x32xf32>
    %624 = vector.shape_cast %623 : vector<1x32x32xf32> to vector<32x32xf32>
    %cst_192 = arith.constant dense<0.000000e+00> : vector<8x32xf32>
    %625 = tpu.matmul %614, %624, %cst_192 {dimension_numbers = #tpu.dot_dimension_numbers<[1], [0], [0], [1], [0, 0, 1, 1], [], []>} : vector<8x32xf32>, vector<32x32xf32>, vector<8x32xf32> -> vector<8x32xf32>
    %626 = arith.addf %622, %625 : vector<8x32xf32>
    %627 = arith.negf %626 : vector<8x32xf32>
    %628 = math.exp %627 : vector<8x32xf32>
    %cst_193 = arith.constant 1.000000e+00 : f32
    %629 = vector.broadcast %cst_193 : f32 to vector<8x32xf32>
    %630 = arith.addf %629, %628 : vector<8x32xf32>
    %631 = arith.divf %629, %630 : vector<8x32xf32>
    %632 = vector.extract_strided_slice %621 {offsets = [8, 0], sizes = [8, 32], strides = [1, 1]} : vector<32x32xf32> to vector<8x32xf32>
    %633 = vector.extract_strided_slice %435 {offsets = [1, 0, 0], sizes = [1, 32, 32], strides = [1, 1, 1]} : vector<4x32x32xf32> to vector<1x32x32xf32>
    %634 = vector.shape_cast %633 : vector<1x32x32xf32> to vector<32x32xf32>
    %cst_194 = arith.constant dense<0.000000e+00> : vector<8x32xf32>
    %635 = tpu.matmul %614, %634, %cst_194 {dimension_numbers = #tpu.dot_dimension_numbers<[1], [0], [0], [1], [0, 0, 1, 1], [], []>} : vector<8x32xf32>, vector<32x32xf32>, vector<8x32xf32> -> vector<8x32xf32>
    %636 = arith.addf %632, %635 : vector<8x32xf32>
    %637 = arith.negf %636 : vector<8x32xf32>
    %638 = math.exp %637 : vector<8x32xf32>
    %cst_195 = arith.constant 1.000000e+00 : f32
    %639 = vector.broadcast %cst_195 : f32 to vector<8x32xf32>
    %640 = arith.addf %639, %638 : vector<8x32xf32>
    %641 = arith.divf %639, %640 : vector<8x32xf32>
    %642 = vector.extract_strided_slice %621 {offsets = [16, 0], sizes = [8, 32], strides = [1, 1]} : vector<32x32xf32> to vector<8x32xf32>
    %643 = vector.extract_strided_slice %435 {offsets = [2, 0, 0], sizes = [1, 32, 32], strides = [1, 1, 1]} : vector<4x32x32xf32> to vector<1x32x32xf32>
    %644 = vector.shape_cast %643 : vector<1x32x32xf32> to vector<32x32xf32>
    %cst_196 = arith.constant dense<0.000000e+00> : vector<8x32xf32>
    %645 = tpu.matmul %614, %644, %cst_196 {dimension_numbers = #tpu.dot_dimension_numbers<[1], [0], [0], [1], [0, 0, 1, 1], [], []>} : vector<8x32xf32>, vector<32x32xf32>, vector<8x32xf32> -> vector<8x32xf32>
    %646 = arith.addf %642, %645 : vector<8x32xf32>
    %647 = math.tanh %646 : vector<8x32xf32>
    %648 = vector.extract_strided_slice %621 {offsets = [24, 0], sizes = [8, 32], strides = [1, 1]} : vector<32x32xf32> to vector<8x32xf32>
    %649 = vector.extract_strided_slice %435 {offsets = [3, 0, 0], sizes = [1, 32, 32], strides = [1, 1, 1]} : vector<4x32x32xf32> to vector<1x32x32xf32>
    %650 = vector.shape_cast %649 : vector<1x32x32xf32> to vector<32x32xf32>
    %cst_197 = arith.constant dense<0.000000e+00> : vector<8x32xf32>
    %651 = tpu.matmul %614, %650, %cst_197 {dimension_numbers = #tpu.dot_dimension_numbers<[1], [0], [0], [1], [0, 0, 1, 1], [], []>} : vector<8x32xf32>, vector<32x32xf32>, vector<8x32xf32> -> vector<8x32xf32>
    %652 = arith.addf %648, %651 : vector<8x32xf32>
    %653 = arith.negf %652 : vector<8x32xf32>
    %654 = math.exp %653 : vector<8x32xf32>
    %cst_198 = arith.constant 1.000000e+00 : f32
    %655 = vector.broadcast %cst_198 : f32 to vector<8x32xf32>
    %656 = arith.addf %655, %654 : vector<8x32xf32>
    %657 = arith.divf %655, %656 : vector<8x32xf32>
    %658 = arith.mulf %641, %612 : vector<8x32xf32>
    %659 = arith.mulf %631, %647 : vector<8x32xf32>
    %660 = arith.addf %658, %659 : vector<8x32xf32>
    %661 = math.tanh %660 : vector<8x32xf32>
    %662 = arith.mulf %657, %661 : vector<8x32xf32>
    %663 = arith.index_cast %c3_i32_189 : i32 to index
    %c0_199 = arith.constant 0 : index
    %c0_200 = arith.constant 0 : index
    %664 = vector.load %arg7[%663, %c0_199, %c0_200] : memref<8x8x32xf32, #tpu.memory_space<vmem>>, vector<1x8x32xf32>
    %665 = vector.shape_cast %664 : vector<1x8x32xf32> to vector<8x32xf32>
    %666 = vector.shape_cast %662 : vector<8x32xf32> to vector<1x8x32xf32>
    tpu.vector_store %arg7[%663, %c0_199, %c0_200], %666 {strides = array<i32>} : memref<8x8x32xf32, #tpu.memory_space<vmem>>, vector<1x8x32xf32>,
    %c4_i32_201 = arith.constant 4 : i32
    %667 = arith.index_cast %c4_i32_201 : i32 to index
    %c0_202 = arith.constant 0 : index
    %c0_203 = arith.constant 0 : index
    %668 = vector.load %arg8[%667, %c0_202, %c0_203] : memref<8x32x32xf32, #tpu.memory_space<vmem>>, vector<1x32x32xf32>
    %669 = vector.shape_cast %668 : vector<1x32x32xf32> to vector<32x32xf32>
    %670 = vector.extract_strided_slice %669 {offsets = [0, 0], sizes = [8, 32], strides = [1, 1]} : vector<32x32xf32> to vector<8x32xf32>
    %671 = vector.extract_strided_slice %435 {offsets = [0, 0, 0], sizes = [1, 32, 32], strides = [1, 1, 1]} : vector<4x32x32xf32> to vector<1x32x32xf32>
    %672 = vector.shape_cast %671 : vector<1x32x32xf32> to vector<32x32xf32>
    %cst_204 = arith.constant dense<0.000000e+00> : vector<8x32xf32>
    %673 = tpu.matmul %662, %672, %cst_204 {dimension_numbers = #tpu.dot_dimension_numbers<[1], [0], [0], [1], [0, 0, 1, 1], [], []>} : vector<8x32xf32>, vector<32x32xf32>, vector<8x32xf32> -> vector<8x32xf32>
    %674 = arith.addf %670, %673 : vector<8x32xf32>
    %675 = arith.negf %674 : vector<8x32xf32>
    %676 = math.exp %675 : vector<8x32xf32>
    %cst_205 = arith.constant 1.000000e+00 : f32
    %677 = vector.broadcast %cst_205 : f32 to vector<8x32xf32>
    %678 = arith.addf %677, %676 : vector<8x32xf32>
    %679 = arith.divf %677, %678 : vector<8x32xf32>
    %680 = vector.extract_strided_slice %669 {offsets = [8, 0], sizes = [8, 32], strides = [1, 1]} : vector<32x32xf32> to vector<8x32xf32>
    %681 = vector.extract_strided_slice %435 {offsets = [1, 0, 0], sizes = [1, 32, 32], strides = [1, 1, 1]} : vector<4x32x32xf32> to vector<1x32x32xf32>
    %682 = vector.shape_cast %681 : vector<1x32x32xf32> to vector<32x32xf32>
    %cst_206 = arith.constant dense<0.000000e+00> : vector<8x32xf32>
    %683 = tpu.matmul %662, %682, %cst_206 {dimension_numbers = #tpu.dot_dimension_numbers<[1], [0], [0], [1], [0, 0, 1, 1], [], []>} : vector<8x32xf32>, vector<32x32xf32>, vector<8x32xf32> -> vector<8x32xf32>
    %684 = arith.addf %680, %683 : vector<8x32xf32>
    %685 = arith.negf %684 : vector<8x32xf32>
    %686 = math.exp %685 : vector<8x32xf32>
    %cst_207 = arith.constant 1.000000e+00 : f32
    %687 = vector.broadcast %cst_207 : f32 to vector<8x32xf32>
    %688 = arith.addf %687, %686 : vector<8x32xf32>
    %689 = arith.divf %687, %688 : vector<8x32xf32>
    %690 = vector.extract_strided_slice %669 {offsets = [16, 0], sizes = [8, 32], strides = [1, 1]} : vector<32x32xf32> to vector<8x32xf32>
    %691 = vector.extract_strided_slice %435 {offsets = [2, 0, 0], sizes = [1, 32, 32], strides = [1, 1, 1]} : vector<4x32x32xf32> to vector<1x32x32xf32>
    %692 = vector.shape_cast %691 : vector<1x32x32xf32> to vector<32x32xf32>
    %cst_208 = arith.constant dense<0.000000e+00> : vector<8x32xf32>
    %693 = tpu.matmul %662, %692, %cst_208 {dimension_numbers = #tpu.dot_dimension_numbers<[1], [0], [0], [1], [0, 0, 1, 1], [], []>} : vector<8x32xf32>, vector<32x32xf32>, vector<8x32xf32> -> vector<8x32xf32>
    %694 = arith.addf %690, %693 : vector<8x32xf32>
    %695 = math.tanh %694 : vector<8x32xf32>
    %696 = vector.extract_strided_slice %669 {offsets = [24, 0], sizes = [8, 32], strides = [1, 1]} : vector<32x32xf32> to vector<8x32xf32>
    %697 = vector.extract_strided_slice %435 {offsets = [3, 0, 0], sizes = [1, 32, 32], strides = [1, 1, 1]} : vector<4x32x32xf32> to vector<1x32x32xf32>
    %698 = vector.shape_cast %697 : vector<1x32x32xf32> to vector<32x32xf32>
    %cst_209 = arith.constant dense<0.000000e+00> : vector<8x32xf32>
    %699 = tpu.matmul %662, %698, %cst_209 {dimension_numbers = #tpu.dot_dimension_numbers<[1], [0], [0], [1], [0, 0, 1, 1], [], []>} : vector<8x32xf32>, vector<32x32xf32>, vector<8x32xf32> -> vector<8x32xf32>
    %700 = arith.addf %696, %699 : vector<8x32xf32>
    %701 = arith.negf %700 : vector<8x32xf32>
    %702 = math.exp %701 : vector<8x32xf32>
    %cst_210 = arith.constant 1.000000e+00 : f32
    %703 = vector.broadcast %cst_210 : f32 to vector<8x32xf32>
    %704 = arith.addf %703, %702 : vector<8x32xf32>
    %705 = arith.divf %703, %704 : vector<8x32xf32>
    %706 = arith.mulf %689, %660 : vector<8x32xf32>
    %707 = arith.mulf %679, %695 : vector<8x32xf32>
    %708 = arith.addf %706, %707 : vector<8x32xf32>
    %709 = math.tanh %708 : vector<8x32xf32>
    %710 = arith.mulf %705, %709 : vector<8x32xf32>
    %711 = arith.index_cast %c4_i32_201 : i32 to index
    %c0_211 = arith.constant 0 : index
    %c0_212 = arith.constant 0 : index
    %712 = vector.load %arg7[%711, %c0_211, %c0_212] : memref<8x8x32xf32, #tpu.memory_space<vmem>>, vector<1x8x32xf32>
    %713 = vector.shape_cast %712 : vector<1x8x32xf32> to vector<8x32xf32>
    %714 = vector.shape_cast %710 : vector<8x32xf32> to vector<1x8x32xf32>
    tpu.vector_store %arg7[%711, %c0_211, %c0_212], %714 {strides = array<i32>} : memref<8x8x32xf32, #tpu.memory_space<vmem>>, vector<1x8x32xf32>,
    %c5_i32_213 = arith.constant 5 : i32
    %715 = arith.index_cast %c5_i32_213 : i32 to index
    %c0_214 = arith.constant 0 : index
    %c0_215 = arith.constant 0 : index
    %716 = vector.load %arg8[%715, %c0_214, %c0_215] : memref<8x32x32xf32, #tpu.memory_space<vmem>>, vector<1x32x32xf32>
    %717 = vector.shape_cast %716 : vector<1x32x32xf32> to vector<32x32xf32>
    %718 = vector.extract_strided_slice %717 {offsets = [0, 0], sizes = [8, 32], strides = [1, 1]} : vector<32x32xf32> to vector<8x32xf32>
    %719 = vector.extract_strided_slice %435 {offsets = [0, 0, 0], sizes = [1, 32, 32], strides = [1, 1, 1]} : vector<4x32x32xf32> to vector<1x32x32xf32>
    %720 = vector.shape_cast %719 : vector<1x32x32xf32> to vector<32x32xf32>
    %cst_216 = arith.constant dense<0.000000e+00> : vector<8x32xf32>
    %721 = tpu.matmul %710, %720, %cst_216 {dimension_numbers = #tpu.dot_dimension_numbers<[1], [0], [0], [1], [0, 0, 1, 1], [], []>} : vector<8x32xf32>, vector<32x32xf32>, vector<8x32xf32> -> vector<8x32xf32>
    %722 = arith.addf %718, %721 : vector<8x32xf32>
    %723 = arith.negf %722 : vector<8x32xf32>
    %724 = math.exp %723 : vector<8x32xf32>
    %cst_217 = arith.constant 1.000000e+00 : f32
    %725 = vector.broadcast %cst_217 : f32 to vector<8x32xf32>
    %726 = arith.addf %725, %724 : vector<8x32xf32>
    %727 = arith.divf %725, %726 : vector<8x32xf32>
    %728 = vector.extract_strided_slice %717 {offsets = [8, 0], sizes = [8, 32], strides = [1, 1]} : vector<32x32xf32> to vector<8x32xf32>
    %729 = vector.extract_strided_slice %435 {offsets = [1, 0, 0], sizes = [1, 32, 32], strides = [1, 1, 1]} : vector<4x32x32xf32> to vector<1x32x32xf32>
    %730 = vector.shape_cast %729 : vector<1x32x32xf32> to vector<32x32xf32>
    %cst_218 = arith.constant dense<0.000000e+00> : vector<8x32xf32>
    %731 = tpu.matmul %710, %730, %cst_218 {dimension_numbers = #tpu.dot_dimension_numbers<[1], [0], [0], [1], [0, 0, 1, 1], [], []>} : vector<8x32xf32>, vector<32x32xf32>, vector<8x32xf32> -> vector<8x32xf32>
    %732 = arith.addf %728, %731 : vector<8x32xf32>
    %733 = arith.negf %732 : vector<8x32xf32>
    %734 = math.exp %733 : vector<8x32xf32>
    %cst_219 = arith.constant 1.000000e+00 : f32
    %735 = vector.broadcast %cst_219 : f32 to vector<8x32xf32>
    %736 = arith.addf %735, %734 : vector<8x32xf32>
    %737 = arith.divf %735, %736 : vector<8x32xf32>
    %738 = vector.extract_strided_slice %717 {offsets = [16, 0], sizes = [8, 32], strides = [1, 1]} : vector<32x32xf32> to vector<8x32xf32>
    %739 = vector.extract_strided_slice %435 {offsets = [2, 0, 0], sizes = [1, 32, 32], strides = [1, 1, 1]} : vector<4x32x32xf32> to vector<1x32x32xf32>
    %740 = vector.shape_cast %739 : vector<1x32x32xf32> to vector<32x32xf32>
    %cst_220 = arith.constant dense<0.000000e+00> : vector<8x32xf32>
    %741 = tpu.matmul %710, %740, %cst_220 {dimension_numbers = #tpu.dot_dimension_numbers<[1], [0], [0], [1], [0, 0, 1, 1], [], []>} : vector<8x32xf32>, vector<32x32xf32>, vector<8x32xf32> -> vector<8x32xf32>
    %742 = arith.addf %738, %741 : vector<8x32xf32>
    %743 = math.tanh %742 : vector<8x32xf32>
    %744 = vector.extract_strided_slice %717 {offsets = [24, 0], sizes = [8, 32], strides = [1, 1]} : vector<32x32xf32> to vector<8x32xf32>
    %745 = vector.extract_strided_slice %435 {offsets = [3, 0, 0], sizes = [1, 32, 32], strides = [1, 1, 1]} : vector<4x32x32xf32> to vector<1x32x32xf32>
    %746 = vector.shape_cast %745 : vector<1x32x32xf32> to vector<32x32xf32>
    %cst_221 = arith.constant dense<0.000000e+00> : vector<8x32xf32>
    %747 = tpu.matmul %710, %746, %cst_221 {dimension_numbers = #tpu.dot_dimension_numbers<[1], [0], [0], [1], [0, 0, 1, 1], [], []>} : vector<8x32xf32>, vector<32x32xf32>, vector<8x32xf32> -> vector<8x32xf32>
    %748 = arith.addf %744, %747 : vector<8x32xf32>
    %749 = arith.negf %748 : vector<8x32xf32>
    %750 = math.exp %749 : vector<8x32xf32>
    %cst_222 = arith.constant 1.000000e+00 : f32
    %751 = vector.broadcast %cst_222 : f32 to vector<8x32xf32>
    %752 = arith.addf %751, %750 : vector<8x32xf32>
    %753 = arith.divf %751, %752 : vector<8x32xf32>
    %754 = arith.mulf %737, %708 : vector<8x32xf32>
    %755 = arith.mulf %727, %743 : vector<8x32xf32>
    %756 = arith.addf %754, %755 : vector<8x32xf32>
    %757 = math.tanh %756 : vector<8x32xf32>
    %758 = arith.mulf %753, %757 : vector<8x32xf32>
    %759 = arith.index_cast %c5_i32_213 : i32 to index
    %c0_223 = arith.constant 0 : index
    %c0_224 = arith.constant 0 : index
    %760 = vector.load %arg7[%759, %c0_223, %c0_224] : memref<8x8x32xf32, #tpu.memory_space<vmem>>, vector<1x8x32xf32>
    %761 = vector.shape_cast %760 : vector<1x8x32xf32> to vector<8x32xf32>
    %762 = vector.shape_cast %758 : vector<8x32xf32> to vector<1x8x32xf32>
    tpu.vector_store %arg7[%759, %c0_223, %c0_224], %762 {strides = array<i32>} : memref<8x8x32xf32, #tpu.memory_space<vmem>>, vector<1x8x32xf32>,
    %c6_i32_225 = arith.constant 6 : i32
    %763 = arith.index_cast %c6_i32_225 : i32 to index
    %c0_226 = arith.constant 0 : index
    %c0_227 = arith.constant 0 : index
    %764 = vector.load %arg8[%763, %c0_226, %c0_227] : memref<8x32x32xf32, #tpu.memory_space<vmem>>, vector<1x32x32xf32>
    %765 = vector.shape_cast %764 : vector<1x32x32xf32> to vector<32x32xf32>
    %766 = vector.extract_strided_slice %765 {offsets = [0, 0], sizes = [8, 32], strides = [1, 1]} : vector<32x32xf32> to vector<8x32xf32>
    %767 = vector.extract_strided_slice %435 {offsets = [0, 0, 0], sizes = [1, 32, 32], strides = [1, 1, 1]} : vector<4x32x32xf32> to vector<1x32x32xf32>
    %768 = vector.shape_cast %767 : vector<1x32x32xf32> to vector<32x32xf32>
    %cst_228 = arith.constant dense<0.000000e+00> : vector<8x32xf32>
    %769 = tpu.matmul %758, %768, %cst_228 {dimension_numbers = #tpu.dot_dimension_numbers<[1], [0], [0], [1], [0, 0, 1, 1], [], []>} : vector<8x32xf32>, vector<32x32xf32>, vector<8x32xf32> -> vector<8x32xf32>
    %770 = arith.addf %766, %769 : vector<8x32xf32>
    %771 = arith.negf %770 : vector<8x32xf32>
    %772 = math.exp %771 : vector<8x32xf32>
    %cst_229 = arith.constant 1.000000e+00 : f32
    %773 = vector.broadcast %cst_229 : f32 to vector<8x32xf32>
    %774 = arith.addf %773, %772 : vector<8x32xf32>
    %775 = arith.divf %773, %774 : vector<8x32xf32>
    %776 = vector.extract_strided_slice %765 {offsets = [8, 0], sizes = [8, 32], strides = [1, 1]} : vector<32x32xf32> to vector<8x32xf32>
    %777 = vector.extract_strided_slice %435 {offsets = [1, 0, 0], sizes = [1, 32, 32], strides = [1, 1, 1]} : vector<4x32x32xf32> to vector<1x32x32xf32>
    %778 = vector.shape_cast %777 : vector<1x32x32xf32> to vector<32x32xf32>
    %cst_230 = arith.constant dense<0.000000e+00> : vector<8x32xf32>
    %779 = tpu.matmul %758, %778, %cst_230 {dimension_numbers = #tpu.dot_dimension_numbers<[1], [0], [0], [1], [0, 0, 1, 1], [], []>} : vector<8x32xf32>, vector<32x32xf32>, vector<8x32xf32> -> vector<8x32xf32>
    %780 = arith.addf %776, %779 : vector<8x32xf32>
    %781 = arith.negf %780 : vector<8x32xf32>
    %782 = math.exp %781 : vector<8x32xf32>
    %cst_231 = arith.constant 1.000000e+00 : f32
    %783 = vector.broadcast %cst_231 : f32 to vector<8x32xf32>
    %784 = arith.addf %783, %782 : vector<8x32xf32>
    %785 = arith.divf %783, %784 : vector<8x32xf32>
    %786 = vector.extract_strided_slice %765 {offsets = [16, 0], sizes = [8, 32], strides = [1, 1]} : vector<32x32xf32> to vector<8x32xf32>
    %787 = vector.extract_strided_slice %435 {offsets = [2, 0, 0], sizes = [1, 32, 32], strides = [1, 1, 1]} : vector<4x32x32xf32> to vector<1x32x32xf32>
    %788 = vector.shape_cast %787 : vector<1x32x32xf32> to vector<32x32xf32>
    %cst_232 = arith.constant dense<0.000000e+00> : vector<8x32xf32>
    %789 = tpu.matmul %758, %788, %cst_232 {dimension_numbers = #tpu.dot_dimension_numbers<[1], [0], [0], [1], [0, 0, 1, 1], [], []>} : vector<8x32xf32>, vector<32x32xf32>, vector<8x32xf32> -> vector<8x32xf32>
    %790 = arith.addf %786, %789 : vector<8x32xf32>
    %791 = math.tanh %790 : vector<8x32xf32>
    %792 = vector.extract_strided_slice %765 {offsets = [24, 0], sizes = [8, 32], strides = [1, 1]} : vector<32x32xf32> to vector<8x32xf32>
    %793 = vector.extract_strided_slice %435 {offsets = [3, 0, 0], sizes = [1, 32, 32], strides = [1, 1, 1]} : vector<4x32x32xf32> to vector<1x32x32xf32>
    %794 = vector.shape_cast %793 : vector<1x32x32xf32> to vector<32x32xf32>
    %cst_233 = arith.constant dense<0.000000e+00> : vector<8x32xf32>
    %795 = tpu.matmul %758, %794, %cst_233 {dimension_numbers = #tpu.dot_dimension_numbers<[1], [0], [0], [1], [0, 0, 1, 1], [], []>} : vector<8x32xf32>, vector<32x32xf32>, vector<8x32xf32> -> vector<8x32xf32>
    %796 = arith.addf %792, %795 : vector<8x32xf32>
    %797 = arith.negf %796 : vector<8x32xf32>
    %798 = math.exp %797 : vector<8x32xf32>
    %cst_234 = arith.constant 1.000000e+00 : f32
    %799 = vector.broadcast %cst_234 : f32 to vector<8x32xf32>
    %800 = arith.addf %799, %798 : vector<8x32xf32>
    %801 = arith.divf %799, %800 : vector<8x32xf32>
    %802 = arith.mulf %785, %756 : vector<8x32xf32>
    %803 = arith.mulf %775, %791 : vector<8x32xf32>
    %804 = arith.addf %802, %803 : vector<8x32xf32>
    %805 = math.tanh %804 : vector<8x32xf32>
    %806 = arith.mulf %801, %805 : vector<8x32xf32>
    %807 = arith.index_cast %c6_i32_225 : i32 to index
    %c0_235 = arith.constant 0 : index
    %c0_236 = arith.constant 0 : index
    %808 = vector.load %arg7[%807, %c0_235, %c0_236] : memref<8x8x32xf32, #tpu.memory_space<vmem>>, vector<1x8x32xf32>
    %809 = vector.shape_cast %808 : vector<1x8x32xf32> to vector<8x32xf32>
    %810 = vector.shape_cast %806 : vector<8x32xf32> to vector<1x8x32xf32>
    tpu.vector_store %arg7[%807, %c0_235, %c0_236], %810 {strides = array<i32>} : memref<8x8x32xf32, #tpu.memory_space<vmem>>, vector<1x8x32xf32>,
    %c7_i32_237 = arith.constant 7 : i32
    %811 = arith.index_cast %c7_i32_237 : i32 to index
    %c0_238 = arith.constant 0 : index
    %c0_239 = arith.constant 0 : index
    %812 = vector.load %arg8[%811, %c0_238, %c0_239] : memref<8x32x32xf32, #tpu.memory_space<vmem>>, vector<1x32x32xf32>
    %813 = vector.shape_cast %812 : vector<1x32x32xf32> to vector<32x32xf32>
    %814 = vector.extract_strided_slice %813 {offsets = [0, 0], sizes = [8, 32], strides = [1, 1]} : vector<32x32xf32> to vector<8x32xf32>
    %815 = vector.extract_strided_slice %435 {offsets = [0, 0, 0], sizes = [1, 32, 32], strides = [1, 1, 1]} : vector<4x32x32xf32> to vector<1x32x32xf32>
    %816 = vector.shape_cast %815 : vector<1x32x32xf32> to vector<32x32xf32>
    %cst_240 = arith.constant dense<0.000000e+00> : vector<8x32xf32>
    %817 = tpu.matmul %806, %816, %cst_240 {dimension_numbers = #tpu.dot_dimension_numbers<[1], [0], [0], [1], [0, 0, 1, 1], [], []>} : vector<8x32xf32>, vector<32x32xf32>, vector<8x32xf32> -> vector<8x32xf32>
    %818 = arith.addf %814, %817 : vector<8x32xf32>
    %819 = arith.negf %818 : vector<8x32xf32>
    %820 = math.exp %819 : vector<8x32xf32>
    %cst_241 = arith.constant 1.000000e+00 : f32
    %821 = vector.broadcast %cst_241 : f32 to vector<8x32xf32>
    %822 = arith.addf %821, %820 : vector<8x32xf32>
    %823 = arith.divf %821, %822 : vector<8x32xf32>
    %824 = vector.extract_strided_slice %813 {offsets = [8, 0], sizes = [8, 32], strides = [1, 1]} : vector<32x32xf32> to vector<8x32xf32>
    %825 = vector.extract_strided_slice %435 {offsets = [1, 0, 0], sizes = [1, 32, 32], strides = [1, 1, 1]} : vector<4x32x32xf32> to vector<1x32x32xf32>
    %826 = vector.shape_cast %825 : vector<1x32x32xf32> to vector<32x32xf32>
    %cst_242 = arith.constant dense<0.000000e+00> : vector<8x32xf32>
    %827 = tpu.matmul %806, %826, %cst_242 {dimension_numbers = #tpu.dot_dimension_numbers<[1], [0], [0], [1], [0, 0, 1, 1], [], []>} : vector<8x32xf32>, vector<32x32xf32>, vector<8x32xf32> -> vector<8x32xf32>
    %828 = arith.addf %824, %827 : vector<8x32xf32>
    %829 = arith.negf %828 : vector<8x32xf32>
    %830 = math.exp %829 : vector<8x32xf32>
    %cst_243 = arith.constant 1.000000e+00 : f32
    %831 = vector.broadcast %cst_243 : f32 to vector<8x32xf32>
    %832 = arith.addf %831, %830 : vector<8x32xf32>
    %833 = arith.divf %831, %832 : vector<8x32xf32>
    %834 = vector.extract_strided_slice %813 {offsets = [16, 0], sizes = [8, 32], strides = [1, 1]} : vector<32x32xf32> to vector<8x32xf32>
    %835 = vector.extract_strided_slice %435 {offsets = [2, 0, 0], sizes = [1, 32, 32], strides = [1, 1, 1]} : vector<4x32x32xf32> to vector<1x32x32xf32>
    %836 = vector.shape_cast %835 : vector<1x32x32xf32> to vector<32x32xf32>
    %cst_244 = arith.constant dense<0.000000e+00> : vector<8x32xf32>
    %837 = tpu.matmul %806, %836, %cst_244 {dimension_numbers = #tpu.dot_dimension_numbers<[1], [0], [0], [1], [0, 0, 1, 1], [], []>} : vector<8x32xf32>, vector<32x32xf32>, vector<8x32xf32> -> vector<8x32xf32>
    %838 = arith.addf %834, %837 : vector<8x32xf32>
    %839 = math.tanh %838 : vector<8x32xf32>
    %840 = vector.extract_strided_slice %813 {offsets = [24, 0], sizes = [8, 32], strides = [1, 1]} : vector<32x32xf32> to vector<8x32xf32>
    %841 = vector.extract_strided_slice %435 {offsets = [3, 0, 0], sizes = [1, 32, 32], strides = [1, 1, 1]} : vector<4x32x32xf32> to vector<1x32x32xf32>
    %842 = vector.shape_cast %841 : vector<1x32x32xf32> to vector<32x32xf32>
    %cst_245 = arith.constant dense<0.000000e+00> : vector<8x32xf32>
    %843 = tpu.matmul %806, %842, %cst_245 {dimension_numbers = #tpu.dot_dimension_numbers<[1], [0], [0], [1], [0, 0, 1, 1], [], []>} : vector<8x32xf32>, vector<32x32xf32>, vector<8x32xf32> -> vector<8x32xf32>
    %844 = arith.addf %840, %843 : vector<8x32xf32>
    %845 = arith.negf %844 : vector<8x32xf32>
    %846 = math.exp %845 : vector<8x32xf32>
    %cst_246 = arith.constant 1.000000e+00 : f32
    %847 = vector.broadcast %cst_246 : f32 to vector<8x32xf32>
    %848 = arith.addf %847, %846 : vector<8x32xf32>
    %849 = arith.divf %847, %848 : vector<8x32xf32>
    %850 = arith.mulf %833, %804 : vector<8x32xf32>
    %851 = arith.mulf %823, %839 : vector<8x32xf32>
    %852 = arith.addf %850, %851 : vector<8x32xf32>
    %853 = math.tanh %852 : vector<8x32xf32>
    %854 = arith.mulf %849, %853 : vector<8x32xf32>
    %855 = arith.index_cast %c7_i32_237 : i32 to index
    %c0_247 = arith.constant 0 : index
    %c0_248 = arith.constant 0 : index
    %856 = vector.load %arg7[%855, %c0_247, %c0_248] : memref<8x8x32xf32, #tpu.memory_space<vmem>>, vector<1x8x32xf32>
    %857 = vector.shape_cast %856 : vector<1x8x32xf32> to vector<8x32xf32>
    %858 = vector.shape_cast %854 : vector<8x32xf32> to vector<1x8x32xf32>
    tpu.vector_store %arg7[%855, %c0_247, %c0_248], %858 {strides = array<i32>} : memref<8x8x32xf32, #tpu.memory_space<vmem>>, vector<1x8x32xf32>,
    %c8_i32_249 = arith.constant 8 : i32
    %c0_250 = arith.constant 0 : index
    %c0_251 = arith.constant 0 : index
    %c0_252 = arith.constant 0 : index
    %859 = vector.load %arg7[%c0_250, %c0_251, %c0_252] : memref<8x8x32xf32, #tpu.memory_space<vmem>>, vector<8x8x32xf32>
    %860 = vector.shape_cast %859 : vector<8x8x32xf32> to vector<64x32xf32>
    %c0_253 = arith.constant 0 : index
    %c2 = arith.constant 2 : index
    %c0_254 = arith.constant 0 : index
    %c0_255 = arith.constant 0 : index
    %c0_256 = arith.constant 0 : index
    %861 = vector.load %arg2[%c0_253, %c2, %c0_254, %c0_255, %c0_256] : memref<1x3x4x32x32xf32, #tpu.memory_space<vmem>>, vector<1x1x4x32x32xf32>
    %862 = vector.shape_cast %861 : vector<1x1x4x32x32xf32> to vector<4x32x32xf32>
    %c0_257 = arith.constant 0 : index
    %c2_258 = arith.constant 2 : index
    %c0_259 = arith.constant 0 : index
    %c0_260 = arith.constant 0 : index
    %c0_261 = arith.constant 0 : index
    %863 = vector.load %arg3[%c0_257, %c2_258, %c0_259, %c0_260, %c0_261] : memref<1x3x4x32x32xf32, #tpu.memory_space<vmem>>, vector<1x1x4x32x32xf32>
    %864 = vector.shape_cast %863 : vector<1x1x4x32x32xf32> to vector<4x32x32xf32>
    %c0_262 = arith.constant 0 : index
    %c2_263 = arith.constant 2 : index
    %c0_264 = arith.constant 0 : index
    %c0_265 = arith.constant 0 : index
    %c0_266 = arith.constant 0 : index
    %865 = vector.load %arg4[%c0_262, %c2_263, %c0_264, %c0_265, %c0_266] : memref<1x3x4x1x32xf32, #tpu.memory_space<vmem>>, vector<1x1x4x1x32xf32>
    %866 = vector.shape_cast %865 : vector<1x1x4x1x32xf32> to vector<4x1x32xf32>
    %867 = vector.extract_strided_slice %862 {offsets = [0, 0, 0], sizes = [1, 32, 32], strides = [1, 1, 1]} : vector<4x32x32xf32> to vector<1x32x32xf32>
    %868 = vector.shape_cast %867 : vector<1x32x32xf32> to vector<32x32xf32>
    %cst_267 = arith.constant dense<0.000000e+00> : vector<64x32xf32>
    %869 = tpu.matmul %860, %868, %cst_267 {dimension_numbers = #tpu.dot_dimension_numbers<[1], [0], [0], [1], [0, 0, 1, 1], [], []>} : vector<64x32xf32>, vector<32x32xf32>, vector<64x32xf32> -> vector<64x32xf32>
    %870 = vector.extract_strided_slice %866 {offsets = [0, 0, 0], sizes = [1, 1, 32], strides = [1, 1, 1]} : vector<4x1x32xf32> to vector<1x1x32xf32>
    %871 = vector.shape_cast %870 : vector<1x1x32xf32> to vector<1x32xf32>
    %872 = vector.broadcast %871 : vector<1x32xf32> to vector<64x32xf32>
    %873 = arith.addf %869, %872 : vector<64x32xf32>
    %874 = vector.shape_cast %873 : vector<64x32xf32> to vector<8x8x32xf32>
    %c0_268 = arith.constant 0 : index
    %c0_269 = arith.constant 0 : index
    %c0_270 = arith.constant 0 : index
    %875 = vector.load %arg8[%c0_268, %c0_269, %c0_270] : memref<8x32x32xf32, #tpu.memory_space<vmem>>, vector<8x8x32xf32>
    tpu.vector_store %arg8[%c0_268, %c0_269, %c0_270], %874 {strides = array<i32>} : memref<8x32x32xf32, #tpu.memory_space<vmem>>, vector<8x8x32xf32>,
    %876 = vector.extract_strided_slice %862 {offsets = [1, 0, 0], sizes = [1, 32, 32], strides = [1, 1, 1]} : vector<4x32x32xf32> to vector<1x32x32xf32>
    %877 = vector.shape_cast %876 : vector<1x32x32xf32> to vector<32x32xf32>
    %cst_271 = arith.constant dense<0.000000e+00> : vector<64x32xf32>
    %878 = tpu.matmul %860, %877, %cst_271 {dimension_numbers = #tpu.dot_dimension_numbers<[1], [0], [0], [1], [0, 0, 1, 1], [], []>} : vector<64x32xf32>, vector<32x32xf32>, vector<64x32xf32> -> vector<64x32xf32>
    %879 = vector.extract_strided_slice %866 {offsets = [1, 0, 0], sizes = [1, 1, 32], strides = [1, 1, 1]} : vector<4x1x32xf32> to vector<1x1x32xf32>
    %880 = vector.shape_cast %879 : vector<1x1x32xf32> to vector<1x32xf32>
    %881 = vector.broadcast %880 : vector<1x32xf32> to vector<64x32xf32>
    %882 = arith.addf %878, %881 : vector<64x32xf32>
    %883 = vector.shape_cast %882 : vector<64x32xf32> to vector<8x8x32xf32>
    %c0_272 = arith.constant 0 : index
    %c8_273 = arith.constant 8 : index
    %c0_274 = arith.constant 0 : index
    %884 = vector.load %arg8[%c0_272, %c8_273, %c0_274] : memref<8x32x32xf32, #tpu.memory_space<vmem>>, vector<8x8x32xf32>
    tpu.vector_store %arg8[%c0_272, %c8_273, %c0_274], %883 {strides = array<i32>} : memref<8x32x32xf32, #tpu.memory_space<vmem>>, vector<8x8x32xf32>,
    %885 = vector.extract_strided_slice %862 {offsets = [2, 0, 0], sizes = [1, 32, 32], strides = [1, 1, 1]} : vector<4x32x32xf32> to vector<1x32x32xf32>
    %886 = vector.shape_cast %885 : vector<1x32x32xf32> to vector<32x32xf32>
    %cst_275 = arith.constant dense<0.000000e+00> : vector<64x32xf32>
    %887 = tpu.matmul %860, %886, %cst_275 {dimension_numbers = #tpu.dot_dimension_numbers<[1], [0], [0], [1], [0, 0, 1, 1], [], []>} : vector<64x32xf32>, vector<32x32xf32>, vector<64x32xf32> -> vector<64x32xf32>
    %888 = vector.extract_strided_slice %866 {offsets = [2, 0, 0], sizes = [1, 1, 32], strides = [1, 1, 1]} : vector<4x1x32xf32> to vector<1x1x32xf32>
    %889 = vector.shape_cast %888 : vector<1x1x32xf32> to vector<1x32xf32>
    %890 = vector.broadcast %889 : vector<1x32xf32> to vector<64x32xf32>
    %891 = arith.addf %887, %890 : vector<64x32xf32>
    %892 = vector.shape_cast %891 : vector<64x32xf32> to vector<8x8x32xf32>
    %c0_276 = arith.constant 0 : index
    %c16_277 = arith.constant 16 : index
    %c0_278 = arith.constant 0 : index
    %893 = vector.load %arg8[%c0_276, %c16_277, %c0_278] : memref<8x32x32xf32, #tpu.memory_space<vmem>>, vector<8x8x32xf32>
    tpu.vector_store %arg8[%c0_276, %c16_277, %c0_278], %892 {strides = array<i32>} : memref<8x32x32xf32, #tpu.memory_space<vmem>>, vector<8x8x32xf32>,
    %894 = vector.extract_strided_slice %862 {offsets = [3, 0, 0], sizes = [1, 32, 32], strides = [1, 1, 1]} : vector<4x32x32xf32> to vector<1x32x32xf32>
    %895 = vector.shape_cast %894 : vector<1x32x32xf32> to vector<32x32xf32>
    %cst_279 = arith.constant dense<0.000000e+00> : vector<64x32xf32>
    %896 = tpu.matmul %860, %895, %cst_279 {dimension_numbers = #tpu.dot_dimension_numbers<[1], [0], [0], [1], [0, 0, 1, 1], [], []>} : vector<64x32xf32>, vector<32x32xf32>, vector<64x32xf32> -> vector<64x32xf32>
    %897 = vector.extract_strided_slice %866 {offsets = [3, 0, 0], sizes = [1, 1, 32], strides = [1, 1, 1]} : vector<4x1x32xf32> to vector<1x1x32xf32>
    %898 = vector.shape_cast %897 : vector<1x1x32xf32> to vector<1x32xf32>
    %899 = vector.broadcast %898 : vector<1x32xf32> to vector<64x32xf32>
    %900 = arith.addf %896, %899 : vector<64x32xf32>
    %901 = vector.shape_cast %900 : vector<64x32xf32> to vector<8x8x32xf32>
    %c0_280 = arith.constant 0 : index
    %c24_281 = arith.constant 24 : index
    %c0_282 = arith.constant 0 : index
    %902 = vector.load %arg8[%c0_280, %c24_281, %c0_282] : memref<8x32x32xf32, #tpu.memory_space<vmem>>, vector<8x8x32xf32>
    tpu.vector_store %arg8[%c0_280, %c24_281, %c0_282], %901 {strides = array<i32>} : memref<8x32x32xf32, #tpu.memory_space<vmem>>, vector<8x8x32xf32>,
    %cst_283 = arith.constant 0.000000e+00 : f32
    %903 = vector.broadcast %cst_283 : f32 to vector<8x32xf32>
    %c0_i32_284 = arith.constant 0 : i32
    %904 = arith.index_cast %c0_i32_284 : i32 to index
    %c0_285 = arith.constant 0 : index
    %c0_286 = arith.constant 0 : index
    %905 = vector.load %arg8[%904, %c0_285, %c0_286] : memref<8x32x32xf32, #tpu.memory_space<vmem>>, vector<1x32x32xf32>
    %906 = vector.shape_cast %905 : vector<1x32x32xf32> to vector<32x32xf32>
    %907 = vector.extract_strided_slice %906 {offsets = [0, 0], sizes = [8, 32], strides = [1, 1]} : vector<32x32xf32> to vector<8x32xf32>
    %908 = vector.extract_strided_slice %864 {offsets = [0, 0, 0], sizes = [1, 32, 32], strides = [1, 1, 1]} : vector<4x32x32xf32> to vector<1x32x32xf32>
    %909 = vector.shape_cast %908 : vector<1x32x32xf32> to vector<32x32xf32>
    %cst_287 = arith.constant dense<0.000000e+00> : vector<8x32xf32>
    %910 = tpu.matmul %903, %909, %cst_287 {dimension_numbers = #tpu.dot_dimension_numbers<[1], [0], [0], [1], [0, 0, 1, 1], [], []>} : vector<8x32xf32>, vector<32x32xf32>, vector<8x32xf32> -> vector<8x32xf32>
    %911 = arith.addf %907, %910 : vector<8x32xf32>
    %912 = arith.negf %911 : vector<8x32xf32>
    %913 = math.exp %912 : vector<8x32xf32>
    %cst_288 = arith.constant 1.000000e+00 : f32
    %914 = vector.broadcast %cst_288 : f32 to vector<8x32xf32>
    %915 = arith.addf %914, %913 : vector<8x32xf32>
    %916 = arith.divf %914, %915 : vector<8x32xf32>
    %917 = vector.extract_strided_slice %906 {offsets = [8, 0], sizes = [8, 32], strides = [1, 1]} : vector<32x32xf32> to vector<8x32xf32>
    %918 = vector.extract_strided_slice %864 {offsets = [1, 0, 0], sizes = [1, 32, 32], strides = [1, 1, 1]} : vector<4x32x32xf32> to vector<1x32x32xf32>
    %919 = vector.shape_cast %918 : vector<1x32x32xf32> to vector<32x32xf32>
    %cst_289 = arith.constant dense<0.000000e+00> : vector<8x32xf32>
    %920 = tpu.matmul %903, %919, %cst_289 {dimension_numbers = #tpu.dot_dimension_numbers<[1], [0], [0], [1], [0, 0, 1, 1], [], []>} : vector<8x32xf32>, vector<32x32xf32>, vector<8x32xf32> -> vector<8x32xf32>
    %921 = arith.addf %917, %920 : vector<8x32xf32>
    %922 = arith.negf %921 : vector<8x32xf32>
    %923 = math.exp %922 : vector<8x32xf32>
    %cst_290 = arith.constant 1.000000e+00 : f32
    %924 = vector.broadcast %cst_290 : f32 to vector<8x32xf32>
    %925 = arith.addf %924, %923 : vector<8x32xf32>
    %926 = arith.divf %924, %925 : vector<8x32xf32>
    %927 = vector.extract_strided_slice %906 {offsets = [16, 0], sizes = [8, 32], strides = [1, 1]} : vector<32x32xf32> to vector<8x32xf32>
    %928 = vector.extract_strided_slice %864 {offsets = [2, 0, 0], sizes = [1, 32, 32], strides = [1, 1, 1]} : vector<4x32x32xf32> to vector<1x32x32xf32>
    %929 = vector.shape_cast %928 : vector<1x32x32xf32> to vector<32x32xf32>
    %cst_291 = arith.constant dense<0.000000e+00> : vector<8x32xf32>
    %930 = tpu.matmul %903, %929, %cst_291 {dimension_numbers = #tpu.dot_dimension_numbers<[1], [0], [0], [1], [0, 0, 1, 1], [], []>} : vector<8x32xf32>, vector<32x32xf32>, vector<8x32xf32> -> vector<8x32xf32>
    %931 = arith.addf %927, %930 : vector<8x32xf32>
    %932 = math.tanh %931 : vector<8x32xf32>
    %933 = vector.extract_strided_slice %906 {offsets = [24, 0], sizes = [8, 32], strides = [1, 1]} : vector<32x32xf32> to vector<8x32xf32>
    %934 = vector.extract_strided_slice %864 {offsets = [3, 0, 0], sizes = [1, 32, 32], strides = [1, 1, 1]} : vector<4x32x32xf32> to vector<1x32x32xf32>
    %935 = vector.shape_cast %934 : vector<1x32x32xf32> to vector<32x32xf32>
    %cst_292 = arith.constant dense<0.000000e+00> : vector<8x32xf32>
    %936 = tpu.matmul %903, %935, %cst_292 {dimension_numbers = #tpu.dot_dimension_numbers<[1], [0], [0], [1], [0, 0, 1, 1], [], []>} : vector<8x32xf32>, vector<32x32xf32>, vector<8x32xf32> -> vector<8x32xf32>
    %937 = arith.addf %933, %936 : vector<8x32xf32>
    %938 = arith.negf %937 : vector<8x32xf32>
    %939 = math.exp %938 : vector<8x32xf32>
    %cst_293 = arith.constant 1.000000e+00 : f32
    %940 = vector.broadcast %cst_293 : f32 to vector<8x32xf32>
    %941 = arith.addf %940, %939 : vector<8x32xf32>
    %942 = arith.divf %940, %941 : vector<8x32xf32>
    %943 = arith.mulf %926, %903 : vector<8x32xf32>
    %944 = arith.mulf %916, %932 : vector<8x32xf32>
    %945 = arith.addf %943, %944 : vector<8x32xf32>
    %946 = math.tanh %945 : vector<8x32xf32>
    %947 = arith.mulf %942, %946 : vector<8x32xf32>
    %948 = arith.index_cast %c0_i32_284 : i32 to index
    %c0_294 = arith.constant 0 : index
    %c0_295 = arith.constant 0 : index
    %949 = vector.load %arg7[%948, %c0_294, %c0_295] : memref<8x8x32xf32, #tpu.memory_space<vmem>>, vector<1x8x32xf32>
    %950 = vector.shape_cast %949 : vector<1x8x32xf32> to vector<8x32xf32>
    %951 = vector.shape_cast %947 : vector<8x32xf32> to vector<1x8x32xf32>
    tpu.vector_store %arg7[%948, %c0_294, %c0_295], %951 {strides = array<i32>} : memref<8x8x32xf32, #tpu.memory_space<vmem>>, vector<1x8x32xf32>,
    %c1_i32_296 = arith.constant 1 : i32
    %952 = arith.index_cast %c1_i32_296 : i32 to index
    %c0_297 = arith.constant 0 : index
    %c0_298 = arith.constant 0 : index
    %953 = vector.load %arg8[%952, %c0_297, %c0_298] : memref<8x32x32xf32, #tpu.memory_space<vmem>>, vector<1x32x32xf32>
    %954 = vector.shape_cast %953 : vector<1x32x32xf32> to vector<32x32xf32>
    %955 = vector.extract_strided_slice %954 {offsets = [0, 0], sizes = [8, 32], strides = [1, 1]} : vector<32x32xf32> to vector<8x32xf32>
    %956 = vector.extract_strided_slice %864 {offsets = [0, 0, 0], sizes = [1, 32, 32], strides = [1, 1, 1]} : vector<4x32x32xf32> to vector<1x32x32xf32>
    %957 = vector.shape_cast %956 : vector<1x32x32xf32> to vector<32x32xf32>
    %cst_299 = arith.constant dense<0.000000e+00> : vector<8x32xf32>
    %958 = tpu.matmul %947, %957, %cst_299 {dimension_numbers = #tpu.dot_dimension_numbers<[1], [0], [0], [1], [0, 0, 1, 1], [], []>} : vector<8x32xf32>, vector<32x32xf32>, vector<8x32xf32> -> vector<8x32xf32>
    %959 = arith.addf %955, %958 : vector<8x32xf32>
    %960 = arith.negf %959 : vector<8x32xf32>
    %961 = math.exp %960 : vector<8x32xf32>
    %cst_300 = arith.constant 1.000000e+00 : f32
    %962 = vector.broadcast %cst_300 : f32 to vector<8x32xf32>
    %963 = arith.addf %962, %961 : vector<8x32xf32>
    %964 = arith.divf %962, %963 : vector<8x32xf32>
    %965 = vector.extract_strided_slice %954 {offsets = [8, 0], sizes = [8, 32], strides = [1, 1]} : vector<32x32xf32> to vector<8x32xf32>
    %966 = vector.extract_strided_slice %864 {offsets = [1, 0, 0], sizes = [1, 32, 32], strides = [1, 1, 1]} : vector<4x32x32xf32> to vector<1x32x32xf32>
    %967 = vector.shape_cast %966 : vector<1x32x32xf32> to vector<32x32xf32>
    %cst_301 = arith.constant dense<0.000000e+00> : vector<8x32xf32>
    %968 = tpu.matmul %947, %967, %cst_301 {dimension_numbers = #tpu.dot_dimension_numbers<[1], [0], [0], [1], [0, 0, 1, 1], [], []>} : vector<8x32xf32>, vector<32x32xf32>, vector<8x32xf32> -> vector<8x32xf32>
    %969 = arith.addf %965, %968 : vector<8x32xf32>
    %970 = arith.negf %969 : vector<8x32xf32>
    %971 = math.exp %970 : vector<8x32xf32>
    %cst_302 = arith.constant 1.000000e+00 : f32
    %972 = vector.broadcast %cst_302 : f32 to vector<8x32xf32>
    %973 = arith.addf %972, %971 : vector<8x32xf32>
    %974 = arith.divf %972, %973 : vector<8x32xf32>
    %975 = vector.extract_strided_slice %954 {offsets = [16, 0], sizes = [8, 32], strides = [1, 1]} : vector<32x32xf32> to vector<8x32xf32>
    %976 = vector.extract_strided_slice %864 {offsets = [2, 0, 0], sizes = [1, 32, 32], strides = [1, 1, 1]} : vector<4x32x32xf32> to vector<1x32x32xf32>
    %977 = vector.shape_cast %976 : vector<1x32x32xf32> to vector<32x32xf32>
    %cst_303 = arith.constant dense<0.000000e+00> : vector<8x32xf32>
    %978 = tpu.matmul %947, %977, %cst_303 {dimension_numbers = #tpu.dot_dimension_numbers<[1], [0], [0], [1], [0, 0, 1, 1], [], []>} : vector<8x32xf32>, vector<32x32xf32>, vector<8x32xf32> -> vector<8x32xf32>
    %979 = arith.addf %975, %978 : vector<8x32xf32>
    %980 = math.tanh %979 : vector<8x32xf32>
    %981 = vector.extract_strided_slice %954 {offsets = [24, 0], sizes = [8, 32], strides = [1, 1]} : vector<32x32xf32> to vector<8x32xf32>
    %982 = vector.extract_strided_slice %864 {offsets = [3, 0, 0], sizes = [1, 32, 32], strides = [1, 1, 1]} : vector<4x32x32xf32> to vector<1x32x32xf32>
    %983 = vector.shape_cast %982 : vector<1x32x32xf32> to vector<32x32xf32>
    %cst_304 = arith.constant dense<0.000000e+00> : vector<8x32xf32>
    %984 = tpu.matmul %947, %983, %cst_304 {dimension_numbers = #tpu.dot_dimension_numbers<[1], [0], [0], [1], [0, 0, 1, 1], [], []>} : vector<8x32xf32>, vector<32x32xf32>, vector<8x32xf32> -> vector<8x32xf32>
    %985 = arith.addf %981, %984 : vector<8x32xf32>
    %986 = arith.negf %985 : vector<8x32xf32>
    %987 = math.exp %986 : vector<8x32xf32>
    %cst_305 = arith.constant 1.000000e+00 : f32
    %988 = vector.broadcast %cst_305 : f32 to vector<8x32xf32>
    %989 = arith.addf %988, %987 : vector<8x32xf32>
    %990 = arith.divf %988, %989 : vector<8x32xf32>
    %991 = arith.mulf %974, %945 : vector<8x32xf32>
    %992 = arith.mulf %964, %980 : vector<8x32xf32>
    %993 = arith.addf %991, %992 : vector<8x32xf32>
    %994 = math.tanh %993 : vector<8x32xf32>
    %995 = arith.mulf %990, %994 : vector<8x32xf32>
    %996 = arith.index_cast %c1_i32_296 : i32 to index
    %c0_306 = arith.constant 0 : index
    %c0_307 = arith.constant 0 : index
    %997 = vector.load %arg7[%996, %c0_306, %c0_307] : memref<8x8x32xf32, #tpu.memory_space<vmem>>, vector<1x8x32xf32>
    %998 = vector.shape_cast %997 : vector<1x8x32xf32> to vector<8x32xf32>
    %999 = vector.shape_cast %995 : vector<8x32xf32> to vector<1x8x32xf32>
    tpu.vector_store %arg7[%996, %c0_306, %c0_307], %999 {strides = array<i32>} : memref<8x8x32xf32, #tpu.memory_space<vmem>>, vector<1x8x32xf32>,
    %c2_i32_308 = arith.constant 2 : i32
    %1000 = arith.index_cast %c2_i32_308 : i32 to index
    %c0_309 = arith.constant 0 : index
    %c0_310 = arith.constant 0 : index
    %1001 = vector.load %arg8[%1000, %c0_309, %c0_310] : memref<8x32x32xf32, #tpu.memory_space<vmem>>, vector<1x32x32xf32>
    %1002 = vector.shape_cast %1001 : vector<1x32x32xf32> to vector<32x32xf32>
    %1003 = vector.extract_strided_slice %1002 {offsets = [0, 0], sizes = [8, 32], strides = [1, 1]} : vector<32x32xf32> to vector<8x32xf32>
    %1004 = vector.extract_strided_slice %864 {offsets = [0, 0, 0], sizes = [1, 32, 32], strides = [1, 1, 1]} : vector<4x32x32xf32> to vector<1x32x32xf32>
    %1005 = vector.shape_cast %1004 : vector<1x32x32xf32> to vector<32x32xf32>
    %cst_311 = arith.constant dense<0.000000e+00> : vector<8x32xf32>
    %1006 = tpu.matmul %995, %1005, %cst_311 {dimension_numbers = #tpu.dot_dimension_numbers<[1], [0], [0], [1], [0, 0, 1, 1], [], []>} : vector<8x32xf32>, vector<32x32xf32>, vector<8x32xf32> -> vector<8x32xf32>
    %1007 = arith.addf %1003, %1006 : vector<8x32xf32>
    %1008 = arith.negf %1007 : vector<8x32xf32>
    %1009 = math.exp %1008 : vector<8x32xf32>
    %cst_312 = arith.constant 1.000000e+00 : f32
    %1010 = vector.broadcast %cst_312 : f32 to vector<8x32xf32>
    %1011 = arith.addf %1010, %1009 : vector<8x32xf32>
    %1012 = arith.divf %1010, %1011 : vector<8x32xf32>
    %1013 = vector.extract_strided_slice %1002 {offsets = [8, 0], sizes = [8, 32], strides = [1, 1]} : vector<32x32xf32> to vector<8x32xf32>
    %1014 = vector.extract_strided_slice %864 {offsets = [1, 0, 0], sizes = [1, 32, 32], strides = [1, 1, 1]} : vector<4x32x32xf32> to vector<1x32x32xf32>
    %1015 = vector.shape_cast %1014 : vector<1x32x32xf32> to vector<32x32xf32>
    %cst_313 = arith.constant dense<0.000000e+00> : vector<8x32xf32>
    %1016 = tpu.matmul %995, %1015, %cst_313 {dimension_numbers = #tpu.dot_dimension_numbers<[1], [0], [0], [1], [0, 0, 1, 1], [], []>} : vector<8x32xf32>, vector<32x32xf32>, vector<8x32xf32> -> vector<8x32xf32>
    %1017 = arith.addf %1013, %1016 : vector<8x32xf32>
    %1018 = arith.negf %1017 : vector<8x32xf32>
    %1019 = math.exp %1018 : vector<8x32xf32>
    %cst_314 = arith.constant 1.000000e+00 : f32
    %1020 = vector.broadcast %cst_314 : f32 to vector<8x32xf32>
    %1021 = arith.addf %1020, %1019 : vector<8x32xf32>
    %1022 = arith.divf %1020, %1021 : vector<8x32xf32>
    %1023 = vector.extract_strided_slice %1002 {offsets = [16, 0], sizes = [8, 32], strides = [1, 1]} : vector<32x32xf32> to vector<8x32xf32>
    %1024 = vector.extract_strided_slice %864 {offsets = [2, 0, 0], sizes = [1, 32, 32], strides = [1, 1, 1]} : vector<4x32x32xf32> to vector<1x32x32xf32>
    %1025 = vector.shape_cast %1024 : vector<1x32x32xf32> to vector<32x32xf32>
    %cst_315 = arith.constant dense<0.000000e+00> : vector<8x32xf32>
    %1026 = tpu.matmul %995, %1025, %cst_315 {dimension_numbers = #tpu.dot_dimension_numbers<[1], [0], [0], [1], [0, 0, 1, 1], [], []>} : vector<8x32xf32>, vector<32x32xf32>, vector<8x32xf32> -> vector<8x32xf32>
    %1027 = arith.addf %1023, %1026 : vector<8x32xf32>
    %1028 = math.tanh %1027 : vector<8x32xf32>
    %1029 = vector.extract_strided_slice %1002 {offsets = [24, 0], sizes = [8, 32], strides = [1, 1]} : vector<32x32xf32> to vector<8x32xf32>
    %1030 = vector.extract_strided_slice %864 {offsets = [3, 0, 0], sizes = [1, 32, 32], strides = [1, 1, 1]} : vector<4x32x32xf32> to vector<1x32x32xf32>
    %1031 = vector.shape_cast %1030 : vector<1x32x32xf32> to vector<32x32xf32>
    %cst_316 = arith.constant dense<0.000000e+00> : vector<8x32xf32>
    %1032 = tpu.matmul %995, %1031, %cst_316 {dimension_numbers = #tpu.dot_dimension_numbers<[1], [0], [0], [1], [0, 0, 1, 1], [], []>} : vector<8x32xf32>, vector<32x32xf32>, vector<8x32xf32> -> vector<8x32xf32>
    %1033 = arith.addf %1029, %1032 : vector<8x32xf32>
    %1034 = arith.negf %1033 : vector<8x32xf32>
    %1035 = math.exp %1034 : vector<8x32xf32>
    %cst_317 = arith.constant 1.000000e+00 : f32
    %1036 = vector.broadcast %cst_317 : f32 to vector<8x32xf32>
    %1037 = arith.addf %1036, %1035 : vector<8x32xf32>
    %1038 = arith.divf %1036, %1037 : vector<8x32xf32>
    %1039 = arith.mulf %1022, %993 : vector<8x32xf32>
    %1040 = arith.mulf %1012, %1028 : vector<8x32xf32>
    %1041 = arith.addf %1039, %1040 : vector<8x32xf32>
    %1042 = math.tanh %1041 : vector<8x32xf32>
    %1043 = arith.mulf %1038, %1042 : vector<8x32xf32>
    %1044 = arith.index_cast %c2_i32_308 : i32 to index
    %c0_318 = arith.constant 0 : index
    %c0_319 = arith.constant 0 : index
    %1045 = vector.load %arg7[%1044, %c0_318, %c0_319] : memref<8x8x32xf32, #tpu.memory_space<vmem>>, vector<1x8x32xf32>
    %1046 = vector.shape_cast %1045 : vector<1x8x32xf32> to vector<8x32xf32>
    %1047 = vector.shape_cast %1043 : vector<8x32xf32> to vector<1x8x32xf32>
    tpu.vector_store %arg7[%1044, %c0_318, %c0_319], %1047 {strides = array<i32>} : memref<8x8x32xf32, #tpu.memory_space<vmem>>, vector<1x8x32xf32>,
    %c3_i32_320 = arith.constant 3 : i32
    %1048 = arith.index_cast %c3_i32_320 : i32 to index
    %c0_321 = arith.constant 0 : index
    %c0_322 = arith.constant 0 : index
    %1049 = vector.load %arg8[%1048, %c0_321, %c0_322] : memref<8x32x32xf32, #tpu.memory_space<vmem>>, vector<1x32x32xf32>
    %1050 = vector.shape_cast %1049 : vector<1x32x32xf32> to vector<32x32xf32>
    %1051 = vector.extract_strided_slice %1050 {offsets = [0, 0], sizes = [8, 32], strides = [1, 1]} : vector<32x32xf32> to vector<8x32xf32>
    %1052 = vector.extract_strided_slice %864 {offsets = [0, 0, 0], sizes = [1, 32, 32], strides = [1, 1, 1]} : vector<4x32x32xf32> to vector<1x32x32xf32>
    %1053 = vector.shape_cast %1052 : vector<1x32x32xf32> to vector<32x32xf32>
    %cst_323 = arith.constant dense<0.000000e+00> : vector<8x32xf32>
    %1054 = tpu.matmul %1043, %1053, %cst_323 {dimension_numbers = #tpu.dot_dimension_numbers<[1], [0], [0], [1], [0, 0, 1, 1], [], []>} : vector<8x32xf32>, vector<32x32xf32>, vector<8x32xf32> -> vector<8x32xf32>
    %1055 = arith.addf %1051, %1054 : vector<8x32xf32>
    %1056 = arith.negf %1055 : vector<8x32xf32>
    %1057 = math.exp %1056 : vector<8x32xf32>
    %cst_324 = arith.constant 1.000000e+00 : f32
    %1058 = vector.broadcast %cst_324 : f32 to vector<8x32xf32>
    %1059 = arith.addf %1058, %1057 : vector<8x32xf32>
    %1060 = arith.divf %1058, %1059 : vector<8x32xf32>
    %1061 = vector.extract_strided_slice %1050 {offsets = [8, 0], sizes = [8, 32], strides = [1, 1]} : vector<32x32xf32> to vector<8x32xf32>
    %1062 = vector.extract_strided_slice %864 {offsets = [1, 0, 0], sizes = [1, 32, 32], strides = [1, 1, 1]} : vector<4x32x32xf32> to vector<1x32x32xf32>
    %1063 = vector.shape_cast %1062 : vector<1x32x32xf32> to vector<32x32xf32>
    %cst_325 = arith.constant dense<0.000000e+00> : vector<8x32xf32>
    %1064 = tpu.matmul %1043, %1063, %cst_325 {dimension_numbers = #tpu.dot_dimension_numbers<[1], [0], [0], [1], [0, 0, 1, 1], [], []>} : vector<8x32xf32>, vector<32x32xf32>, vector<8x32xf32> -> vector<8x32xf32>
    %1065 = arith.addf %1061, %1064 : vector<8x32xf32>
    %1066 = arith.negf %1065 : vector<8x32xf32>
    %1067 = math.exp %1066 : vector<8x32xf32>
    %cst_326 = arith.constant 1.000000e+00 : f32
    %1068 = vector.broadcast %cst_326 : f32 to vector<8x32xf32>
    %1069 = arith.addf %1068, %1067 : vector<8x32xf32>
    %1070 = arith.divf %1068, %1069 : vector<8x32xf32>
    %1071 = vector.extract_strided_slice %1050 {offsets = [16, 0], sizes = [8, 32], strides = [1, 1]} : vector<32x32xf32> to vector<8x32xf32>
    %1072 = vector.extract_strided_slice %864 {offsets = [2, 0, 0], sizes = [1, 32, 32], strides = [1, 1, 1]} : vector<4x32x32xf32> to vector<1x32x32xf32>
    %1073 = vector.shape_cast %1072 : vector<1x32x32xf32> to vector<32x32xf32>
    %cst_327 = arith.constant dense<0.000000e+00> : vector<8x32xf32>
    %1074 = tpu.matmul %1043, %1073, %cst_327 {dimension_numbers = #tpu.dot_dimension_numbers<[1], [0], [0], [1], [0, 0, 1, 1], [], []>} : vector<8x32xf32>, vector<32x32xf32>, vector<8x32xf32> -> vector<8x32xf32>
    %1075 = arith.addf %1071, %1074 : vector<8x32xf32>
    %1076 = math.tanh %1075 : vector<8x32xf32>
    %1077 = vector.extract_strided_slice %1050 {offsets = [24, 0], sizes = [8, 32], strides = [1, 1]} : vector<32x32xf32> to vector<8x32xf32>
    %1078 = vector.extract_strided_slice %864 {offsets = [3, 0, 0], sizes = [1, 32, 32], strides = [1, 1, 1]} : vector<4x32x32xf32> to vector<1x32x32xf32>
    %1079 = vector.shape_cast %1078 : vector<1x32x32xf32> to vector<32x32xf32>
    %cst_328 = arith.constant dense<0.000000e+00> : vector<8x32xf32>
    %1080 = tpu.matmul %1043, %1079, %cst_328 {dimension_numbers = #tpu.dot_dimension_numbers<[1], [0], [0], [1], [0, 0, 1, 1], [], []>} : vector<8x32xf32>, vector<32x32xf32>, vector<8x32xf32> -> vector<8x32xf32>
    %1081 = arith.addf %1077, %1080 : vector<8x32xf32>
    %1082 = arith.negf %1081 : vector<8x32xf32>
    %1083 = math.exp %1082 : vector<8x32xf32>
    %cst_329 = arith.constant 1.000000e+00 : f32
    %1084 = vector.broadcast %cst_329 : f32 to vector<8x32xf32>
    %1085 = arith.addf %1084, %1083 : vector<8x32xf32>
    %1086 = arith.divf %1084, %1085 : vector<8x32xf32>
    %1087 = arith.mulf %1070, %1041 : vector<8x32xf32>
    %1088 = arith.mulf %1060, %1076 : vector<8x32xf32>
    %1089 = arith.addf %1087, %1088 : vector<8x32xf32>
    %1090 = math.tanh %1089 : vector<8x32xf32>
    %1091 = arith.mulf %1086, %1090 : vector<8x32xf32>
    %1092 = arith.index_cast %c3_i32_320 : i32 to index
    %c0_330 = arith.constant 0 : index
    %c0_331 = arith.constant 0 : index
    %1093 = vector.load %arg7[%1092, %c0_330, %c0_331] : memref<8x8x32xf32, #tpu.memory_space<vmem>>, vector<1x8x32xf32>
    %1094 = vector.shape_cast %1093 : vector<1x8x32xf32> to vector<8x32xf32>
    %1095 = vector.shape_cast %1091 : vector<8x32xf32> to vector<1x8x32xf32>
    tpu.vector_store %arg7[%1092, %c0_330, %c0_331], %1095 {strides = array<i32>} : memref<8x8x32xf32, #tpu.memory_space<vmem>>, vector<1x8x32xf32>,
    %c4_i32_332 = arith.constant 4 : i32
    %1096 = arith.index_cast %c4_i32_332 : i32 to index
    %c0_333 = arith.constant 0 : index
    %c0_334 = arith.constant 0 : index
    %1097 = vector.load %arg8[%1096, %c0_333, %c0_334] : memref<8x32x32xf32, #tpu.memory_space<vmem>>, vector<1x32x32xf32>
    %1098 = vector.shape_cast %1097 : vector<1x32x32xf32> to vector<32x32xf32>
    %1099 = vector.extract_strided_slice %1098 {offsets = [0, 0], sizes = [8, 32], strides = [1, 1]} : vector<32x32xf32> to vector<8x32xf32>
    %1100 = vector.extract_strided_slice %864 {offsets = [0, 0, 0], sizes = [1, 32, 32], strides = [1, 1, 1]} : vector<4x32x32xf32> to vector<1x32x32xf32>
    %1101 = vector.shape_cast %1100 : vector<1x32x32xf32> to vector<32x32xf32>
    %cst_335 = arith.constant dense<0.000000e+00> : vector<8x32xf32>
    %1102 = tpu.matmul %1091, %1101, %cst_335 {dimension_numbers = #tpu.dot_dimension_numbers<[1], [0], [0], [1], [0, 0, 1, 1], [], []>} : vector<8x32xf32>, vector<32x32xf32>, vector<8x32xf32> -> vector<8x32xf32>
    %1103 = arith.addf %1099, %1102 : vector<8x32xf32>
    %1104 = arith.negf %1103 : vector<8x32xf32>
    %1105 = math.exp %1104 : vector<8x32xf32>
    %cst_336 = arith.constant 1.000000e+00 : f32
    %1106 = vector.broadcast %cst_336 : f32 to vector<8x32xf32>
    %1107 = arith.addf %1106, %1105 : vector<8x32xf32>
    %1108 = arith.divf %1106, %1107 : vector<8x32xf32>
    %1109 = vector.extract_strided_slice %1098 {offsets = [8, 0], sizes = [8, 32], strides = [1, 1]} : vector<32x32xf32> to vector<8x32xf32>
    %1110 = vector.extract_strided_slice %864 {offsets = [1, 0, 0], sizes = [1, 32, 32], strides = [1, 1, 1]} : vector<4x32x32xf32> to vector<1x32x32xf32>
    %1111 = vector.shape_cast %1110 : vector<1x32x32xf32> to vector<32x32xf32>
    %cst_337 = arith.constant dense<0.000000e+00> : vector<8x32xf32>
    %1112 = tpu.matmul %1091, %1111, %cst_337 {dimension_numbers = #tpu.dot_dimension_numbers<[1], [0], [0], [1], [0, 0, 1, 1], [], []>} : vector<8x32xf32>, vector<32x32xf32>, vector<8x32xf32> -> vector<8x32xf32>
    %1113 = arith.addf %1109, %1112 : vector<8x32xf32>
    %1114 = arith.negf %1113 : vector<8x32xf32>
    %1115 = math.exp %1114 : vector<8x32xf32>
    %cst_338 = arith.constant 1.000000e+00 : f32
    %1116 = vector.broadcast %cst_338 : f32 to vector<8x32xf32>
    %1117 = arith.addf %1116, %1115 : vector<8x32xf32>
    %1118 = arith.divf %1116, %1117 : vector<8x32xf32>
    %1119 = vector.extract_strided_slice %1098 {offsets = [16, 0], sizes = [8, 32], strides = [1, 1]} : vector<32x32xf32> to vector<8x32xf32>
    %1120 = vector.extract_strided_slice %864 {offsets = [2, 0, 0], sizes = [1, 32, 32], strides = [1, 1, 1]} : vector<4x32x32xf32> to vector<1x32x32xf32>
    %1121 = vector.shape_cast %1120 : vector<1x32x32xf32> to vector<32x32xf32>
    %cst_339 = arith.constant dense<0.000000e+00> : vector<8x32xf32>
    %1122 = tpu.matmul %1091, %1121, %cst_339 {dimension_numbers = #tpu.dot_dimension_numbers<[1], [0], [0], [1], [0, 0, 1, 1], [], []>} : vector<8x32xf32>, vector<32x32xf32>, vector<8x32xf32> -> vector<8x32xf32>
    %1123 = arith.addf %1119, %1122 : vector<8x32xf32>
    %1124 = math.tanh %1123 : vector<8x32xf32>
    %1125 = vector.extract_strided_slice %1098 {offsets = [24, 0], sizes = [8, 32], strides = [1, 1]} : vector<32x32xf32> to vector<8x32xf32>
    %1126 = vector.extract_strided_slice %864 {offsets = [3, 0, 0], sizes = [1, 32, 32], strides = [1, 1, 1]} : vector<4x32x32xf32> to vector<1x32x32xf32>
    %1127 = vector.shape_cast %1126 : vector<1x32x32xf32> to vector<32x32xf32>
    %cst_340 = arith.constant dense<0.000000e+00> : vector<8x32xf32>
    %1128 = tpu.matmul %1091, %1127, %cst_340 {dimension_numbers = #tpu.dot_dimension_numbers<[1], [0], [0], [1], [0, 0, 1, 1], [], []>} : vector<8x32xf32>, vector<32x32xf32>, vector<8x32xf32> -> vector<8x32xf32>
    %1129 = arith.addf %1125, %1128 : vector<8x32xf32>
    %1130 = arith.negf %1129 : vector<8x32xf32>
    %1131 = math.exp %1130 : vector<8x32xf32>
    %cst_341 = arith.constant 1.000000e+00 : f32
    %1132 = vector.broadcast %cst_341 : f32 to vector<8x32xf32>
    %1133 = arith.addf %1132, %1131 : vector<8x32xf32>
    %1134 = arith.divf %1132, %1133 : vector<8x32xf32>
    %1135 = arith.mulf %1118, %1089 : vector<8x32xf32>
    %1136 = arith.mulf %1108, %1124 : vector<8x32xf32>
    %1137 = arith.addf %1135, %1136 : vector<8x32xf32>
    %1138 = math.tanh %1137 : vector<8x32xf32>
    %1139 = arith.mulf %1134, %1138 : vector<8x32xf32>
    %1140 = arith.index_cast %c4_i32_332 : i32 to index
    %c0_342 = arith.constant 0 : index
    %c0_343 = arith.constant 0 : index
    %1141 = vector.load %arg7[%1140, %c0_342, %c0_343] : memref<8x8x32xf32, #tpu.memory_space<vmem>>, vector<1x8x32xf32>
    %1142 = vector.shape_cast %1141 : vector<1x8x32xf32> to vector<8x32xf32>
    %1143 = vector.shape_cast %1139 : vector<8x32xf32> to vector<1x8x32xf32>
    tpu.vector_store %arg7[%1140, %c0_342, %c0_343], %1143 {strides = array<i32>} : memref<8x8x32xf32, #tpu.memory_space<vmem>>, vector<1x8x32xf32>,
    %c5_i32_344 = arith.constant 5 : i32
    %1144 = arith.index_cast %c5_i32_344 : i32 to index
    %c0_345 = arith.constant 0 : index
    %c0_346 = arith.constant 0 : index
    %1145 = vector.load %arg8[%1144, %c0_345, %c0_346] : memref<8x32x32xf32, #tpu.memory_space<vmem>>, vector<1x32x32xf32>
    %1146 = vector.shape_cast %1145 : vector<1x32x32xf32> to vector<32x32xf32>
    %1147 = vector.extract_strided_slice %1146 {offsets = [0, 0], sizes = [8, 32], strides = [1, 1]} : vector<32x32xf32> to vector<8x32xf32>
    %1148 = vector.extract_strided_slice %864 {offsets = [0, 0, 0], sizes = [1, 32, 32], strides = [1, 1, 1]} : vector<4x32x32xf32> to vector<1x32x32xf32>
    %1149 = vector.shape_cast %1148 : vector<1x32x32xf32> to vector<32x32xf32>
    %cst_347 = arith.constant dense<0.000000e+00> : vector<8x32xf32>
    %1150 = tpu.matmul %1139, %1149, %cst_347 {dimension_numbers = #tpu.dot_dimension_numbers<[1], [0], [0], [1], [0, 0, 1, 1], [], []>} : vector<8x32xf32>, vector<32x32xf32>, vector<8x32xf32> -> vector<8x32xf32>
    %1151 = arith.addf %1147, %1150 : vector<8x32xf32>
    %1152 = arith.negf %1151 : vector<8x32xf32>
    %1153 = math.exp %1152 : vector<8x32xf32>
    %cst_348 = arith.constant 1.000000e+00 : f32
    %1154 = vector.broadcast %cst_348 : f32 to vector<8x32xf32>
    %1155 = arith.addf %1154, %1153 : vector<8x32xf32>
    %1156 = arith.divf %1154, %1155 : vector<8x32xf32>
    %1157 = vector.extract_strided_slice %1146 {offsets = [8, 0], sizes = [8, 32], strides = [1, 1]} : vector<32x32xf32> to vector<8x32xf32>
    %1158 = vector.extract_strided_slice %864 {offsets = [1, 0, 0], sizes = [1, 32, 32], strides = [1, 1, 1]} : vector<4x32x32xf32> to vector<1x32x32xf32>
    %1159 = vector.shape_cast %1158 : vector<1x32x32xf32> to vector<32x32xf32>
    %cst_349 = arith.constant dense<0.000000e+00> : vector<8x32xf32>
    %1160 = tpu.matmul %1139, %1159, %cst_349 {dimension_numbers = #tpu.dot_dimension_numbers<[1], [0], [0], [1], [0, 0, 1, 1], [], []>} : vector<8x32xf32>, vector<32x32xf32>, vector<8x32xf32> -> vector<8x32xf32>
    %1161 = arith.addf %1157, %1160 : vector<8x32xf32>
    %1162 = arith.negf %1161 : vector<8x32xf32>
    %1163 = math.exp %1162 : vector<8x32xf32>
    %cst_350 = arith.constant 1.000000e+00 : f32
    %1164 = vector.broadcast %cst_350 : f32 to vector<8x32xf32>
    %1165 = arith.addf %1164, %1163 : vector<8x32xf32>
    %1166 = arith.divf %1164, %1165 : vector<8x32xf32>
    %1167 = vector.extract_strided_slice %1146 {offsets = [16, 0], sizes = [8, 32], strides = [1, 1]} : vector<32x32xf32> to vector<8x32xf32>
    %1168 = vector.extract_strided_slice %864 {offsets = [2, 0, 0], sizes = [1, 32, 32], strides = [1, 1, 1]} : vector<4x32x32xf32> to vector<1x32x32xf32>
    %1169 = vector.shape_cast %1168 : vector<1x32x32xf32> to vector<32x32xf32>
    %cst_351 = arith.constant dense<0.000000e+00> : vector<8x32xf32>
    %1170 = tpu.matmul %1139, %1169, %cst_351 {dimension_numbers = #tpu.dot_dimension_numbers<[1], [0], [0], [1], [0, 0, 1, 1], [], []>} : vector<8x32xf32>, vector<32x32xf32>, vector<8x32xf32> -> vector<8x32xf32>
    %1171 = arith.addf %1167, %1170 : vector<8x32xf32>
    %1172 = math.tanh %1171 : vector<8x32xf32>
    %1173 = vector.extract_strided_slice %1146 {offsets = [24, 0], sizes = [8, 32], strides = [1, 1]} : vector<32x32xf32> to vector<8x32xf32>
    %1174 = vector.extract_strided_slice %864 {offsets = [3, 0, 0], sizes = [1, 32, 32], strides = [1, 1, 1]} : vector<4x32x32xf32> to vector<1x32x32xf32>
    %1175 = vector.shape_cast %1174 : vector<1x32x32xf32> to vector<32x32xf32>
    %cst_352 = arith.constant dense<0.000000e+00> : vector<8x32xf32>
    %1176 = tpu.matmul %1139, %1175, %cst_352 {dimension_numbers = #tpu.dot_dimension_numbers<[1], [0], [0], [1], [0, 0, 1, 1], [], []>} : vector<8x32xf32>, vector<32x32xf32>, vector<8x32xf32> -> vector<8x32xf32>
    %1177 = arith.addf %1173, %1176 : vector<8x32xf32>
    %1178 = arith.negf %1177 : vector<8x32xf32>
    %1179 = math.exp %1178 : vector<8x32xf32>
    %cst_353 = arith.constant 1.000000e+00 : f32
    %1180 = vector.broadcast %cst_353 : f32 to vector<8x32xf32>
    %1181 = arith.addf %1180, %1179 : vector<8x32xf32>
    %1182 = arith.divf %1180, %1181 : vector<8x32xf32>
    %1183 = arith.mulf %1166, %1137 : vector<8x32xf32>
    %1184 = arith.mulf %1156, %1172 : vector<8x32xf32>
    %1185 = arith.addf %1183, %1184 : vector<8x32xf32>
    %1186 = math.tanh %1185 : vector<8x32xf32>
    %1187 = arith.mulf %1182, %1186 : vector<8x32xf32>
    %1188 = arith.index_cast %c5_i32_344 : i32 to index
    %c0_354 = arith.constant 0 : index
    %c0_355 = arith.constant 0 : index
    %1189 = vector.load %arg7[%1188, %c0_354, %c0_355] : memref<8x8x32xf32, #tpu.memory_space<vmem>>, vector<1x8x32xf32>
    %1190 = vector.shape_cast %1189 : vector<1x8x32xf32> to vector<8x32xf32>
    %1191 = vector.shape_cast %1187 : vector<8x32xf32> to vector<1x8x32xf32>
    tpu.vector_store %arg7[%1188, %c0_354, %c0_355], %1191 {strides = array<i32>} : memref<8x8x32xf32, #tpu.memory_space<vmem>>, vector<1x8x32xf32>,
    %c6_i32_356 = arith.constant 6 : i32
    %1192 = arith.index_cast %c6_i32_356 : i32 to index
    %c0_357 = arith.constant 0 : index
    %c0_358 = arith.constant 0 : index
    %1193 = vector.load %arg8[%1192, %c0_357, %c0_358] : memref<8x32x32xf32, #tpu.memory_space<vmem>>, vector<1x32x32xf32>
    %1194 = vector.shape_cast %1193 : vector<1x32x32xf32> to vector<32x32xf32>
    %1195 = vector.extract_strided_slice %1194 {offsets = [0, 0], sizes = [8, 32], strides = [1, 1]} : vector<32x32xf32> to vector<8x32xf32>
    %1196 = vector.extract_strided_slice %864 {offsets = [0, 0, 0], sizes = [1, 32, 32], strides = [1, 1, 1]} : vector<4x32x32xf32> to vector<1x32x32xf32>
    %1197 = vector.shape_cast %1196 : vector<1x32x32xf32> to vector<32x32xf32>
    %cst_359 = arith.constant dense<0.000000e+00> : vector<8x32xf32>
    %1198 = tpu.matmul %1187, %1197, %cst_359 {dimension_numbers = #tpu.dot_dimension_numbers<[1], [0], [0], [1], [0, 0, 1, 1], [], []>} : vector<8x32xf32>, vector<32x32xf32>, vector<8x32xf32> -> vector<8x32xf32>
    %1199 = arith.addf %1195, %1198 : vector<8x32xf32>
    %1200 = arith.negf %1199 : vector<8x32xf32>
    %1201 = math.exp %1200 : vector<8x32xf32>
    %cst_360 = arith.constant 1.000000e+00 : f32
    %1202 = vector.broadcast %cst_360 : f32 to vector<8x32xf32>
    %1203 = arith.addf %1202, %1201 : vector<8x32xf32>
    %1204 = arith.divf %1202, %1203 : vector<8x32xf32>
    %1205 = vector.extract_strided_slice %1194 {offsets = [8, 0], sizes = [8, 32], strides = [1, 1]} : vector<32x32xf32> to vector<8x32xf32>
    %1206 = vector.extract_strided_slice %864 {offsets = [1, 0, 0], sizes = [1, 32, 32], strides = [1, 1, 1]} : vector<4x32x32xf32> to vector<1x32x32xf32>
    %1207 = vector.shape_cast %1206 : vector<1x32x32xf32> to vector<32x32xf32>
    %cst_361 = arith.constant dense<0.000000e+00> : vector<8x32xf32>
    %1208 = tpu.matmul %1187, %1207, %cst_361 {dimension_numbers = #tpu.dot_dimension_numbers<[1], [0], [0], [1], [0, 0, 1, 1], [], []>} : vector<8x32xf32>, vector<32x32xf32>, vector<8x32xf32> -> vector<8x32xf32>
    %1209 = arith.addf %1205, %1208 : vector<8x32xf32>
    %1210 = arith.negf %1209 : vector<8x32xf32>
    %1211 = math.exp %1210 : vector<8x32xf32>
    %cst_362 = arith.constant 1.000000e+00 : f32
    %1212 = vector.broadcast %cst_362 : f32 to vector<8x32xf32>
    %1213 = arith.addf %1212, %1211 : vector<8x32xf32>
    %1214 = arith.divf %1212, %1213 : vector<8x32xf32>
    %1215 = vector.extract_strided_slice %1194 {offsets = [16, 0], sizes = [8, 32], strides = [1, 1]} : vector<32x32xf32> to vector<8x32xf32>
    %1216 = vector.extract_strided_slice %864 {offsets = [2, 0, 0], sizes = [1, 32, 32], strides = [1, 1, 1]} : vector<4x32x32xf32> to vector<1x32x32xf32>
    %1217 = vector.shape_cast %1216 : vector<1x32x32xf32> to vector<32x32xf32>
    %cst_363 = arith.constant dense<0.000000e+00> : vector<8x32xf32>
    %1218 = tpu.matmul %1187, %1217, %cst_363 {dimension_numbers = #tpu.dot_dimension_numbers<[1], [0], [0], [1], [0, 0, 1, 1], [], []>} : vector<8x32xf32>, vector<32x32xf32>, vector<8x32xf32> -> vector<8x32xf32>
    %1219 = arith.addf %1215, %1218 : vector<8x32xf32>
    %1220 = math.tanh %1219 : vector<8x32xf32>
    %1221 = vector.extract_strided_slice %1194 {offsets = [24, 0], sizes = [8, 32], strides = [1, 1]} : vector<32x32xf32> to vector<8x32xf32>
    %1222 = vector.extract_strided_slice %864 {offsets = [3, 0, 0], sizes = [1, 32, 32], strides = [1, 1, 1]} : vector<4x32x32xf32> to vector<1x32x32xf32>
    %1223 = vector.shape_cast %1222 : vector<1x32x32xf32> to vector<32x32xf32>
    %cst_364 = arith.constant dense<0.000000e+00> : vector<8x32xf32>
    %1224 = tpu.matmul %1187, %1223, %cst_364 {dimension_numbers = #tpu.dot_dimension_numbers<[1], [0], [0], [1], [0, 0, 1, 1], [], []>} : vector<8x32xf32>, vector<32x32xf32>, vector<8x32xf32> -> vector<8x32xf32>
    %1225 = arith.addf %1221, %1224 : vector<8x32xf32>
    %1226 = arith.negf %1225 : vector<8x32xf32>
    %1227 = math.exp %1226 : vector<8x32xf32>
    %cst_365 = arith.constant 1.000000e+00 : f32
    %1228 = vector.broadcast %cst_365 : f32 to vector<8x32xf32>
    %1229 = arith.addf %1228, %1227 : vector<8x32xf32>
    %1230 = arith.divf %1228, %1229 : vector<8x32xf32>
    %1231 = arith.mulf %1214, %1185 : vector<8x32xf32>
    %1232 = arith.mulf %1204, %1220 : vector<8x32xf32>
    %1233 = arith.addf %1231, %1232 : vector<8x32xf32>
    %1234 = math.tanh %1233 : vector<8x32xf32>
    %1235 = arith.mulf %1230, %1234 : vector<8x32xf32>
    %1236 = arith.index_cast %c6_i32_356 : i32 to index
    %c0_366 = arith.constant 0 : index
    %c0_367 = arith.constant 0 : index
    %1237 = vector.load %arg7[%1236, %c0_366, %c0_367] : memref<8x8x32xf32, #tpu.memory_space<vmem>>, vector<1x8x32xf32>
    %1238 = vector.shape_cast %1237 : vector<1x8x32xf32> to vector<8x32xf32>
    %1239 = vector.shape_cast %1235 : vector<8x32xf32> to vector<1x8x32xf32>
    tpu.vector_store %arg7[%1236, %c0_366, %c0_367], %1239 {strides = array<i32>} : memref<8x8x32xf32, #tpu.memory_space<vmem>>, vector<1x8x32xf32>,
    %c7_i32_368 = arith.constant 7 : i32
    %1240 = arith.index_cast %c7_i32_368 : i32 to index
    %c0_369 = arith.constant 0 : index
    %c0_370 = arith.constant 0 : index
    %1241 = vector.load %arg8[%1240, %c0_369, %c0_370] : memref<8x32x32xf32, #tpu.memory_space<vmem>>, vector<1x32x32xf32>
    %1242 = vector.shape_cast %1241 : vector<1x32x32xf32> to vector<32x32xf32>
    %1243 = vector.extract_strided_slice %1242 {offsets = [0, 0], sizes = [8, 32], strides = [1, 1]} : vector<32x32xf32> to vector<8x32xf32>
    %1244 = vector.extract_strided_slice %864 {offsets = [0, 0, 0], sizes = [1, 32, 32], strides = [1, 1, 1]} : vector<4x32x32xf32> to vector<1x32x32xf32>
    %1245 = vector.shape_cast %1244 : vector<1x32x32xf32> to vector<32x32xf32>
    %cst_371 = arith.constant dense<0.000000e+00> : vector<8x32xf32>
    %1246 = tpu.matmul %1235, %1245, %cst_371 {dimension_numbers = #tpu.dot_dimension_numbers<[1], [0], [0], [1], [0, 0, 1, 1], [], []>} : vector<8x32xf32>, vector<32x32xf32>, vector<8x32xf32> -> vector<8x32xf32>
    %1247 = arith.addf %1243, %1246 : vector<8x32xf32>
    %1248 = arith.negf %1247 : vector<8x32xf32>
    %1249 = math.exp %1248 : vector<8x32xf32>
    %cst_372 = arith.constant 1.000000e+00 : f32
    %1250 = vector.broadcast %cst_372 : f32 to vector<8x32xf32>
    %1251 = arith.addf %1250, %1249 : vector<8x32xf32>
    %1252 = arith.divf %1250, %1251 : vector<8x32xf32>
    %1253 = vector.extract_strided_slice %1242 {offsets = [8, 0], sizes = [8, 32], strides = [1, 1]} : vector<32x32xf32> to vector<8x32xf32>
    %1254 = vector.extract_strided_slice %864 {offsets = [1, 0, 0], sizes = [1, 32, 32], strides = [1, 1, 1]} : vector<4x32x32xf32> to vector<1x32x32xf32>
    %1255 = vector.shape_cast %1254 : vector<1x32x32xf32> to vector<32x32xf32>
    %cst_373 = arith.constant dense<0.000000e+00> : vector<8x32xf32>
    %1256 = tpu.matmul %1235, %1255, %cst_373 {dimension_numbers = #tpu.dot_dimension_numbers<[1], [0], [0], [1], [0, 0, 1, 1], [], []>} : vector<8x32xf32>, vector<32x32xf32>, vector<8x32xf32> -> vector<8x32xf32>
    %1257 = arith.addf %1253, %1256 : vector<8x32xf32>
    %1258 = arith.negf %1257 : vector<8x32xf32>
    %1259 = math.exp %1258 : vector<8x32xf32>
    %cst_374 = arith.constant 1.000000e+00 : f32
    %1260 = vector.broadcast %cst_374 : f32 to vector<8x32xf32>
    %1261 = arith.addf %1260, %1259 : vector<8x32xf32>
    %1262 = arith.divf %1260, %1261 : vector<8x32xf32>
    %1263 = vector.extract_strided_slice %1242 {offsets = [16, 0], sizes = [8, 32], strides = [1, 1]} : vector<32x32xf32> to vector<8x32xf32>
    %1264 = vector.extract_strided_slice %864 {offsets = [2, 0, 0], sizes = [1, 32, 32], strides = [1, 1, 1]} : vector<4x32x32xf32> to vector<1x32x32xf32>
    %1265 = vector.shape_cast %1264 : vector<1x32x32xf32> to vector<32x32xf32>
    %cst_375 = arith.constant dense<0.000000e+00> : vector<8x32xf32>
    %1266 = tpu.matmul %1235, %1265, %cst_375 {dimension_numbers = #tpu.dot_dimension_numbers<[1], [0], [0], [1], [0, 0, 1, 1], [], []>} : vector<8x32xf32>, vector<32x32xf32>, vector<8x32xf32> -> vector<8x32xf32>
    %1267 = arith.addf %1263, %1266 : vector<8x32xf32>
    %1268 = math.tanh %1267 : vector<8x32xf32>
    %1269 = vector.extract_strided_slice %1242 {offsets = [24, 0], sizes = [8, 32], strides = [1, 1]} : vector<32x32xf32> to vector<8x32xf32>
    %1270 = vector.extract_strided_slice %864 {offsets = [3, 0, 0], sizes = [1, 32, 32], strides = [1, 1, 1]} : vector<4x32x32xf32> to vector<1x32x32xf32>
    %1271 = vector.shape_cast %1270 : vector<1x32x32xf32> to vector<32x32xf32>
    %cst_376 = arith.constant dense<0.000000e+00> : vector<8x32xf32>
    %1272 = tpu.matmul %1235, %1271, %cst_376 {dimension_numbers = #tpu.dot_dimension_numbers<[1], [0], [0], [1], [0, 0, 1, 1], [], []>} : vector<8x32xf32>, vector<32x32xf32>, vector<8x32xf32> -> vector<8x32xf32>
    %1273 = arith.addf %1269, %1272 : vector<8x32xf32>
    %1274 = arith.negf %1273 : vector<8x32xf32>
    %1275 = math.exp %1274 : vector<8x32xf32>
    %cst_377 = arith.constant 1.000000e+00 : f32
    %1276 = vector.broadcast %cst_377 : f32 to vector<8x32xf32>
    %1277 = arith.addf %1276, %1275 : vector<8x32xf32>
    %1278 = arith.divf %1276, %1277 : vector<8x32xf32>
    %1279 = arith.mulf %1262, %1233 : vector<8x32xf32>
    %1280 = arith.mulf %1252, %1268 : vector<8x32xf32>
    %1281 = arith.addf %1279, %1280 : vector<8x32xf32>
    %1282 = math.tanh %1281 : vector<8x32xf32>
    %1283 = arith.mulf %1278, %1282 : vector<8x32xf32>
    %1284 = arith.index_cast %c7_i32_368 : i32 to index
    %c0_378 = arith.constant 0 : index
    %c0_379 = arith.constant 0 : index
    %1285 = vector.load %arg7[%1284, %c0_378, %c0_379] : memref<8x8x32xf32, #tpu.memory_space<vmem>>, vector<1x8x32xf32>
    %1286 = vector.shape_cast %1285 : vector<1x8x32xf32> to vector<8x32xf32>
    %1287 = vector.shape_cast %1283 : vector<8x32xf32> to vector<1x8x32xf32>
    tpu.vector_store %arg7[%1284, %c0_378, %c0_379], %1287 {strides = array<i32>} : memref<8x8x32xf32, #tpu.memory_space<vmem>>, vector<1x8x32xf32>,
    %c8_i32_380 = arith.constant 8 : i32
    %1288 = tpu.iota {dimensions = array<i32: 0>} : vector<8x8x1xi32>
    %c1_i32_381 = arith.constant 1 : i32
    %1289 = vector.broadcast %c1_i32_381 : i32 to vector<8x8x1xi32>
    %1290 = arith.addi %1288, %1289 : vector<8x8x1xi32>
    %c0_382 = arith.constant 0 : index
    %c0_383 = arith.constant 0 : index
    %c0_384 = arith.constant 0 : index
    %1291 = vector.load %arg5[%c0_382, %c0_383, %c0_384] : memref<1x8x1xi32, #tpu.memory_space<vmem>>, vector<1x8x1xi32>
    %1292 = vector.shape_cast %1291 : vector<1x8x1xi32> to vector<8x1xi32>
    %1293 = vector.shape_cast %1292 : vector<8x1xi32> to vector<1x8x1xi32>
    %1294 = vector.broadcast %1293 : vector<1x8x1xi32> to vector<8x8x1xi32>
    %1295 = arith.cmpi eq, %1290, %1294 : vector<8x8x1xi32>
    %1296 = arith.extui %1295 : vector<8x8x1xi1> to vector<8x8x1xi32>
    %1297 = arith.sitofp %1296 : vector<8x8x1xi32> to vector<8x8x1xf32>
    %c0_385 = arith.constant 0 : index
    %c0_386 = arith.constant 0 : index
    %c0_387 = arith.constant 0 : index
    %1298 = vector.load %arg7[%c0_385, %c0_386, %c0_387] : memref<8x8x32xf32, #tpu.memory_space<vmem>>, vector<8x8x32xf32>
    %1299 = vector.broadcast %1297 : vector<8x8x1xf32> to vector<8x8x32xf32>
    %1300 = arith.mulf %1298, %1299 : vector<8x8x32xf32>
    %cst_388 = arith.constant dense<0.000000e+00> : vector<8x32xf32>
    %1301 = vector.multi_reduction <add>, %1300, %cst_388 [0] : vector<8x8x32xf32> to vector<8x32xf32>
    %c0_389 = arith.constant 0 : index
    %c0_390 = arith.constant 0 : index
    %c0_391 = arith.constant 0 : index
    %1302 = vector.load %arg6[%c0_389, %c0_390, %c0_391] : memref<1x8x32xf32, #tpu.memory_space<vmem>>, vector<1x8x32xf32>
    %1303 = vector.shape_cast %1302 : vector<1x8x32xf32> to vector<8x32xf32>
    %1304 = vector.shape_cast %1301 : vector<8x32xf32> to vector<1x8x32xf32>
    tpu.vector_store %arg6[%c0_389, %c0_390, %c0_391], %1304 {strides = array<i32>} : memref<1x8x32xf32, #tpu.memory_space<vmem>>, vector<1x8x32xf32>,
    return
  }
  func.func @transform_0(%arg0: i32) -> (i32, i32, i32, i32) {
    %c0_i32 = arith.constant 0 : i32
    %c0_i32_0 = arith.constant 0 : i32
    %c0_i32_1 = arith.constant 0 : i32
    %c0_i32_2 = arith.constant 0 : i32
    return %arg0, %c0_i32, %c0_i32_0, %c0_i32_1 : i32, i32, i32, i32
  }
  func.func @transform_1(%arg0: i32) -> (i32, i32, i32, i32, i32) {
    %c0_i32 = arith.constant 0 : i32
    %c0_i32_0 = arith.constant 0 : i32
    %c0_i32_1 = arith.constant 0 : i32
    %c0_i32_2 = arith.constant 0 : i32
    %c0_i32_3 = arith.constant 0 : i32
    return %arg0, %c0_i32, %c0_i32_0, %c0_i32_1, %c0_i32_2 : i32, i32, i32, i32, i32
  }
  func.func @transform_2(%arg0: i32) -> (i32, i32, i32, i32, i32) {
    %c0_i32 = arith.constant 0 : i32
    %c0_i32_0 = arith.constant 0 : i32
    %c0_i32_1 = arith.constant 0 : i32
    %c0_i32_2 = arith.constant 0 : i32
    %c0_i32_3 = arith.constant 0 : i32
    return %arg0, %c0_i32, %c0_i32_0, %c0_i32_1, %c0_i32_2 : i32, i32, i32, i32, i32
  }
  func.func @transform_3(%arg0: i32) -> (i32, i32, i32, i32, i32) {
    %c0_i32 = arith.constant 0 : i32
    %c0_i32_0 = arith.constant 0 : i32
    %c0_i32_1 = arith.constant 0 : i32
    %c0_i32_2 = arith.constant 0 : i32
    %c0_i32_3 = arith.constant 0 : i32
    return %arg0, %c0_i32, %c0_i32_0, %c0_i32_1, %c0_i32_2 : i32, i32, i32, i32, i32
  }
  func.func @transform_4(%arg0: i32) -> (i32, i32, i32) {
    %c0_i32 = arith.constant 0 : i32
    %c0_i32_0 = arith.constant 0 : i32
    %c0_i32_1 = arith.constant 0 : i32
    return %arg0, %c0_i32, %c0_i32_0 : i32, i32, i32
  }
  func.func @transform_5(%arg0: i32) -> (i32, i32, i32) {
    %c0_i32 = arith.constant 0 : i32
    %c0_i32_0 = arith.constant 0 : i32
    %c0_i32_1 = arith.constant 0 : i32
    return %arg0, %c0_i32, %c0_i32_0 : i32, i32, i32
  }
}

</mosaic_0001>

<bundles_post_ra>
// kernel: match_model_forward.3
= control target key start
LH: loop header
LB: loop body
LE: loop exit
PB: predicated region body
PF: predicated region fallthrough
CT: control target
= control target key end

     0   :  { %v621_v0 = vmov 0.0   ;;  %vm622_vm0 = vmmov 0   ;;  %vm43_vm1 = vcmask 261120   ;;  %vm214_vm2 = vcmask 523264   ;;  %s840_s1 = inlined_call_operand.vmem [shape: f32[64,64], index: 1, kind: input, shape index: {}]   ;;  %s841_s0 = inlined_call_operand.vmem [shape: f32[2,8,32], index: 0, kind: input, shape index: {}]   ;;  %s842_s3 = inlined_call_operand.vmem [shape: f32[64,64], index: 3, kind: input, shape index: {}]   ;;  %s843_s2 = inlined_call_operand.vmem [shape: f32[1,64], index: 2, kind: input, shape index: {}]   ;;  %s844_s5 = inlined_call_operand.vmem [shape: f32[64,64], index: 5, kind: input, shape index: {}]   ;;  %s845_s4 = inlined_call_operand.vmem [shape: f32[1,64], index: 4, kind: input, shape index: {}]   ;;  %s846_s7 = inlined_call_operand.vmem [shape: f32[64,2], index: 7, kind: input, shape index: {}]   ;;  %s847_s6 = inlined_call_operand.vmem [shape: f32[1,64], index: 6, kind: input, shape index: {}]   ;;  %s848_s8 = inlined_call_operand.vmem [shape: f32[1,2], index: 8, kind: input, shape index: {}]   ;;  %s849_s9 = inlined_call_operand.vmem [shape: f32[8,2], index: 9, kind: output, shape index: {}]  }
   0x1   :  { %530 = vmatprep.subr.mxu1 %v621_v0  ;;  %v42_v1 = vld [vmem:[%s840_s1 + $0x38] sm:$0xff]  ;;  %v41_v2 = vld [vmem:[%s840_s1 + $0x30] sm:$0xff]  ;;  %538 = vmatprep.mubr.msk.f32.mxu1 %vm622_vm0, %v621_v0  ;;  %v40_v3 = vld [vmem:[%s840_s1 + $0x28] sm:$0xff]  ;;  %vm466_vm3 = vcmask 15360  }
   0x2   :  { %531 = vmatpush3.msra.mxu1 %v42_v1  ;;  %552 = vmatprep.subr.mxu0 %v621_v0  ;;  %v39_v4 = vld [vmem:[%s840_s1 + $0x20] sm:$0xff]  ;;  %v483_v5 = vld [vmem:[%s841_s0 + $0x8] sm:$0xff]  ;;  %v38_v6 = vld [vmem:[%s840_s1 + $0x18] sm:$0xff] }
   0x3   :  { %532 = vmatprep.subr.mxu1 %v621_v0  ;;  %568 = vmatprep.mubr.msk.f32.mxu0 %vm622_vm0, %v621_v0  ;;  %v37_v7 = vld [vmem:[%s840_s1 + $0x10] sm:$0xff]  ;;  %v36_v8 = vld [vmem:[%s840_s1 + $0x8] sm:$0xff]  ;;  %v35_v9 = vld [vmem:[%s840_s1] sm:$0xff] }
   0x4   :  { %533 = vmatpush3.msra.mxu1 %v41_v2  ;;  %v32_v10 = vld [vmem:[%s841_s0] sm:$0xff]  ;;  %v206_v11 = vld [vmem:[%s842_s3 + $0x38] sm:$0xff]  ;;  %v205_v12 = vld [vmem:[%s842_s3 + $0x30] sm:$0xff] }
   0x5   :  { %534 = vmatprep.subr.mxu1 %v621_v0  ;;  %553 = vmatpush3.msra.mxu0 %v206_v11  ;;  %v204_v13 = vld [vmem:[%s842_s3 + $0x28] sm:$0xff]  ;;  %v203_v14 = vld [vmem:[%s842_s3 + $0x20] sm:$0xff]  ;;  %v202_v15 = vld [vmem:[%s842_s3 + $0x18] sm:$0xff] }
   0x6   :  { %535 = vmatpush3.msra.mxu1 %v40_v3  ;;  %554 = vmatprep.subr.mxu0 %v621_v0  ;;  %v201_v16 = vld [vmem:[%s842_s3 + $0x10] sm:$0xff]  ;;  %v200_v17 = vld [vmem:[%s842_s3 + $0x8] sm:$0xff]  ;;  %v199_v18 = vld [vmem:[%s842_s3] sm:$0xff] }
   0x7   :  { %536 = vmatprep.subr.mxu1 %v621_v0  ;;  %555 = vmatpush3.msra.mxu0 %v205_v12  ;;  %v486_v22 = vld [vmem:[%s843_s2] ss:$0 sm:$0xff]  ;;  %v296_v27 = vld [vmem:[%s844_s5 + $0x38] sm:$0xff]  ;;  %v295_v28 = vld [vmem:[%s844_s5 + $0x30] sm:$0xff] }
   0x8   :  { %537 = vmatpush3.msra.mxu1 %v39_v4  ;;  %556 = vmatprep.subr.mxu0 %v621_v0  ;;  %v294_v29 = vld [vmem:[%s844_s5 + $0x28] sm:$0xff]  ;;  %v293_v30 = vld [vmem:[%s844_s5 + $0x20] sm:$0xff]  ;;  %v292_v31 = vld [vmem:[%s844_s5 + $0x18] sm:$0xff] }
   0x9   :  { %539 = vmatmul.mubr.msk.f32.vlgmr.msra.gmra.mxu1 %vm43_vm1, %v483_v5  ;;  %541 = vmatprep.subr.mxu1 %v621_v0  ;;  %v291_v32 = vld [vmem:[%s844_s5 + $0x10] sm:$0xff]  ;;  %v290_v33 = vld [vmem:[%s844_s5 + $0x8] sm:$0xff]  ;;  %v289_v34 = vld [vmem:[%s844_s5] sm:$0xff] }
   0xa   :  { %542 = vmatpush3.msra.mxu1 %v38_v6  ;;  %549 = vmatprep.mubr.msk.f32.mxu1 %vm622_vm0, %v621_v0  ;;  %v487_v35 = vld [vmem:[%s845_s4] ss:$0 sm:$0xff]  ;;  %v385_v40 = vld [vmem:[%s846_s7 + $0x38] sm:$0xff]  ;;  %v384_v41 = vld [vmem:[%s846_s7 + $0x30] sm:$0xff] }
   0xb   :  { %543 = vmatprep.subr.mxu1 %v621_v0  ;;  %557 = vmatpush3.msra.mxu0 %v204_v13  ;;  %v383_v42 = vld [vmem:[%s846_s7 + $0x28] sm:$0xff]  ;;  %v382_v43 = vld [vmem:[%s846_s7 + $0x20] sm:$0xff]  ;;  %v381_v44 = vld [vmem:[%s846_s7 + $0x18] sm:$0xff] }
   0xc   :  { %544 = vmatpush3.msra.mxu1 %v37_v7  ;;  %558 = vmatprep.subr.mxu0 %v621_v0  ;;  %v380_v45 = vld [vmem:[%s846_s7 + $0x10] sm:$0xff]  ;;  %v379_v46 = vld [vmem:[%s846_s7 + $0x8] sm:$0xff]  ;;  %v378_v47 = vld [vmem:[%s846_s7] sm:$0xff] }
   0xd   :  { %545 = vmatprep.subr.mxu1 %v621_v0  ;;  %559 = vmatpush3.msra.mxu0 %v203_v14  ;;  %v489_v48 = vld [vmem:[%s847_s6] ss:$0 sm:$0xff] }
   0xe   :  { %546 = vmatpush3.msra.mxu1 %v36_v8  ;;  %560 = vmatprep.subr.mxu0 %v621_v0  ;;  %v491_v53 = vld [vmem:[%s848_s8] ss:$0 sm:$0xff] }
   0xf   :  { %547 = vmatprep.subr.mxu1 %v621_v0  ;;  %561 = vmatpush3.msra.mxu0 %v202_v15 }
  0x10   :  { %548 = vmatpush3.msra.mxu1 %v35_v9  ;;  %562 = vmatprep.subr.mxu0 %v621_v0 }
  0x11   :  { %550 = vmatmul.mubr.msk.f32.vlgmr.msra.gmra.mxu1 %vm43_vm1, %v32_v10  ;;  %571 = vmatprep.subr.mxu1 %v621_v0 }
  0x12   :  { %587 = vmatprep.mubr.msk.f32.mxu1 %vm622_vm0, %v621_v0  ;;  %563 = vmatpush3.msra.mxu0 %v201_v16 }
  0x13   :  { %564 = vmatprep.subr.mxu0 %v621_v0  ;;  %572 = vmatpush3.msra.mxu1 %v296_v27 }
  0x14   :  { %565 = vmatpush3.msra.mxu0 %v200_v17  ;;  %573 = vmatprep.subr.mxu1 %v621_v0 }
  0x15   :  { %566 = vmatprep.subr.mxu0 %v621_v0  ;;  %574 = vmatpush3.msra.mxu1 %v295_v28 }
  0x16   :  { %567 = vmatpush3.msra.mxu0 %v199_v18  ;;  %575 = vmatprep.subr.mxu1 %v621_v0 }
  0x17   :  { %590 = vmatprep.subr.mxu0 %v621_v0  ;;  %576 = vmatpush3.msra.mxu1 %v294_v29 }
  0x18   :  { %577 = vmatprep.subr.mxu1 %v621_v0 }
  0x19   :  { %578 = vmatpush3.msra.mxu1 %v293_v30 }
  0x1a   :  { %579 = vmatprep.subr.mxu1 %v621_v0 }
  0x1b   :  { %580 = vmatpush3.msra.mxu1 %v292_v31 }
  0x1c   :  { %581 = vmatprep.subr.mxu1 %v621_v0 }
  0x1d   :  { %582 = vmatpush3.msra.mxu1 %v291_v32 }
  0x1e   :  { %583 = vmatprep.subr.mxu1 %v621_v0 }
  0x1f   :  { %584 = vmatpush3.msra.mxu1 %v290_v33 }
  0x20   :  { %585 = vmatprep.subr.mxu1 %v621_v0 }
  0x21   :  { %586 = vmatpush3.msra.mxu1 %v289_v34 }
  0xc9   :  { %v113_v19 = vpop.f32.mrf.mxu1 }
  0xcb   :  { %v540_v20 = vpop.f32.mrf.mxu1 }
  0xd1   :  { %v186_v21 = vpop.f32.mrf.mxu1 }
  0xd2   :  { %v187_v23 = vadd.f32 %v186_v21, %v113_v19 }
  0xd3   :  { %v551_v24 = vpop.f32.mrf.mxu1 }
  0xd4   :  { %v197_v25 = vadd.f32 %v486_v22, %v187_v23 }
  0xd6   :  { %611 = vtanh.f32 %v197_v25 }
  0xe3   :  { %v612_v26 = vpop.eup %611 }
  0xe4   :  { %569 = vmatmul.mubr.msk.f32.vlgmr.msra.gmra.mxu0 %vm214_vm2, %v612_v26 }
  0xe5   :  { %606 = vmatprep.mubr.msk.f32.mxu0 %vm622_vm0, %v621_v0  ;;  %591 = vmatpush3.msra.mxu0 %v385_v40 }
  0xe6   :  { %592 = vmatprep.subr.mxu0 %v621_v0 }
  0xe7   :  { %593 = vmatpush3.msra.mxu0 %v384_v41 }
  0xe8   :  { %594 = vmatprep.subr.mxu0 %v621_v0 }
  0xe9   :  { %595 = vmatpush3.msra.mxu0 %v383_v42 }
  0xea   :  { %596 = vmatprep.subr.mxu0 %v621_v0 }
  0xeb   :  { %597 = vmatpush3.msra.mxu0 %v382_v43 }
  0xec   :  { %598 = vmatprep.subr.mxu0 %v621_v0 }
  0xed   :  { %599 = vmatpush3.msra.mxu0 %v381_v44 }
  0xee   :  { %600 = vmatprep.subr.mxu0 %v621_v0 }
  0xef   :  { %601 = vmatpush3.msra.mxu0 %v380_v45 }
  0xf0   :  { %602 = vmatprep.subr.mxu0 %v621_v0 }
  0xf1   :  { %603 = vmatpush3.msra.mxu0 %v379_v46 }
  0xf2   :  { %604 = vmatprep.subr.mxu0 %v621_v0 }
  0xf3   :  { %605 = vmatpush3.msra.mxu0 %v378_v47 }
 0x1a4   :  { %v284_v36 = vpop.f32.mrf.mxu0 }
 0x1a5   :  { %v285_v37 = vadd.f32 %v487_v35, %v284_v36 }
 0x1a6   :  { %v570_v38 = vpop.f32.mrf.mxu0 }
 0x1a7   :  { %613 = vtanh.f32 %v285_v37 }
 0x1b4   :  { %v614_v39 = vpop.eup %613 }
 0x1b5   :  { %588 = vmatmul.mubr.msk.f32.vlgmr.msra.gmra.mxu1 %vm214_vm2, %v614_v39 }
 0x275   :  { %v373_v49 = vpop.f32.mrf.mxu1 }
 0x276   :  { %v374_v50 = vadd.f32 %v489_v48, %v373_v49 }
 0x277   :  { %v589_v51 = vpop.f32.mrf.mxu1 }
 0x278   :  { %615 = vtanh.f32 %v374_v50 }
 0x285   :  { %v616_v52 = vpop.eup %615 }
 0x286   :  { %607 = vmatmul.mubr.msk.f32.vlgmr.msra.gmra.mxu0 %vm214_vm2, %v616_v52 }
 0x346   :  { %v462_v54 = vpop.f32.mrf.mxu0 }
 0x347   :  { %v463_v55 = vadd.f32 %v491_v53, %v462_v54 }
 0x348   :  { %v608_v56 = vpop.f32.mrf.mxu0 }
 0x349   :  { %v467_v57 = vsel %vm466_vm3, %v463_v55, -inf }
 0x34a   :  { %468 = vmax.xlane.f32.xlu0 %v467_v57 }
 0x3d3   :  { %v469_v58 = vpop.xlane.xlu0 %468 }
 0x3d4   :  { %v470_v59 = vsub.f32 %v463_v55, %v469_v58 }
 0x3d6   :  { %v471_v60 = vmul.f32 1.442695, %v470_v59 }
 0x3d8   :  { %617 = vpow2.f32 %v471_v60 }
 0x3e5   :  { %v618_v61 = vpop.eup %617 }
 0x3e6   :  { %v473_v62 = vsel %vm466_vm3, %v618_v61, 0.0 }
 0x3e7   :  { %474 = vadd.xlane.f32.xlu0 %v473_v62 }
 0x470   :  { %v475_v63 = vpop.xlane.xlu0 %474 }
 0x471   :  { %619 = vrcp.f32 %v475_v63 }
 0x47e   :  { %v620_v0 = vpop.eup %619 }
 0x47f   :  { %v477_v1 = vmul.f32 %v620_v0, %v618_v61 }
 0x481   :  { %478 = vst.msk [vmem:[%s849_s9] sm:$0xff] %vm466_vm3, %v477_v1 }

// kernel: match_model_forward.2
= control target key start
LH: loop header
LB: loop body
LE: loop exit
PB: predicated region body
PF: predicated region fallthrough
CT: control target
= control target key end

     0   :  { %10 = vsyncpa [#allocation5], 0  ;;  %s14620_s0 = inlined_call_operand.vmem [shape: f32[2,8,8,32], index: 0, kind: input, shape index: {}]   ;;  %s14621_s1 = inlined_call_operand.vmem [shape: f32[2,3,4,32,32], index: 1, kind: input, shape index: {}]   ;;  %s14622_s2 = inlined_call_operand.hbm [shape: f32[2,3,4,32,32], index: 2, kind: input, shape index: {}]   ;;  %s14623_s3 = inlined_call_operand.vmem [shape: f32[2,3,4,1,32], index: 3, kind: input, shape index: {}]   ;;  %s14624_s4 = inlined_call_operand.vmem [shape: s32[2,8,1], index: 4, kind: input, shape index: {}]   ;;  %s14625_s5 = inlined_call_operand.vmem [shape: f32[2,8,32], index: 5, kind: output, shape index: {}]  }
   0x1   :  { %12 = vsyncpa [#allocation5 + $0x1], 0  ;;  %s12624_s18 = smov 0   ;;  %s12626_s19 = smov 0  }
   0x2   :  { %s12628_s20 = smov 0   ;;  %s12630_s21 = smov 0  }
   0x3 LB: > { %s12643_s22 = sadd.s32 4294967295, %s12586_s21   ;;  %s12646_s23 = sadd.s32 1, %s12586_s21   ;;  %s12586_s21 = sphi %s12630_s21, %s14634_s21   ;;  %s12582_s20 = sphi %s12628_s20, %s14633_s20   ;;  %s12578_s19 = sphi %s12626_s19, %s14632_s19   ;;  %s12574_s18 = sphi %s12624_s18, %s14631_s18  }
   0x4   : > { %s74_s24 = ssub.s32 %s12586_s21, %s12646_s23  ;;  %s77_s25 = sadd.s32 1, %s12582_s20 }
   0x5   : > { %p75_p0 = scmp.eq.s32.totalorder %s74_s24, 0  ;;  %p84_p1 = scmp.ne.s32.totalorder %s12582_s20, %s12578_s19 }
   0x6   : > { %p85_p2 = scmp.eq.s32.totalorder %s12586_s21, 0  ;;  %p90_p3 = scmp.ne.s32.totalorder %s12578_s19, %s12574_s18 }
   0x7   : > { %s12656_s26 = scalar_select %p75_p0, %s12582_s20, %s77_s25  }
   0x8   : > { %p86_p4 = por %p85_p2, %p84_p1  ;;  %p91_p5 = scmp.eq.s32.totalorder %s12643_s22, 0 }
   0x9   : > { %p12046_p6 = scmp.lt.s32.totalorder %s12586_s21, 2  ;;  %s208_s28 = sand.u32 1, %s12582_s20  }
   0xa   : > { %p12660_p7 = por %p91_p5, %p90_p3  ;;  %s12035_s29 = smul.u32 384, %s208_s28 }
   0xb   : > { %s12036_s30 = smul.u32 6144, %s12586_s21  ;;  %p12666_p8 = pnand %p12046_p6, %p86_p4 }
   0xc   : > { %s14627_s27 = scalar_select %p12660_p7, 1, 0 }
   0xd   : > { %s12673_s9 = scalar_lea.hbm %s14622_s2, %s12036_s30  ;;  %s212_s10 = scalar_lea.vmem [#allocation4], %s12035_s29 }
   0xe   : > { %s219_s11 = sshll.u32 %s212_s10, 4  ;;  %s12678_s12 = scalar_lea.sflag [#allocation5], %s208_s28  ;;  %s12675_s11 = int_to_ptr.vmem [resolvable:$true] %s219_s11 }
   0xf   : > { %s12524_s13 = scalar_lea.hbm %s12673_s9, 6144  ;;  %p12526_p11 = pneg %p12666_p8 }
  0x10   : > { %p12525_p10 = scmp.ne.s32.totalorder %s12673_s9, %s12524_s13  ;;  %s12529_s16 = scalar_lea.hbm %s14622_s2, 12288 }
  0x11   : > { %p12530_p0 = scmp.lt.s32.totalorder %s12673_s9, %s14622_s2  ;;  %p12531_p1 = scmp.lt.s32.totalorder %s12529_s16, %s12524_s13 }
  0x12   : > { %p12527_p12 = pnand %p12526_p11, %p12525_p10 }
  0x13   : > { %p12532_p2 = por %p12531_p1, %p12530_p0 }
  0x14   : > { %p12528_p13 = pneg %p12527_p12 }
  0x16   : > { %p12533_p3 = pnand %p12532_p2, %p12528_p13 }
  0x18   : > { %12536 = shalt.err (!%p12533_p3)
}
  0x19   : > { %s12537_s24 = scalar_lea.vmem %s12675_s11, 6144  ;;  %s12588_s25 = smov [#allocation4]  }
  0x1a   : > { %p12538_p4 = scmp.ne.s32.totalorder %s12675_s11, %s12537_s24  ;;  %s12542_s28 = sshll.u32 %s12588_s25, 4  ;;  %s12543_s28 = int_to_ptr.vmem [resolvable:$false] %s12542_s28 }
  0x1b   : > { %s12544_s29 = scalar_lea.vmem %s12543_s28, 12288  ;;  %p12545_p10 = scmp.lt.s32.totalorder %s12675_s11, %s12543_s28 }
  0x1c   : > { %p12540_p5 = pnand %p12538_p4, %p12526_p11  ;;  %p12546_p12 = scmp.lt.s32.totalorder %s12544_s29, %s12537_s24 }
  0x1e   : > { %p12541_p6 = pneg %p12540_p5  ;;  %p12547_p9 = por %p12546_p12, %p12545_p10 }
  0x20   : > { %p12548_p7 = pnand %p12547_p9, %p12541_p6 }
  0x22   : > { %12551 = shalt.err (!%p12548_p7)
}
  0x23   : > { %s12589_s30 = smov 128   ;;  %s12590_s7 = smov 8  }
  0x24   : > { %12045 = dma.hbm_to_vmem [thread:$0]  (!%p12666_p8), %s12673_s9, 6144, %s12675_s11, %s12678_s12, %s12589_s30, %s12589_s30, %s12590_s7  }
  0x25   : > { %p241_p11 = scmp.lt.s32.totalorder %s12586_s21, 3  ;;  %p14629_p13 = scmp.ge.s32.totalorder %s12586_s21, 1 }
  0x27   : > { %p242_p0 = pnand %p14629_p13, %p241_p11 }
  0x28   : > { %s247_s8 = sand.u32 (!%p242_p0), 1, %s12578_s19   ;;  %p14630_p7 = scmp.ne.s32.totalorder (!%p242_p0), %s14627_s27, 0 }
  0x29   : > { %245 = sbr.rel (%p242_p0) target bundleno = 6117 (0x17e5), region = 40  ;;  %s248_s13 = scalar_lea.sflag (!%p242_p0), [#allocation5], %s247_s8 }
  0x2a   : > { %s12037_s10 = smul.u32 (!%p242_p0), 384, %s247_s8 }
  0x2c   : > { %s12703_s14 = scalar_lea.vmem (!%p242_p0), [#allocation4], %s12037_s10 }
  0x2e   : > { %12569 = dma.done.wait (%p14630_p7), %s248_s13, 6144  }
  0x2f   : > { %12571 = vsyncadd (%p14630_p7), %s248_s13, 4294961152  ;;  %p295_p9 = scmp.lt.s32.totalorder %s12643_s22, 1  ;;  %vm367_vm0 = vcmask 261120   ;;  %v12768_v24 = vld [vmem:[%s12703_s14 + $0x18] sm:$0xff]  ;;  %v12591_v26 = vmov 0.0   ;;  %v12782_v27 = vld [vmem:[%s12703_s14 + $0x10] sm:$0xff] }
  0x30   : > { %v12771_v25 = vld [vmem:[%s12703_s14 + $0x38] sm:$0xff]  ;;  %v12785_v28 = vld [vmem:[%s12703_s14 + $0x30] sm:$0xff]  ;;  %v12796_v29 = vld [vmem:[%s12703_s14 + $0x8] sm:$0xff]  ;;  %vm12592_vm1 = vmmov 0  }
  0x31   : > { %s14636_s22 = smov (!%p295_p9, %s12643_s22), 1  ;;  %v12799_v30 = vld [vmem:[%s12703_s14 + $0x28] sm:$0xff]  ;;  %v12810_v31 = vld [vmem:[%s12703_s14] sm:$0xff]  ;;  %v12826_v33 = vld [vmem:[%s12703_s14 + $0x58] sm:$0xff] }
  0x32   : > { %s12038_s21 = smul.u32 384, %s14636_s22  ;;  %s10114_s27 = sshll.u32 %s14636_s22, 6  ;;  %v12813_v32 = vld [vmem:[%s12703_s14 + $0x20] sm:$0xff]  ;;  %v12829_v34 = vld [vmem:[%s12703_s14 + $0x78] sm:$0xff]  ;;  %v12836_v35 = vld [vmem:[%s12703_s14 + $0x50] sm:$0xff] }
  0x33   : > { %s12729_s16 = scalar_lea.vmem %s14620_s0, %s10114_s27  ;;  %v12839_v36 = vld [vmem:[%s12703_s14 + $0x70] sm:$0xff]  ;;  %v12846_v37 = vld [vmem:[%s12703_s14 + $0x48] sm:$0xff]  ;;  %v12856_v39 = vld [vmem:[%s12703_s14 + $0x40] sm:$0xff]  ;;  %s12039_s17 = smul.u32 12, %s14636_s22 }
  0x34   : > { %s12717_s11 = scalar_lea.vmem %s14621_s1, %s12038_s21  ;;  %v317_v8 = vld [vmem:[%s12729_s16] sm:$0xff]  ;;  %v318_v9 = vld [vmem:[%s12729_s16 + $0x8] sm:$0xff]  ;;  %v319_v12 = vld [vmem:[%s12729_s16 + $0x10] sm:$0xff]  ;;  %s9766_s28 = sshll.u32 %s14636_s22, 3 }
  0x35   : > { %v328_v0 = vld [vmem:[%s12717_s11 + $0x18] sm:$0xff]  ;;  %v327_v2 = vld [vmem:[%s12717_s11 + $0x10] sm:$0xff]  ;;  %v326_v4 = vld [vmem:[%s12717_s11 + $0x8] sm:$0xff]  ;;  %10747 = vmatprep.mubr.msk.f32.mxu0 %vm367_vm0, %v317_v8  ;;  %10767 = vmatprep.mubr.msk.f32.mxu1 %vm367_vm0, %v317_v8  ;;  %s12899_s25 = scalar_lea.vmem %s14623_s3, %s12039_s17  ;;  %s14001_s7 = scalar_lea.vmem %s14624_s4, %s9766_s28 }
  0x36   : > { %v332_v1 = vld [vmem:[%s12717_s11 + $0x38] sm:$0xff]  ;;  %10739 = vmatprep.subr.mxu0 %v328_v0  ;;  %v331_v3 = vld [vmem:[%s12717_s11 + $0x30] sm:$0xff]  ;;  %v330_v5 = vld [vmem:[%s12717_s11 + $0x28] sm:$0xff]  ;;  %s316_s13 = scalar_lea.vmem %s14625_s5, %s9766_s28 }
  0x37   : > { %10759 = vmatprep.subr.mxu1 %v332_v1  ;;  %10740 = vmatpush3.msra.mxu0 %v328_v0  ;;  %v325_v6 = vld [vmem:[%s12717_s11] sm:$0xff]  ;;  %v336_v10 = vld [vmem:[%s12717_s11 + $0x58] sm:$0xff]  ;;  %v335_v14 = vld [vmem:[%s12717_s11 + $0x50] sm:$0xff] }
  0x38   : > { %10760 = vmatpush3.msra.mxu1 %v332_v1  ;;  %10741 = vmatprep.subr.mxu0 %v327_v2  ;;  %v329_v7 = vld [vmem:[%s12717_s11 + $0x20] sm:$0xff]  ;;  %v340_v11 = vld [vmem:[%s12717_s11 + $0x78] sm:$0xff]  ;;  %v339_v15 = vld [vmem:[%s12717_s11 + $0x70] sm:$0xff] }
  0x39   : > { %10761 = vmatprep.subr.mxu1 %v331_v3  ;;  %10742 = vmatpush3.msra.mxu0 %v327_v2  ;;  %v320_v13 = vld [vmem:[%s12729_s16 + $0x18] sm:$0xff]  ;;  %v321_v16 = vld [vmem:[%s12729_s16 + $0x20] sm:$0xff]  ;;  %v322_v17 = vld [vmem:[%s12729_s16 + $0x28] sm:$0xff] }
  0x3a   : > { %10762 = vmatpush3.msra.mxu1 %v331_v3  ;;  %10743 = vmatprep.subr.mxu0 %v326_v4  ;;  %v334_v18 = vld [vmem:[%s12717_s11 + $0x48] sm:$0xff]  ;;  %v323_v20 = vld [vmem:[%s12729_s16 + $0x30] sm:$0xff]  ;;  %v324_v21 = vld [vmem:[%s12729_s16 + $0x38] sm:$0xff] }
  0x3b   : > { %10763 = vmatprep.subr.mxu1 %v330_v5  ;;  %10744 = vmatpush3.msra.mxu0 %v326_v4  ;;  %v338_v19 = vld [vmem:[%s12717_s11 + $0x68] sm:$0xff]  ;;  %v333_v22 = vld [vmem:[%s12717_s11 + $0x40] sm:$0xff] }
  0x3c   : > { %10764 = vmatpush3.msra.mxu1 %v330_v5  ;;  %10745 = vmatprep.subr.mxu0 %v325_v6  ;;  %v337_v23 = vld [vmem:[%s12717_s11 + $0x60] sm:$0xff]  ;;  %v12849_v38 = vld [vmem:[%s12703_s14 + $0x68] sm:$0xff] }
  0x3d   : > { %10765 = vmatprep.subr.mxu1 %v329_v7  ;;  %10746 = vmatpush3.msra.mxu0 %v325_v6  ;;  %v12861_v40 = vld [vmem:[%s12703_s14 + $0x60] sm:$0xff] }
  0x3e   : > { %10766 = vmatpush3.msra.mxu1 %v329_v7  ;;  %10748 = vmatmul.mubr.msk.f32.vlgmr.msra.gmra.mxu0 %vm367_vm0, %v318_v9  ;;  %v9768_v41 = vld [vmem:[%s12899_s25] ss:$0 sm:$0xff]  ;;  %v9777_v42 = vld [vmem:[%s12899_s25 + $0x1] ss:$0 sm:$0xff] }
  0x3f   : > { %10768 = vmatmul.mubr.msk.f32.vlgmr.msra.gmra.mxu1 %vm367_vm0, %v318_v9  ;;  %10779 = vmatprep.subr.mxu0 %v336_v10 }
  0x40   : > { %10799 = vmatprep.subr.mxu1 %v340_v11  ;;  %10780 = vmatpush3.msra.mxu0 %v336_v10  ;;  %v9795_v10 = vld [vmem:[%s12899_s25 + $0x3] ss:$0 sm:$0xff] }
  0x41   : > { %10800 = vmatpush3.msra.mxu1 %v340_v11  ;;  %10750 = vmatprep.mubr.msk.f32.mxu0 %vm367_vm0, %v319_v12 }
  0x42   : > { %10770 = vmatprep.mubr.msk.f32.mxu1 %vm367_vm0, %v319_v12  ;;  %10751 = vmatmul.mubr.msk.f32.gmra.mxu0 %vm367_vm0, %v320_v13 }
  0x43   : > { %10771 = vmatmul.mubr.msk.f32.gmra.mxu1 %vm367_vm0, %v320_v13  ;;  %10781 = vmatprep.subr.mxu0 %v335_v14 }
  0x44   : > { %10801 = vmatprep.subr.mxu1 %v339_v15  ;;  %10782 = vmatpush3.msra.mxu0 %v335_v14 }
  0x45   : > { %10802 = vmatpush3.msra.mxu1 %v339_v15  ;;  %10753 = vmatprep.mubr.msk.f32.mxu0 %vm367_vm0, %v321_v16 }
  0x46   : > { %10773 = vmatprep.mubr.msk.f32.mxu1 %vm367_vm0, %v321_v16  ;;  %10754 = vmatmul.mubr.msk.f32.gmra.mxu0 %vm367_vm0, %v322_v17 }
  0x47   : > { %10774 = vmatmul.mubr.msk.f32.gmra.mxu1 %vm367_vm0, %v322_v17  ;;  %10783 = vmatprep.subr.mxu0 %v334_v18 }
  0x48   : > { %10803 = vmatprep.subr.mxu1 %v338_v19  ;;  %10784 = vmatpush3.msra.mxu0 %v334_v18 }
  0x49   : > { %10804 = vmatpush3.msra.mxu1 %v338_v19  ;;  %10756 = vmatprep.mubr.msk.f32.mxu0 %vm367_vm0, %v323_v20 }
  0x4a   : > { %10776 = vmatprep.mubr.msk.f32.mxu1 %vm367_vm0, %v323_v20  ;;  %10757 = vmatmul.mubr.msk.f32.gmra.mxu0 %vm367_vm0, %v324_v21 }
  0x4b   : > { %10777 = vmatmul.mubr.msk.f32.gmra.mxu1 %vm367_vm0, %v324_v21  ;;  %10785 = vmatprep.subr.mxu0 %v333_v22 }
  0x4c   : > { %10805 = vmatprep.subr.mxu1 %v337_v23  ;;  %10786 = vmatpush3.msra.mxu0 %v333_v22 }
  0x4d   : > { %10806 = vmatpush3.msra.mxu1 %v337_v23  ;;  %10787 = vmatprep.mubr.msk.f32.mxu0 %vm367_vm0, %v317_v8 }
  0x4e   : > { %10807 = vmatprep.mubr.msk.f32.mxu1 %vm367_vm0, %v317_v8  ;;  %10788 = vmatmul.mubr.msk.f32.vlgmr.msra.gmra.mxu0 %vm367_vm0, %v318_v9 }
  0x4f   : > { %10808 = vmatmul.mubr.msk.f32.vlgmr.msra.gmra.mxu1 %vm367_vm0, %v318_v9  ;;  %10819 = vmatprep.subr.mxu0 %v12591_v26  ;;  %v9786_v9 = vld [vmem:[%s12899_s25 + $0x2] ss:$0 sm:$0xff] }
  0x50   : > { %10830 = vmatprep.subr.mxu1 %v12591_v26  ;;  %10820 = vmatpush3.msra.mxu0 %v12768_v24 }
  0x51   : > { %10831 = vmatpush3.msra.mxu1 %v12771_v25  ;;  %10790 = vmatprep.mubr.msk.f32.mxu0 %vm367_vm0, %v319_v12 }
  0x52   : > { %10810 = vmatprep.mubr.msk.f32.mxu1 %vm367_vm0, %v319_v12  ;;  %10791 = vmatmul.mubr.msk.f32.gmra.mxu0 %vm367_vm0, %v320_v13 }
  0x53   : > { %10811 = vmatmul.mubr.msk.f32.gmra.mxu1 %vm367_vm0, %v320_v13  ;;  %10821 = vmatprep.subr.mxu0 %v12591_v26 }
  0x54   : > { %10832 = vmatprep.subr.mxu1 %v12591_v26  ;;  %10822 = vmatpush3.msra.mxu0 %v12782_v27 }
  0x55   : > { %10833 = vmatpush3.msra.mxu1 %v12785_v28  ;;  %10793 = vmatprep.mubr.msk.f32.mxu0 %vm367_vm0, %v321_v16 }
  0x56   : > { %10813 = vmatprep.mubr.msk.f32.mxu1 %vm367_vm0, %v321_v16  ;;  %10794 = vmatmul.mubr.msk.f32.gmra.mxu0 %vm367_vm0, %v322_v17 }
  0x57   : > { %10814 = vmatmul.mubr.msk.f32.gmra.mxu1 %vm367_vm0, %v322_v17  ;;  %10823 = vmatprep.subr.mxu0 %v12591_v26 }
  0x58   : > { %10834 = vmatprep.subr.mxu1 %v12591_v26  ;;  %10824 = vmatpush3.msra.mxu0 %v12796_v29 }
  0x59   : > { %10835 = vmatpush3.msra.mxu1 %v12799_v30  ;;  %10796 = vmatprep.mubr.msk.f32.mxu0 %vm367_vm0, %v323_v20 }
  0x5a   : > { %10816 = vmatprep.mubr.msk.f32.mxu1 %vm367_vm0, %v323_v20  ;;  %10797 = vmatmul.mubr.msk.f32.gmra.mxu0 %vm367_vm0, %v324_v21 }
  0x5b   : > { %10817 = vmatmul.mubr.msk.f32.gmra.mxu1 %vm367_vm0, %v324_v21  ;;  %10825 = vmatprep.subr.mxu0 %v12591_v26 }
  0x5c   : > { %10836 = vmatprep.subr.mxu1 %v12591_v26  ;;  %10826 = vmatpush3.msra.mxu0 %v12810_v31 }
  0x5d   : > { %10837 = vmatpush3.msra.mxu1 %v12813_v32  ;;  %10827 = vmatprep.mubr.msk.f32.mxu0 %vm12592_vm1, %v12591_v26 }
  0x5e   : > { %10838 = vmatprep.mubr.msk.f32.mxu1 %vm12592_vm1, %v12591_v26  ;;  %10841 = vmatprep.subr.mxu0 %v12591_v26 }
  0x5f   : > { %10852 = vmatprep.subr.mxu1 %v12591_v26  ;;  %10828 = vmatmul.mubr.f32.vlgmr.msra.gmra.mxu0 %v12591_v26 }
  0x60   : > { %10839 = vmatmul.mubr.f32.vlgmr.msra.gmra.mxu1 %v12591_v26  ;;  %10842 = vmatpush3.msra.mxu0 %v12826_v33 }
  0x61   : > { %10853 = vmatpush3.msra.mxu1 %v12829_v34  ;;  %10843 = vmatprep.subr.mxu0 %v12591_v26 }
  0x62   : > { %10854 = vmatprep.subr.mxu1 %v12591_v26  ;;  %10844 = vmatpush3.msra.mxu0 %v12836_v35 }
  0x63   : > { %10855 = vmatpush3.msra.mxu1 %v12839_v36  ;;  %10845 = vmatprep.subr.mxu0 %v12591_v26 }
  0x64   : > { %10856 = vmatprep.subr.mxu1 %v12591_v26  ;;  %10846 = vmatpush3.msra.mxu0 %v12846_v37 }
  0x65   : > { %10857 = vmatpush3.msra.mxu1 %v12849_v38  ;;  %10847 = vmatprep.subr.mxu0 %v12591_v26 }
  0x66   : > { %10858 = vmatprep.subr.mxu1 %v12591_v26  ;;  %10848 = vmatpush3.msra.mxu0 %v12856_v39 }
  0x67   : > { %10849 = vmatprep.mubr.msk.f32.mxu0 %vm12592_vm1, %v12591_v26  ;;  %10859 = vmatpush3.msra.mxu1 %v12861_v40 }
  0x68   : > { %10860 = vmatprep.mubr.msk.f32.mxu1 %vm12592_vm1, %v12591_v26  ;;  %10850 = vmatmul.mubr.f32.vlgmr.msra.gmra.mxu0 %v12591_v26 }
  0x69   : > { %10861 = vmatmul.mubr.f32.vlgmr.msra.gmra.mxu1 %v12591_v26  ;;  %10863 = vmatprep.subr.mxu0 %v12591_v26 }
  0x6a   : > { %10874 = vmatprep.subr.mxu1 %v12591_v26  ;;  %10864 = vmatpush3.msra.mxu0 %v12768_v24 }
  0x6b   : > { %10875 = vmatpush3.msra.mxu1 %v12771_v25  ;;  %10865 = vmatprep.subr.mxu0 %v12591_v26 }
  0x6c   : > { %10876 = vmatprep.subr.mxu1 %v12591_v26  ;;  %10866 = vmatpush3.msra.mxu0 %v12782_v27 }
  0x6d   : > { %10877 = vmatpush3.msra.mxu1 %v12785_v28  ;;  %10867 = vmatprep.subr.mxu0 %v12591_v26 }
  0x6e   : > { %10878 = vmatprep.subr.mxu1 %v12591_v26  ;;  %10868 = vmatpush3.msra.mxu0 %v12796_v29 }
  0x6f   : > { %10879 = vmatpush3.msra.mxu1 %v12799_v30  ;;  %10869 = vmatprep.subr.mxu0 %v12591_v26 }
  0x70   : > { %10880 = vmatprep.subr.mxu1 %v12591_v26  ;;  %10870 = vmatpush3.msra.mxu0 %v12810_v31 }
  0x71   : > { %10881 = vmatpush3.msra.mxu1 %v12813_v32  ;;  %10871 = vmatprep.mubr.msk.f32.mxu0 %vm12592_vm1, %v12591_v26 }
  0x72   : > { %10882 = vmatprep.mubr.msk.f32.mxu1 %vm12592_vm1, %v12591_v26  ;;  %10885 = vmatprep.subr.mxu0 %v12591_v26 }
  0x73   : > { %10896 = vmatprep.subr.mxu1 %v12591_v26 }
  0xfe   : > { %v10749_v43 = vpop.f32.mrf.mxu0 }
  0xff   : > { %v10769_v44 = vpop.f32.mrf.mxu1  ;;  %v464_v45 = vadd.f32 %v10749_v43, %v9768_v41 }
 0x100   : > { %v583_v46 = vadd.f32 %v10769_v44, %v9777_v42  ;;  %v458_v47 = vpop.f32.mrf.mxu0 }
 0x101   : > { %v577_v48 = vpop.f32.mrf.mxu1  ;;  %498 = vst.msk [vmem:[#allocation3 + $0x20] sm:$0xff] %vm367_vm0, %v464_v45  ;;  %v459_v49 = vadd.f32 %v9768_v41, %v458_v47 }
 0x102   : > { %617 = vst.msk [vmem:[#allocation3 + $0x28] sm:$0xff] %vm367_vm0, %v583_v46  ;;  %v578_v50 = vadd.f32 %v9777_v42, %v577_v48  ;;  %v10752_v51 = vpop.f32.mrf.mxu0 }
 0x103   : > { %v10772_v52 = vpop.f32.mrf.mxu1  ;;  %497 = vst.msk [vmem:[#allocation3] sm:$0xff] %vm367_vm0, %v459_v49  ;;  %v474_v53 = vadd.f32 %v10752_v51, %v9768_v41 }
 0x104   : > { %616 = vst.msk [vmem:[#allocation3 + $0x8] sm:$0xff] %vm367_vm0, %v578_v50  ;;  %v593_v54 = vadd.f32 %v10772_v52, %v9777_v42  ;;  %v468_v55 = vpop.f32.mrf.mxu0 }
 0x105   : > { %v587_v56 = vpop.f32.mrf.mxu1  ;;  %500 = vst.msk [vmem:[#allocation3 + $0x60] sm:$0xff] %vm367_vm0, %v474_v53  ;;  %v469_v57 = vadd.f32 %v9768_v41, %v468_v55 }
 0x106   : > { %619 = vst.msk [vmem:[#allocation3 + $0x68] sm:$0xff] %vm367_vm0, %v593_v54  ;;  %v588_v58 = vadd.f32 %v9777_v42, %v587_v56  ;;  %v10755_v59 = vpop.f32.mrf.mxu0 }
 0x107   : > { %v10775_v60 = vpop.f32.mrf.mxu1  ;;  %499 = vst.msk [vmem:[#allocation3 + $0x40] sm:$0xff] %vm367_vm0, %v469_v57  ;;  %v484_v61 = vadd.f32 %v10755_v59, %v9768_v41 }
 0x108   : > { %618 = vst.msk [vmem:[#allocation3 + $0x48] sm:$0xff] %vm367_vm0, %v588_v58  ;;  %v603_v62 = vadd.f32 %v10775_v60, %v9777_v42  ;;  %v478_v63 = vpop.f32.mrf.mxu0 }
 0x109   : > { %v597_v0 = vpop.f32.mrf.mxu1  ;;  %502 = vst.msk [vmem:[#allocation3 + $0xa0] sm:$0xff] %vm367_vm0, %v484_v61  ;;  %v479_v1 = vadd.f32 %v9768_v41, %v478_v63 }
 0x10a   : > { %621 = vst.msk [vmem:[#allocation3 + $0xa8] sm:$0xff] %vm367_vm0, %v603_v62  ;;  %v598_v2 = vadd.f32 %v9777_v42, %v597_v0  ;;  %v10758_v3 = vpop.f32.mrf.mxu0  ;;  %v862_v62 = vld [vmem:[#allocation3] sm:$0xff] }
 0x10b   : > { %v10778_v4 = vpop.f32.mrf.mxu1  ;;  %501 = vst.msk [vmem:[#allocation3 + $0x80] sm:$0xff] %vm367_vm0, %v479_v1  ;;  %v494_v5 = vadd.f32 %v10758_v3, %v9768_v41  ;;  %v863_v0 = vld [vmem:[#allocation3 + $0x8] sm:$0xff] }
 0x10c   : > { %620 = vst.msk [vmem:[#allocation3 + $0x88] sm:$0xff] %vm367_vm0, %v598_v2  ;;  %v613_v6 = vadd.f32 %v10778_v4, %v9777_v42  ;;  %v488_v7 = vpop.f32.mrf.mxu0 }
 0x10d   : > { %v607_v8 = vpop.f32.mrf.mxu1  ;;  %504 = vst.msk [vmem:[#allocation3 + $0xe0] sm:$0xff] %vm367_vm0, %v494_v5  ;;  %v489_v11 = vadd.f32 %v9768_v41, %v488_v7 }
 0x10e   : > { %623 = vst.msk [vmem:[#allocation3 + $0xe8] sm:$0xff] %vm367_vm0, %v613_v6  ;;  %v608_v12 = vadd.f32 %v9777_v42, %v607_v8  ;;  %v10789_v13 = vpop.f32.mrf.mxu0 }
 0x10f   : > { %v10809_v14 = vpop.f32.mrf.mxu1  ;;  %503 = vst.msk [vmem:[#allocation3 + $0xc0] sm:$0xff] %vm367_vm0, %v489_v11  ;;  %v702_v15 = vadd.f32 %v10789_v13, %v9786_v9 }
 0x110   : > { %622 = vst.msk [vmem:[#allocation3 + $0xc8] sm:$0xff] %vm367_vm0, %v608_v12  ;;  %v821_v16 = vadd.f32 %v10809_v14, %v9795_v10  ;;  %v696_v17 = vpop.f32.mrf.mxu0 }
 0x111   : > { %v815_v18 = vpop.f32.mrf.mxu1  ;;  %736 = vst.msk [vmem:[#allocation3 + $0x30] sm:$0xff] %vm367_vm0, %v702_v15  ;;  %v697_v19 = vadd.f32 %v9786_v9, %v696_v17 }
 0x112   : > { %855 = vst.msk [vmem:[#allocation3 + $0x38] sm:$0xff] %vm367_vm0, %v821_v16  ;;  %v816_v20 = vadd.f32 %v9795_v10, %v815_v18  ;;  %v10792_v21 = vpop.f32.mrf.mxu0 }
 0x113   : > { %v10812_v22 = vpop.f32.mrf.mxu1  ;;  %735 = vst.msk [vmem:[#allocation3 + $0x10] sm:$0xff] %vm367_vm0, %v697_v19  ;;  %v712_v23 = vadd.f32 %v10792_v21, %v9786_v9 }
 0x114   : > { %854 = vst.msk [vmem:[#allocation3 + $0x18] sm:$0xff] %vm367_vm0, %v816_v20  ;;  %v831_v41 = vadd.f32 %v10812_v22, %v9795_v10  ;;  %v706_v42 = vpop.f32.mrf.mxu0 }
 0x115   : > { %v825_v43 = vpop.f32.mrf.mxu1  ;;  %738 = vst.msk [vmem:[#allocation3 + $0x70] sm:$0xff] %vm367_vm0, %v712_v23  ;;  %v707_v44 = vadd.f32 %v9786_v9, %v706_v42 }
 0x116   : > { %857 = vst.msk [vmem:[#allocation3 + $0x78] sm:$0xff] %vm367_vm0, %v831_v41  ;;  %v826_v45 = vadd.f32 %v9795_v10, %v825_v43  ;;  %v10795_v46 = vpop.f32.mrf.mxu0 }
 0x117   : > { %v10815_v47 = vpop.f32.mrf.mxu1  ;;  %737 = vst.msk [vmem:[#allocation3 + $0x50] sm:$0xff] %vm367_vm0, %v707_v44  ;;  %v722_v48 = vadd.f32 %v10795_v46, %v9786_v9 }
 0x118   : > { %856 = vst.msk [vmem:[#allocation3 + $0x58] sm:$0xff] %vm367_vm0, %v826_v45  ;;  %v841_v49 = vadd.f32 %v10815_v47, %v9795_v10  ;;  %v716_v50 = vpop.f32.mrf.mxu0 }
 0x119   : > { %v835_v51 = vpop.f32.mrf.mxu1  ;;  %740 = vst.msk [vmem:[#allocation3 + $0xb0] sm:$0xff] %vm367_vm0, %v722_v48  ;;  %v717_v52 = vadd.f32 %v9786_v9, %v716_v50 }
 0x11a   : > { %859 = vst.msk [vmem:[#allocation3 + $0xb8] sm:$0xff] %vm367_vm0, %v841_v49  ;;  %v836_v53 = vadd.f32 %v9795_v10, %v835_v51  ;;  %v10798_v54 = vpop.f32.mrf.mxu0  ;;  %v864_v14 = vld [vmem:[#allocation3 + $0x10] sm:$0xff]  ;;  %v1179_v49 = vld [vmem:[#allocation3 + $0x20] sm:$0xff]  ;;  %v1180_v51 = vld [vmem:[#allocation3 + $0x28] sm:$0xff] }
 0x11b   : > { %v10818_v55 = vpop.f32.mrf.mxu1  ;;  %739 = vst.msk [vmem:[#allocation3 + $0x90] sm:$0xff] %vm367_vm0, %v717_v52  ;;  %v732_v56 = vadd.f32 %v10798_v54, %v9786_v9 }
 0x11c   : > { %858 = vst.msk [vmem:[#allocation3 + $0x98] sm:$0xff] %vm367_vm0, %v836_v53  ;;  %v851_v57 = vadd.f32 %v10818_v55, %v9795_v10  ;;  %v726_v58 = vpop.f32.mrf.mxu0 }
 0x11d   : > { %v845_v59 = vpop.f32.mrf.mxu1  ;;  %742 = vst.msk [vmem:[#allocation3 + $0xf0] sm:$0xff] %vm367_vm0, %v732_v56  ;;  %v727_v60 = vadd.f32 %v9786_v9, %v726_v58  ;;  %v865_v9 = vld [vmem:[#allocation3 + $0x18] sm:$0xff] }
 0x11e   : > { %861 = vst.msk [vmem:[#allocation3 + $0xf8] sm:$0xff] %vm367_vm0, %v851_v57  ;;  %v846_v61 = vadd.f32 %v9795_v10, %v845_v59 }
 0x11f   : > { %741 = vst.msk [vmem:[#allocation3 + $0xd0] sm:$0xff] %vm367_vm0, %v727_v60  ;;  %v935_v63 = vpop.f32.mrf.mxu0 }
 0x120   : > { %860 = vst.msk [vmem:[#allocation3 + $0xd8] sm:$0xff] %vm367_vm0, %v846_v61  ;;  %v1012_v1 = vpop.f32.mrf.mxu1  ;;  %v939_v2 = vadd.f32 %v935_v63, %v862_v62  ;;  %v1182_v61 = vld [vmem:[#allocation3 + $0x38] sm:$0xff] }
 0x121   : > { %v1016_v3 = vadd.f32 %v1012_v1, %v863_v0  ;;  %v10829_v4 = vpop.f32.mrf.mxu0  ;;  %v1181_v1 = vld [vmem:[#allocation3 + $0x30] sm:$0xff] }
 0x122   : > { %v10840_v5 = vpop.f32.mrf.mxu1  ;;  %v9804_v6 = vmul.f32 -1.442695, %v939_v2 }
 0x123   : > { %v9805_v7 = vmul.f32 -1.442695, %v1016_v3 }
 0x124   : > { %12091 = vpow2.f32 %v9804_v6 }
 0x125   : > { %12093 = vpow2.f32 %v9805_v7 }
 0x128   : > { %v1089_v8 = vpop.f32.mrf.mxu0 }
 0x129   : > { %v1161_v11 = vpop.f32.mrf.mxu1  ;;  %v1093_v16 = vadd.f32 %v1089_v8, %v864_v14 }
 0x12a   : > { %v1165_v10 = vadd.f32 %v1161_v11, %v865_v9  ;;  %v10851_v12 = vpop.f32.mrf.mxu0 }
 0x12b   : > { %v10862_v13 = vpop.f32.mrf.mxu1 }
 0x12c   : > { %v9806_v15 = vmul.f32 -1.442695, %v1165_v10 }
 0x12e   : > { %12095 = vpow2.f32 %v9806_v15 }
 0x12f   : > { %12097 = vtanh.f32 %v1093_v16 }
 0x131   : > { %v12092_v17 = vpop.eup %12091 }
 0x132   : > { %v12094_v18 = vpop.eup %12093  ;;  %v943_v19 = vadd.f32 1.0, %v12092_v17 }
 0x133   : > { %v1020_v20 = vadd.f32 1.0, %v12094_v18 }
 0x134   : > { %12099 = vrcp.f32 %v943_v19  ;;  %v1497_v19 = vld [vmem:[#allocation3 + $0x40] sm:$0xff] }
 0x135   : > { %12101 = vrcp.f32 %v1020_v20 }
 0x13b   : > { %v12096_v21 = vpop.eup %12095 }
 0x13c   : > { %v12098_v22 = vpop.eup %12097  ;;  %v1169_v43 = vadd.f32 1.0, %v12096_v21  ;;  %v1498_v21 = vld [vmem:[#allocation3 + $0x48] sm:$0xff] }
 0x13e   : > { %12103 = vrcp.f32 %v1169_v43 }
 0x141   : > { %v12100_v23 = vpop.eup %12099 }
 0x142   : > { %v12102_v41 = vpop.eup %12101  ;;  %v1173_v42 = vmul.f32 %v12100_v23, %v12098_v22 }
 0x143   : > { %v1172_v44 = vmul.f32 0.0, %v12102_v41 }
 0x145   : > { %v12937_v45 = vadd.f32 %v1173_v42, %v1172_v44 }
 0x147   : > { %12105 = vtanh.f32 %v12937_v45 }
 0x14b   : > { %v12104_v46 = vpop.eup %12103 }
 0x154   : > { %v12106_v47 = vpop.eup %12105 }
 0x155   : > { %v1176_v48 = vmul.f32 %v12106_v47, %v12104_v46 }
 0x157   : > { %1177 = vst.msk [vmem:[#allocation2] sm:$0xff] %vm367_vm0, %v1176_v48  ;;  %10872 = vmatmul.mubr.msk.f32.vlgmr.msra.gmra.mxu0 %vm367_vm0, %v1176_v48  ;;  %10883 = vmatmul.mubr.msk.f32.vlgmr.msra.gmra.mxu1 %vm367_vm0, %v1176_v48 }
 0x158   : > { %10886 = vmatpush3.msra.mxu0 %v12826_v33  ;;  %10897 = vmatpush3.msra.mxu1 %v12829_v34 }
 0x159   : > { %10887 = vmatprep.subr.mxu0 %v12591_v26  ;;  %10898 = vmatprep.subr.mxu1 %v12591_v26 }
 0x15a   : > { %10888 = vmatpush3.msra.mxu0 %v12836_v35  ;;  %10899 = vmatpush3.msra.mxu1 %v12839_v36 }
 0x15b   : > { %10889 = vmatprep.subr.mxu0 %v12591_v26  ;;  %10900 = vmatprep.subr.mxu1 %v12591_v26 }
 0x15c   : > { %10890 = vmatpush3.msra.mxu0 %v12846_v37  ;;  %10901 = vmatpush3.msra.mxu1 %v12849_v38 }
 0x15d   : > { %10891 = vmatprep.subr.mxu0 %v12591_v26  ;;  %10902 = vmatprep.subr.mxu1 %v12591_v26 }
 0x15e   : > { %10892 = vmatpush3.msra.mxu0 %v12856_v39  ;;  %10893 = vmatprep.mubr.msk.f32.mxu0 %vm12592_vm1, %v12591_v26 }
 0x15f   : > { %10903 = vmatpush3.msra.mxu1 %v12861_v40  ;;  %10904 = vmatprep.mubr.msk.f32.mxu1 %vm12592_vm1, %v12591_v26 }
 0x160   : > { %10894 = vmatmul.mubr.msk.f32.vlgmr.msra.gmra.mxu0 %vm367_vm0, %v1176_v48  ;;  %10905 = vmatmul.mubr.msk.f32.vlgmr.msra.gmra.mxu1 %vm367_vm0, %v1176_v48  ;;  %v1500_v48 = vld [vmem:[#allocation3 + $0x58] sm:$0xff] }
 0x161   : > { %10907 = vmatprep.subr.mxu0 %v12591_v26  ;;  %10918 = vmatprep.subr.mxu1 %v12591_v26 }
 0x162   : > { %10908 = vmatpush3.msra.mxu0 %v12768_v24  ;;  %10919 = vmatpush3.msra.mxu1 %v12771_v25 }
 0x163   : > { %10909 = vmatprep.subr.mxu0 %v12591_v26  ;;  %10920 = vmatprep.subr.mxu1 %v12591_v26 }
 0x164   : > { %10910 = vmatpush3.msra.mxu0 %v12782_v27  ;;  %10921 = vmatpush3.msra.mxu1 %v12785_v28 }
 0x165   : > { %10911 = vmatprep.subr.mxu0 %v12591_v26  ;;  %10922 = vmatprep.subr.mxu1 %v12591_v26 }
 0x166   : > { %10912 = vmatpush3.msra.mxu0 %v12796_v29  ;;  %10923 = vmatpush3.msra.mxu1 %v12799_v30 }
 0x167   : > { %10913 = vmatprep.subr.mxu0 %v12591_v26  ;;  %10924 = vmatprep.subr.mxu1 %v12591_v26 }
 0x168   : > { %10914 = vmatpush3.msra.mxu0 %v12810_v31  ;;  %10925 = vmatpush3.msra.mxu1 %v12813_v32 }
 0x169   : > { %10915 = vmatprep.mubr.msk.f32.mxu0 %vm12592_vm1, %v12591_v26  ;;  %10926 = vmatprep.mubr.msk.f32.mxu1 %vm12592_vm1, %v12591_v26 }
 0x16a   : > { %10929 = vmatprep.subr.mxu0 %v12591_v26  ;;  %10940 = vmatprep.subr.mxu1 %v12591_v26 }
 0x217   : > { %v1252_v50 = vpop.f32.mrf.mxu0  ;;  %v1329_v52 = vpop.f32.mrf.mxu1 }
 0x218   : > { %v1256_v53 = vadd.f32 %v1252_v50, %v1179_v49  ;;  %v1333_v54 = vadd.f32 %v1329_v52, %v1180_v51  ;;  %v1499_v52 = vld [vmem:[#allocation3 + $0x50] sm:$0xff] }
 0x219   : > { %v10873_v55 = vpop.f32.mrf.mxu0  ;;  %v10884_v56 = vpop.f32.mrf.mxu1 }
 0x21a   : > { %v9808_v57 = vmul.f32 -1.442695, %v1256_v53  ;;  %v9810_v58 = vmul.f32 -1.442695, %v1333_v54 }
 0x21c   : > { %12107 = vpow2.f32 %v9808_v57 }
 0x21d   : > { %12109 = vpow2.f32 %v9810_v58 }
 0x220   : > { %v1406_v59 = vpop.f32.mrf.mxu0  ;;  %v1478_v60 = vpop.f32.mrf.mxu1 }
 0x221   : > { %v1482_v62 = vadd.f32 %v1478_v60, %v1182_v61  ;;  %v1410_v3 = vadd.f32 %v1406_v59, %v1181_v1 }
 0x222   : > { %v10895_v63 = vpop.f32.mrf.mxu0  ;;  %v10906_v0 = vpop.f32.mrf.mxu1 }
 0x223   : > { %v9813_v2 = vmul.f32 -1.442695, %v1482_v62 }
 0x225   : > { %12111 = vpow2.f32 %v9813_v2 }
 0x226   : > { %12113 = vtanh.f32 %v1410_v3 }
 0x229   : > { %v12108_v4 = vpop.eup %12107 }
 0x22a   : > { %v12110_v5 = vpop.eup %12109  ;;  %v1260_v6 = vadd.f32 1.0, %v12108_v4 }
 0x22b   : > { %v1337_v7 = vadd.f32 1.0, %v12110_v5 }
 0x22c   : > { %12115 = vrcp.f32 %v1260_v6  ;;  %v1815_v6 = vld [vmem:[#allocation3 + $0x60] sm:$0xff] }
 0x22d   : > { %12117 = vrcp.f32 %v1337_v7 }
 0x232   : > { %v12112_v8 = vpop.eup %12111 }
 0x233   : > { %v12114_v11 = vpop.eup %12113  ;;  %v1486_v13 = vadd.f32 1.0, %v12112_v8  ;;  %v1816_v8 = vld [vmem:[#allocation3 + $0x68] sm:$0xff] }
 0x235   : > { %12119 = vrcp.f32 %v1486_v13 }
 0x239   : > { %v12116_v9 = vpop.eup %12115 }
 0x23a   : > { %v12118_v10 = vpop.eup %12117  ;;  %v1490_v12 = vmul.f32 %v12116_v9, %v12114_v11 }
 0x23b   : > { %v1489_v14 = vmul.f32 %v12118_v10, %v12937_v45 }
 0x23d   : > { %v12986_v15 = vadd.f32 %v1490_v12, %v1489_v14 }
 0x23f   : > { %12121 = vtanh.f32 %v12986_v15 }
 0x242   : > { %v12120_v16 = vpop.eup %12119 }
 0x24c   : > { %v12122_v17 = vpop.eup %12121 }
 0x24d   : > { %v1493_v18 = vmul.f32 %v12122_v17, %v12120_v16 }
 0x24f   : > { %1495 = vst.msk [vmem:[#allocation2 + $0x8] sm:$0xff] %vm367_vm0, %v1493_v18  ;;  %10916 = vmatmul.mubr.msk.f32.vlgmr.msra.gmra.mxu0 %vm367_vm0, %v1493_v18  ;;  %10927 = vmatmul.mubr.msk.f32.vlgmr.msra.gmra.mxu1 %vm367_vm0, %v1493_v18 }
 0x250   : > { %10930 = vmatpush3.msra.mxu0 %v12826_v33  ;;  %10941 = vmatpush3.msra.mxu1 %v12829_v34 }
 0x251   : > { %10931 = vmatprep.subr.mxu0 %v12591_v26  ;;  %10942 = vmatprep.subr.mxu1 %v12591_v26 }
 0x252   : > { %10932 = vmatpush3.msra.mxu0 %v12836_v35  ;;  %10943 = vmatpush3.msra.mxu1 %v12839_v36 }
 0x253   : > { %10933 = vmatprep.subr.mxu0 %v12591_v26  ;;  %10944 = vmatprep.subr.mxu1 %v12591_v26 }
 0x254   : > { %10934 = vmatpush3.msra.mxu0 %v12846_v37  ;;  %10945 = vmatpush3.msra.mxu1 %v12849_v38 }
 0x255   : > { %10935 = vmatprep.subr.mxu0 %v12591_v26  ;;  %10946 = vmatprep.subr.mxu1 %v12591_v26 }
 0x256   : > { %10936 = vmatpush3.msra.mxu0 %v12856_v39  ;;  %10937 = vmatprep.mubr.msk.f32.mxu0 %vm12592_vm1, %v12591_v26 }
 0x257   : > { %10947 = vmatpush3.msra.mxu1 %v12861_v40  ;;  %10948 = vmatprep.mubr.msk.f32.mxu1 %vm12592_vm1, %v12591_v26 }
 0x258   : > { %10938 = vmatmul.mubr.msk.f32.vlgmr.msra.gmra.mxu0 %vm367_vm0, %v1493_v18  ;;  %10949 = vmatmul.mubr.msk.f32.vlgmr.msra.gmra.mxu1 %vm367_vm0, %v1493_v18  ;;  %v1818_v18 = vld [vmem:[#allocation3 + $0x78] sm:$0xff] }
 0x259   : > { %10951 = vmatprep.subr.mxu0 %v12591_v26  ;;  %10962 = vmatprep.subr.mxu1 %v12591_v26 }
 0x25a   : > { %10952 = vmatpush3.msra.mxu0 %v12768_v24  ;;  %10963 = vmatpush3.msra.mxu1 %v12771_v25 }
 0x25b   : > { %10953 = vmatprep.subr.mxu0 %v12591_v26  ;;  %10964 = vmatprep.subr.mxu1 %v12591_v26 }
 0x25c   : > { %10954 = vmatpush3.msra.mxu0 %v12782_v27  ;;  %10965 = vmatpush3.msra.mxu1 %v12785_v28 }
 0x25d   : > { %10955 = vmatprep.subr.mxu0 %v12591_v26  ;;  %10966 = vmatprep.subr.mxu1 %v12591_v26 }
 0x25e   : > { %10956 = vmatpush3.msra.mxu0 %v12796_v29  ;;  %10967 = vmatpush3.msra.mxu1 %v12799_v30 }
 0x25f   : > { %10957 = vmatprep.subr.mxu0 %v12591_v26  ;;  %10968 = vmatprep.subr.mxu1 %v12591_v26 }
 0x260   : > { %10958 = vmatpush3.msra.mxu0 %v12810_v31  ;;  %10969 = vmatpush3.msra.mxu1 %v12813_v32 }
 0x261   : > { %10959 = vmatprep.mubr.msk.f32.mxu0 %vm12592_vm1, %v12591_v26  ;;  %10970 = vmatprep.mubr.msk.f32.mxu1 %vm12592_vm1, %v12591_v26 }
 0x262   : > { %10973 = vmatprep.subr.mxu0 %v12591_v26  ;;  %10984 = vmatprep.subr.mxu1 %v12591_v26 }
 0x30f   : > { %v1570_v20 = vpop.f32.mrf.mxu0  ;;  %v1647_v22 = vpop.f32.mrf.mxu1 }
 0x310   : > { %v1574_v23 = vadd.f32 %v1570_v20, %v1497_v19  ;;  %v1651_v41 = vadd.f32 %v1647_v22, %v1498_v21  ;;  %v1817_v22 = vld [vmem:[#allocation3 + $0x70] sm:$0xff] }
 0x311   : > { %v10917_v42 = vpop.f32.mrf.mxu0  ;;  %v10928_v43 = vpop.f32.mrf.mxu1 }
 0x312   : > { %v9815_v44 = vmul.f32 -1.442695, %v1574_v23  ;;  %v9817_v45 = vmul.f32 -1.442695, %v1651_v41 }
 0x314   : > { %12123 = vpow2.f32 %v9815_v44 }
 0x315   : > { %12125 = vpow2.f32 %v9817_v45 }
 0x318   : > { %v1724_v46 = vpop.f32.mrf.mxu0  ;;  %v1796_v47 = vpop.f32.mrf.mxu1 }
 0x319   : > { %v1800_v49 = vadd.f32 %v1796_v47, %v1500_v48  ;;  %v1728_v54 = vadd.f32 %v1724_v46, %v1499_v52 }
 0x31a   : > { %v10939_v50 = vpop.f32.mrf.mxu0  ;;  %v10950_v51 = vpop.f32.mrf.mxu1 }
 0x31b   : > { %v9820_v53 = vmul.f32 -1.442695, %v1800_v49 }
 0x31d   : > { %12127 = vpow2.f32 %v9820_v53 }
 0x31e   : > { %12129 = vtanh.f32 %v1728_v54 }
 0x321   : > { %v12124_v55 = vpop.eup %12123 }
 0x322   : > { %v12126_v56 = vpop.eup %12125  ;;  %v1578_v57 = vadd.f32 1.0, %v12124_v55 }
 0x323   : > { %v1655_v58 = vadd.f32 1.0, %v12126_v56 }
 0x324   : > { %12131 = vrcp.f32 %v1578_v57  ;;  %v2135_v57 = vld [vmem:[#allocation3 + $0x90] sm:$0xff] }
 0x325   : > { %12133 = vrcp.f32 %v1655_v58 }
 0x32a   : > { %v12128_v59 = vpop.eup %12127 }
 0x32b   : > { %v12130_v60 = vpop.eup %12129  ;;  %v1804_v0 = vadd.f32 1.0, %v12128_v59 }
 0x32d   : > { %12135 = vrcp.f32 %v1804_v0 }
 0x331   : > { %v12132_v61 = vpop.eup %12131 }
 0x332   : > { %v12134_v62 = vpop.eup %12133  ;;  %v1808_v63 = vmul.f32 %v12132_v61, %v12130_v60 }
 0x333   : > { %v1807_v1 = vmul.f32 %v12134_v62, %v12986_v15 }
 0x335   : > { %v13035_v2 = vadd.f32 %v1808_v63, %v1807_v1 }
 0x337   : > { %12137 = vtanh.f32 %v13035_v2 }
 0x33a   : > { %v12136_v3 = vpop.eup %12135 }
 0x344   : > { %v12138_v4 = vpop.eup %12137 }
 0x345   : > { %v1811_v5 = vmul.f32 %v12138_v4, %v12136_v3 }
 0x347   : > { %1813 = vst.msk [vmem:[#allocation2 + $0x10] sm:$0xff] %vm367_vm0, %v1811_v5  ;;  %10960 = vmatmul.mubr.msk.f32.vlgmr.msra.gmra.mxu0 %vm367_vm0, %v1811_v5  ;;  %10971 = vmatmul.mubr.msk.f32.vlgmr.msra.gmra.mxu1 %vm367_vm0, %v1811_v5 }
 0x348   : > { %10974 = vmatpush3.msra.mxu0 %v12826_v33  ;;  %10985 = vmatpush3.msra.mxu1 %v12829_v34 }
 0x349   : > { %10975 = vmatprep.subr.mxu0 %v12591_v26  ;;  %10986 = vmatprep.subr.mxu1 %v12591_v26 }
 0x34a   : > { %10976 = vmatpush3.msra.mxu0 %v12836_v35  ;;  %10987 = vmatpush3.msra.mxu1 %v12839_v36 }
 0x34b   : > { %10977 = vmatprep.subr.mxu0 %v12591_v26  ;;  %10988 = vmatprep.subr.mxu1 %v12591_v26 }
 0x34c   : > { %10978 = vmatpush3.msra.mxu0 %v12846_v37  ;;  %10989 = vmatpush3.msra.mxu1 %v12849_v38 }
 0x34d   : > { %10979 = vmatprep.subr.mxu0 %v12591_v26  ;;  %10990 = vmatprep.subr.mxu1 %v12591_v26 }
 0x34e   : > { %10980 = vmatpush3.msra.mxu0 %v12856_v39  ;;  %10981 = vmatprep.mubr.msk.f32.mxu0 %vm12592_vm1, %v12591_v26 }
 0x34f   : > { %10991 = vmatpush3.msra.mxu1 %v12861_v40  ;;  %10992 = vmatprep.mubr.msk.f32.mxu1 %vm12592_vm1, %v12591_v26 }
 0x350   : > { %10982 = vmatmul.mubr.msk.f32.vlgmr.msra.gmra.mxu0 %vm367_vm0, %v1811_v5  ;;  %10993 = vmatmul.mubr.msk.f32.vlgmr.msra.gmra.mxu1 %vm367_vm0, %v1811_v5 }
 0x351   : > { %10995 = vmatprep.subr.mxu0 %v12591_v26  ;;  %11006 = vmatprep.subr.mxu1 %v12591_v26 }
 0x352   : > { %10996 = vmatpush3.msra.mxu0 %v12768_v24  ;;  %11007 = vmatpush3.msra.mxu1 %v12771_v25 }
 0x353   : > { %10997 = vmatprep.subr.mxu0 %v12591_v26  ;;  %11008 = vmatprep.subr.mxu1 %v12591_v26 }
 0x354   : > { %10998 = vmatpush3.msra.mxu0 %v12782_v27  ;;  %11009 = vmatpush3.msra.mxu1 %v12785_v28 }
 0x355   : > { %10999 = vmatprep.subr.mxu0 %v12591_v26  ;;  %11010 = vmatprep.subr.mxu1 %v12591_v26 }
 0x356   : > { %11000 = vmatpush3.msra.mxu0 %v12796_v29  ;;  %11011 = vmatpush3.msra.mxu1 %v12799_v30 }
 0x357   : > { %11001 = vmatprep.subr.mxu0 %v12591_v26  ;;  %11012 = vmatprep.subr.mxu1 %v12591_v26 }
 0x358   : > { %11002 = vmatpush3.msra.mxu0 %v12810_v31  ;;  %11013 = vmatpush3.msra.mxu1 %v12813_v32 }
 0x359   : > { %11003 = vmatprep.mubr.msk.f32.mxu0 %vm12592_vm1, %v12591_v26  ;;  %11014 = vmatprep.mubr.msk.f32.mxu1 %vm12592_vm1, %v12591_v26 }
 0x35a   : > { %11017 = vmatprep.subr.mxu0 %v12591_v26  ;;  %11028 = vmatprep.subr.mxu1 %v12591_v26 }
 0x407   : > { %v1888_v7 = vpop.f32.mrf.mxu0  ;;  %v1965_v11 = vpop.f32.mrf.mxu1 }
 0x408   : > { %v1892_v9 = vadd.f32 %v1888_v7, %v1815_v6  ;;  %v1969_v10 = vadd.f32 %v1965_v11, %v1816_v8 }
 0x409   : > { %v10961_v12 = vpop.f32.mrf.mxu0  ;;  %v10972_v13 = vpop.f32.mrf.mxu1 }
 0x40a   : > { %v9822_v14 = vmul.f32 -1.442695, %v1892_v9  ;;  %v9824_v15 = vmul.f32 -1.442695, %v1969_v10  ;;  %v13140_v10 = vld [vmem:[%s12703_s14 + $0x58] sm:$0xff]  ;;  %v13150_v13 = vld [vmem:[%s12703_s14 + $0x50] sm:$0xff] }
 0x40b   : > { %v13144_v12 = vld [vmem:[%s12703_s14 + $0x78] sm:$0xff] }
 0x40c   : > { %12139 = vpow2.f32 %v9822_v14  ;;  %v13154_v14 = vld [vmem:[%s12703_s14 + $0x70] sm:$0xff] }
 0x40d   : > { %12141 = vpow2.f32 %v9824_v15  ;;  %v13160_v15 = vld [vmem:[%s12703_s14 + $0x48] sm:$0xff] }
 0x410   : > { %v2042_v16 = vpop.f32.mrf.mxu0  ;;  %v2114_v17 = vpop.f32.mrf.mxu1 }
 0x411   : > { %v2118_v19 = vadd.f32 %v2114_v17, %v1818_v18  ;;  %v2046_v41 = vadd.f32 %v2042_v16, %v1817_v22  ;;  %v13164_v16 = vld [vmem:[%s12703_s14 + $0x68] sm:$0xff]  ;;  %v13170_v17 = vld [vmem:[%s12703_s14 + $0x40] sm:$0xff]  ;;  %v13200_v22 = vld [vmem:[%s12703_s14 + $0x30] sm:$0xff] }
 0x412   : > { %v10983_v20 = vpop.f32.mrf.mxu0  ;;  %v10994_v21 = vpop.f32.mrf.mxu1  ;;  %v13176_v18 = vld [vmem:[%s12703_s14 + $0x60] sm:$0xff] }
 0x413   : > { %v9827_v23 = vmul.f32 -1.442695, %v2118_v19  ;;  %v13186_v19 = vld [vmem:[%s12703_s14 + $0x18] sm:$0xff]  ;;  %v13196_v21 = vld [vmem:[%s12703_s14 + $0x10] sm:$0xff] }
 0x414   : > { %v13190_v20 = vld [vmem:[%s12703_s14 + $0x38] sm:$0xff] }
 0x415   : > { %12143 = vpow2.f32 %v9827_v23  ;;  %v13206_v23 = vld [vmem:[%s12703_s14 + $0x8] sm:$0xff] }
 0x416   : > { %12145 = vtanh.f32 %v2046_v41  ;;  %v13210_v41 = vld [vmem:[%s12703_s14 + $0x28] sm:$0xff] }
 0x419   : > { %v12140_v42 = vpop.eup %12139 }
 0x41a   : > { %v12142_v43 = vpop.eup %12141  ;;  %v1896_v44 = vadd.f32 1.0, %v12140_v42  ;;  %v13216_v42 = vld [vmem:[%s12703_s14] sm:$0xff] }
 0x41b   : > { %v1973_v45 = vadd.f32 1.0, %v12142_v43  ;;  %v13220_v43 = vld [vmem:[%s12703_s14 + $0x20] sm:$0xff] }
 0x41c   : > { %12147 = vrcp.f32 %v1896_v44  ;;  %v2451_v44 = vld [vmem:[#allocation3 + $0xa0] sm:$0xff] }
 0x41d   : > { %12149 = vrcp.f32 %v1973_v45 }
 0x422   : > { %v12144_v46 = vpop.eup %12143 }
 0x423   : > { %v12146_v47 = vpop.eup %12145  ;;  %v2122_v51 = vadd.f32 1.0, %v12144_v46  ;;  %v2452_v46 = vld [vmem:[#allocation3 + $0xa8] sm:$0xff] }
 0x425   : > { %12151 = vrcp.f32 %v2122_v51 }
 0x429   : > { %v12148_v48 = vpop.eup %12147 }
 0x42a   : > { %v12150_v49 = vpop.eup %12149  ;;  %v2126_v50 = vmul.f32 %v12148_v48, %v12146_v47 }
 0x42b   : > { %v2125_v52 = vmul.f32 %v12150_v49, %v13035_v2 }
 0x42d   : > { %v13084_v53 = vadd.f32 %v2126_v50, %v2125_v52 }
 0x42f   : > { %12153 = vtanh.f32 %v13084_v53 }
 0x432   : > { %v12152_v54 = vpop.eup %12151 }
 0x43c   : > { %v12154_v55 = vpop.eup %12153 }
 0x43d   : > { %v2129_v56 = vmul.f32 %v12154_v55, %v12152_v54 }
 0x43f   : > { %2131 = vst.msk [vmem:[#allocation2 + $0x18] sm:$0xff] %vm367_vm0, %v2129_v56  ;;  %11004 = vmatmul.mubr.msk.f32.vlgmr.msra.gmra.mxu0 %vm367_vm0, %v2129_v56  ;;  %11015 = vmatmul.mubr.msk.f32.vlgmr.msra.gmra.mxu1 %vm367_vm0, %v2129_v56 }
 0x440   : > { %11018 = vmatpush3.msra.mxu0 %v12826_v33  ;;  %11029 = vmatpush3.msra.mxu1 %v12829_v34 }
 0x441   : > { %11019 = vmatprep.subr.mxu0 %v12591_v26  ;;  %11030 = vmatprep.subr.mxu1 %v12591_v26 }
 0x442   : > { %11020 = vmatpush3.msra.mxu0 %v12836_v35  ;;  %11031 = vmatpush3.msra.mxu1 %v12839_v36 }
 0x443   : > { %11021 = vmatprep.subr.mxu0 %v12591_v26  ;;  %11032 = vmatprep.subr.mxu1 %v12591_v26 }
 0x444   : > { %11022 = vmatpush3.msra.mxu0 %v12846_v37  ;;  %11033 = vmatpush3.msra.mxu1 %v12849_v38  ;;  %v2136_v37 = vld [vmem:[#allocation3 + $0x98] sm:$0xff] }
 0x445   : > { %11023 = vmatprep.subr.mxu0 %v12591_v26  ;;  %11034 = vmatprep.subr.mxu1 %v12591_v26 }
 0x446   : > { %11024 = vmatpush3.msra.mxu0 %v12856_v39  ;;  %11025 = vmatprep.mubr.msk.f32.mxu0 %vm12592_vm1, %v12591_v26 }
 0x447   : > { %11035 = vmatpush3.msra.mxu1 %v12861_v40  ;;  %11036 = vmatprep.mubr.msk.f32.mxu1 %vm12592_vm1, %v12591_v26 }
 0x448   : > { %11026 = vmatmul.mubr.msk.f32.vlgmr.msra.gmra.mxu0 %vm367_vm0, %v2129_v56  ;;  %11037 = vmatmul.mubr.msk.f32.vlgmr.msra.gmra.mxu1 %vm367_vm0, %v2129_v56  ;;  %v2454_v56 = vld [vmem:[#allocation3 + $0xb8] sm:$0xff] }
 0x449   : > { %11039 = vmatprep.subr.mxu0 %v12591_v26  ;;  %11050 = vmatprep.subr.mxu1 %v12591_v26 }
 0x44a   : > { %11040 = vmatpush3.msra.mxu0 %v12768_v24  ;;  %11051 = vmatpush3.msra.mxu1 %v12771_v25  ;;  %v2133_v24 = vld [vmem:[#allocation3 + $0x80] sm:$0xff] }
 0x44b   : > { %11041 = vmatprep.subr.mxu0 %v12591_v26  ;;  %11052 = vmatprep.subr.mxu1 %v12591_v26 }
 0x44c   : > { %11042 = vmatpush3.msra.mxu0 %v12782_v27  ;;  %11053 = vmatpush3.msra.mxu1 %v12785_v28  ;;  %v2134_v27 = vld [vmem:[#allocation3 + $0x88] sm:$0xff] }
 0x44d   : > { %11043 = vmatprep.subr.mxu0 %v12591_v26  ;;  %11054 = vmatprep.subr.mxu1 %v12591_v26 }
 0x44e   : > { %11044 = vmatpush3.msra.mxu0 %v12796_v29  ;;  %11055 = vmatpush3.msra.mxu1 %v12799_v30 }
 0x44f   : > { %11045 = vmatprep.subr.mxu0 %v12591_v26  ;;  %11056 = vmatprep.subr.mxu1 %v12591_v26 }
 0x450   : > { %11046 = vmatpush3.msra.mxu0 %v12810_v31  ;;  %11057 = vmatpush3.msra.mxu1 %v12813_v32 }
 0x451   : > { %11047 = vmatprep.mubr.msk.f32.mxu0 %vm12592_vm1, %v12591_v26  ;;  %11058 = vmatprep.mubr.msk.f32.mxu1 %vm12592_vm1, %v12591_v26 }
 0x452   : > { %11061 = vmatprep.subr.mxu0 %v12591_v26  ;;  %11072 = vmatprep.subr.mxu1 %v12591_v26 }
 0x4ff   : > { %v2206_v25 = vpop.f32.mrf.mxu0  ;;  %v2283_v28 = vpop.f32.mrf.mxu1 }
 0x500   : > { %v2210_v29 = vadd.f32 %v2206_v25, %v2133_v24  ;;  %v2287_v30 = vadd.f32 %v2283_v28, %v2134_v27  ;;  %v2453_v28 = vld [vmem:[#allocation3 + $0xb0] sm:$0xff] }
 0x501   : > { %v11005_v33 = vpop.f32.mrf.mxu0  ;;  %v11016_v31 = vpop.f32.mrf.mxu1 }
 0x502   : > { %v9829_v34 = vmul.f32 -1.442695, %v2210_v29  ;;  %v9831_v32 = vmul.f32 -1.442695, %v2287_v30 }
 0x504   : > { %12155 = vpow2.f32 %v9829_v34 }
 0x505   : > { %12157 = vpow2.f32 %v9831_v32 }
 0x508   : > { %v2360_v35 = vpop.f32.mrf.mxu0  ;;  %v2432_v36 = vpop.f32.mrf.mxu1 }
 0x509   : > { %v2436_v38 = vadd.f32 %v2432_v36, %v2136_v37  ;;  %v2364_v59 = vadd.f32 %v2360_v35, %v2135_v57 }
 0x50a   : > { %v11027_v39 = vpop.f32.mrf.mxu0  ;;  %v11038_v40 = vpop.f32.mrf.mxu1 }
 0x50b   : > { %v9834_v58 = vmul.f32 -1.442695, %v2436_v38 }
 0x50d   : > { %12159 = vpow2.f32 %v9834_v58 }
 0x50e   : > { %12161 = vtanh.f32 %v2364_v59 }
 0x511   : > { %v12156_v60 = vpop.eup %12155 }
 0x512   : > { %v12158_v61 = vpop.eup %12157  ;;  %v2214_v62 = vadd.f32 1.0, %v12156_v60 }
 0x513   : > { %v2291_v63 = vadd.f32 1.0, %v12158_v61 }
 0x514   : > { %12163 = vrcp.f32 %v2214_v62  ;;  %v2769_v62 = vld [vmem:[#allocation3 + $0xc0] sm:$0xff] }
 0x515   : > { %12165 = vrcp.f32 %v2291_v63 }
 0x51a   : > { %v12160_v0 = vpop.eup %12159 }
 0x51b   : > { %v12162_v1 = vpop.eup %12161  ;;  %v2440_v5 = vadd.f32 1.0, %v12160_v0  ;;  %v2770_v0 = vld [vmem:[#allocation3 + $0xc8] sm:$0xff] }
 0x51d   : > { %12167 = vrcp.f32 %v2440_v5 }
 0x521   : > { %v12164_v2 = vpop.eup %12163 }
 0x522   : > { %v12166_v3 = vpop.eup %12165  ;;  %v2444_v4 = vmul.f32 %v12164_v2, %v12162_v1 }
 0x523   : > { %v2443_v6 = vmul.f32 %v12166_v3, %v13084_v53 }
 0x525   : > { %v13133_v7 = vadd.f32 %v2444_v4, %v2443_v6 }
 0x527   : > { %12169 = vtanh.f32 %v13133_v7 }
 0x52a   : > { %v12168_v8 = vpop.eup %12167 }
 0x534   : > { %v12170_v11 = vpop.eup %12169 }
 0x535   : > { %v2447_v9 = vmul.f32 %v12170_v11, %v12168_v8 }
 0x537   : > { %2449 = vst.msk [vmem:[#allocation2 + $0x20] sm:$0xff] %vm367_vm0, %v2447_v9  ;;  %11048 = vmatmul.mubr.msk.f32.vlgmr.msra.gmra.mxu0 %vm367_vm0, %v2447_v9  ;;  %11059 = vmatmul.mubr.msk.f32.vlgmr.msra.gmra.mxu1 %vm367_vm0, %v2447_v9 }
 0x538   : > { %11062 = vmatpush3.msra.mxu0 %v13140_v10  ;;  %11073 = vmatpush3.msra.mxu1 %v13144_v12 }
 0x539   : > { %11063 = vmatprep.subr.mxu0 %v12591_v26  ;;  %11074 = vmatprep.subr.mxu1 %v12591_v26 }
 0x53a   : > { %11064 = vmatpush3.msra.mxu0 %v13150_v13  ;;  %11075 = vmatpush3.msra.mxu1 %v13154_v14 }
 0x53b   : > { %11065 = vmatprep.subr.mxu0 %v12591_v26  ;;  %11076 = vmatprep.subr.mxu1 %v12591_v26 }
 0x53c   : > { %11066 = vmatpush3.msra.mxu0 %v13160_v15  ;;  %11077 = vmatpush3.msra.mxu1 %v13164_v16 }
 0x53d   : > { %11067 = vmatprep.subr.mxu0 %v12591_v26  ;;  %11078 = vmatprep.subr.mxu1 %v12591_v26 }
 0x53e   : > { %11068 = vmatpush3.msra.mxu0 %v13170_v17  ;;  %11069 = vmatprep.mubr.msk.f32.mxu0 %vm12592_vm1, %v12591_v26 }
 0x53f   : > { %11079 = vmatpush3.msra.mxu1 %v13176_v18  ;;  %11080 = vmatprep.mubr.msk.f32.mxu1 %vm12592_vm1, %v12591_v26 }
 0x540   : > { %11070 = vmatmul.mubr.msk.f32.vlgmr.msra.gmra.mxu0 %vm367_vm0, %v2447_v9  ;;  %11081 = vmatmul.mubr.msk.f32.vlgmr.msra.gmra.mxu1 %vm367_vm0, %v2447_v9  ;;  %v2772_v9 = vld [vmem:[#allocation3 + $0xd8] sm:$0xff] }
 0x541   : > { %11083 = vmatprep.subr.mxu0 %v12591_v26  ;;  %11094 = vmatprep.subr.mxu1 %v12591_v26 }
 0x542   : > { %11084 = vmatpush3.msra.mxu0 %v13186_v19  ;;  %11095 = vmatpush3.msra.mxu1 %v13190_v20 }
 0x543   : > { %11085 = vmatprep.subr.mxu0 %v12591_v26  ;;  %11096 = vmatprep.subr.mxu1 %v12591_v26 }
 0x544   : > { %11086 = vmatpush3.msra.mxu0 %v13196_v21  ;;  %11097 = vmatpush3.msra.mxu1 %v13200_v22 }
 0x545   : > { %11087 = vmatprep.subr.mxu0 %v12591_v26  ;;  %11098 = vmatprep.subr.mxu1 %v12591_v26 }
 0x546   : > { %11088 = vmatpush3.msra.mxu0 %v13206_v23  ;;  %11099 = vmatpush3.msra.mxu1 %v13210_v41 }
 0x547   : > { %11089 = vmatprep.subr.mxu0 %v12591_v26  ;;  %11100 = vmatprep.subr.mxu1 %v12591_v26 }
 0x548   : > { %11090 = vmatpush3.msra.mxu0 %v13216_v42  ;;  %11101 = vmatpush3.msra.mxu1 %v13220_v43 }
 0x549   : > { %11091 = vmatprep.mubr.msk.f32.mxu0 %vm12592_vm1, %v12591_v26  ;;  %11102 = vmatprep.mubr.msk.f32.mxu1 %vm12592_vm1, %v12591_v26 }
 0x54a   : > { %11105 = vmatprep.subr.mxu0 %v12591_v26  ;;  %11116 = vmatprep.subr.mxu1 %v12591_v26 }
 0x5f7   : > { %v2524_v45 = vpop.f32.mrf.mxu0  ;;  %v2601_v47 = vpop.f32.mrf.mxu1 }
 0x5f8   : > { %v2528_v48 = vadd.f32 %v2524_v45, %v2451_v44  ;;  %v2605_v49 = vadd.f32 %v2601_v47, %v2452_v46 }
 0x5f9   : > { %v11049_v50 = vpop.f32.mrf.mxu0  ;;  %v11060_v51 = vpop.f32.mrf.mxu1 }
 0x5fa   : > { %v9836_v52 = vmul.f32 -1.442695, %v2528_v48  ;;  %v9838_v53 = vmul.f32 -1.442695, %v2605_v49 }
 0x5fc   : > { %12171 = vpow2.f32 %v9836_v52 }
 0x5fd   : > { %12173 = vpow2.f32 %v9838_v53 }
 0x600   : > { %v2678_v54 = vpop.f32.mrf.mxu0  ;;  %v2750_v55 = vpop.f32.mrf.mxu1 }
 0x601   : > { %v2754_v24 = vadd.f32 %v2750_v55, %v2454_v56  ;;  %v2682_v30 = vadd.f32 %v2678_v54, %v2453_v28  ;;  %v13331_v28 = vld [vmem:[#allocation2 + $0x18] sm:$0xff] }
 0x602   : > { %v11071_v25 = vpop.f32.mrf.mxu0  ;;  %v11082_v27 = vpop.f32.mrf.mxu1 }
 0x603   : > { %v9841_v29 = vmul.f32 -1.442695, %v2754_v24  ;;  %v9860_v24 = vld [vmem:[%s12717_s11 + $0xa0] sm:$0xff]  ;;  %v13319_v25 = vld [vmem:[#allocation2 + $0x8] sm:$0xff]  ;;  %v13325_v27 = vld [vmem:[#allocation2 + $0x10] sm:$0xff] }
 0x605   : > { %12175 = vpow2.f32 %v9841_v29  ;;  %v13337_v29 = vld [vmem:[#allocation2 + $0x20] sm:$0xff] }
 0x606   : > { %12177 = vtanh.f32 %v2682_v30 }
 0x609   : > { %v12172_v33 = vpop.eup %12171 }
 0x60a   : > { %v12174_v31 = vpop.eup %12173  ;;  %v2532_v34 = vadd.f32 1.0, %v12172_v33 }
 0x60b   : > { %v2609_v32 = vadd.f32 1.0, %v12174_v31  ;;  %v9867_v31 = vld [vmem:[%s12717_s11 + $0xd8] sm:$0xff] }
 0x60c   : > { %12179 = vrcp.f32 %v2532_v34  ;;  %v9871_v34 = vld [vmem:[%s12717_s11 + $0xf8] sm:$0xff] }
 0x60d   : > { %12181 = vrcp.f32 %v2609_v32  ;;  %v9866_v32 = vld [vmem:[%s12717_s11 + $0xd0] sm:$0xff] }
 0x612   : > { %v12176_v35 = vpop.eup %12175 }
 0x613   : > { %v12178_v36 = vpop.eup %12177  ;;  %v2758_v40 = vadd.f32 1.0, %v12176_v35  ;;  %v9870_v35 = vld [vmem:[%s12717_s11 + $0xf0] sm:$0xff] }
 0x615   : > { %12183 = vrcp.f32 %v2758_v40  ;;  %v3087_v40 = vld [vmem:[#allocation3 + $0xe0] sm:$0xff] }
 0x619   : > { %v12180_v37 = vpop.eup %12179 }
 0x61a   : > { %v12182_v38 = vpop.eup %12181  ;;  %v2762_v39 = vmul.f32 %v12180_v37, %v12178_v36  ;;  %v9865_v36 = vld [vmem:[%s12717_s11 + $0xc8] sm:$0xff] }
 0x61b   : > { %v2761_v57 = vmul.f32 %v12182_v38, %v13133_v7  ;;  %v9869_v37 = vld [vmem:[%s12717_s11 + $0xe8] sm:$0xff]  ;;  %v9864_v38 = vld [vmem:[%s12717_s11 + $0xc0] sm:$0xff] }
 0x61d   : > { %v13230_v58 = vadd.f32 %v2762_v39, %v2761_v57  ;;  %v9868_v39 = vld [vmem:[%s12717_s11 + $0xe0] sm:$0xff] }
 0x61f   : > { %12185 = vtanh.f32 %v13230_v58 }
 0x622   : > { %v12184_v59 = vpop.eup %12183 }
 0x62c   : > { %v12186_v60 = vpop.eup %12185 }
 0x62d   : > { %v2765_v61 = vmul.f32 %v12186_v60, %v12184_v59 }
 0x62f   : > { %2767 = vst.msk [vmem:[#allocation2 + $0x28] sm:$0xff] %vm367_vm0, %v2765_v61  ;;  %11092 = vmatmul.mubr.msk.f32.vlgmr.msra.gmra.mxu0 %vm367_vm0, %v2765_v61  ;;  %11103 = vmatmul.mubr.msk.f32.vlgmr.msra.gmra.mxu1 %vm367_vm0, %v2765_v61 }
 0x630   : > { %11106 = vmatpush3.msra.mxu0 %v13140_v10  ;;  %11117 = vmatpush3.msra.mxu1 %v13144_v12 }
 0x631   : > { %11107 = vmatprep.subr.mxu0 %v12591_v26  ;;  %11118 = vmatprep.subr.mxu1 %v12591_v26 }
 0x632   : > { %11108 = vmatpush3.msra.mxu0 %v13150_v13  ;;  %11119 = vmatpush3.msra.mxu1 %v13154_v14 }
 0x633   : > { %11109 = vmatprep.subr.mxu0 %v12591_v26  ;;  %11120 = vmatprep.subr.mxu1 %v12591_v26 }
 0x634   : > { %11110 = vmatpush3.msra.mxu0 %v13160_v15  ;;  %11121 = vmatpush3.msra.mxu1 %v13164_v16 }
 0x635   : > { %11111 = vmatprep.subr.mxu0 %v12591_v26  ;;  %11122 = vmatprep.subr.mxu1 %v12591_v26 }
 0x636   : > { %11112 = vmatpush3.msra.mxu0 %v13170_v17  ;;  %11113 = vmatprep.mubr.msk.f32.mxu0 %vm12592_vm1, %v12591_v26  ;;  %v13343_v30 = vld [vmem:[#allocation2 + $0x28] sm:$0xff] }
 0x637   : > { %11123 = vmatpush3.msra.mxu1 %v13176_v18  ;;  %11124 = vmatprep.mubr.msk.f32.mxu1 %vm12592_vm1, %v12591_v26 }
 0x638   : > { %11114 = vmatmul.mubr.msk.f32.vlgmr.msra.gmra.mxu0 %vm367_vm0, %v2765_v61  ;;  %11125 = vmatmul.mubr.msk.f32.vlgmr.msra.gmra.mxu1 %vm367_vm0, %v2765_v61 }
 0x639   : > { %11127 = vmatprep.subr.mxu0 %v12591_v26  ;;  %11138 = vmatprep.subr.mxu1 %v12591_v26 }
 0x63a   : > { %11128 = vmatpush3.msra.mxu0 %v13186_v19  ;;  %11139 = vmatpush3.msra.mxu1 %v13190_v20 }
 0x63b   : > { %11129 = vmatprep.subr.mxu0 %v12591_v26  ;;  %11140 = vmatprep.subr.mxu1 %v12591_v26 }
 0x63c   : > { %11130 = vmatpush3.msra.mxu0 %v13196_v21  ;;  %11141 = vmatpush3.msra.mxu1 %v13200_v22  ;;  %v2771_v22 = vld [vmem:[#allocation3 + $0xd0] sm:$0xff] }
 0x63d   : > { %11131 = vmatprep.subr.mxu0 %v12591_v26  ;;  %11142 = vmatprep.subr.mxu1 %v12591_v26 }
 0x63e   : > { %11132 = vmatpush3.msra.mxu0 %v13206_v23  ;;  %11143 = vmatpush3.msra.mxu1 %v13210_v41 }
 0x63f   : > { %11133 = vmatprep.subr.mxu0 %v12591_v26  ;;  %11144 = vmatprep.subr.mxu1 %v12591_v26 }
 0x640   : > { %11134 = vmatpush3.msra.mxu0 %v13216_v42  ;;  %11145 = vmatpush3.msra.mxu1 %v13220_v43 }
 0x641   : > { %11135 = vmatprep.mubr.msk.f32.mxu0 %vm12592_vm1, %v12591_v26  ;;  %11146 = vmatprep.mubr.msk.f32.mxu1 %vm12592_vm1, %v12591_v26 }
 0x642   : > { %11149 = vmatprep.subr.mxu0 %v12591_v26  ;;  %11160 = vmatprep.subr.mxu1 %v12591_v26 }
 0x6ef   : > { %v2842_v63 = vpop.f32.mrf.mxu0  ;;  %v2919_v1 = vpop.f32.mrf.mxu1 }
 0x6f0   : > { %v2846_v2 = vadd.f32 %v2842_v63, %v2769_v62  ;;  %v2923_v3 = vadd.f32 %v2919_v1, %v2770_v0 }
 0x6f1   : > { %v11093_v4 = vpop.f32.mrf.mxu0  ;;  %v11104_v5 = vpop.f32.mrf.mxu1 }
 0x6f2   : > { %v9843_v6 = vmul.f32 -1.442695, %v2846_v2  ;;  %v9845_v7 = vmul.f32 -1.442695, %v2923_v3  ;;  %v3090_v4 = vld [vmem:[#allocation3 + $0xf8] sm:$0xff] }
 0x6f4   : > { %12187 = vpow2.f32 %v9843_v6 }
 0x6f5   : > { %12189 = vpow2.f32 %v9845_v7 }
 0x6f8   : > { %v2996_v8 = vpop.f32.mrf.mxu0  ;;  %v3068_v11 = vpop.f32.mrf.mxu1 }
 0x6f9   : > { %v3072_v19 = vadd.f32 %v3068_v11, %v2772_v9  ;;  %v3000_v41 = vadd.f32 %v2996_v8, %v2771_v22  ;;  %v3089_v8 = vld [vmem:[#allocation3 + $0xf0] sm:$0xff] }
 0x6fa   : > { %v11115_v20 = vpop.f32.mrf.mxu0  ;;  %v11126_v21 = vpop.f32.mrf.mxu1 }
 0x6fb   : > { %v9848_v23 = vmul.f32 -1.442695, %v3072_v19  ;;  %v13366_v19 = vld [vmem:[%s12899_s25 + $0x4] ss:$0 sm:$0xff]  ;;  %v13369_v20 = vld [vmem:[%s12899_s25 + $0x5] ss:$0 sm:$0xff] }
 0x6fd   : > { %12191 = vpow2.f32 %v9848_v23 }
 0x6fe   : > { %12193 = vtanh.f32 %v3000_v41 }
 0x701   : > { %v12188_v42 = vpop.eup %12187 }
 0x702   : > { %v12190_v43 = vpop.eup %12189  ;;  %v2850_v44 = vadd.f32 1.0, %v12188_v42 }
 0x703   : > { %v2927_v45 = vadd.f32 1.0, %v12190_v43 }
 0x704   : > { %12195 = vrcp.f32 %v2850_v44 }
 0x705   : > { %12197 = vrcp.f32 %v2927_v45 }
 0x70a   : > { %v12192_v46 = vpop.eup %12191 }
 0x70b   : > { %v12194_v47 = vpop.eup %12193  ;;  %v3076_v51 = vadd.f32 1.0, %v12192_v46 }
 0x70d   : > { %12199 = vrcp.f32 %v3076_v51 }
 0x711   : > { %v12196_v48 = vpop.eup %12195 }
 0x712   : > { %v12198_v49 = vpop.eup %12197  ;;  %v3080_v50 = vmul.f32 %v12196_v48, %v12194_v47 }
 0x713   : > { %v3079_v52 = vmul.f32 %v12198_v49, %v13230_v58  ;;  %v3088_v58 = vld [vmem:[#allocation3 + $0xe8] sm:$0xff] }
 0x715   : > { %v13279_v53 = vadd.f32 %v3080_v50, %v3079_v52 }
 0x717   : > { %12201 = vtanh.f32 %v13279_v53 }
 0x71a   : > { %v12200_v54 = vpop.eup %12199 }
 0x724   : > { %v12202_v55 = vpop.eup %12201 }
 0x725   : > { %v3083_v56 = vmul.f32 %v12202_v55, %v12200_v54 }
 0x727   : > { %3085 = vst.msk [vmem:[#allocation2 + $0x30] sm:$0xff] %vm367_vm0, %v3083_v56  ;;  %11136 = vmatmul.mubr.msk.f32.vlgmr.msra.gmra.mxu0 %vm367_vm0, %v3083_v56  ;;  %11147 = vmatmul.mubr.msk.f32.vlgmr.msra.gmra.mxu1 %vm367_vm0, %v3083_v56 }
 0x728   : > { %11150 = vmatpush3.msra.mxu0 %v13140_v10  ;;  %11161 = vmatpush3.msra.mxu1 %v13144_v12  ;;  %v9859_v10 = vld [vmem:[%s12717_s11 + $0x98] sm:$0xff] }
 0x729   : > { %11151 = vmatprep.subr.mxu0 %v12591_v26  ;;  %11162 = vmatprep.subr.mxu1 %v12591_v26  ;;  %v9863_v12 = vld [vmem:[%s12717_s11 + $0xb8] sm:$0xff] }
 0x72a   : > { %11152 = vmatpush3.msra.mxu0 %v13150_v13  ;;  %11163 = vmatpush3.msra.mxu1 %v13154_v14  ;;  %v13307_v13 = vld [vmem:[#allocation2] sm:$0xff]  ;;  %v9858_v14 = vld [vmem:[%s12717_s11 + $0x90] sm:$0xff] }
 0x72b   : > { %11153 = vmatprep.subr.mxu0 %v12591_v26  ;;  %11164 = vmatprep.subr.mxu1 %v12591_v26 }
 0x72c   : > { %11154 = vmatpush3.msra.mxu0 %v13160_v15  ;;  %11165 = vmatpush3.msra.mxu1 %v13164_v16  ;;  %v9862_v15 = vld [vmem:[%s12717_s11 + $0xb0] sm:$0xff]  ;;  %v9857_v16 = vld [vmem:[%s12717_s11 + $0x88] sm:$0xff] }
 0x72d   : > { %11155 = vmatprep.subr.mxu0 %v12591_v26  ;;  %11166 = vmatprep.subr.mxu1 %v12591_v26 }
 0x72e   : > { %11156 = vmatpush3.msra.mxu0 %v13170_v17  ;;  %11157 = vmatprep.mubr.msk.f32.mxu0 %vm12592_vm1, %v12591_v26  ;;  %v9861_v17 = vld [vmem:[%s12717_s11 + $0xa8] sm:$0xff]  ;;  %v13349_v33 = vld [vmem:[#allocation2 + $0x30] sm:$0xff] }
 0x72f   : > { %11167 = vmatpush3.msra.mxu1 %v13176_v18  ;;  %11168 = vmatprep.mubr.msk.f32.mxu1 %vm12592_vm1, %v12591_v26  ;;  %v9856_v18 = vld [vmem:[%s12717_s11 + $0x80] sm:$0xff] }
 0x730   : > { %11158 = vmatmul.mubr.msk.f32.vlgmr.msra.gmra.mxu0 %vm367_vm0, %v3083_v56  ;;  %11169 = vmatmul.mubr.msk.f32.vlgmr.msra.gmra.mxu1 %vm367_vm0, %v3083_v56 }
 0x731   : > { %11171 = vmatprep.subr.mxu0 %v9859_v10  ;;  %11191 = vmatprep.subr.mxu1 %v9863_v12 }
 0x732   : > { %11172 = vmatpush3.msra.mxu0 %v9859_v10  ;;  %11179 = vmatprep.mubr.msk.f32.mxu0 %vm367_vm0, %v13307_v13 }
 0x733   : > { %11192 = vmatpush3.msra.mxu1 %v9863_v12  ;;  %11199 = vmatprep.mubr.msk.f32.mxu1 %vm367_vm0, %v13307_v13 }
 0x734   : > { %11173 = vmatprep.subr.mxu0 %v9858_v14  ;;  %11193 = vmatprep.subr.mxu1 %v9862_v15 }
 0x735   : > { %11174 = vmatpush3.msra.mxu0 %v9858_v14  ;;  %11194 = vmatpush3.msra.mxu1 %v9862_v15 }
 0x736   : > { %11175 = vmatprep.subr.mxu0 %v9857_v16  ;;  %11195 = vmatprep.subr.mxu1 %v9861_v17 }
 0x737   : > { %11176 = vmatpush3.msra.mxu0 %v9857_v16  ;;  %11196 = vmatpush3.msra.mxu1 %v9861_v17 }
 0x738   : > { %11177 = vmatprep.subr.mxu0 %v9856_v18  ;;  %11197 = vmatprep.subr.mxu1 %v9860_v24 }
 0x739   : > { %11178 = vmatpush3.msra.mxu0 %v9856_v18  ;;  %11198 = vmatpush3.msra.mxu1 %v9860_v24 }
 0x73a   : > { %11180 = vmatmul.mubr.msk.f32.vlgmr.msra.gmra.mxu0 %vm367_vm0, %v13319_v25  ;;  %11200 = vmatmul.mubr.msk.f32.vlgmr.msra.gmra.mxu1 %vm367_vm0, %v13319_v25 }
 0x73b   : > { %11182 = vmatprep.mubr.msk.f32.mxu0 %vm367_vm0, %v13325_v27  ;;  %11202 = vmatprep.mubr.msk.f32.mxu1 %vm367_vm0, %v13325_v27 }
 0x73c   : > { %11211 = vmatprep.subr.mxu0 %v9867_v31  ;;  %11231 = vmatprep.subr.mxu1 %v9871_v34 }
 0x73d   : > { %11212 = vmatpush3.msra.mxu0 %v9867_v31  ;;  %11232 = vmatpush3.msra.mxu1 %v9871_v34 }
 0x73e   : > { %11183 = vmatmul.mubr.msk.f32.gmra.mxu0 %vm367_vm0, %v13331_v28  ;;  %11203 = vmatmul.mubr.msk.f32.gmra.mxu1 %vm367_vm0, %v13331_v28 }
 0x73f   : > { %11185 = vmatprep.mubr.msk.f32.mxu0 %vm367_vm0, %v13337_v29  ;;  %11205 = vmatprep.mubr.msk.f32.mxu1 %vm367_vm0, %v13337_v29 }
 0x740   : > { %11213 = vmatprep.subr.mxu0 %v9866_v32  ;;  %11233 = vmatprep.subr.mxu1 %v9870_v35 }
 0x741   : > { %11214 = vmatpush3.msra.mxu0 %v9866_v32  ;;  %11234 = vmatpush3.msra.mxu1 %v9870_v35 }
 0x742   : > { %11186 = vmatmul.mubr.msk.f32.gmra.mxu0 %vm367_vm0, %v13343_v30  ;;  %11206 = vmatmul.mubr.msk.f32.gmra.mxu1 %vm367_vm0, %v13343_v30 }
 0x743   : > { %11188 = vmatprep.mubr.msk.f32.mxu0 %vm367_vm0, %v13349_v33  ;;  %11208 = vmatprep.mubr.msk.f32.mxu1 %vm367_vm0, %v13349_v33 }
 0x744   : > { %11215 = vmatprep.subr.mxu0 %v9865_v36  ;;  %11235 = vmatprep.subr.mxu1 %v9869_v37 }
 0x745   : > { %11216 = vmatpush3.msra.mxu0 %v9865_v36  ;;  %11236 = vmatpush3.msra.mxu1 %v9869_v37 }
 0x746   : > { %11217 = vmatprep.subr.mxu0 %v9864_v38  ;;  %11237 = vmatprep.subr.mxu1 %v9868_v39 }
 0x747   : > { %11218 = vmatpush3.msra.mxu0 %v9864_v38  ;;  %11238 = vmatpush3.msra.mxu1 %v9868_v39 }
 0x748   : > { %11251 = vmatprep.subr.mxu0 %v12591_v26  ;;  %11262 = vmatprep.subr.mxu1 %v12591_v26 }
 0x7e7   : > { %v3160_v57 = vpop.f32.mrf.mxu0  ;;  %v3237_v59 = vpop.f32.mrf.mxu1 }
 0x7e8   : > { %v3164_v60 = vadd.f32 %v3160_v57, %v3087_v40  ;;  %v3241_v61 = vadd.f32 %v3237_v59, %v3088_v58 }
 0x7e9   : > { %v11137_v62 = vpop.f32.mrf.mxu0  ;;  %v11148_v63 = vpop.f32.mrf.mxu1 }
 0x7ea   : > { %v9850_v0 = vmul.f32 -1.442695, %v3164_v60  ;;  %v9852_v1 = vmul.f32 -1.442695, %v3241_v61  ;;  %v13407_v62 = vld [vmem:[%s12703_s14 + $0xb8] sm:$0xff]  ;;  %v13425_v63 = vld [vmem:[%s12703_s14 + $0xb0] sm:$0xff] }
 0x7ec   : > { %12203 = vpow2.f32 %v9850_v0  ;;  %v13482_v0 = vld [vmem:[%s12703_s14 + $0xd0] sm:$0xff] }
 0x7ed   : > { %12205 = vpow2.f32 %v9852_v1  ;;  %v13485_v1 = vld [vmem:[%s12703_s14 + $0xf0] sm:$0xff] }
 0x7f0   : > { %v3314_v2 = vpop.f32.mrf.mxu0  ;;  %v3386_v3 = vpop.f32.mrf.mxu1 }
 0x7f1   : > { %v3390_v5 = vadd.f32 %v3386_v3, %v3090_v4  ;;  %v3318_v9 = vadd.f32 %v3314_v2, %v3089_v8  ;;  %v13492_v2 = vld [vmem:[%s12703_s14 + $0xc8] sm:$0xff]  ;;  %v13502_v4 = vld [vmem:[%s12703_s14 + $0xc0] sm:$0xff] }
 0x7f2   : > { %v11159_v6 = vpop.f32.mrf.mxu0  ;;  %v11170_v7 = vpop.f32.mrf.mxu1  ;;  %v13495_v3 = vld [vmem:[%s12703_s14 + $0xe8] sm:$0xff] }
 0x7f3   : > { %v9855_v11 = vmul.f32 -1.442695, %v3390_v5  ;;  %v13507_v5 = vld [vmem:[%s12703_s14 + $0xe0] sm:$0xff] }
 0x7f5   : > { %12207 = vpow2.f32 %v9855_v11 }
 0x7f6   : > { %12209 = vtanh.f32 %v3318_v9 }
 0x7f9   : > { %v12204_v21 = vpop.eup %12203 }
 0x7fa   : > { %v12206_v22 = vpop.eup %12205  ;;  %v3168_v23 = vadd.f32 1.0, %v12204_v21  ;;  %v11181_v41 = vpop.f32.mrf.mxu0 }
 0x7fb   : > { %v11201_v42 = vpop.f32.mrf.mxu1  ;;  %v3245_v43 = vadd.f32 1.0, %v12206_v22  ;;  %v3553_v44 = vadd.f32 %v11181_v41, %v13366_v19  ;;  %v9910_v22 = vld [vmem:[%s12899_s25 + $0x6] ss:$0 sm:$0xff] }
 0x7fc   : > { %v3672_v45 = vadd.f32 %v11201_v42, %v13369_v20  ;;  %12211 = vrcp.f32 %v3168_v23  ;;  %v3547_v46 = vpop.f32.mrf.mxu0  ;;  %v9919_v23 = vld [vmem:[%s12899_s25 + $0x7] ss:$0 sm:$0xff] }
 0x7fd   : > { %v3666_v47 = vpop.f32.mrf.mxu1  ;;  %12213 = vrcp.f32 %v3245_v43  ;;  %3587 = vst.msk [vmem:[#allocation3 + $0x20] sm:$0xff] %vm367_vm0, %v3553_v44  ;;  %v3548_v48 = vadd.f32 %v13366_v19, %v3547_v46 }
 0x7fe   : > { %3706 = vst.msk [vmem:[#allocation3 + $0x28] sm:$0xff] %vm367_vm0, %v3672_v45  ;;  %v3667_v49 = vadd.f32 %v13369_v20, %v3666_v47  ;;  %v11184_v50 = vpop.f32.mrf.mxu0 }
 0x7ff   : > { %v11204_v51 = vpop.f32.mrf.mxu1  ;;  %3586 = vst.msk [vmem:[#allocation3] sm:$0xff] %vm367_vm0, %v3548_v48  ;;  %v3563_v52 = vadd.f32 %v11184_v50, %v13366_v19 }
 0x800   : > { %3705 = vst.msk [vmem:[#allocation3 + $0x8] sm:$0xff] %vm367_vm0, %v3667_v49  ;;  %v3682_v54 = vadd.f32 %v11204_v51, %v13369_v20  ;;  %v3557_v55 = vpop.f32.mrf.mxu0 }
 0x801   : > { %v3676_v56 = vpop.f32.mrf.mxu1  ;;  %3589 = vst.msk [vmem:[#allocation3 + $0x60] sm:$0xff] %vm367_vm0, %v3563_v52  ;;  %v3558_v10 = vadd.f32 %v13366_v19, %v3557_v55 }
 0x802   : > { %3708 = vst.msk [vmem:[#allocation3 + $0x68] sm:$0xff] %vm367_vm0, %v3682_v54  ;;  %v3677_v12 = vadd.f32 %v13369_v20, %v3676_v56  ;;  %v11187_v14 = vpop.f32.mrf.mxu0  ;;  %v12208_v32 = vpop.eup %12207 }
 0x803   : > { %v11207_v15 = vpop.f32.mrf.mxu1  ;;  %3588 = vst.msk [vmem:[#allocation3 + $0x40] sm:$0xff] %vm367_vm0, %v3558_v10  ;;  %v3573_v16 = vadd.f32 %v11187_v14, %v13366_v19  ;;  %v12210_v35 = vpop.eup %12209  ;;  %v3394_v39 = vadd.f32 1.0, %v12208_v32 }
 0x804   : > { %3707 = vst.msk [vmem:[#allocation3 + $0x48] sm:$0xff] %vm367_vm0, %v3677_v12  ;;  %v3692_v17 = vadd.f32 %v11207_v15, %v13369_v20  ;;  %v3567_v18 = vpop.f32.mrf.mxu0 }
 0x805   : > { %v3686_v24 = vpop.f32.mrf.mxu1  ;;  %3591 = vst.msk [vmem:[#allocation3 + $0xa0] sm:$0xff] %vm367_vm0, %v3573_v16  ;;  %v3568_v31 = vadd.f32 %v13366_v19, %v3567_v18  ;;  %12215 = vrcp.f32 %v3394_v39 }
 0x806   : > { %3710 = vst.msk [vmem:[#allocation3 + $0xa8] sm:$0xff] %vm367_vm0, %v3692_v17  ;;  %v3687_v34 = vadd.f32 %v13369_v20, %v3686_v24 }
 0x807   : > { %3590 = vst.msk [vmem:[#allocation3 + $0x80] sm:$0xff] %vm367_vm0, %v3568_v31 }
 0x808   : > { %3709 = vst.msk [vmem:[#allocation3 + $0x88] sm:$0xff] %vm367_vm0, %v3687_v34 }
 0x809   : > { %v12212_v36 = vpop.eup %12211 }
 0x80a   : > { %v12214_v37 = vpop.eup %12213  ;;  %v3398_v38 = vmul.f32 %v12212_v36, %v12210_v35 }
 0x80b   : > { %v3397_v40 = vmul.f32 %v12214_v37, %v13279_v53  ;;  %v13404_v53 = vld [vmem:[%s12703_s14 + $0x98] sm:$0xff] }
 0x80d   : > { %v3399_v57 = vadd.f32 %v3398_v38, %v3397_v40 }
 0x80f   : > { %12217 = vtanh.f32 %v3399_v57  ;;  %v3951_v57 = vld [vmem:[#allocation3] sm:$0xff] }
 0x812   : > { %v12216_v58 = vpop.eup %12215 }
 0x81c   : > { %v12218_v59 = vpop.eup %12217 }
 0x81d   : > { %v3401_v60 = vmul.f32 %v12218_v59, %v12216_v58  ;;  %v3952_v59 = vld [vmem:[#allocation3 + $0x8] sm:$0xff] }
 0x81f   : > { %3403 = vst.msk [vmem:[#allocation2 + $0x38] sm:$0xff] %vm367_vm0, %v3401_v60 }
 0x826   : > { %v3411_v61 = vld [vmem:[#allocation2 + $0x38] sm:$0xff] }
 0x827   : > { %11189 = vmatmul.mubr.msk.f32.gmra.mxu0 %vm367_vm0, %v3411_v61  ;;  %11209 = vmatmul.mubr.msk.f32.gmra.mxu1 %vm367_vm0, %v3411_v61 }
 0x828   : > { %11219 = vmatprep.mubr.msk.f32.mxu0 %vm367_vm0, %v13307_v13  ;;  %11239 = vmatprep.mubr.msk.f32.mxu1 %vm367_vm0, %v13307_v13  ;;  %v13422_v13 = vld [vmem:[%s12703_s14 + $0x90] sm:$0xff] }
 0x82b   : > { %11220 = vmatmul.mubr.msk.f32.vlgmr.msra.gmra.mxu0 %vm367_vm0, %v13319_v25  ;;  %11240 = vmatmul.mubr.msk.f32.vlgmr.msra.gmra.mxu1 %vm367_vm0, %v13319_v25  ;;  %v13440_v25 = vld [vmem:[%s12703_s14 + $0x88] sm:$0xff] }
 0x82c   : > { %11222 = vmatprep.mubr.msk.f32.mxu0 %vm367_vm0, %v13325_v27  ;;  %11242 = vmatprep.mubr.msk.f32.mxu1 %vm367_vm0, %v13325_v27  ;;  %v13443_v27 = vld [vmem:[%s12703_s14 + $0xa8] sm:$0xff] }
 0x82d   : > { %11252 = vmatpush3.msra.mxu0 %v13404_v53  ;;  %11263 = vmatpush3.msra.mxu1 %v13407_v62 }
 0x82e   : > { %11253 = vmatprep.subr.mxu0 %v12591_v26  ;;  %11264 = vmatprep.subr.mxu1 %v12591_v26 }
 0x82f   : > { %11223 = vmatmul.mubr.msk.f32.gmra.mxu0 %vm367_vm0, %v13331_v28  ;;  %11243 = vmatmul.mubr.msk.f32.gmra.mxu1 %vm367_vm0, %v13331_v28  ;;  %v13456_v28 = vld [vmem:[%s12703_s14 + $0x80] sm:$0xff] }
 0x830   : > { %11225 = vmatprep.mubr.msk.f32.mxu0 %vm367_vm0, %v13337_v29  ;;  %11245 = vmatprep.mubr.msk.f32.mxu1 %vm367_vm0, %v13337_v29  ;;  %v13459_v29 = vld [vmem:[%s12703_s14 + $0xa0] sm:$0xff] }
 0x831   : > { %11254 = vmatpush3.msra.mxu0 %v13422_v13  ;;  %11265 = vmatpush3.msra.mxu1 %v13425_v63 }
 0x832   : > { %11255 = vmatprep.subr.mxu0 %v12591_v26  ;;  %11266 = vmatprep.subr.mxu1 %v12591_v26 }
 0x833   : > { %11226 = vmatmul.mubr.msk.f32.gmra.mxu0 %vm367_vm0, %v13343_v30  ;;  %11246 = vmatmul.mubr.msk.f32.gmra.mxu1 %vm367_vm0, %v13343_v30  ;;  %v13472_v30 = vld [vmem:[%s12703_s14 + $0xd8] sm:$0xff] }
 0x834   : > { %11228 = vmatprep.mubr.msk.f32.mxu0 %vm367_vm0, %v13349_v33  ;;  %11248 = vmatprep.mubr.msk.f32.mxu1 %vm367_vm0, %v13349_v33  ;;  %v13475_v33 = vld [vmem:[%s12703_s14 + $0xf8] sm:$0xff] }
 0x835   : > { %11256 = vmatpush3.msra.mxu0 %v13440_v25  ;;  %11267 = vmatpush3.msra.mxu1 %v13443_v27 }
 0x836   : > { %11257 = vmatprep.subr.mxu0 %v12591_v26  ;;  %11268 = vmatprep.subr.mxu1 %v12591_v26 }
 0x837   : > { %11229 = vmatmul.mubr.msk.f32.gmra.mxu0 %vm367_vm0, %v3411_v61  ;;  %11249 = vmatmul.mubr.msk.f32.gmra.mxu1 %vm367_vm0, %v3411_v61 }
 0x838   : > { %11258 = vmatpush3.msra.mxu0 %v13456_v28  ;;  %11269 = vmatpush3.msra.mxu1 %v13459_v29 }
 0x839   : > { %11259 = vmatprep.mubr.msk.f32.mxu0 %vm12592_vm1, %v12591_v26  ;;  %11270 = vmatprep.mubr.msk.f32.mxu1 %vm12592_vm1, %v12591_v26 }
 0x83a   : > { %11273 = vmatprep.subr.mxu0 %v12591_v26  ;;  %11284 = vmatprep.subr.mxu1 %v12591_v26 }
 0x83b   : > { %11260 = vmatmul.mubr.f32.vlgmr.msra.gmra.mxu0 %v12591_v26  ;;  %11271 = vmatmul.mubr.f32.vlgmr.msra.gmra.mxu1 %v12591_v26 }
 0x83c   : > { %11274 = vmatpush3.msra.mxu0 %v13472_v30  ;;  %11285 = vmatpush3.msra.mxu1 %v13475_v33 }
 0x83d   : > { %11275 = vmatprep.subr.mxu0 %v12591_v26  ;;  %11286 = vmatprep.subr.mxu1 %v12591_v26 }
 0x83e   : > { %11276 = vmatpush3.msra.mxu0 %v13482_v0  ;;  %11287 = vmatpush3.msra.mxu1 %v13485_v1 }
 0x83f   : > { %11277 = vmatprep.subr.mxu0 %v12591_v26  ;;  %11288 = vmatprep.subr.mxu1 %v12591_v26 }
 0x840   : > { %11278 = vmatpush3.msra.mxu0 %v13492_v2  ;;  %11289 = vmatpush3.msra.mxu1 %v13495_v3 }
 0x841   : > { %11279 = vmatprep.subr.mxu0 %v12591_v26  ;;  %11290 = vmatprep.subr.mxu1 %v12591_v26 }
 0x842   : > { %11280 = vmatpush3.msra.mxu0 %v13502_v4  ;;  %11281 = vmatprep.mubr.msk.f32.mxu0 %vm12592_vm1, %v12591_v26 }
 0x843   : > { %11291 = vmatpush3.msra.mxu1 %v13507_v5  ;;  %11292 = vmatprep.mubr.msk.f32.mxu1 %vm12592_vm1, %v12591_v26 }
 0x844   : > { %11282 = vmatmul.mubr.f32.vlgmr.msra.gmra.mxu0 %v12591_v26  ;;  %11293 = vmatmul.mubr.f32.vlgmr.msra.gmra.mxu1 %v12591_v26 }
 0x845   : > { %11295 = vmatprep.subr.mxu0 %v12591_v26  ;;  %11306 = vmatprep.subr.mxu1 %v12591_v26 }
 0x846   : > { %11296 = vmatpush3.msra.mxu0 %v13404_v53  ;;  %11307 = vmatpush3.msra.mxu1 %v13407_v62 }
 0x847   : > { %11297 = vmatprep.subr.mxu0 %v12591_v26  ;;  %11308 = vmatprep.subr.mxu1 %v12591_v26 }
 0x848   : > { %11298 = vmatpush3.msra.mxu0 %v13422_v13  ;;  %11309 = vmatpush3.msra.mxu1 %v13425_v63 }
 0x849   : > { %11299 = vmatprep.subr.mxu0 %v12591_v26  ;;  %11310 = vmatprep.subr.mxu1 %v12591_v26 }
 0x84a   : > { %11300 = vmatpush3.msra.mxu0 %v13440_v25  ;;  %11311 = vmatpush3.msra.mxu1 %v13443_v27 }
 0x84b   : > { %11301 = vmatprep.subr.mxu0 %v12591_v26  ;;  %11312 = vmatprep.subr.mxu1 %v12591_v26 }
 0x84c   : > { %11302 = vmatpush3.msra.mxu0 %v13456_v28  ;;  %11313 = vmatpush3.msra.mxu1 %v13459_v29 }
 0x84d   : > { %11303 = vmatprep.mubr.msk.f32.mxu0 %vm12592_vm1, %v12591_v26  ;;  %11314 = vmatprep.mubr.msk.f32.mxu1 %vm12592_vm1, %v12591_v26 }
 0x84e   : > { %11317 = vmatprep.subr.mxu0 %v12591_v26  ;;  %11328 = vmatprep.subr.mxu1 %v12591_v26 }
 0x8e7   : > { %v11190_v6 = vpop.f32.mrf.mxu0  ;;  %v11210_v7 = vpop.f32.mrf.mxu1 }
 0x8e8   : > { %v3583_v8 = vadd.f32 %v11190_v6, %v13366_v19  ;;  %v3702_v11 = vadd.f32 %v11210_v7, %v13369_v20 }
 0x8e9   : > { %v3577_v9 = vpop.f32.mrf.mxu0  ;;  %v3696_v21 = vpop.f32.mrf.mxu1 }
 0x8ea   : > { %3593 = vst.msk [vmem:[#allocation3 + $0xe0] sm:$0xff] %vm367_vm0, %v3583_v8  ;;  %3712 = vst.msk [vmem:[#allocation3 + $0xe8] sm:$0xff] %vm367_vm0, %v3702_v11  ;;  %v3578_v41 = vadd.f32 %v13366_v19, %v3577_v9  ;;  %v3697_v42 = vadd.f32 %v13369_v20, %v3696_v21 }
 0x8eb   : > { %v11221_v43 = vpop.f32.mrf.mxu0  ;;  %v11241_v44 = vpop.f32.mrf.mxu1 }
 0x8ec   : > { %3592 = vst.msk [vmem:[#allocation3 + $0xc0] sm:$0xff] %vm367_vm0, %v3578_v41  ;;  %3711 = vst.msk [vmem:[#allocation3 + $0xc8] sm:$0xff] %vm367_vm0, %v3697_v42  ;;  %v3791_v45 = vadd.f32 %v11221_v43, %v9910_v22  ;;  %v3910_v46 = vadd.f32 %v11241_v44, %v9919_v23 }
 0x8ed   : > { %v3785_v47 = vpop.f32.mrf.mxu0  ;;  %v3904_v48 = vpop.f32.mrf.mxu1 }
 0x8ee   : > { %3825 = vst.msk [vmem:[#allocation3 + $0x30] sm:$0xff] %vm367_vm0, %v3791_v45  ;;  %3944 = vst.msk [vmem:[#allocation3 + $0x38] sm:$0xff] %vm367_vm0, %v3910_v46  ;;  %v3786_v49 = vadd.f32 %v9910_v22, %v3785_v47  ;;  %v3905_v50 = vadd.f32 %v9919_v23, %v3904_v48 }
 0x8ef   : > { %v11224_v51 = vpop.f32.mrf.mxu0  ;;  %v11244_v19 = vpop.f32.mrf.mxu1 }
 0x8f0   : > { %3824 = vst.msk [vmem:[#allocation3 + $0x10] sm:$0xff] %vm367_vm0, %v3786_v49  ;;  %3943 = vst.msk [vmem:[#allocation3 + $0x18] sm:$0xff] %vm367_vm0, %v3905_v50  ;;  %v3801_v20 = vadd.f32 %v11224_v51, %v9910_v22  ;;  %v3920_v52 = vadd.f32 %v11244_v19, %v9919_v23 }
 0x8f1   : > { %v3795_v54 = vpop.f32.mrf.mxu0  ;;  %v3914_v55 = vpop.f32.mrf.mxu1 }
 0x8f2   : > { %3827 = vst.msk [vmem:[#allocation3 + $0x70] sm:$0xff] %vm367_vm0, %v3801_v20  ;;  %3946 = vst.msk [vmem:[#allocation3 + $0x78] sm:$0xff] %vm367_vm0, %v3920_v52  ;;  %v3796_v56 = vadd.f32 %v9910_v22, %v3795_v54  ;;  %v3915_v10 = vadd.f32 %v9919_v23, %v3914_v55 }
 0x8f3   : > { %v11227_v12 = vpop.f32.mrf.mxu0  ;;  %v11247_v14 = vpop.f32.mrf.mxu1 }
 0x8f4   : > { %3826 = vst.msk [vmem:[#allocation3 + $0x50] sm:$0xff] %vm367_vm0, %v3796_v56  ;;  %3945 = vst.msk [vmem:[#allocation3 + $0x58] sm:$0xff] %vm367_vm0, %v3915_v10  ;;  %v3811_v15 = vadd.f32 %v11227_v12, %v9910_v22  ;;  %v3930_v16 = vadd.f32 %v11247_v14, %v9919_v23 }
 0x8f5   : > { %v3805_v17 = vpop.f32.mrf.mxu0  ;;  %v3924_v18 = vpop.f32.mrf.mxu1 }
 0x8f6   : > { %3829 = vst.msk [vmem:[#allocation3 + $0xb0] sm:$0xff] %vm367_vm0, %v3811_v15  ;;  %3948 = vst.msk [vmem:[#allocation3 + $0xb8] sm:$0xff] %vm367_vm0, %v3930_v16  ;;  %v3806_v24 = vadd.f32 %v9910_v22, %v3805_v17  ;;  %v3925_v31 = vadd.f32 %v9919_v23, %v3924_v18  ;;  %v4264_v16 = vld [vmem:[#allocation3 + $0x20] sm:$0xff]  ;;  %v4265_v18 = vld [vmem:[#allocation3 + $0x28] sm:$0xff] }
 0x8f7   : > { %v11230_v34 = vpop.f32.mrf.mxu0  ;;  %v11250_v32 = vpop.f32.mrf.mxu1  ;;  %v3953_v44 = vld [vmem:[#allocation3 + $0x10] sm:$0xff] }
 0x8f8   : > { %3828 = vst.msk [vmem:[#allocation3 + $0x90] sm:$0xff] %vm367_vm0, %v3806_v24  ;;  %3947 = vst.msk [vmem:[#allocation3 + $0x98] sm:$0xff] %vm367_vm0, %v3925_v31  ;;  %v3821_v35 = vadd.f32 %v11230_v34, %v9910_v22  ;;  %v3940_v36 = vadd.f32 %v11250_v32, %v9919_v23 }
 0x8f9   : > { %v3815_v37 = vpop.f32.mrf.mxu0  ;;  %v3934_v38 = vpop.f32.mrf.mxu1 }
 0x8fa   : > { %3831 = vst.msk [vmem:[#allocation3 + $0xf0] sm:$0xff] %vm367_vm0, %v3821_v35  ;;  %3950 = vst.msk [vmem:[#allocation3 + $0xf8] sm:$0xff] %vm367_vm0, %v3940_v36  ;;  %v3816_v39 = vadd.f32 %v9910_v22, %v3815_v37  ;;  %v3935_v40 = vadd.f32 %v9919_v23, %v3934_v38  ;;  %v3954_v22 = vld [vmem:[#allocation3 + $0x18] sm:$0xff] }
 0x8fb   : > { %v4021_v58 = vpop.f32.mrf.mxu0  ;;  %v4098_v60 = vpop.f32.mrf.mxu1 }
 0x8fc   : > { %3830 = vst.msk [vmem:[#allocation3 + $0xd0] sm:$0xff] %vm367_vm0, %v3816_v39  ;;  %3949 = vst.msk [vmem:[#allocation3 + $0xd8] sm:$0xff] %vm367_vm0, %v3935_v40  ;;  %v4025_v61 = vadd.f32 %v4021_v58, %v3951_v57  ;;  %v4102_v6 = vadd.f32 %v4098_v60, %v3952_v59  ;;  %v4267_v40 = vld [vmem:[#allocation3 + $0x38] sm:$0xff]  ;;  %v4266_v60 = vld [vmem:[#allocation3 + $0x30] sm:$0xff] }
 0x8fd   : > { %v11261_v7 = vpop.f32.mrf.mxu0  ;;  %v11272_v8 = vpop.f32.mrf.mxu1 }
 0x8fe   : > { %v9928_v11 = vmul.f32 -1.442695, %v4025_v61  ;;  %v9929_v9 = vmul.f32 -1.442695, %v4102_v6 }
 0x900   : > { %12219 = vpow2.f32 %v9928_v11 }
 0x901   : > { %12221 = vpow2.f32 %v9929_v9 }
 0x904   : > { %v4175_v21 = vpop.f32.mrf.mxu0  ;;  %v4247_v41 = vpop.f32.mrf.mxu1 }
 0x905   : > { %v4251_v23 = vadd.f32 %v4247_v41, %v3954_v22  ;;  %v4179_v46 = vadd.f32 %v4175_v21, %v3953_v44 }
 0x906   : > { %v11283_v42 = vpop.f32.mrf.mxu0  ;;  %v11294_v43 = vpop.f32.mrf.mxu1 }
 0x907   : > { %v9930_v45 = vmul.f32 -1.442695, %v4251_v23 }
 0x909   : > { %12223 = vpow2.f32 %v9930_v45 }
 0x90a   : > { %12225 = vtanh.f32 %v4179_v46 }
 0x90d   : > { %v12220_v47 = vpop.eup %12219 }
 0x90e   : > { %v12222_v48 = vpop.eup %12221  ;;  %v4029_v49 = vadd.f32 1.0, %v12220_v47 }
 0x90f   : > { %v4106_v50 = vadd.f32 1.0, %v12222_v48 }
 0x910   : > { %12227 = vrcp.f32 %v4029_v49  ;;  %v4580_v49 = vld [vmem:[#allocation3 + $0x40] sm:$0xff] }
 0x911   : > { %12229 = vrcp.f32 %v4106_v50 }
 0x916   : > { %v12224_v51 = vpop.eup %12223 }
 0x917   : > { %v12226_v19 = vpop.eup %12225  ;;  %v4255_v55 = vadd.f32 1.0, %v12224_v51  ;;  %v4581_v51 = vld [vmem:[#allocation3 + $0x48] sm:$0xff] }
 0x919   : > { %12231 = vrcp.f32 %v4255_v55 }
 0x91d   : > { %v12228_v20 = vpop.eup %12227 }
 0x91e   : > { %v12230_v52 = vpop.eup %12229  ;;  %v4259_v54 = vmul.f32 %v12228_v20, %v12226_v19 }
 0x91f   : > { %v4258_v56 = vmul.f32 0.0, %v12230_v52 }
 0x921   : > { %v13567_v10 = vadd.f32 %v4259_v54, %v4258_v56 }
 0x923   : > { %12233 = vtanh.f32 %v13567_v10 }
 0x926   : > { %v12232_v12 = vpop.eup %12231 }
 0x930   : > { %v12234_v14 = vpop.eup %12233 }
 0x931   : > { %v4262_v15 = vmul.f32 %v12234_v14, %v12232_v12 }
 0x933   : > { %4263 = vst.msk [vmem:[#allocation2] sm:$0xff] %vm367_vm0, %v4262_v15  ;;  %11304 = vmatmul.mubr.msk.f32.vlgmr.msra.gmra.mxu0 %vm367_vm0, %v4262_v15  ;;  %11315 = vmatmul.mubr.msk.f32.vlgmr.msra.gmra.mxu1 %vm367_vm0, %v4262_v15 }
 0x934   : > { %11318 = vmatpush3.msra.mxu0 %v13472_v30  ;;  %11329 = vmatpush3.msra.mxu1 %v13475_v33 }
 0x935   : > { %11319 = vmatprep.subr.mxu0 %v12591_v26  ;;  %11330 = vmatprep.subr.mxu1 %v12591_v26 }
 0x936   : > { %11320 = vmatpush3.msra.mxu0 %v13482_v0  ;;  %11331 = vmatpush3.msra.mxu1 %v13485_v1 }
 0x937   : > { %11321 = vmatprep.subr.mxu0 %v12591_v26  ;;  %11332 = vmatprep.subr.mxu1 %v12591_v26 }
 0x938   : > { %11322 = vmatpush3.msra.mxu0 %v13492_v2  ;;  %11333 = vmatpush3.msra.mxu1 %v13495_v3 }
 0x939   : > { %11323 = vmatprep.subr.mxu0 %v12591_v26  ;;  %11334 = vmatprep.subr.mxu1 %v12591_v26 }
 0x93a   : > { %11324 = vmatpush3.msra.mxu0 %v13502_v4  ;;  %11325 = vmatprep.mubr.msk.f32.mxu0 %vm12592_vm1, %v12591_v26 }
 0x93b   : > { %11335 = vmatpush3.msra.mxu1 %v13507_v5  ;;  %11336 = vmatprep.mubr.msk.f32.mxu1 %vm12592_vm1, %v12591_v26 }
 0x93c   : > { %11326 = vmatmul.mubr.msk.f32.vlgmr.msra.gmra.mxu0 %vm367_vm0, %v4262_v15  ;;  %11337 = vmatmul.mubr.msk.f32.vlgmr.msra.gmra.mxu1 %vm367_vm0, %v4262_v15  ;;  %v4583_v15 = vld [vmem:[#allocation3 + $0x58] sm:$0xff] }
 0x93d   : > { %11339 = vmatprep.subr.mxu0 %v12591_v26  ;;  %11350 = vmatprep.subr.mxu1 %v12591_v26 }
 0x93e   : > { %11340 = vmatpush3.msra.mxu0 %v13404_v53  ;;  %11351 = vmatpush3.msra.mxu1 %v13407_v62 }
 0x93f   : > { %11341 = vmatprep.subr.mxu0 %v12591_v26  ;;  %11352 = vmatprep.subr.mxu1 %v12591_v26 }
 0x940   : > { %11342 = vmatpush3.msra.mxu0 %v13422_v13  ;;  %11353 = vmatpush3.msra.mxu1 %v13425_v63 }
 0x941   : > { %11343 = vmatprep.subr.mxu0 %v12591_v26  ;;  %11354 = vmatprep.subr.mxu1 %v12591_v26 }
 0x942   : > { %11344 = vmatpush3.msra.mxu0 %v13440_v25  ;;  %11355 = vmatpush3.msra.mxu1 %v13443_v27 }
 0x943   : > { %11345 = vmatprep.subr.mxu0 %v12591_v26  ;;  %11356 = vmatprep.subr.mxu1 %v12591_v26 }
 0x944   : > { %11346 = vmatpush3.msra.mxu0 %v13456_v28  ;;  %11357 = vmatpush3.msra.mxu1 %v13459_v29 }
 0x945   : > { %11347 = vmatprep.mubr.msk.f32.mxu0 %vm12592_vm1, %v12591_v26  ;;  %11358 = vmatprep.mubr.msk.f32.mxu1 %vm12592_vm1, %v12591_v26 }
 0x946   : > { %11361 = vmatprep.subr.mxu0 %v12591_v26  ;;  %11372 = vmatprep.subr.mxu1 %v12591_v26 }
 0x9f3   : > { %v4337_v17 = vpop.f32.mrf.mxu0  ;;  %v4414_v24 = vpop.f32.mrf.mxu1 }
 0x9f4   : > { %v4341_v31 = vadd.f32 %v4337_v17, %v4264_v16  ;;  %v4418_v34 = vadd.f32 %v4414_v24, %v4265_v18  ;;  %v4582_v24 = vld [vmem:[#allocation3 + $0x50] sm:$0xff] }
 0x9f5   : > { %v11305_v32 = vpop.f32.mrf.mxu0  ;;  %v11316_v35 = vpop.f32.mrf.mxu1 }
 0x9f6   : > { %v9932_v36 = vmul.f32 -1.442695, %v4341_v31  ;;  %v9934_v37 = vmul.f32 -1.442695, %v4418_v34 }
 0x9f8   : > { %12235 = vpow2.f32 %v9932_v36 }
 0x9f9   : > { %12237 = vpow2.f32 %v9934_v37 }
 0x9fc   : > { %v4491_v38 = vpop.f32.mrf.mxu0  ;;  %v4563_v39 = vpop.f32.mrf.mxu1 }
 0x9fd   : > { %v4567_v57 = vadd.f32 %v4563_v39, %v4267_v40  ;;  %v4495_v6 = vadd.f32 %v4491_v38, %v4266_v60 }
 0x9fe   : > { %v11327_v58 = vpop.f32.mrf.mxu0  ;;  %v11338_v59 = vpop.f32.mrf.mxu1 }
 0x9ff   : > { %v9937_v61 = vmul.f32 -1.442695, %v4567_v57 }
 0xa01   : > { %12239 = vpow2.f32 %v9937_v61 }
 0xa02   : > { %12241 = vtanh.f32 %v4495_v6 }
 0xa05   : > { %v12236_v7 = vpop.eup %12235 }
 0xa06   : > { %v12238_v8 = vpop.eup %12237  ;;  %v4345_v11 = vadd.f32 1.0, %v12236_v7 }
 0xa07   : > { %v4422_v9 = vadd.f32 1.0, %v12238_v8 }
 0xa08   : > { %12243 = vrcp.f32 %v4345_v11  ;;  %v4896_v11 = vld [vmem:[#allocation3 + $0x60] sm:$0xff] }
 0xa09   : > { %12245 = vrcp.f32 %v4422_v9 }
 0xa0e   : > { %v12240_v21 = vpop.eup %12239 }
 0xa0f   : > { %v12242_v41 = vpop.eup %12241  ;;  %v4571_v43 = vadd.f32 1.0, %v12240_v21  ;;  %v4897_v21 = vld [vmem:[#allocation3 + $0x68] sm:$0xff] }
 0xa11   : > { %12247 = vrcp.f32 %v4571_v43 }
 0xa15   : > { %v12244_v22 = vpop.eup %12243 }
 0xa16   : > { %v12246_v23 = vpop.eup %12245  ;;  %v4575_v42 = vmul.f32 %v12244_v22, %v12242_v41 }
 0xa17   : > { %v4574_v44 = vmul.f32 %v12246_v23, %v13567_v10 }
 0xa19   : > { %v13616_v45 = vadd.f32 %v4575_v42, %v4574_v44 }
 0xa1b   : > { %12249 = vtanh.f32 %v13616_v45 }
 0xa1e   : > { %v12248_v46 = vpop.eup %12247 }
 0xa28   : > { %v12250_v47 = vpop.eup %12249 }
 0xa29   : > { %v4578_v48 = vmul.f32 %v12250_v47, %v12248_v46 }
 0xa2b   : > { %4579 = vst.msk [vmem:[#allocation2 + $0x8] sm:$0xff] %vm367_vm0, %v4578_v48  ;;  %11348 = vmatmul.mubr.msk.f32.vlgmr.msra.gmra.mxu0 %vm367_vm0, %v4578_v48  ;;  %11359 = vmatmul.mubr.msk.f32.vlgmr.msra.gmra.mxu1 %vm367_vm0, %v4578_v48 }
 0xa2c   : > { %11362 = vmatpush3.msra.mxu0 %v13472_v30  ;;  %11373 = vmatpush3.msra.mxu1 %v13475_v33 }
 0xa2d   : > { %11363 = vmatprep.subr.mxu0 %v12591_v26  ;;  %11374 = vmatprep.subr.mxu1 %v12591_v26 }
 0xa2e   : > { %11364 = vmatpush3.msra.mxu0 %v13482_v0  ;;  %11375 = vmatpush3.msra.mxu1 %v13485_v1 }
 0xa2f   : > { %11365 = vmatprep.subr.mxu0 %v12591_v26  ;;  %11376 = vmatprep.subr.mxu1 %v12591_v26 }
 0xa30   : > { %11366 = vmatpush3.msra.mxu0 %v13492_v2  ;;  %11377 = vmatpush3.msra.mxu1 %v13495_v3 }
 0xa31   : > { %11367 = vmatprep.subr.mxu0 %v12591_v26  ;;  %11378 = vmatprep.subr.mxu1 %v12591_v26 }
 0xa32   : > { %11368 = vmatpush3.msra.mxu0 %v13502_v4  ;;  %11369 = vmatprep.mubr.msk.f32.mxu0 %vm12592_vm1, %v12591_v26 }
 0xa33   : > { %11379 = vmatpush3.msra.mxu1 %v13507_v5  ;;  %11380 = vmatprep.mubr.msk.f32.mxu1 %vm12592_vm1, %v12591_v26 }
 0xa34   : > { %11370 = vmatmul.mubr.msk.f32.vlgmr.msra.gmra.mxu0 %vm367_vm0, %v4578_v48  ;;  %11381 = vmatmul.mubr.msk.f32.vlgmr.msra.gmra.mxu1 %vm367_vm0, %v4578_v48  ;;  %v4899_v48 = vld [vmem:[#allocation3 + $0x78] sm:$0xff] }
 0xa35   : > { %11383 = vmatprep.subr.mxu0 %v12591_v26  ;;  %11394 = vmatprep.subr.mxu1 %v12591_v26 }
 0xa36   : > { %11384 = vmatpush3.msra.mxu0 %v13404_v53  ;;  %11395 = vmatpush3.msra.mxu1 %v13407_v62 }
 0xa37   : > { %11385 = vmatprep.subr.mxu0 %v12591_v26  ;;  %11396 = vmatprep.subr.mxu1 %v12591_v26 }
 0xa38   : > { %11386 = vmatpush3.msra.mxu0 %v13422_v13  ;;  %11397 = vmatpush3.msra.mxu1 %v13425_v63 }
 0xa39   : > { %11387 = vmatprep.subr.mxu0 %v12591_v26  ;;  %11398 = vmatprep.subr.mxu1 %v12591_v26 }
 0xa3a   : > { %11388 = vmatpush3.msra.mxu0 %v13440_v25  ;;  %11399 = vmatpush3.msra.mxu1 %v13443_v27 }
 0xa3b   : > { %11389 = vmatprep.subr.mxu0 %v12591_v26  ;;  %11400 = vmatprep.subr.mxu1 %v12591_v26 }
 0xa3c   : > { %11390 = vmatpush3.msra.mxu0 %v13456_v28  ;;  %11401 = vmatpush3.msra.mxu1 %v13459_v29 }
 0xa3d   : > { %11391 = vmatprep.mubr.msk.f32.mxu0 %vm12592_vm1, %v12591_v26  ;;  %11402 = vmatprep.mubr.msk.f32.mxu1 %vm12592_vm1, %v12591_v26 }
 0xa3e   : > { %11405 = vmatprep.subr.mxu0 %v12591_v26  ;;  %11416 = vmatprep.subr.mxu1 %v12591_v26 }
 0xaeb   : > { %v4653_v50 = vpop.f32.mrf.mxu0  ;;  %v4730_v19 = vpop.f32.mrf.mxu1 }
 0xaec   : > { %v4657_v20 = vadd.f32 %v4653_v50, %v4580_v49  ;;  %v4734_v52 = vadd.f32 %v4730_v19, %v4581_v51  ;;  %v4898_v19 = vld [vmem:[#allocation3 + $0x70] sm:$0xff] }
 0xaed   : > { %v11349_v54 = vpop.f32.mrf.mxu0  ;;  %v11360_v55 = vpop.f32.mrf.mxu1 }
 0xaee   : > { %v9939_v56 = vmul.f32 -1.442695, %v4657_v20  ;;  %v9941_v10 = vmul.f32 -1.442695, %v4734_v52 }
 0xaf0   : > { %12251 = vpow2.f32 %v9939_v56 }
 0xaf1   : > { %12253 = vpow2.f32 %v9941_v10 }
 0xaf4   : > { %v4807_v12 = vpop.f32.mrf.mxu0  ;;  %v4879_v14 = vpop.f32.mrf.mxu1 }
 0xaf5   : > { %v4883_v16 = vadd.f32 %v4879_v14, %v4583_v15  ;;  %v4811_v34 = vadd.f32 %v4807_v12, %v4582_v24 }
 0xaf6   : > { %v11371_v17 = vpop.f32.mrf.mxu0  ;;  %v11382_v18 = vpop.f32.mrf.mxu1 }
 0xaf7   : > { %v9944_v31 = vmul.f32 -1.442695, %v4883_v16 }
 0xaf9   : > { %12255 = vpow2.f32 %v9944_v31 }
 0xafa   : > { %12257 = vtanh.f32 %v4811_v34 }
 0xafd   : > { %v12252_v32 = vpop.eup %12251 }
 0xafe   : > { %v12254_v35 = vpop.eup %12253  ;;  %v4661_v36 = vadd.f32 1.0, %v12252_v32 }
 0xaff   : > { %v4738_v37 = vadd.f32 1.0, %v12254_v35 }
 0xb00   : > { %12259 = vrcp.f32 %v4661_v36 }
 0xb01   : > { %12261 = vrcp.f32 %v4738_v37 }
 0xb06   : > { %v12256_v38 = vpop.eup %12255 }
 0xb07   : > { %v12258_v39 = vpop.eup %12257  ;;  %v4887_v59 = vadd.f32 1.0, %v12256_v38 }
 0xb09   : > { %12263 = vrcp.f32 %v4887_v59 }
 0xb0d   : > { %v12260_v40 = vpop.eup %12259 }
 0xb0e   : > { %v12262_v57 = vpop.eup %12261  ;;  %v4891_v58 = vmul.f32 %v12260_v40, %v12258_v39  ;;  %v5215_v40 = vld [vmem:[#allocation3 + $0x98] sm:$0xff] }
 0xb0f   : > { %v4890_v60 = vmul.f32 %v12262_v57, %v13616_v45 }
 0xb11   : > { %v13665_v61 = vadd.f32 %v4891_v58, %v4890_v60  ;;  %v5214_v60 = vld [vmem:[#allocation3 + $0x90] sm:$0xff] }
 0xb13   : > { %12265 = vtanh.f32 %v13665_v61 }
 0xb16   : > { %v12264_v6 = vpop.eup %12263 }
 0xb20   : > { %v12266_v7 = vpop.eup %12265 }
 0xb21   : > { %v4894_v8 = vmul.f32 %v12266_v7, %v12264_v6 }
 0xb23   : > { %4895 = vst.msk [vmem:[#allocation2 + $0x10] sm:$0xff] %vm367_vm0, %v4894_v8  ;;  %11392 = vmatmul.mubr.msk.f32.vlgmr.msra.gmra.mxu0 %vm367_vm0, %v4894_v8  ;;  %11403 = vmatmul.mubr.msk.f32.vlgmr.msra.gmra.mxu1 %vm367_vm0, %v4894_v8 }
 0xb24   : > { %11406 = vmatpush3.msra.mxu0 %v13472_v30  ;;  %11417 = vmatpush3.msra.mxu1 %v13475_v33 }
 0xb25   : > { %11407 = vmatprep.subr.mxu0 %v12591_v26  ;;  %11418 = vmatprep.subr.mxu1 %v12591_v26 }
 0xb26   : > { %11408 = vmatpush3.msra.mxu0 %v13482_v0  ;;  %11419 = vmatpush3.msra.mxu1 %v13485_v1 }
 0xb27   : > { %11409 = vmatprep.subr.mxu0 %v12591_v26  ;;  %11420 = vmatprep.subr.mxu1 %v12591_v26 }
 0xb28   : > { %11410 = vmatpush3.msra.mxu0 %v13492_v2  ;;  %11421 = vmatpush3.msra.mxu1 %v13495_v3 }
 0xb29   : > { %11411 = vmatprep.subr.mxu0 %v12591_v26  ;;  %11422 = vmatprep.subr.mxu1 %v12591_v26 }
 0xb2a   : > { %11412 = vmatpush3.msra.mxu0 %v13502_v4  ;;  %11413 = vmatprep.mubr.msk.f32.mxu0 %vm12592_vm1, %v12591_v26 }
 0xb2b   : > { %11423 = vmatpush3.msra.mxu1 %v13507_v5  ;;  %11424 = vmatprep.mubr.msk.f32.mxu1 %vm12592_vm1, %v12591_v26 }
 0xb2c   : > { %11414 = vmatmul.mubr.msk.f32.vlgmr.msra.gmra.mxu0 %vm367_vm0, %v4894_v8  ;;  %11425 = vmatmul.mubr.msk.f32.vlgmr.msra.gmra.mxu1 %vm367_vm0, %v4894_v8 }
 0xb2d   : > { %11427 = vmatprep.subr.mxu0 %v12591_v26  ;;  %11438 = vmatprep.subr.mxu1 %v12591_v26 }
 0xb2e   : > { %11428 = vmatpush3.msra.mxu0 %v13404_v53  ;;  %11439 = vmatpush3.msra.mxu1 %v13407_v62 }
 0xb2f   : > { %11429 = vmatprep.subr.mxu0 %v12591_v26  ;;  %11440 = vmatprep.subr.mxu1 %v12591_v26 }
 0xb30   : > { %11430 = vmatpush3.msra.mxu0 %v13422_v13  ;;  %11441 = vmatpush3.msra.mxu1 %v13425_v63 }
 0xb31   : > { %11431 = vmatprep.subr.mxu0 %v12591_v26  ;;  %11442 = vmatprep.subr.mxu1 %v12591_v26 }
 0xb32   : > { %11432 = vmatpush3.msra.mxu0 %v13440_v25  ;;  %11443 = vmatpush3.msra.mxu1 %v13443_v27 }
 0xb33   : > { %11433 = vmatprep.subr.mxu0 %v12591_v26  ;;  %11444 = vmatprep.subr.mxu1 %v12591_v26 }
 0xb34   : > { %11434 = vmatpush3.msra.mxu0 %v13456_v28  ;;  %11445 = vmatpush3.msra.mxu1 %v13459_v29 }
 0xb35   : > { %11435 = vmatprep.mubr.msk.f32.mxu0 %vm12592_vm1, %v12591_v26  ;;  %11446 = vmatprep.mubr.msk.f32.mxu1 %vm12592_vm1, %v12591_v26 }
 0xb36   : > { %11449 = vmatprep.subr.mxu0 %v12591_v26  ;;  %11460 = vmatprep.subr.mxu1 %v12591_v26 }
 0xbe3   : > { %v4969_v9 = vpop.f32.mrf.mxu0  ;;  %v5046_v41 = vpop.f32.mrf.mxu1 }
 0xbe4   : > { %v4973_v22 = vadd.f32 %v4969_v9, %v4896_v11  ;;  %v5050_v23 = vadd.f32 %v5046_v41, %v4897_v21 }
 0xbe5   : > { %v11393_v42 = vpop.f32.mrf.mxu0  ;;  %v11404_v43 = vpop.f32.mrf.mxu1 }
 0xbe6   : > { %v9946_v44 = vmul.f32 -1.442695, %v4973_v22  ;;  %v9948_v45 = vmul.f32 -1.442695, %v5050_v23 }
 0xbe8   : > { %12267 = vpow2.f32 %v9946_v44 }
 0xbe9   : > { %12269 = vpow2.f32 %v9948_v45 }
 0xbec   : > { %v5123_v46 = vpop.f32.mrf.mxu0  ;;  %v5195_v47 = vpop.f32.mrf.mxu1 }
 0xbed   : > { %v5199_v49 = vadd.f32 %v5195_v47, %v4899_v48  ;;  %v5127_v52 = vadd.f32 %v5123_v46, %v4898_v19 }
 0xbee   : > { %v11415_v50 = vpop.f32.mrf.mxu0  ;;  %v11426_v51 = vpop.f32.mrf.mxu1 }
 0xbef   : > { %v9951_v20 = vmul.f32 -1.442695, %v5199_v49  ;;  %v5528_v49 = vld [vmem:[#allocation3 + $0xa0] sm:$0xff]  ;;  %v5529_v51 = vld [vmem:[#allocation3 + $0xa8] sm:$0xff] }
 0xbf1   : > { %12271 = vpow2.f32 %v9951_v20 }
 0xbf2   : > { %12273 = vtanh.f32 %v5127_v52 }
 0xbf5   : > { %v12268_v54 = vpop.eup %12267 }
 0xbf6   : > { %v12270_v55 = vpop.eup %12269  ;;  %v4977_v56 = vadd.f32 1.0, %v12268_v54 }
 0xbf7   : > { %v5054_v10 = vadd.f32 1.0, %v12270_v55 }
 0xbf8   : > { %12275 = vrcp.f32 %v4977_v56 }
 0xbf9   : > { %12277 = vrcp.f32 %v5054_v10 }
 0xbfe   : > { %v12272_v12 = vpop.eup %12271 }
 0xbff   : > { %v12274_v14 = vpop.eup %12273  ;;  %v5203_v18 = vadd.f32 1.0, %v12272_v12 }
 0xc01   : > { %12279 = vrcp.f32 %v5203_v18 }
 0xc05   : > { %v12276_v15 = vpop.eup %12275 }
 0xc06   : > { %v12278_v16 = vpop.eup %12277  ;;  %v5207_v17 = vmul.f32 %v12276_v15, %v12274_v14  ;;  %v5531_v15 = vld [vmem:[#allocation3 + $0xb8] sm:$0xff] }
 0xc07   : > { %v5206_v24 = vmul.f32 %v12278_v16, %v13665_v61 }
 0xc09   : > { %v13714_v31 = vadd.f32 %v5207_v17, %v5206_v24  ;;  %v5530_v24 = vld [vmem:[#allocation3 + $0xb0] sm:$0xff] }
 0xc0b   : > { %12281 = vtanh.f32 %v13714_v31 }
 0xc0e   : > { %v12280_v34 = vpop.eup %12279 }
 0xc18   : > { %v12282_v32 = vpop.eup %12281 }
 0xc19   : > { %v5210_v35 = vmul.f32 %v12282_v32, %v12280_v34 }
 0xc1b   : > { %5211 = vst.msk [vmem:[#allocation2 + $0x18] sm:$0xff] %vm367_vm0, %v5210_v35  ;;  %11436 = vmatmul.mubr.msk.f32.vlgmr.msra.gmra.mxu0 %vm367_vm0, %v5210_v35  ;;  %11447 = vmatmul.mubr.msk.f32.vlgmr.msra.gmra.mxu1 %vm367_vm0, %v5210_v35 }
 0xc1c   : > { %11450 = vmatpush3.msra.mxu0 %v13472_v30  ;;  %11461 = vmatpush3.msra.mxu1 %v13475_v33 }
 0xc1d   : > { %11451 = vmatprep.subr.mxu0 %v12591_v26  ;;  %11462 = vmatprep.subr.mxu1 %v12591_v26 }
 0xc1e   : > { %11452 = vmatpush3.msra.mxu0 %v13482_v0  ;;  %11463 = vmatpush3.msra.mxu1 %v13485_v1 }
 0xc1f   : > { %11453 = vmatprep.subr.mxu0 %v12591_v26  ;;  %11464 = vmatprep.subr.mxu1 %v12591_v26 }
 0xc20   : > { %11454 = vmatpush3.msra.mxu0 %v13492_v2  ;;  %11465 = vmatpush3.msra.mxu1 %v13495_v3 }
 0xc21   : > { %11455 = vmatprep.subr.mxu0 %v12591_v26  ;;  %11466 = vmatprep.subr.mxu1 %v12591_v26 }
 0xc22   : > { %11456 = vmatpush3.msra.mxu0 %v13502_v4  ;;  %11457 = vmatprep.mubr.msk.f32.mxu0 %vm12592_vm1, %v12591_v26 }
 0xc23   : > { %11467 = vmatpush3.msra.mxu1 %v13507_v5  ;;  %11468 = vmatprep.mubr.msk.f32.mxu1 %vm12592_vm1, %v12591_v26 }
 0xc24   : > { %11458 = vmatmul.mubr.msk.f32.vlgmr.msra.gmra.mxu0 %vm367_vm0, %v5210_v35  ;;  %11469 = vmatmul.mubr.msk.f32.vlgmr.msra.gmra.mxu1 %vm367_vm0, %v5210_v35 }
 0xc25   : > { %11471 = vmatprep.subr.mxu0 %v12591_v26  ;;  %11482 = vmatprep.subr.mxu1 %v12591_v26 }
 0xc26   : > { %11472 = vmatpush3.msra.mxu0 %v13404_v53  ;;  %11483 = vmatpush3.msra.mxu1 %v13407_v62  ;;  %v5212_v53 = vld [vmem:[#allocation3 + $0x80] sm:$0xff] }
 0xc27   : > { %11473 = vmatprep.subr.mxu0 %v12591_v26  ;;  %11484 = vmatprep.subr.mxu1 %v12591_v26 }
 0xc28   : > { %11474 = vmatpush3.msra.mxu0 %v13422_v13  ;;  %11485 = vmatpush3.msra.mxu1 %v13425_v63  ;;  %v5213_v13 = vld [vmem:[#allocation3 + $0x88] sm:$0xff] }
 0xc29   : > { %11475 = vmatprep.subr.mxu0 %v12591_v26  ;;  %11486 = vmatprep.subr.mxu1 %v12591_v26 }
 0xc2a   : > { %11476 = vmatpush3.msra.mxu0 %v13440_v25  ;;  %11487 = vmatpush3.msra.mxu1 %v13443_v27 }
 0xc2b   : > { %11477 = vmatprep.subr.mxu0 %v12591_v26  ;;  %11488 = vmatprep.subr.mxu1 %v12591_v26 }
 0xc2c   : > { %11478 = vmatpush3.msra.mxu0 %v13456_v28  ;;  %11489 = vmatpush3.msra.mxu1 %v13459_v29 }
 0xc2d   : > { %11479 = vmatprep.mubr.msk.f32.mxu0 %vm12592_vm1, %v12591_v26  ;;  %11490 = vmatprep.mubr.msk.f32.mxu1 %vm12592_vm1, %v12591_v26 }
 0xc2e   : > { %11493 = vmatprep.subr.mxu0 %v12591_v26  ;;  %11504 = vmatprep.subr.mxu1 %v12591_v26 }
 0xcdb   : > { %v5285_v62 = vpop.f32.mrf.mxu0  ;;  %v5362_v63 = vpop.f32.mrf.mxu1 }
 0xcdc   : > { %v5289_v25 = vadd.f32 %v5285_v62, %v5212_v53  ;;  %v5366_v27 = vadd.f32 %v5362_v63, %v5213_v13 }
 0xcdd   : > { %v11437_v36 = vpop.f32.mrf.mxu0  ;;  %v11448_v28 = vpop.f32.mrf.mxu1 }
 0xcde   : > { %v9953_v37 = vmul.f32 -1.442695, %v5289_v25  ;;  %v9955_v29 = vmul.f32 -1.442695, %v5366_v27 }
 0xce0   : > { %12283 = vpow2.f32 %v9953_v37 }
 0xce1   : > { %12285 = vpow2.f32 %v9955_v29 }
 0xce4   : > { %v5439_v38 = vpop.f32.mrf.mxu0  ;;  %v5511_v39 = vpop.f32.mrf.mxu1 }
 0xce5   : > { %v5515_v57 = vadd.f32 %v5511_v39, %v5215_v40  ;;  %v5443_v6 = vadd.f32 %v5439_v38, %v5214_v60  ;;  %v13857_v60 = vld [vmem:[%s12703_s14 + $0xf0] sm:$0xff] }
 0xce6   : > { %v11459_v58 = vpop.f32.mrf.mxu0  ;;  %v11470_v59 = vpop.f32.mrf.mxu1 }
 0xce7   : > { %v9958_v61 = vmul.f32 -1.442695, %v5515_v57  ;;  %v13843_v57 = vld [vmem:[%s12703_s14 + $0xd8] sm:$0xff]  ;;  %v13853_v59 = vld [vmem:[%s12703_s14 + $0xd0] sm:$0xff] }
 0xce8   : > { %v13847_v58 = vld [vmem:[%s12703_s14 + $0xf8] sm:$0xff] }
 0xce9   : > { %12287 = vpow2.f32 %v9958_v61  ;;  %v13863_v61 = vld [vmem:[%s12703_s14 + $0xc8] sm:$0xff] }
 0xcea   : > { %12289 = vtanh.f32 %v5443_v6  ;;  %v13867_v6 = vld [vmem:[%s12703_s14 + $0xe8] sm:$0xff] }
 0xced   : > { %v12284_v7 = vpop.eup %12283 }
 0xcee   : > { %v12286_v8 = vpop.eup %12285  ;;  %v5293_v11 = vadd.f32 1.0, %v12284_v7  ;;  %v13873_v7 = vld [vmem:[%s12703_s14 + $0xc0] sm:$0xff] }
 0xcef   : > { %v5370_v9 = vadd.f32 1.0, %v12286_v8  ;;  %v13879_v8 = vld [vmem:[%s12703_s14 + $0xe0] sm:$0xff] }
 0xcf0   : > { %12291 = vrcp.f32 %v5293_v11  ;;  %v5844_v11 = vld [vmem:[#allocation3 + $0xc0] sm:$0xff] }
 0xcf1   : > { %12293 = vrcp.f32 %v5370_v9 }
 0xcf6   : > { %v12288_v21 = vpop.eup %12287 }
 0xcf7   : > { %v12290_v41 = vpop.eup %12289  ;;  %v5519_v43 = vadd.f32 1.0, %v12288_v21  ;;  %v5845_v21 = vld [vmem:[#allocation3 + $0xc8] sm:$0xff] }
 0xcf9   : > { %12295 = vrcp.f32 %v5519_v43 }
 0xcfd   : > { %v12292_v22 = vpop.eup %12291 }
 0xcfe   : > { %v12294_v23 = vpop.eup %12293  ;;  %v5523_v42 = vmul.f32 %v12292_v22, %v12290_v41 }
 0xcff   : > { %v5522_v44 = vmul.f32 %v12294_v23, %v13714_v31 }
 0xd01   : > { %v13763_v45 = vadd.f32 %v5523_v42, %v5522_v44 }
 0xd03   : > { %12297 = vtanh.f32 %v13763_v45 }
 0xd06   : > { %v12296_v46 = vpop.eup %12295 }
 0xd10   : > { %v12298_v47 = vpop.eup %12297 }
 0xd11   : > { %v5526_v48 = vmul.f32 %v12298_v47, %v12296_v46 }
 0xd13   : > { %5527 = vst.msk [vmem:[#allocation2 + $0x20] sm:$0xff] %vm367_vm0, %v5526_v48  ;;  %11480 = vmatmul.mubr.msk.f32.vlgmr.msra.gmra.mxu0 %vm367_vm0, %v5526_v48  ;;  %11491 = vmatmul.mubr.msk.f32.vlgmr.msra.gmra.mxu1 %vm367_vm0, %v5526_v48 }
 0xd14   : > { %11494 = vmatpush3.msra.mxu0 %v13472_v30  ;;  %11505 = vmatpush3.msra.mxu1 %v13475_v33  ;;  %v13792_v30 = vld [vmem:[%s12703_s14 + $0x98] sm:$0xff] }
 0xd15   : > { %11495 = vmatprep.subr.mxu0 %v12591_v26  ;;  %11506 = vmatprep.subr.mxu1 %v12591_v26  ;;  %v13796_v33 = vld [vmem:[%s12703_s14 + $0xb8] sm:$0xff] }
 0xd16   : > { %11496 = vmatpush3.msra.mxu0 %v13482_v0  ;;  %11507 = vmatpush3.msra.mxu1 %v13485_v1  ;;  %v13802_v0 = vld [vmem:[%s12703_s14 + $0x90] sm:$0xff] }
 0xd17   : > { %11497 = vmatprep.subr.mxu0 %v12591_v26  ;;  %11508 = vmatprep.subr.mxu1 %v12591_v26  ;;  %v13806_v1 = vld [vmem:[%s12703_s14 + $0xb0] sm:$0xff] }
 0xd18   : > { %11498 = vmatpush3.msra.mxu0 %v13492_v2  ;;  %11509 = vmatpush3.msra.mxu1 %v13495_v3  ;;  %v13812_v2 = vld [vmem:[%s12703_s14 + $0x88] sm:$0xff] }
 0xd19   : > { %11499 = vmatprep.subr.mxu0 %v12591_v26  ;;  %11510 = vmatprep.subr.mxu1 %v12591_v26  ;;  %v13816_v3 = vld [vmem:[%s12703_s14 + $0xa8] sm:$0xff] }
 0xd1a   : > { %11500 = vmatpush3.msra.mxu0 %v13502_v4  ;;  %11501 = vmatprep.mubr.msk.f32.mxu0 %vm12592_vm1, %v12591_v26  ;;  %v13822_v4 = vld [vmem:[%s12703_s14 + $0x80] sm:$0xff] }
 0xd1b   : > { %11511 = vmatpush3.msra.mxu1 %v13507_v5  ;;  %11512 = vmatprep.mubr.msk.f32.mxu1 %vm12592_vm1, %v12591_v26  ;;  %v13826_v5 = vld [vmem:[%s12703_s14 + $0xa0] sm:$0xff] }
 0xd1c   : > { %11502 = vmatmul.mubr.msk.f32.vlgmr.msra.gmra.mxu0 %vm367_vm0, %v5526_v48  ;;  %11513 = vmatmul.mubr.msk.f32.vlgmr.msra.gmra.mxu1 %vm367_vm0, %v5526_v48  ;;  %v5847_v48 = vld [vmem:[#allocation3 + $0xd8] sm:$0xff] }
 0xd1d   : > { %11515 = vmatprep.subr.mxu0 %v12591_v26  ;;  %11526 = vmatprep.subr.mxu1 %v12591_v26 }
 0xd1e   : > { %11516 = vmatpush3.msra.mxu0 %v13792_v30  ;;  %11527 = vmatpush3.msra.mxu1 %v13796_v33 }
 0xd1f   : > { %11517 = vmatprep.subr.mxu0 %v12591_v26  ;;  %11528 = vmatprep.subr.mxu1 %v12591_v26 }
 0xd20   : > { %11518 = vmatpush3.msra.mxu0 %v13802_v0  ;;  %11529 = vmatpush3.msra.mxu1 %v13806_v1 }
 0xd21   : > { %11519 = vmatprep.subr.mxu0 %v12591_v26  ;;  %11530 = vmatprep.subr.mxu1 %v12591_v26 }
 0xd22   : > { %11520 = vmatpush3.msra.mxu0 %v13812_v2  ;;  %11531 = vmatpush3.msra.mxu1 %v13816_v3 }
 0xd23   : > { %11521 = vmatprep.subr.mxu0 %v12591_v26  ;;  %11532 = vmatprep.subr.mxu1 %v12591_v26 }
 0xd24   : > { %11522 = vmatpush3.msra.mxu0 %v13822_v4  ;;  %11533 = vmatpush3.msra.mxu1 %v13826_v5 }
 0xd25   : > { %11523 = vmatprep.mubr.msk.f32.mxu0 %vm12592_vm1, %v12591_v26  ;;  %11534 = vmatprep.mubr.msk.f32.mxu1 %vm12592_vm1, %v12591_v26 }
 0xd26   : > { %11537 = vmatprep.subr.mxu0 %v12591_v26  ;;  %11548 = vmatprep.subr.mxu1 %v12591_v26 }
 0xdd3   : > { %v5601_v50 = vpop.f32.mrf.mxu0  ;;  %v5678_v19 = vpop.f32.mrf.mxu1 }
 0xdd4   : > { %v5605_v20 = vadd.f32 %v5601_v50, %v5528_v49  ;;  %v5682_v52 = vadd.f32 %v5678_v19, %v5529_v51 }
 0xdd5   : > { %v11481_v54 = vpop.f32.mrf.mxu0  ;;  %v11492_v55 = vpop.f32.mrf.mxu1 }
 0xdd6   : > { %v9960_v56 = vmul.f32 -1.442695, %v5605_v20  ;;  %v9962_v10 = vmul.f32 -1.442695, %v5682_v52 }
 0xdd8   : > { %12299 = vpow2.f32 %v9960_v56 }
 0xdd9   : > { %12301 = vpow2.f32 %v9962_v10 }
 0xddc   : > { %v5755_v12 = vpop.f32.mrf.mxu0  ;;  %v5827_v14 = vpop.f32.mrf.mxu1 }
 0xddd   : > { %v5831_v16 = vadd.f32 %v5827_v14, %v5531_v15  ;;  %v5759_v34 = vadd.f32 %v5755_v12, %v5530_v24  ;;  %v9982_v24 = vld [vmem:[%s12717_s11 + $0x110] sm:$0xff] }
 0xdde   : > { %v11503_v17 = vpop.f32.mrf.mxu0  ;;  %v11514_v18 = vpop.f32.mrf.mxu1 }
 0xddf   : > { %v9965_v31 = vmul.f32 -1.442695, %v5831_v16  ;;  %v9983_v16 = vld [vmem:[%s12717_s11 + $0x118] sm:$0xff]  ;;  %v13937_v18 = vld [vmem:[#allocation2] sm:$0xff] }
 0xde0   : > { %v9987_v17 = vld [vmem:[%s12717_s11 + $0x138] sm:$0xff] }
 0xde1   : > { %12303 = vpow2.f32 %v9965_v31  ;;  %v9986_v31 = vld [vmem:[%s12717_s11 + $0x130] sm:$0xff] }
 0xde2   : > { %12305 = vtanh.f32 %v5759_v34  ;;  %v9981_v34 = vld [vmem:[%s12717_s11 + $0x108] sm:$0xff] }
 0xde5   : > { %v12300_v32 = vpop.eup %12299 }
 0xde6   : > { %v12302_v35 = vpop.eup %12301  ;;  %v5609_v53 = vadd.f32 1.0, %v12300_v32  ;;  %v9985_v32 = vld [vmem:[%s12717_s11 + $0x128] sm:$0xff] }
 0xde7   : > { %v5686_v62 = vadd.f32 1.0, %v12302_v35  ;;  %v9980_v35 = vld [vmem:[%s12717_s11 + $0x100] sm:$0xff] }
 0xde8   : > { %12307 = vrcp.f32 %v5609_v53  ;;  %v9984_v53 = vld [vmem:[%s12717_s11 + $0x120] sm:$0xff] }
 0xde9   : > { %12309 = vrcp.f32 %v5686_v62  ;;  %v13949_v62 = vld [vmem:[#allocation2 + $0x8] sm:$0xff] }
 0xdee   : > { %v12304_v13 = vpop.eup %12303 }
 0xdef   : > { %v12306_v63 = vpop.eup %12305  ;;  %v5835_v28 = vadd.f32 1.0, %v12304_v13  ;;  %v13955_v13 = vld [vmem:[#allocation2 + $0x10] sm:$0xff] }
 0xdf1   : > { %12311 = vrcp.f32 %v5835_v28  ;;  %v9991_v28 = vld [vmem:[%s12717_s11 + $0x158] sm:$0xff] }
 0xdf5   : > { %v12308_v25 = vpop.eup %12307 }
 0xdf6   : > { %v12310_v27 = vpop.eup %12309  ;;  %v5839_v36 = vmul.f32 %v12308_v25, %v12306_v63  ;;  %v13961_v63 = vld [vmem:[#allocation2 + $0x18] sm:$0xff]  ;;  %v13967_v25 = vld [vmem:[#allocation2 + $0x20] sm:$0xff] }
 0xdf7   : > { %v5838_v37 = vmul.f32 %v12310_v27, %v13763_v45 }
 0xdf9   : > { %v13836_v29 = vadd.f32 %v5839_v36, %v5838_v37  ;;  %v9995_v37 = vld [vmem:[%s12717_s11 + $0x178] sm:$0xff] }
 0xdfb   : > { %12313 = vtanh.f32 %v13836_v29 }
 0xdfe   : > { %v12312_v38 = vpop.eup %12311 }
 0xe08   : > { %v12314_v39 = vpop.eup %12313 }
 0xe09   : > { %v5842_v40 = vmul.f32 %v12314_v39, %v12312_v38  ;;  %v9994_v38 = vld [vmem:[%s12717_s11 + $0x170] sm:$0xff]  ;;  %v9989_v39 = vld [vmem:[%s12717_s11 + $0x148] sm:$0xff] }
 0xe0b   : > { %5843 = vst.msk [vmem:[#allocation2 + $0x28] sm:$0xff] %vm367_vm0, %v5842_v40  ;;  %11524 = vmatmul.mubr.msk.f32.vlgmr.msra.gmra.mxu0 %vm367_vm0, %v5842_v40  ;;  %11535 = vmatmul.mubr.msk.f32.vlgmr.msra.gmra.mxu1 %vm367_vm0, %v5842_v40 }
 0xe0c   : > { %11538 = vmatpush3.msra.mxu0 %v13843_v57  ;;  %11549 = vmatpush3.msra.mxu1 %v13847_v58 }
 0xe0d   : > { %11539 = vmatprep.subr.mxu0 %v12591_v26  ;;  %11550 = vmatprep.subr.mxu1 %v12591_v26 }
 0xe0e   : > { %11540 = vmatpush3.msra.mxu0 %v13853_v59  ;;  %11551 = vmatpush3.msra.mxu1 %v13857_v60 }
 0xe0f   : > { %11541 = vmatprep.subr.mxu0 %v12591_v26  ;;  %11552 = vmatprep.subr.mxu1 %v12591_v26 }
 0xe10   : > { %11542 = vmatpush3.msra.mxu0 %v13863_v61  ;;  %11553 = vmatpush3.msra.mxu1 %v13867_v6 }
 0xe11   : > { %11543 = vmatprep.subr.mxu0 %v12591_v26  ;;  %11554 = vmatprep.subr.mxu1 %v12591_v26 }
 0xe12   : > { %11544 = vmatpush3.msra.mxu0 %v13873_v7  ;;  %11545 = vmatprep.mubr.msk.f32.mxu0 %vm12592_vm1, %v12591_v26  ;;  %v13973_v27 = vld [vmem:[#allocation2 + $0x28] sm:$0xff] }
 0xe13   : > { %11555 = vmatpush3.msra.mxu1 %v13879_v8  ;;  %11556 = vmatprep.mubr.msk.f32.mxu1 %vm12592_vm1, %v12591_v26 }
 0xe14   : > { %11546 = vmatmul.mubr.msk.f32.vlgmr.msra.gmra.mxu0 %vm367_vm0, %v5842_v40  ;;  %11557 = vmatmul.mubr.msk.f32.vlgmr.msra.gmra.mxu1 %vm367_vm0, %v5842_v40  ;;  %v9993_v40 = vld [vmem:[%s12717_s11 + $0x168] sm:$0xff] }
 0xe15   : > { %11559 = vmatprep.subr.mxu0 %v12591_v26  ;;  %11570 = vmatprep.subr.mxu1 %v12591_v26 }
 0xe16   : > { %11560 = vmatpush3.msra.mxu0 %v13792_v30  ;;  %11571 = vmatpush3.msra.mxu1 %v13796_v33 }
 0xe17   : > { %11561 = vmatprep.subr.mxu0 %v12591_v26  ;;  %11572 = vmatprep.subr.mxu1 %v12591_v26 }
 0xe18   : > { %11562 = vmatpush3.msra.mxu0 %v13802_v0  ;;  %11573 = vmatpush3.msra.mxu1 %v13806_v1  ;;  %v5846_v1 = vld [vmem:[#allocation3 + $0xd0] sm:$0xff] }
 0xe19   : > { %11563 = vmatprep.subr.mxu0 %v12591_v26  ;;  %11574 = vmatprep.subr.mxu1 %v12591_v26 }
 0xe1a   : > { %11564 = vmatpush3.msra.mxu0 %v13812_v2  ;;  %11575 = vmatpush3.msra.mxu1 %v13816_v3 }
 0xe1b   : > { %11565 = vmatprep.subr.mxu0 %v12591_v26  ;;  %11576 = vmatprep.subr.mxu1 %v12591_v26 }
 0xe1c   : > { %11566 = vmatpush3.msra.mxu0 %v13822_v4  ;;  %11577 = vmatpush3.msra.mxu1 %v13826_v5 }
 0xe1d   : > { %11567 = vmatprep.mubr.msk.f32.mxu0 %vm12592_vm1, %v12591_v26  ;;  %11578 = vmatprep.mubr.msk.f32.mxu1 %vm12592_vm1, %v12591_v26 }
 0xe1e   : > { %11581 = vmatprep.subr.mxu0 %v12591_v26  ;;  %11592 = vmatprep.subr.mxu1 %v12591_v26 }
 0xecb   : > { %v5917_v9 = vpop.f32.mrf.mxu0  ;;  %v5994_v41 = vpop.f32.mrf.mxu1 }
 0xecc   : > { %v5921_v22 = vadd.f32 %v5917_v9, %v5844_v11  ;;  %v5998_v23 = vadd.f32 %v5994_v41, %v5845_v21  ;;  %v6161_v9 = vld [vmem:[#allocation3 + $0xe8] sm:$0xff] }
 0xecd   : > { %v11525_v42 = vpop.f32.mrf.mxu0  ;;  %v11536_v43 = vpop.f32.mrf.mxu1 }
 0xece   : > { %v9967_v44 = vmul.f32 -1.442695, %v5921_v22  ;;  %v9969_v45 = vmul.f32 -1.442695, %v5998_v23 }
 0xed0   : > { %12315 = vpow2.f32 %v9967_v44 }
 0xed1   : > { %12317 = vpow2.f32 %v9969_v45 }
 0xed4   : > { %v6071_v46 = vpop.f32.mrf.mxu0  ;;  %v6143_v47 = vpop.f32.mrf.mxu1 }
 0xed5   : > { %v6147_v30 = vadd.f32 %v6143_v47, %v5847_v48  ;;  %v6075_v3 = vadd.f32 %v6071_v46, %v5846_v1  ;;  %v6163_v47 = vld [vmem:[#allocation3 + $0xf8] sm:$0xff] }
 0xed6   : > { %v11547_v33 = vpop.f32.mrf.mxu0  ;;  %v11558_v0 = vpop.f32.mrf.mxu1 }
 0xed7   : > { %v9972_v2 = vmul.f32 -1.442695, %v6147_v30  ;;  %v6162_v0 = vld [vmem:[#allocation3 + $0xf0] sm:$0xff] }
 0xed9   : > { %12319 = vpow2.f32 %v9972_v2 }
 0xeda   : > { %12321 = vtanh.f32 %v6075_v3  ;;  %v14011_v3 = vld [vmem:[%s12899_s25 + $0x8] ss:$0 sm:$0xff] }
 0xedd   : > { %v12316_v4 = vpop.eup %12315 }
 0xede   : > { %v12318_v5 = vpop.eup %12317  ;;  %v5925_v49 = vadd.f32 1.0, %v12316_v4  ;;  %v14014_v4 = vld [vmem:[%s12899_s25 + $0x9] ss:$0 sm:$0xff] }
 0xedf   : > { %v6002_v50 = vadd.f32 1.0, %v12318_v5 }
 0xee0   : > { %12323 = vrcp.f32 %v5925_v49 }
 0xee1   : > { %12325 = vrcp.f32 %v6002_v50 }
 0xee6   : > { %v12320_v51 = vpop.eup %12319 }
 0xee7   : > { %v12322_v19 = vpop.eup %12321  ;;  %v6151_v55 = vadd.f32 1.0, %v12320_v51 }
 0xee9   : > { %12327 = vrcp.f32 %v6151_v55 }
 0xeed   : > { %v12324_v20 = vpop.eup %12323 }
 0xeee   : > { %v12326_v52 = vpop.eup %12325  ;;  %v6155_v54 = vmul.f32 %v12324_v20, %v12322_v19 }
 0xeef   : > { %v6154_v56 = vmul.f32 %v12326_v52, %v13836_v29  ;;  %v9990_v29 = vld [vmem:[%s12717_s11 + $0x150] sm:$0xff] }
 0xef1   : > { %v13909_v10 = vadd.f32 %v6155_v54, %v6154_v56 }
 0xef3   : > { %12329 = vtanh.f32 %v13909_v10 }
 0xef6   : > { %v12328_v12 = vpop.eup %12327 }
 0xf00   : > { %v12330_v14 = vpop.eup %12329 }
 0xf01   : > { %v6158_v15 = vmul.f32 %v12330_v14, %v12328_v12 }
 0xf03   : > { %6159 = vst.msk [vmem:[#allocation2 + $0x30] sm:$0xff] %vm367_vm0, %v6158_v15  ;;  %11568 = vmatmul.mubr.msk.f32.vlgmr.msra.gmra.mxu0 %vm367_vm0, %v6158_v15  ;;  %11579 = vmatmul.mubr.msk.f32.vlgmr.msra.gmra.mxu1 %vm367_vm0, %v6158_v15 }
 0xf04   : > { %11582 = vmatpush3.msra.mxu0 %v13843_v57  ;;  %11593 = vmatpush3.msra.mxu1 %v13847_v58  ;;  %v9988_v57 = vld [vmem:[%s12717_s11 + $0x140] sm:$0xff] }
 0xf05   : > { %11583 = vmatprep.subr.mxu0 %v12591_v26  ;;  %11594 = vmatprep.subr.mxu1 %v12591_v26  ;;  %v9992_v58 = vld [vmem:[%s12717_s11 + $0x160] sm:$0xff] }
 0xf06   : > { %11584 = vmatpush3.msra.mxu0 %v13853_v59  ;;  %11595 = vmatpush3.msra.mxu1 %v13857_v60  ;;  %v12593_v59 = vmov 0   ;;  %v14004_v60 = vld [vmem:[%s14001_s7] sm:$0xff] }
 0xf07   : > { %11585 = vmatprep.subr.mxu0 %v12591_v26  ;;  %11596 = vmatprep.subr.mxu1 %v12591_v26  ;;  %vm9549_vm2 = vcmp.eq.s32.totalorder %v14004_v60, 1  ;;  %vm9550_vm3 = vcmp.eq.s32.totalorder %v14004_v60, 2  ;;  %vm9551_vm4 = vcmp.eq.s32.totalorder %v14004_v60, 3  ;;  %vm9552_vm5 = vcmp.eq.s32.totalorder %v14004_v60, 4 }
 0xf08   : > { %11586 = vmatpush3.msra.mxu0 %v13863_v61  ;;  %11597 = vmatpush3.msra.mxu1 %v13867_v6  ;;  %v10104_v61 = vsel %vm9549_vm2, 1.0, %v12591_v26  ;;  %v10105_v6 = vsel %vm9550_vm3, 1.0, %v12591_v26  ;;  %vm9553_vm6 = vcmp.eq.s32.totalorder %v14004_v60, 5 }
 0xf09   : > { %11587 = vmatprep.subr.mxu0 %v12591_v26  ;;  %11598 = vmatprep.subr.mxu1 %v12591_v26 }
 0xf0a   : > { %11588 = vmatpush3.msra.mxu0 %v13873_v7  ;;  %11589 = vmatprep.mubr.msk.f32.mxu0 %vm12592_vm1, %v12591_v26  ;;  %v13979_v36 = vld [vmem:[#allocation2 + $0x30] sm:$0xff]  ;;  %v12085_v7 = vpack.i.bf16 %v10105_v6, %v10104_v61 }
 0xf0b   : > { %11599 = vmatpush3.msra.mxu1 %v13879_v8  ;;  %11600 = vmatprep.mubr.msk.f32.mxu1 %vm12592_vm1, %v12591_v26  ;;  %v6160_v8 = vld [vmem:[#allocation3 + $0xe0] sm:$0xff] }
 0xf0c   : > { %11590 = vmatmul.mubr.msk.f32.vlgmr.msra.gmra.mxu0 %vm367_vm0, %v6158_v15  ;;  %11601 = vmatmul.mubr.msk.f32.vlgmr.msra.gmra.mxu1 %vm367_vm0, %v6158_v15 }
 0xf0d   : > { %11603 = vmatprep.subr.mxu0 %v9983_v16  ;;  %11623 = vmatprep.subr.mxu1 %v9987_v17 }
 0xf0e   : > { %11604 = vmatpush3.msra.mxu0 %v9983_v16  ;;  %11611 = vmatprep.mubr.msk.f32.mxu0 %vm367_vm0, %v13937_v18 }
 0xf0f   : > { %11624 = vmatpush3.msra.mxu1 %v9987_v17  ;;  %11631 = vmatprep.mubr.msk.f32.mxu1 %vm367_vm0, %v13937_v18 }
 0xf10   : > { %11605 = vmatprep.subr.mxu0 %v9982_v24  ;;  %11625 = vmatprep.subr.mxu1 %v9986_v31 }
 0xf11   : > { %11606 = vmatpush3.msra.mxu0 %v9982_v24  ;;  %11626 = vmatpush3.msra.mxu1 %v9986_v31 }
 0xf12   : > { %11607 = vmatprep.subr.mxu0 %v9981_v34  ;;  %11627 = vmatprep.subr.mxu1 %v9985_v32 }
 0xf13   : > { %11608 = vmatpush3.msra.mxu0 %v9981_v34  ;;  %11628 = vmatpush3.msra.mxu1 %v9985_v32 }
 0xf14   : > { %11609 = vmatprep.subr.mxu0 %v9980_v35  ;;  %11629 = vmatprep.subr.mxu1 %v9984_v53 }
 0xf15   : > { %11610 = vmatpush3.msra.mxu0 %v9980_v35  ;;  %11630 = vmatpush3.msra.mxu1 %v9984_v53 }
 0xf16   : > { %11612 = vmatmul.mubr.msk.f32.vlgmr.msra.gmra.mxu0 %vm367_vm0, %v13949_v62  ;;  %11632 = vmatmul.mubr.msk.f32.vlgmr.msra.gmra.mxu1 %vm367_vm0, %v13949_v62 }
 0xf17   : > { %11614 = vmatprep.mubr.msk.f32.mxu0 %vm367_vm0, %v13955_v13  ;;  %11634 = vmatprep.mubr.msk.f32.mxu1 %vm367_vm0, %v13955_v13 }
 0xf18   : > { %11643 = vmatprep.subr.mxu0 %v9991_v28  ;;  %11663 = vmatprep.subr.mxu1 %v9995_v37 }
 0xf19   : > { %11644 = vmatpush3.msra.mxu0 %v9991_v28  ;;  %11664 = vmatpush3.msra.mxu1 %v9995_v37 }
 0xf1a   : > { %11615 = vmatmul.mubr.msk.f32.gmra.mxu0 %vm367_vm0, %v13961_v63  ;;  %11635 = vmatmul.mubr.msk.f32.gmra.mxu1 %vm367_vm0, %v13961_v63 }
 0xf1b   : > { %11617 = vmatprep.mubr.msk.f32.mxu0 %vm367_vm0, %v13967_v25  ;;  %11637 = vmatprep.mubr.msk.f32.mxu1 %vm367_vm0, %v13967_v25 }
 0xf1c   : > { %11645 = vmatprep.subr.mxu0 %v9990_v29  ;;  %11665 = vmatprep.subr.mxu1 %v9994_v38 }
 0xf1d   : > { %11646 = vmatpush3.msra.mxu0 %v9990_v29  ;;  %11666 = vmatpush3.msra.mxu1 %v9994_v38 }
 0xf1e   : > { %11618 = vmatmul.mubr.msk.f32.gmra.mxu0 %vm367_vm0, %v13973_v27  ;;  %11638 = vmatmul.mubr.msk.f32.gmra.mxu1 %vm367_vm0, %v13973_v27 }
 0xf1f   : > { %11620 = vmatprep.mubr.msk.f32.mxu0 %vm367_vm0, %v13979_v36  ;;  %11640 = vmatprep.mubr.msk.f32.mxu1 %vm367_vm0, %v13979_v36 }
 0xf20   : > { %11647 = vmatprep.subr.mxu0 %v9989_v39  ;;  %11667 = vmatprep.subr.mxu1 %v9993_v40 }
 0xf21   : > { %11648 = vmatpush3.msra.mxu0 %v9989_v39  ;;  %11668 = vmatpush3.msra.mxu1 %v9993_v40 }
 0xf22   : > { %11649 = vmatprep.subr.mxu0 %v9988_v57  ;;  %11669 = vmatprep.subr.mxu1 %v9992_v58 }
 0xf23   : > { %11650 = vmatpush3.msra.mxu0 %v9988_v57  ;;  %11670 = vmatpush3.msra.mxu1 %v9992_v58 }
 0xf24   : > { %11683 = vmatprep.subr.mxu0 %v12591_v26  ;;  %11694 = vmatprep.subr.mxu1 %v12591_v26 }
 0xf25   : > { %12084 = vset.pattern.permute.xlu0 %v12593_v59  ;;  %12090 = vset.pattern.permute.xlu1 %v12593_v59 }
 0xf26   : > { %12086 = vperm.xlu0 %12084, %v12085_v7  }
 0xfc3   : > { %v6233_v11 = vpop.f32.mrf.mxu0  ;;  %v6310_v21 = vpop.f32.mrf.mxu1 }
 0xfc4   : > { %v6237_v41 = vadd.f32 %v6233_v11, %v6160_v8  ;;  %v6314_v22 = vadd.f32 %v6310_v21, %v6161_v9 }
 0xfc5   : > { %v11569_v23 = vpop.f32.mrf.mxu0  ;;  %v11580_v42 = vpop.f32.mrf.mxu1 }
 0xfc6   : > { %v9974_v43 = vmul.f32 -1.442695, %v6237_v41  ;;  %v9976_v44 = vmul.f32 -1.442695, %v6314_v22  ;;  %v14052_v42 = vld [vmem:[%s12703_s14 + $0x138] sm:$0xff] }
 0xfc8   : > { %12331 = vpow2.f32 %v9974_v43  ;;  %v14070_v43 = vld [vmem:[%s12703_s14 + $0x130] sm:$0xff] }
 0xfc9   : > { %12333 = vpow2.f32 %v9976_v44  ;;  %v14127_v44 = vld [vmem:[%s12703_s14 + $0x150] sm:$0xff] }
 0xfcc   : > { %v6387_v45 = vpop.f32.mrf.mxu0  ;;  %v6459_v46 = vpop.f32.mrf.mxu1 }
 0xfcd   : > { %v6463_v48 = vadd.f32 %v6459_v46, %v6163_v47  ;;  %v6391_v2 = vadd.f32 %v6387_v45, %v6162_v0  ;;  %v14130_v45 = vld [vmem:[%s12703_s14 + $0x170] sm:$0xff]  ;;  %v14137_v46 = vld [vmem:[%s12703_s14 + $0x148] sm:$0xff] }
 0xfce   : > { %v11591_v30 = vpop.f32.mrf.mxu0  ;;  %v11602_v33 = vpop.f32.mrf.mxu1  ;;  %v14140_v47 = vld [vmem:[%s12703_s14 + $0x168] sm:$0xff] }
 0xfcf   : > { %v9979_v1 = vmul.f32 -1.442695, %v6463_v48  ;;  %v14147_v48 = vld [vmem:[%s12703_s14 + $0x140] sm:$0xff] }
 0xfd0   : > { %v14152_v30 = vld [vmem:[%s12703_s14 + $0x160] sm:$0xff] }
 0xfd1   : > { %12335 = vpow2.f32 %v9979_v1 }
 0xfd2   : > { %12337 = vtanh.f32 %v6391_v2 }
 0xfd5   : > { %v12332_v5 = vpop.eup %12331 }
 0xfd6   : > { %v12334_v49 = vpop.eup %12333  ;;  %v6241_v50 = vadd.f32 1.0, %v12332_v5  ;;  %v11613_v51 = vpop.f32.mrf.mxu0 }
 0xfd7   : > { %v11633_v19 = vpop.f32.mrf.mxu1  ;;  %v6318_v20 = vadd.f32 1.0, %v12334_v49  ;;  %v6625_v52 = vadd.f32 %v11613_v51, %v14011_v3  ;;  %v10043_v51 = vld [vmem:[%s12899_s25 + $0xb] ss:$0 sm:$0xff] }
 0xfd8   : > { %v6744_v54 = vadd.f32 %v11633_v19, %v14014_v4  ;;  %12339 = vrcp.f32 %v6241_v50  ;;  %v6619_v55 = vpop.f32.mrf.mxu0  ;;  %v10034_v50 = vld [vmem:[%s12899_s25 + $0xa] ss:$0 sm:$0xff] }
 0xfd9   : > { %v6738_v56 = vpop.f32.mrf.mxu1  ;;  %12341 = vrcp.f32 %v6318_v20  ;;  %6659 = vst.msk [vmem:[#allocation3 + $0x20] sm:$0xff] %vm367_vm0, %v6625_v52  ;;  %v6620_v12 = vadd.f32 %v14011_v3, %v6619_v55 }
 0xfda   : > { %6778 = vst.msk [vmem:[#allocation3 + $0x28] sm:$0xff] %vm367_vm0, %v6744_v54  ;;  %v6739_v14 = vadd.f32 %v14014_v4, %v6738_v56  ;;  %v11616_v15 = vpop.f32.mrf.mxu0 }
 0xfdb   : > { %v11636_v16 = vpop.f32.mrf.mxu1  ;;  %6658 = vst.msk [vmem:[#allocation3] sm:$0xff] %vm367_vm0, %v6620_v12  ;;  %v6635_v17 = vadd.f32 %v11616_v15, %v14011_v3 }
 0xfdc   : > { %6777 = vst.msk [vmem:[#allocation3 + $0x8] sm:$0xff] %vm367_vm0, %v6739_v14  ;;  %v6754_v24 = vadd.f32 %v11636_v16, %v14014_v4  ;;  %v6629_v31 = vpop.f32.mrf.mxu0 }
 0xfdd   : > { %v6748_v34 = vpop.f32.mrf.mxu1  ;;  %6661 = vst.msk [vmem:[#allocation3 + $0x60] sm:$0xff] %vm367_vm0, %v6635_v17  ;;  %v6630_v32 = vadd.f32 %v14011_v3, %v6629_v31 }
 0xfde   : > { %6780 = vst.msk [vmem:[#allocation3 + $0x68] sm:$0xff] %vm367_vm0, %v6754_v24  ;;  %v6749_v35 = vadd.f32 %v14014_v4, %v6748_v34  ;;  %v11619_v53 = vpop.f32.mrf.mxu0  ;;  %v12336_v58 = vpop.eup %12335 }
 0xfdf   : > { %v11639_v28 = vpop.f32.mrf.mxu1  ;;  %6660 = vst.msk [vmem:[#allocation3 + $0x40] sm:$0xff] %vm367_vm0, %v6630_v32  ;;  %v6645_v37 = vadd.f32 %v11619_v53, %v14011_v3  ;;  %v12338_v59 = vpop.eup %12337  ;;  %v6467_v8 = vadd.f32 1.0, %v12336_v58 }
 0xfe0   : > { %6779 = vst.msk [vmem:[#allocation3 + $0x48] sm:$0xff] %vm367_vm0, %v6749_v35  ;;  %v6764_v29 = vadd.f32 %v11639_v28, %v14014_v4  ;;  %v6639_v38 = vpop.f32.mrf.mxu0 }
 0xfe1   : > { %v6758_v39 = vpop.f32.mrf.mxu1  ;;  %6663 = vst.msk [vmem:[#allocation3 + $0xa0] sm:$0xff] %vm367_vm0, %v6645_v37  ;;  %v6640_v40 = vadd.f32 %v14011_v3, %v6639_v38  ;;  %12343 = vrcp.f32 %v6467_v8 }
 0xfe2   : > { %6782 = vst.msk [vmem:[#allocation3 + $0xa8] sm:$0xff] %vm367_vm0, %v6764_v29  ;;  %v6759_v57 = vadd.f32 %v14014_v4, %v6758_v39 }
 0xfe3   : > { %6662 = vst.msk [vmem:[#allocation3 + $0x80] sm:$0xff] %vm367_vm0, %v6640_v40 }
 0xfe4   : > { %6781 = vst.msk [vmem:[#allocation3 + $0x88] sm:$0xff] %vm367_vm0, %v6759_v57 }
 0xfe5   : > { %v12340_v61 = vpop.eup %12339 }
 0xfe6   : > { %v12342_v6 = vpop.eup %12341  ;;  %v6471_v7 = vmul.f32 %v12340_v61, %v12338_v59 }
 0xfe7   : > { %v6470_v11 = vmul.f32 %v12342_v6, %v13909_v10  ;;  %v14049_v10 = vld [vmem:[%s12703_s14 + $0x118] sm:$0xff] }
 0xfe9   : > { %v6472_v9 = vadd.f32 %v6471_v7, %v6470_v11 }
 0xfeb   : > { %12345 = vtanh.f32 %v6472_v9 }
 0xfee   : > { %v12344_v21 = vpop.eup %12343 }
 0xff8   : > { %v12346_v41 = vpop.eup %12345 }
 0xff9   : > { %v6474_v22 = vmul.f32 %v12346_v41, %v12344_v21  ;;  %v7023_v21 = vld [vmem:[#allocation3] sm:$0xff] }
 0xffb   : > { %6475 = vst.msk [vmem:[#allocation2 + $0x38] sm:$0xff] %vm367_vm0, %v6474_v22  ;;  %v7024_v22 = vld [vmem:[#allocation3 + $0x8] sm:$0xff] }
0x1002   : > { %v6483_v23 = vld [vmem:[#allocation2 + $0x38] sm:$0xff] }
0x1003   : > { %11621 = vmatmul.mubr.msk.f32.gmra.mxu0 %vm367_vm0, %v6483_v23  ;;  %11641 = vmatmul.mubr.msk.f32.gmra.mxu1 %vm367_vm0, %v6483_v23 }
0x1004   : > { %11651 = vmatprep.mubr.msk.f32.mxu0 %vm367_vm0, %v13937_v18  ;;  %11671 = vmatprep.mubr.msk.f32.mxu1 %vm367_vm0, %v13937_v18  ;;  %v14067_v18 = vld [vmem:[%s12703_s14 + $0x110] sm:$0xff] }
0x1007   : > { %11652 = vmatmul.mubr.msk.f32.vlgmr.msra.gmra.mxu0 %vm367_vm0, %v13949_v62  ;;  %11672 = vmatmul.mubr.msk.f32.vlgmr.msra.gmra.mxu1 %vm367_vm0, %v13949_v62  ;;  %v14085_v62 = vld [vmem:[%s12703_s14 + $0x108] sm:$0xff] }
0x1008   : > { %11654 = vmatprep.mubr.msk.f32.mxu0 %vm367_vm0, %v13955_v13  ;;  %11674 = vmatprep.mubr.msk.f32.mxu1 %vm367_vm0, %v13955_v13  ;;  %v14088_v13 = vld [vmem:[%s12703_s14 + $0x128] sm:$0xff] }
0x1009   : > { %11684 = vmatpush3.msra.mxu0 %v14049_v10  ;;  %11695 = vmatpush3.msra.mxu1 %v14052_v42 }
0x100a   : > { %11685 = vmatprep.subr.mxu0 %v12591_v26  ;;  %11696 = vmatprep.subr.mxu1 %v12591_v26 }
0x100b   : > { %11655 = vmatmul.mubr.msk.f32.gmra.mxu0 %vm367_vm0, %v13961_v63  ;;  %11675 = vmatmul.mubr.msk.f32.gmra.mxu1 %vm367_vm0, %v13961_v63  ;;  %v14101_v63 = vld [vmem:[%s12703_s14 + $0x100] sm:$0xff] }
0x100c   : > { %11657 = vmatprep.mubr.msk.f32.mxu0 %vm367_vm0, %v13967_v25  ;;  %11677 = vmatprep.mubr.msk.f32.mxu1 %vm367_vm0, %v13967_v25  ;;  %v14104_v25 = vld [vmem:[%s12703_s14 + $0x120] sm:$0xff] }
0x100d   : > { %11686 = vmatpush3.msra.mxu0 %v14067_v18  ;;  %11697 = vmatpush3.msra.mxu1 %v14070_v43 }
0x100e   : > { %11687 = vmatprep.subr.mxu0 %v12591_v26  ;;  %11698 = vmatprep.subr.mxu1 %v12591_v26 }
0x100f   : > { %11658 = vmatmul.mubr.msk.f32.gmra.mxu0 %vm367_vm0, %v13973_v27  ;;  %11678 = vmatmul.mubr.msk.f32.gmra.mxu1 %vm367_vm0, %v13973_v27  ;;  %v14117_v27 = vld [vmem:[%s12703_s14 + $0x158] sm:$0xff] }
0x1010   : > { %11660 = vmatprep.mubr.msk.f32.mxu0 %vm367_vm0, %v13979_v36  ;;  %11680 = vmatprep.mubr.msk.f32.mxu1 %vm367_vm0, %v13979_v36  ;;  %v14120_v36 = vld [vmem:[%s12703_s14 + $0x178] sm:$0xff] }
0x1011   : > { %11688 = vmatpush3.msra.mxu0 %v14085_v62  ;;  %11699 = vmatpush3.msra.mxu1 %v14088_v13 }
0x1012   : > { %11689 = vmatprep.subr.mxu0 %v12591_v26  ;;  %11700 = vmatprep.subr.mxu1 %v12591_v26 }
0x1013   : > { %11661 = vmatmul.mubr.msk.f32.gmra.mxu0 %vm367_vm0, %v6483_v23  ;;  %11681 = vmatmul.mubr.msk.f32.gmra.mxu1 %vm367_vm0, %v6483_v23 }
0x1014   : > { %11690 = vmatpush3.msra.mxu0 %v14101_v63  ;;  %11701 = vmatpush3.msra.mxu1 %v14104_v25 }
0x1015   : > { %11691 = vmatprep.mubr.msk.f32.mxu0 %vm12592_vm1, %v12591_v26  ;;  %11702 = vmatprep.mubr.msk.f32.mxu1 %vm12592_vm1, %v12591_v26 }
0x1016   : > { %11705 = vmatprep.subr.mxu0 %v12591_v26  ;;  %11716 = vmatprep.subr.mxu1 %v12591_v26 }
0x1017   : > { %11692 = vmatmul.mubr.f32.vlgmr.msra.gmra.mxu0 %v12591_v26  ;;  %11703 = vmatmul.mubr.f32.vlgmr.msra.gmra.mxu1 %v12591_v26 }
0x1018   : > { %11706 = vmatpush3.msra.mxu0 %v14117_v27  ;;  %11717 = vmatpush3.msra.mxu1 %v14120_v36 }
0x1019   : > { %11707 = vmatprep.subr.mxu0 %v12591_v26  ;;  %11718 = vmatprep.subr.mxu1 %v12591_v26 }
0x101a   : > { %11708 = vmatpush3.msra.mxu0 %v14127_v44  ;;  %11719 = vmatpush3.msra.mxu1 %v14130_v45 }
0x101b   : > { %11709 = vmatprep.subr.mxu0 %v12591_v26  ;;  %11720 = vmatprep.subr.mxu1 %v12591_v26 }
0x101c   : > { %11710 = vmatpush3.msra.mxu0 %v14137_v46  ;;  %11721 = vmatpush3.msra.mxu1 %v14140_v47 }
0x101d   : > { %11711 = vmatprep.subr.mxu0 %v12591_v26  ;;  %11722 = vmatprep.subr.mxu1 %v12591_v26 }
0x101e   : > { %11712 = vmatpush3.msra.mxu0 %v14147_v48  ;;  %11713 = vmatprep.mubr.msk.f32.mxu0 %vm12592_vm1, %v12591_v26 }
0x101f   : > { %11723 = vmatpush3.msra.mxu1 %v14152_v30  ;;  %11724 = vmatprep.mubr.msk.f32.mxu1 %vm12592_vm1, %v12591_v26 }
0x1020   : > { %11714 = vmatmul.mubr.f32.vlgmr.msra.gmra.mxu0 %v12591_v26  ;;  %11725 = vmatmul.mubr.f32.vlgmr.msra.gmra.mxu1 %v12591_v26 }
0x1021   : > { %11727 = vmatprep.subr.mxu0 %v12591_v26  ;;  %11738 = vmatprep.subr.mxu1 %v12591_v26 }
0x1022   : > { %11728 = vmatpush3.msra.mxu0 %v14049_v10  ;;  %11739 = vmatpush3.msra.mxu1 %v14052_v42 }
0x1023   : > { %11729 = vmatprep.subr.mxu0 %v12591_v26  ;;  %11740 = vmatprep.subr.mxu1 %v12591_v26 }
0x1024   : > { %11730 = vmatpush3.msra.mxu0 %v14067_v18  ;;  %11741 = vmatpush3.msra.mxu1 %v14070_v43 }
0x1025   : > { %11731 = vmatprep.subr.mxu0 %v12591_v26  ;;  %11742 = vmatprep.subr.mxu1 %v12591_v26 }
0x1026   : > { %11732 = vmatpush3.msra.mxu0 %v14085_v62  ;;  %11743 = vmatpush3.msra.mxu1 %v14088_v13 }
0x1027   : > { %11733 = vmatprep.subr.mxu0 %v12591_v26  ;;  %11744 = vmatprep.subr.mxu1 %v12591_v26 }
0x1028   : > { %11734 = vmatpush3.msra.mxu0 %v14101_v63  ;;  %11745 = vmatpush3.msra.mxu1 %v14104_v25 }
0x1029   : > { %11735 = vmatprep.mubr.msk.f32.mxu0 %vm12592_vm1, %v12591_v26  ;;  %11746 = vmatprep.mubr.msk.f32.mxu1 %vm12592_vm1, %v12591_v26 }
0x102a   : > { %11749 = vmatprep.subr.mxu0 %v12591_v26  ;;  %11760 = vmatprep.subr.mxu1 %v12591_v26 }
0x10c3   : > { %v11622_v33 = vpop.f32.mrf.mxu0  ;;  %v11642_v0 = vpop.f32.mrf.mxu1 }
0x10c4   : > { %v6655_v1 = vadd.f32 %v11622_v33, %v14011_v3  ;;  %v6774_v2 = vadd.f32 %v11642_v0, %v14014_v4 }
0x10c5   : > { %v6649_v5 = vpop.f32.mrf.mxu0  ;;  %v6768_v49 = vpop.f32.mrf.mxu1 }
0x10c6   : > { %6665 = vst.msk [vmem:[#allocation3 + $0xe0] sm:$0xff] %vm367_vm0, %v6655_v1  ;;  %6784 = vst.msk [vmem:[#allocation3 + $0xe8] sm:$0xff] %vm367_vm0, %v6774_v2  ;;  %v6650_v19 = vadd.f32 %v14011_v3, %v6649_v5  ;;  %v6769_v20 = vadd.f32 %v14014_v4, %v6768_v49 }
0x10c7   : > { %v11653_v52 = vpop.f32.mrf.mxu0  ;;  %v11673_v54 = vpop.f32.mrf.mxu1 }
0x10c8   : > { %6664 = vst.msk [vmem:[#allocation3 + $0xc0] sm:$0xff] %vm367_vm0, %v6650_v19  ;;  %6783 = vst.msk [vmem:[#allocation3 + $0xc8] sm:$0xff] %vm367_vm0, %v6769_v20  ;;  %v6863_v55 = vadd.f32 %v11653_v52, %v10034_v50  ;;  %v6982_v56 = vadd.f32 %v11673_v54, %v10043_v51 }
0x10c9   : > { %v6857_v12 = vpop.f32.mrf.mxu0  ;;  %v6976_v14 = vpop.f32.mrf.mxu1 }
0x10ca   : > { %6897 = vst.msk [vmem:[#allocation3 + $0x30] sm:$0xff] %vm367_vm0, %v6863_v55  ;;  %7016 = vst.msk [vmem:[#allocation3 + $0x38] sm:$0xff] %vm367_vm0, %v6982_v56  ;;  %v6858_v15 = vadd.f32 %v10034_v50, %v6857_v12  ;;  %v6977_v16 = vadd.f32 %v10043_v51, %v6976_v14 }
0x10cb   : > { %v11656_v17 = vpop.f32.mrf.mxu0  ;;  %v11676_v3 = vpop.f32.mrf.mxu1 }
0x10cc   : > { %6896 = vst.msk [vmem:[#allocation3 + $0x10] sm:$0xff] %vm367_vm0, %v6858_v15  ;;  %7015 = vst.msk [vmem:[#allocation3 + $0x18] sm:$0xff] %vm367_vm0, %v6977_v16  ;;  %v6873_v4 = vadd.f32 %v11656_v17, %v10034_v50  ;;  %v6992_v24 = vadd.f32 %v11676_v3, %v10043_v51 }
0x10cd   : > { %v6867_v31 = vpop.f32.mrf.mxu0  ;;  %v6986_v34 = vpop.f32.mrf.mxu1 }
0x10ce   : > { %6899 = vst.msk [vmem:[#allocation3 + $0x70] sm:$0xff] %vm367_vm0, %v6873_v4  ;;  %7018 = vst.msk [vmem:[#allocation3 + $0x78] sm:$0xff] %vm367_vm0, %v6992_v24  ;;  %v6868_v32 = vadd.f32 %v10034_v50, %v6867_v31  ;;  %v6987_v35 = vadd.f32 %v10043_v51, %v6986_v34 }
0x10cf   : > { %v11659_v53 = vpop.f32.mrf.mxu0  ;;  %v11679_v28 = vpop.f32.mrf.mxu1 }
0x10d0   : > { %6898 = vst.msk [vmem:[#allocation3 + $0x50] sm:$0xff] %vm367_vm0, %v6868_v32  ;;  %7017 = vst.msk [vmem:[#allocation3 + $0x58] sm:$0xff] %vm367_vm0, %v6987_v35  ;;  %v6883_v37 = vadd.f32 %v11659_v53, %v10034_v50  ;;  %v7002_v29 = vadd.f32 %v11679_v28, %v10043_v51 }
0x10d1   : > { %v6877_v38 = vpop.f32.mrf.mxu0  ;;  %v6996_v39 = vpop.f32.mrf.mxu1 }
0x10d2   : > { %6901 = vst.msk [vmem:[#allocation3 + $0xb0] sm:$0xff] %vm367_vm0, %v6883_v37  ;;  %7020 = vst.msk [vmem:[#allocation3 + $0xb8] sm:$0xff] %vm367_vm0, %v7002_v29  ;;  %v6878_v40 = vadd.f32 %v10034_v50, %v6877_v38  ;;  %v6997_v57 = vadd.f32 %v10043_v51, %v6996_v39  ;;  %v10106_v38 = vsel %vm9551_vm4, 1.0, %v12591_v26  ;;  %v7336_v39 = vld [vmem:[#allocation3 + $0x20] sm:$0xff] }
0x10d3   : > { %v11662_v58 = vpop.f32.mrf.mxu0  ;;  %v11682_v59 = vpop.f32.mrf.mxu1  ;;  %v7025_v55 = vld [vmem:[#allocation3 + $0x10] sm:$0xff]  ;;  %9593 = vperm.xlu0 %12084, %v10106_v38  }
0x10d4   : > { %6900 = vst.msk [vmem:[#allocation3 + $0x90] sm:$0xff] %vm367_vm0, %v6878_v40  ;;  %7019 = vst.msk [vmem:[#allocation3 + $0x98] sm:$0xff] %vm367_vm0, %v6997_v57  ;;  %v6893_v61 = vadd.f32 %v11662_v58, %v10034_v50  ;;  %v7012_v6 = vadd.f32 %v11682_v59, %v10043_v51  ;;  %v7337_v57 = vld [vmem:[#allocation3 + $0x28] sm:$0xff] }
0x10d5   : > { %v6887_v7 = vpop.f32.mrf.mxu0  ;;  %v7006_v8 = vpop.f32.mrf.mxu1 }
0x10d6   : > { %6903 = vst.msk [vmem:[#allocation3 + $0xf0] sm:$0xff] %vm367_vm0, %v6893_v61  ;;  %7022 = vst.msk [vmem:[#allocation3 + $0xf8] sm:$0xff] %vm367_vm0, %v7012_v6  ;;  %v6888_v11 = vadd.f32 %v10034_v50, %v6887_v7  ;;  %v7007_v9 = vadd.f32 %v10043_v51, %v7006_v8  ;;  %v7026_v50 = vld [vmem:[#allocation3 + $0x18] sm:$0xff] }
0x10d7   : > { %v7093_v41 = vpop.f32.mrf.mxu0  ;;  %v7170_v23 = vpop.f32.mrf.mxu1 }
0x10d8   : > { %6902 = vst.msk [vmem:[#allocation3 + $0xd0] sm:$0xff] %vm367_vm0, %v6888_v11  ;;  %7021 = vst.msk [vmem:[#allocation3 + $0xd8] sm:$0xff] %vm367_vm0, %v7007_v9  ;;  %v7097_v33 = vadd.f32 %v7093_v41, %v7023_v21  ;;  %v7174_v0 = vadd.f32 %v7170_v23, %v7024_v22  ;;  %v7339_v41 = vld [vmem:[#allocation3 + $0x38] sm:$0xff] }
0x10d9   : > { %v11693_v1 = vpop.f32.mrf.mxu0  ;;  %v11704_v2 = vpop.f32.mrf.mxu1 }
0x10da   : > { %v10052_v5 = vmul.f32 -1.442695, %v7097_v33  ;;  %v10053_v49 = vmul.f32 -1.442695, %v7174_v0  ;;  %v7338_v0 = vld [vmem:[#allocation3 + $0x30] sm:$0xff] }
0x10dc   : > { %12347 = vpow2.f32 %v10052_v5 }
0x10dd   : > { %12349 = vpow2.f32 %v10053_v49 }
0x10e0   : > { %v7247_v19 = vpop.f32.mrf.mxu0  ;;  %v7319_v20 = vpop.f32.mrf.mxu1 }
0x10e1   : > { %v7323_v51 = vadd.f32 %v7319_v20, %v7026_v50  ;;  %v7251_v12 = vadd.f32 %v7247_v19, %v7025_v55 }
0x10e2   : > { %v11715_v52 = vpop.f32.mrf.mxu0  ;;  %v11726_v54 = vpop.f32.mrf.mxu1 }
0x10e3   : > { %v10054_v56 = vmul.f32 -1.442695, %v7323_v51 }
0x10e5   : > { %12351 = vpow2.f32 %v10054_v56 }
0x10e6   : > { %12353 = vtanh.f32 %v7251_v12 }
0x10e9   : > { %v12348_v14 = vpop.eup %12347 }
0x10ea   : > { %v12350_v15 = vpop.eup %12349  ;;  %v7101_v16 = vadd.f32 1.0, %v12348_v14 }
0x10eb   : > { %v7178_v17 = vadd.f32 1.0, %v12350_v15 }
0x10ec   : > { %12355 = vrcp.f32 %v7101_v16 }
0x10ed   : > { %12357 = vrcp.f32 %v7178_v17 }
0x10f2   : > { %v12352_v3 = vpop.eup %12351 }
0x10f3   : > { %v12354_v4 = vpop.eup %12353  ;;  %v7327_v32 = vadd.f32 1.0, %v12352_v3  ;;  %v10107_v3 = vsel %vm9552_vm5, 1.0, %v12591_v26 }
0x10f4   : > { %9598 = vperm.xlu1 %12090, %v10107_v3  }
0x10f5   : > { %12359 = vrcp.f32 %v7327_v32 }
0x10f9   : > { %v12356_v24 = vpop.eup %12355 }
0x10fa   : > { %v12358_v31 = vpop.eup %12357  ;;  %v7331_v34 = vmul.f32 %v12356_v24, %v12354_v4  ;;  %v7652_v4 = vld [vmem:[#allocation3 + $0x40] sm:$0xff] }
0x10fb   : > { %v7330_v35 = vmul.f32 0.0, %v12358_v31  ;;  %v7653_v31 = vld [vmem:[#allocation3 + $0x48] sm:$0xff] }
0x10fd   : > { %v14212_v53 = vadd.f32 %v7331_v34, %v7330_v35 }
0x10ff   : > { %12361 = vtanh.f32 %v14212_v53 }
0x1102   : > { %v12360_v28 = vpop.eup %12359 }
0x110c   : > { %v12362_v37 = vpop.eup %12361 }
0x110d   : > { %v7334_v29 = vmul.f32 %v12362_v37, %v12360_v28 }
0x110f   : > { %7335 = vst.msk [vmem:[#allocation2] sm:$0xff] %vm367_vm0, %v7334_v29  ;;  %11736 = vmatmul.mubr.msk.f32.vlgmr.msra.gmra.mxu0 %vm367_vm0, %v7334_v29  ;;  %11747 = vmatmul.mubr.msk.f32.vlgmr.msra.gmra.mxu1 %vm367_vm0, %v7334_v29 }
0x1110   : > { %11750 = vmatpush3.msra.mxu0 %v14117_v27  ;;  %11761 = vmatpush3.msra.mxu1 %v14120_v36 }
0x1111   : > { %11751 = vmatprep.subr.mxu0 %v12591_v26  ;;  %11762 = vmatprep.subr.mxu1 %v12591_v26 }
0x1112   : > { %11752 = vmatpush3.msra.mxu0 %v14127_v44  ;;  %11763 = vmatpush3.msra.mxu1 %v14130_v45 }
0x1113   : > { %11753 = vmatprep.subr.mxu0 %v12591_v26  ;;  %11764 = vmatprep.subr.mxu1 %v12591_v26 }
0x1114   : > { %11754 = vmatpush3.msra.mxu0 %v14137_v46  ;;  %11765 = vmatpush3.msra.mxu1 %v14140_v47 }
0x1115   : > { %11755 = vmatprep.subr.mxu0 %v12591_v26  ;;  %11766 = vmatprep.subr.mxu1 %v12591_v26 }
0x1116   : > { %11756 = vmatpush3.msra.mxu0 %v14147_v48  ;;  %11757 = vmatprep.mubr.msk.f32.mxu0 %vm12592_vm1, %v12591_v26 }
0x1117   : > { %11767 = vmatpush3.msra.mxu1 %v14152_v30  ;;  %11768 = vmatprep.mubr.msk.f32.mxu1 %vm12592_vm1, %v12591_v26 }
0x1118   : > { %11758 = vmatmul.mubr.msk.f32.vlgmr.msra.gmra.mxu0 %vm367_vm0, %v7334_v29  ;;  %11769 = vmatmul.mubr.msk.f32.vlgmr.msra.gmra.mxu1 %vm367_vm0, %v7334_v29 }
0x1119   : > { %11771 = vmatprep.subr.mxu0 %v12591_v26  ;;  %11782 = vmatprep.subr.mxu1 %v12591_v26 }
0x111a   : > { %11772 = vmatpush3.msra.mxu0 %v14049_v10  ;;  %11783 = vmatpush3.msra.mxu1 %v14052_v42 }
0x111b   : > { %11773 = vmatprep.subr.mxu0 %v12591_v26  ;;  %11784 = vmatprep.subr.mxu1 %v12591_v26 }
0x111c   : > { %11774 = vmatpush3.msra.mxu0 %v14067_v18  ;;  %11785 = vmatpush3.msra.mxu1 %v14070_v43 }
0x111d   : > { %11775 = vmatprep.subr.mxu0 %v12591_v26  ;;  %11786 = vmatprep.subr.mxu1 %v12591_v26 }
0x111e   : > { %11776 = vmatpush3.msra.mxu0 %v14085_v62  ;;  %11787 = vmatpush3.msra.mxu1 %v14088_v13 }
0x111f   : > { %11777 = vmatprep.subr.mxu0 %v12591_v26  ;;  %11788 = vmatprep.subr.mxu1 %v12591_v26 }
0x1120   : > { %11778 = vmatpush3.msra.mxu0 %v14101_v63  ;;  %11789 = vmatpush3.msra.mxu1 %v14104_v25 }
0x1121   : > { %11779 = vmatprep.mubr.msk.f32.mxu0 %vm12592_vm1, %v12591_v26  ;;  %11790 = vmatprep.mubr.msk.f32.mxu1 %vm12592_vm1, %v12591_v26 }
0x1122   : > { %11793 = vmatprep.subr.mxu0 %v12591_v26  ;;  %11804 = vmatprep.subr.mxu1 %v12591_v26 }
0x11cf   : > { %v7409_v40 = vpop.f32.mrf.mxu0  ;;  %v7486_v58 = vpop.f32.mrf.mxu1 }
0x11d0   : > { %v7413_v59 = vadd.f32 %v7409_v40, %v7336_v39  ;;  %v7490_v61 = vadd.f32 %v7486_v58, %v7337_v57  ;;  %v7655_v40 = vld [vmem:[#allocation3 + $0x58] sm:$0xff] }
0x11d1   : > { %v11737_v6 = vpop.f32.mrf.mxu0  ;;  %v11748_v7 = vpop.f32.mrf.mxu1 }
0x11d2   : > { %v10056_v8 = vmul.f32 -1.442695, %v7413_v59  ;;  %v10058_v11 = vmul.f32 -1.442695, %v7490_v61  ;;  %v7654_v61 = vld [vmem:[#allocation3 + $0x50] sm:$0xff] }
0x11d4   : > { %12363 = vpow2.f32 %v10056_v8 }
0x11d5   : > { %12365 = vpow2.f32 %v10058_v11 }
0x11d8   : > { %v7563_v9 = vpop.f32.mrf.mxu0  ;;  %v7635_v21 = vpop.f32.mrf.mxu1 }
0x11d9   : > { %v7639_v22 = vadd.f32 %v7635_v21, %v7339_v41  ;;  %v7567_v2 = vadd.f32 %v7563_v9, %v7338_v0 }
0x11da   : > { %v11759_v23 = vpop.f32.mrf.mxu0  ;;  %v11770_v33 = vpop.f32.mrf.mxu1 }
0x11db   : > { %v10061_v1 = vmul.f32 -1.442695, %v7639_v22 }
0x11dd   : > { %12367 = vpow2.f32 %v10061_v1 }
0x11de   : > { %12369 = vtanh.f32 %v7567_v2 }
0x11e1   : > { %v12364_v5 = vpop.eup %12363 }
0x11e2   : > { %v12366_v49 = vpop.eup %12365  ;;  %v7417_v19 = vadd.f32 1.0, %v12364_v5 }
0x11e3   : > { %v7494_v20 = vadd.f32 1.0, %v12366_v49 }
0x11e4   : > { %12371 = vrcp.f32 %v7417_v19 }
0x11e5   : > { %12373 = vrcp.f32 %v7494_v20 }
0x11ea   : > { %v12368_v50 = vpop.eup %12367 }
0x11eb   : > { %v12370_v51 = vpop.eup %12369  ;;  %v7643_v56 = vadd.f32 1.0, %v12368_v50  ;;  %v10108_v50 = vsel %vm9553_vm6, 1.0, %v12591_v26 }
0x11ec   : > { %9603 = vperm.xlu1 %12090, %v10108_v50  }
0x11ed   : > { %12375 = vrcp.f32 %v7643_v56 }
0x11f1   : > { %v12372_v52 = vpop.eup %12371 }
0x11f2   : > { %v12374_v54 = vpop.eup %12373  ;;  %v7647_v55 = vmul.f32 %v12372_v52, %v12370_v51  ;;  %v7968_v51 = vld [vmem:[#allocation3 + $0x60] sm:$0xff] }
0x11f3   : > { %v7646_v12 = vmul.f32 %v12374_v54, %v14212_v53  ;;  %v7969_v54 = vld [vmem:[#allocation3 + $0x68] sm:$0xff] }
0x11f5   : > { %v14263_v14 = vadd.f32 %v7647_v55, %v7646_v12 }
0x11f7   : > { %12377 = vtanh.f32 %v14263_v14 }
0x11fa   : > { %v12376_v15 = vpop.eup %12375 }
0x1204   : > { %v12378_v16 = vpop.eup %12377 }
0x1205   : > { %v7650_v17 = vmul.f32 %v12378_v16, %v12376_v15 }
0x1207   : > { %7651 = vst.msk [vmem:[#allocation2 + $0x8] sm:$0xff] %vm367_vm0, %v7650_v17  ;;  %11780 = vmatmul.mubr.msk.f32.vlgmr.msra.gmra.mxu0 %vm367_vm0, %v7650_v17  ;;  %11791 = vmatmul.mubr.msk.f32.vlgmr.msra.gmra.mxu1 %vm367_vm0, %v7650_v17 }
0x1208   : > { %11794 = vmatpush3.msra.mxu0 %v14117_v27  ;;  %11805 = vmatpush3.msra.mxu1 %v14120_v36 }
0x1209   : > { %11795 = vmatprep.subr.mxu0 %v12591_v26  ;;  %11806 = vmatprep.subr.mxu1 %v12591_v26 }
0x120a   : > { %11796 = vmatpush3.msra.mxu0 %v14127_v44  ;;  %11807 = vmatpush3.msra.mxu1 %v14130_v45 }
0x120b   : > { %11797 = vmatprep.subr.mxu0 %v12591_v26  ;;  %11808 = vmatprep.subr.mxu1 %v12591_v26 }
0x120c   : > { %11798 = vmatpush3.msra.mxu0 %v14137_v46  ;;  %11809 = vmatpush3.msra.mxu1 %v14140_v47 }
0x120d   : > { %11799 = vmatprep.subr.mxu0 %v12591_v26  ;;  %11810 = vmatprep.subr.mxu1 %v12591_v26 }
0x120e   : > { %11800 = vmatpush3.msra.mxu0 %v14147_v48  ;;  %11801 = vmatprep.mubr.msk.f32.mxu0 %vm12592_vm1, %v12591_v26 }
0x120f   : > { %11811 = vmatpush3.msra.mxu1 %v14152_v30  ;;  %11812 = vmatprep.mubr.msk.f32.mxu1 %vm12592_vm1, %v12591_v26 }
0x1210   : > { %11802 = vmatmul.mubr.msk.f32.vlgmr.msra.gmra.mxu0 %vm367_vm0, %v7650_v17  ;;  %11813 = vmatmul.mubr.msk.f32.vlgmr.msra.gmra.mxu1 %vm367_vm0, %v7650_v17 }
0x1211   : > { %11815 = vmatprep.subr.mxu0 %v12591_v26  ;;  %11826 = vmatprep.subr.mxu1 %v12591_v26 }
0x1212   : > { %11816 = vmatpush3.msra.mxu0 %v14049_v10  ;;  %11827 = vmatpush3.msra.mxu1 %v14052_v42 }
0x1213   : > { %11817 = vmatprep.subr.mxu0 %v12591_v26  ;;  %11828 = vmatprep.subr.mxu1 %v12591_v26 }
0x1214   : > { %11818 = vmatpush3.msra.mxu0 %v14067_v18  ;;  %11829 = vmatpush3.msra.mxu1 %v14070_v43 }
0x1215   : > { %11819 = vmatprep.subr.mxu0 %v12591_v26  ;;  %11830 = vmatprep.subr.mxu1 %v12591_v26 }
0x1216   : > { %11820 = vmatpush3.msra.mxu0 %v14085_v62  ;;  %11831 = vmatpush3.msra.mxu1 %v14088_v13 }
0x1217   : > { %11821 = vmatprep.subr.mxu0 %v12591_v26  ;;  %11832 = vmatprep.subr.mxu1 %v12591_v26 }
0x1218   : > { %11822 = vmatpush3.msra.mxu0 %v14101_v63  ;;  %11833 = vmatpush3.msra.mxu1 %v14104_v25 }
0x1219   : > { %11823 = vmatprep.mubr.msk.f32.mxu0 %vm12592_vm1, %v12591_v26  ;;  %11834 = vmatprep.mubr.msk.f32.mxu1 %vm12592_vm1, %v12591_v26 }
0x121a   : > { %11837 = vmatprep.subr.mxu0 %v12591_v26  ;;  %11848 = vmatprep.subr.mxu1 %v12591_v26 }
0x12c7   : > { %v7725_v24 = vpop.f32.mrf.mxu0  ;;  %v7802_v34 = vpop.f32.mrf.mxu1 }
0x12c8   : > { %v7729_v32 = vadd.f32 %v7725_v24, %v7652_v4  ;;  %v7806_v35 = vadd.f32 %v7802_v34, %v7653_v31  ;;  %v7971_v24 = vld [vmem:[#allocation3 + $0x78] sm:$0xff] }
0x12c9   : > { %v11781_v53 = vpop.f32.mrf.mxu0  ;;  %v11792_v28 = vpop.f32.mrf.mxu1 }
0x12ca   : > { %v10063_v37 = vmul.f32 -1.442695, %v7729_v32  ;;  %v10065_v29 = vmul.f32 -1.442695, %v7806_v35  ;;  %v7970_v32 = vld [vmem:[#allocation3 + $0x70] sm:$0xff] }
0x12cc   : > { %12379 = vpow2.f32 %v10063_v37 }
0x12cd   : > { %12381 = vpow2.f32 %v10065_v29 }
0x12d0   : > { %v7879_v38 = vpop.f32.mrf.mxu0  ;;  %v7951_v39 = vpop.f32.mrf.mxu1 }
0x12d1   : > { %v7955_v57 = vadd.f32 %v7951_v39, %v7655_v40  ;;  %v7883_v7 = vadd.f32 %v7879_v38, %v7654_v61 }
0x12d2   : > { %v11803_v58 = vpop.f32.mrf.mxu0  ;;  %v11814_v59 = vpop.f32.mrf.mxu1 }
0x12d3   : > { %v10068_v6 = vmul.f32 -1.442695, %v7955_v57 }
0x12d5   : > { %12383 = vpow2.f32 %v10068_v6 }
0x12d6   : > { %12385 = vtanh.f32 %v7883_v7 }
0x12d9   : > { %v12380_v8 = vpop.eup %12379 }
0x12da   : > { %v12382_v11 = vpop.eup %12381  ;;  %v7733_v9 = vadd.f32 1.0, %v12380_v8 }
0x12db   : > { %v7810_v21 = vadd.f32 1.0, %v12382_v11 }
0x12dc   : > { %12387 = vrcp.f32 %v7733_v9 }
0x12dd   : > { %12389 = vrcp.f32 %v7810_v21 }
0x12e2   : > { %v12384_v41 = vpop.eup %12383 }
0x12e3   : > { %v12386_v22 = vpop.eup %12385  ;;  %v7959_v1 = vadd.f32 1.0, %v12384_v41 }
0x12e5   : > { %12391 = vrcp.f32 %v7959_v1  ;;  %v8287_v1 = vld [vmem:[#allocation3 + $0x98] sm:$0xff] }
0x12e9   : > { %v12388_v23 = vpop.eup %12387 }
0x12ea   : > { %v12390_v33 = vpop.eup %12389  ;;  %v7963_v0 = vmul.f32 %v12388_v23, %v12386_v22 }
0x12eb   : > { %v7962_v2 = vmul.f32 %v12390_v33, %v14263_v14 }
0x12ed   : > { %v14314_v5 = vadd.f32 %v7963_v0, %v7962_v2 }
0x12ef   : > { %12393 = vtanh.f32 %v14314_v5 }
0x12f2   : > { %v12392_v49 = vpop.eup %12391 }
0x12fc   : > { %v12394_v19 = vpop.eup %12393 }
0x12fd   : > { %v7966_v20 = vmul.f32 %v12394_v19, %v12392_v49  ;;  %v8286_v19 = vld [vmem:[#allocation3 + $0x90] sm:$0xff] }
0x12ff   : > { %7967 = vst.msk [vmem:[#allocation2 + $0x10] sm:$0xff] %vm367_vm0, %v7966_v20  ;;  %11824 = vmatmul.mubr.msk.f32.vlgmr.msra.gmra.mxu0 %vm367_vm0, %v7966_v20  ;;  %11835 = vmatmul.mubr.msk.f32.vlgmr.msra.gmra.mxu1 %vm367_vm0, %v7966_v20 }
0x1300   : > { %11838 = vmatpush3.msra.mxu0 %v14117_v27  ;;  %11849 = vmatpush3.msra.mxu1 %v14120_v36 }
0x1301   : > { %11839 = vmatprep.subr.mxu0 %v12591_v26  ;;  %11850 = vmatprep.subr.mxu1 %v12591_v26 }
0x1302   : > { %11840 = vmatpush3.msra.mxu0 %v14127_v44  ;;  %11851 = vmatpush3.msra.mxu1 %v14130_v45 }
0x1303   : > { %11841 = vmatprep.subr.mxu0 %v12591_v26  ;;  %11852 = vmatprep.subr.mxu1 %v12591_v26 }
0x1304   : > { %11842 = vmatpush3.msra.mxu0 %v14137_v46  ;;  %11853 = vmatpush3.msra.mxu1 %v14140_v47 }
0x1305   : > { %11843 = vmatprep.subr.mxu0 %v12591_v26  ;;  %11854 = vmatprep.subr.mxu1 %v12591_v26 }
0x1306   : > { %11844 = vmatpush3.msra.mxu0 %v14147_v48  ;;  %11845 = vmatprep.mubr.msk.f32.mxu0 %vm12592_vm1, %v12591_v26 }
0x1307   : > { %11855 = vmatpush3.msra.mxu1 %v14152_v30  ;;  %11856 = vmatprep.mubr.msk.f32.mxu1 %vm12592_vm1, %v12591_v26 }
0x1308   : > { %11846 = vmatmul.mubr.msk.f32.vlgmr.msra.gmra.mxu0 %vm367_vm0, %v7966_v20  ;;  %11857 = vmatmul.mubr.msk.f32.vlgmr.msra.gmra.mxu1 %vm367_vm0, %v7966_v20 }
0x1309   : > { %11859 = vmatprep.subr.mxu0 %v12591_v26  ;;  %11870 = vmatprep.subr.mxu1 %v12591_v26 }
0x130a   : > { %11860 = vmatpush3.msra.mxu0 %v14049_v10  ;;  %11871 = vmatpush3.msra.mxu1 %v14052_v42 }
0x130b   : > { %11861 = vmatprep.subr.mxu0 %v12591_v26  ;;  %11872 = vmatprep.subr.mxu1 %v12591_v26 }
0x130c   : > { %11862 = vmatpush3.msra.mxu0 %v14067_v18  ;;  %11873 = vmatpush3.msra.mxu1 %v14070_v43 }
0x130d   : > { %11863 = vmatprep.subr.mxu0 %v12591_v26  ;;  %11874 = vmatprep.subr.mxu1 %v12591_v26 }
0x130e   : > { %11864 = vmatpush3.msra.mxu0 %v14085_v62  ;;  %11875 = vmatpush3.msra.mxu1 %v14088_v13 }
0x130f   : > { %11865 = vmatprep.subr.mxu0 %v12591_v26  ;;  %11876 = vmatprep.subr.mxu1 %v12591_v26 }
0x1310   : > { %11866 = vmatpush3.msra.mxu0 %v14101_v63  ;;  %11877 = vmatpush3.msra.mxu1 %v14104_v25 }
0x1311   : > { %11867 = vmatprep.mubr.msk.f32.mxu0 %vm12592_vm1, %v12591_v26  ;;  %11878 = vmatprep.mubr.msk.f32.mxu1 %vm12592_vm1, %v12591_v26 }
0x1312   : > { %11881 = vmatprep.subr.mxu0 %v12591_v26  ;;  %11892 = vmatprep.subr.mxu1 %v12591_v26 }
0x13bf   : > { %v8041_v52 = vpop.f32.mrf.mxu0  ;;  %v8118_v55 = vpop.f32.mrf.mxu1 }
0x13c0   : > { %v8045_v56 = vadd.f32 %v8041_v52, %v7968_v51  ;;  %v8122_v12 = vadd.f32 %v8118_v55, %v7969_v54 }
0x13c1   : > { %v11825_v14 = vpop.f32.mrf.mxu0  ;;  %v11836_v15 = vpop.f32.mrf.mxu1 }
0x13c2   : > { %v10070_v16 = vmul.f32 -1.442695, %v8045_v56  ;;  %v10072_v17 = vmul.f32 -1.442695, %v8122_v12 }
0x13c4   : > { %12395 = vpow2.f32 %v10070_v16 }
0x13c5   : > { %12397 = vpow2.f32 %v10072_v17 }
0x13c8   : > { %v8195_v3 = vpop.f32.mrf.mxu0  ;;  %v8267_v4 = vpop.f32.mrf.mxu1 }
0x13c9   : > { %v8271_v31 = vadd.f32 %v8267_v4, %v7971_v24  ;;  %v8199_v53 = vadd.f32 %v8195_v3, %v7970_v32  ;;  %v8600_v32 = vld [vmem:[#allocation3 + $0xa0] sm:$0xff] }
0x13ca   : > { %v11847_v60 = vpop.f32.mrf.mxu0  ;;  %v11858_v34 = vpop.f32.mrf.mxu1 }
0x13cb   : > { %v10075_v35 = vmul.f32 -1.442695, %v8271_v31 }
0x13cd   : > { %12399 = vpow2.f32 %v10075_v35 }
0x13ce   : > { %12401 = vtanh.f32 %v8199_v53  ;;  %v8601_v53 = vld [vmem:[#allocation3 + $0xa8] sm:$0xff] }
0x13d1   : > { %v12396_v28 = vpop.eup %12395 }
0x13d2   : > { %v12398_v37 = vpop.eup %12397  ;;  %v8049_v29 = vadd.f32 1.0, %v12396_v28 }
0x13d3   : > { %v8126_v38 = vadd.f32 1.0, %v12398_v37 }
0x13d4   : > { %12403 = vrcp.f32 %v8049_v29 }
0x13d5   : > { %12405 = vrcp.f32 %v8126_v38 }
0x13da   : > { %v12400_v39 = vpop.eup %12399 }
0x13db   : > { %v12402_v40 = vpop.eup %12401  ;;  %v8275_v61 = vadd.f32 1.0, %v12400_v39 }
0x13dd   : > { %12407 = vrcp.f32 %v8275_v61  ;;  %v8603_v61 = vld [vmem:[#allocation3 + $0xb8] sm:$0xff] }
0x13e1   : > { %v12404_v57 = vpop.eup %12403 }
0x13e2   : > { %v12406_v58 = vpop.eup %12405  ;;  %v8279_v59 = vmul.f32 %v12404_v57, %v12402_v40 }
0x13e3   : > { %v8278_v6 = vmul.f32 %v12406_v58, %v14314_v5 }
0x13e5   : > { %v14365_v7 = vadd.f32 %v8279_v59, %v8278_v6 }
0x13e7   : > { %12409 = vtanh.f32 %v14365_v7 }
0x13ea   : > { %v12408_v8 = vpop.eup %12407 }
0x13f4   : > { %v12410_v11 = vpop.eup %12409 }
0x13f5   : > { %v8282_v9 = vmul.f32 %v12410_v11, %v12408_v8  ;;  %v8602_v11 = vld [vmem:[#allocation3 + $0xb0] sm:$0xff] }
0x13f7   : > { %8283 = vst.msk [vmem:[#allocation2 + $0x18] sm:$0xff] %vm367_vm0, %v8282_v9  ;;  %11868 = vmatmul.mubr.msk.f32.vlgmr.msra.gmra.mxu0 %vm367_vm0, %v8282_v9  ;;  %11879 = vmatmul.mubr.msk.f32.vlgmr.msra.gmra.mxu1 %vm367_vm0, %v8282_v9 }
0x13f8   : > { %11882 = vmatpush3.msra.mxu0 %v14117_v27  ;;  %11893 = vmatpush3.msra.mxu1 %v14120_v36 }
0x13f9   : > { %11883 = vmatprep.subr.mxu0 %v12591_v26  ;;  %11894 = vmatprep.subr.mxu1 %v12591_v26 }
0x13fa   : > { %11884 = vmatpush3.msra.mxu0 %v14127_v44  ;;  %11895 = vmatpush3.msra.mxu1 %v14130_v45 }
0x13fb   : > { %11885 = vmatprep.subr.mxu0 %v12591_v26  ;;  %11896 = vmatprep.subr.mxu1 %v12591_v26 }
0x13fc   : > { %11886 = vmatpush3.msra.mxu0 %v14137_v46  ;;  %11897 = vmatpush3.msra.mxu1 %v14140_v47 }
0x13fd   : > { %11887 = vmatprep.subr.mxu0 %v12591_v26  ;;  %11898 = vmatprep.subr.mxu1 %v12591_v26 }
0x13fe   : > { %11888 = vmatpush3.msra.mxu0 %v14147_v48  ;;  %11889 = vmatprep.mubr.msk.f32.mxu0 %vm12592_vm1, %v12591_v26 }
0x13ff   : > { %11899 = vmatpush3.msra.mxu1 %v14152_v30  ;;  %11900 = vmatprep.mubr.msk.f32.mxu1 %vm12592_vm1, %v12591_v26 }
0x1400   : > { %11890 = vmatmul.mubr.msk.f32.vlgmr.msra.gmra.mxu0 %vm367_vm0, %v8282_v9  ;;  %11901 = vmatmul.mubr.msk.f32.vlgmr.msra.gmra.mxu1 %vm367_vm0, %v8282_v9 }
0x1401   : > { %11903 = vmatprep.subr.mxu0 %v12591_v26  ;;  %11914 = vmatprep.subr.mxu1 %v12591_v26 }
0x1402   : > { %11904 = vmatpush3.msra.mxu0 %v14049_v10  ;;  %11915 = vmatpush3.msra.mxu1 %v14052_v42  ;;  %v14414_v10 = vld [vmem:[%s14001_s7] sm:$0xff] }
0x1403   : > { %11905 = vmatprep.subr.mxu0 %v12591_v26  ;;  %11916 = vmatprep.subr.mxu1 %v12591_v26  ;;  %vm9554_vm7 = vcmp.eq.s32.totalorder %v14414_v10, 6  ;;  %vm9555_vm8 = vcmp.eq.s32.totalorder %v14414_v10, 7  ;;  %vm9556_vm9 = vcmp.eq.s32.totalorder %v14414_v10, 8 }
0x1404   : > { %11906 = vmatpush3.msra.mxu0 %v14067_v18  ;;  %11917 = vmatpush3.msra.mxu1 %v14070_v43  ;;  %v10109_v42 = vsel %vm9554_vm7, 1.0, %v12591_v26  ;;  %v8284_v18 = vld [vmem:[#allocation3 + $0x80] sm:$0xff]  ;;  %v10110_v34 = vsel %vm9555_vm8, 1.0, %v12591_v26 }
0x1405   : > { %11907 = vmatprep.subr.mxu0 %v12591_v26  ;;  %11918 = vmatprep.subr.mxu1 %v12591_v26 }
0x1406   : > { %11908 = vmatpush3.msra.mxu0 %v14085_v62  ;;  %11919 = vmatpush3.msra.mxu1 %v14088_v13  ;;  %v8285_v62 = vld [vmem:[#allocation3 + $0x88] sm:$0xff] }
0x1407   : > { %11909 = vmatprep.subr.mxu0 %v12591_v26  ;;  %11920 = vmatprep.subr.mxu1 %v12591_v26 }
0x1408   : > { %11910 = vmatpush3.msra.mxu0 %v14101_v63  ;;  %11921 = vmatpush3.msra.mxu1 %v14104_v25 }
0x1409   : > { %11911 = vmatprep.mubr.msk.f32.mxu0 %vm12592_vm1, %v12591_v26  ;;  %11922 = vmatprep.mubr.msk.f32.mxu1 %vm12592_vm1, %v12591_v26 }
0x140a   : > { %11925 = vmatprep.subr.mxu0 %v12591_v26  ;;  %11936 = vmatprep.subr.mxu1 %v12591_v26 }
0x140b   : > { %9608 = vperm.xlu0 %12084, %v10109_v42   ;;  %9613 = vperm.xlu1 %12090, %v10110_v34  }
0x14b7   : > { %v8357_v43 = vpop.f32.mrf.mxu0  ;;  %v8434_v13 = vpop.f32.mrf.mxu1 }
0x14b8   : > { %v8361_v63 = vadd.f32 %v8357_v43, %v8284_v18  ;;  %v8438_v25 = vadd.f32 %v8434_v13, %v8285_v62 }
0x14b9   : > { %v11869_v21 = vpop.f32.mrf.mxu0  ;;  %v11880_v41 = vpop.f32.mrf.mxu1 }
0x14ba   : > { %v10077_v22 = vmul.f32 -1.442695, %v8361_v63  ;;  %v10079_v23 = vmul.f32 -1.442695, %v8438_v25 }
0x14bc   : > { %12411 = vpow2.f32 %v10077_v22 }
0x14bd   : > { %12413 = vpow2.f32 %v10079_v23 }
0x14c0   : > { %v8511_v33 = vpop.f32.mrf.mxu0  ;;  %v8583_v0 = vpop.f32.mrf.mxu1 }
0x14c1   : > { %v8587_v2 = vadd.f32 %v8583_v0, %v8287_v1  ;;  %v8515_v50 = vadd.f32 %v8511_v33, %v8286_v19  ;;  %v14505_v19 = vld [vmem:[%s12703_s14 + $0x178] sm:$0xff] }
0x14c2   : > { %v11891_v5 = vpop.f32.mrf.mxu0  ;;  %v11902_v49 = vpop.f32.mrf.mxu1 }
0x14c3   : > { %v10082_v20 = vmul.f32 -1.442695, %v8587_v2  ;;  %v14501_v49 = vld [vmem:[%s12703_s14 + $0x158] sm:$0xff] }
0x14c5   : > { %12415 = vpow2.f32 %v10082_v20  ;;  %v14511_v20 = vld [vmem:[%s12703_s14 + $0x150] sm:$0xff] }
0x14c6   : > { %12417 = vtanh.f32 %v8515_v50  ;;  %v14515_v50 = vld [vmem:[%s12703_s14 + $0x170] sm:$0xff] }
0x14c9   : > { %v12412_v51 = vpop.eup %12411 }
0x14ca   : > { %v12414_v52 = vpop.eup %12413  ;;  %v8365_v54 = vadd.f32 1.0, %v12412_v51  ;;  %v14521_v51 = vld [vmem:[%s12703_s14 + $0x148] sm:$0xff] }
0x14cb   : > { %v8442_v55 = vadd.f32 1.0, %v12414_v52  ;;  %v14525_v52 = vld [vmem:[%s12703_s14 + $0x168] sm:$0xff] }
0x14cc   : > { %12419 = vrcp.f32 %v8365_v54  ;;  %v14531_v54 = vld [vmem:[%s12703_s14 + $0x140] sm:$0xff] }
0x14cd   : > { %12421 = vrcp.f32 %v8442_v55  ;;  %v14537_v55 = vld [vmem:[%s12703_s14 + $0x160] sm:$0xff] }
0x14d2   : > { %v12416_v56 = vpop.eup %12415 }
0x14d3   : > { %v12418_v12 = vpop.eup %12417  ;;  %v8591_v17 = vadd.f32 1.0, %v12416_v56  ;;  %v10111_v56 = vsel %vm9556_vm9, 1.0, %v12591_v26 }
0x14d4   : > { %9618 = vperm.xlu0 %12084, %v10111_v56  }
0x14d5   : > { %12423 = vrcp.f32 %v8591_v17 }
0x14d9   : > { %v12420_v14 = vpop.eup %12419 }
0x14da   : > { %v12422_v15 = vpop.eup %12421  ;;  %v8595_v16 = vmul.f32 %v12420_v14, %v12418_v12  ;;  %v8916_v12 = vld [vmem:[#allocation3 + $0xc0] sm:$0xff] }
0x14db   : > { %v8594_v3 = vmul.f32 %v12422_v15, %v14365_v7  ;;  %v8917_v15 = vld [vmem:[#allocation3 + $0xc8] sm:$0xff] }
0x14dd   : > { %v14419_v4 = vadd.f32 %v8595_v16, %v8594_v3 }
0x14df   : > { %12425 = vtanh.f32 %v14419_v4 }
0x14e2   : > { %v12424_v24 = vpop.eup %12423 }
0x14ec   : > { %v12426_v31 = vpop.eup %12425 }
0x14ed   : > { %v8598_v60 = vmul.f32 %v12426_v31, %v12424_v24 }
0x14ef   : > { %8599 = vst.msk [vmem:[#allocation2 + $0x20] sm:$0xff] %vm367_vm0, %v8598_v60  ;;  %11912 = vmatmul.mubr.msk.f32.vlgmr.msra.gmra.mxu0 %vm367_vm0, %v8598_v60  ;;  %11923 = vmatmul.mubr.msk.f32.vlgmr.msra.gmra.mxu1 %vm367_vm0, %v8598_v60 }
0x14f0   : > { %11926 = vmatpush3.msra.mxu0 %v14117_v27  ;;  %11937 = vmatpush3.msra.mxu1 %v14120_v36  ;;  %v14448_v27 = vld [vmem:[%s12703_s14 + $0x118] sm:$0xff] }
0x14f1   : > { %11927 = vmatprep.subr.mxu0 %v12591_v26  ;;  %11938 = vmatprep.subr.mxu1 %v12591_v26  ;;  %v14452_v36 = vld [vmem:[%s12703_s14 + $0x138] sm:$0xff] }
0x14f2   : > { %11928 = vmatpush3.msra.mxu0 %v14127_v44  ;;  %11939 = vmatpush3.msra.mxu1 %v14130_v45  ;;  %v14458_v44 = vld [vmem:[%s12703_s14 + $0x110] sm:$0xff] }
0x14f3   : > { %11929 = vmatprep.subr.mxu0 %v12591_v26  ;;  %11940 = vmatprep.subr.mxu1 %v12591_v26  ;;  %v14462_v45 = vld [vmem:[%s12703_s14 + $0x130] sm:$0xff] }
0x14f4   : > { %11930 = vmatpush3.msra.mxu0 %v14137_v46  ;;  %11941 = vmatpush3.msra.mxu1 %v14140_v47  ;;  %v14468_v46 = vld [vmem:[%s12703_s14 + $0x108] sm:$0xff] }
0x14f5   : > { %11931 = vmatprep.subr.mxu0 %v12591_v26  ;;  %11942 = vmatprep.subr.mxu1 %v12591_v26  ;;  %v14472_v47 = vld [vmem:[%s12703_s14 + $0x128] sm:$0xff] }
0x14f6   : > { %11932 = vmatpush3.msra.mxu0 %v14147_v48  ;;  %11933 = vmatprep.mubr.msk.f32.mxu0 %vm12592_vm1, %v12591_v26  ;;  %v14478_v48 = vld [vmem:[%s12703_s14 + $0x100] sm:$0xff] }
0x14f7   : > { %11943 = vmatpush3.msra.mxu1 %v14152_v30  ;;  %11944 = vmatprep.mubr.msk.f32.mxu1 %vm12592_vm1, %v12591_v26  ;;  %v14482_v30 = vld [vmem:[%s12703_s14 + $0x120] sm:$0xff] }
0x14f8   : > { %11934 = vmatmul.mubr.msk.f32.vlgmr.msra.gmra.mxu0 %vm367_vm0, %v8598_v60  ;;  %11945 = vmatmul.mubr.msk.f32.vlgmr.msra.gmra.mxu1 %vm367_vm0, %v8598_v60 }
0x14f9   : > { %11947 = vmatprep.subr.mxu0 %v12591_v26  ;;  %11958 = vmatprep.subr.mxu1 %v12591_v26 }
0x14fa   : > { %11948 = vmatpush3.msra.mxu0 %v14448_v27  ;;  %11959 = vmatpush3.msra.mxu1 %v14452_v36 }
0x14fb   : > { %11949 = vmatprep.subr.mxu0 %v12591_v26  ;;  %11960 = vmatprep.subr.mxu1 %v12591_v26 }
0x14fc   : > { %11950 = vmatpush3.msra.mxu0 %v14458_v44  ;;  %11961 = vmatpush3.msra.mxu1 %v14462_v45 }
0x14fd   : > { %11951 = vmatprep.subr.mxu0 %v12591_v26  ;;  %11962 = vmatprep.subr.mxu1 %v12591_v26 }
0x14fe   : > { %11952 = vmatpush3.msra.mxu0 %v14468_v46  ;;  %11963 = vmatpush3.msra.mxu1 %v14472_v47 }
0x14ff   : > { %11953 = vmatprep.subr.mxu0 %v12591_v26  ;;  %11964 = vmatprep.subr.mxu1 %v12591_v26 }
0x1500   : > { %11954 = vmatpush3.msra.mxu0 %v14478_v48  ;;  %11965 = vmatpush3.msra.mxu1 %v14482_v30 }
0x1501   : > { %11955 = vmatprep.mubr.msk.f32.mxu0 %vm12592_vm1, %v12591_v26  ;;  %11966 = vmatprep.mubr.msk.f32.mxu1 %vm12592_vm1, %v12591_v26 }
0x1502   : > { %11969 = vmatprep.subr.mxu0 %v12591_v26  ;;  %11980 = vmatprep.subr.mxu1 %v12591_v26 }
0x15af   : > { %v8673_v35 = vpop.f32.mrf.mxu0  ;;  %v8750_v28 = vpop.f32.mrf.mxu1 }
0x15b0   : > { %v8677_v37 = vadd.f32 %v8673_v35, %v8600_v32  ;;  %v8754_v29 = vadd.f32 %v8750_v28, %v8601_v53 }
0x15b1   : > { %v11913_v38 = vpop.f32.mrf.mxu0  ;;  %v11924_v39 = vpop.f32.mrf.mxu1 }
0x15b2   : > { %v10084_v40 = vmul.f32 -1.442695, %v8677_v37  ;;  %v10086_v57 = vmul.f32 -1.442695, %v8754_v29 }
0x15b4   : > { %12427 = vpow2.f32 %v10084_v40 }
0x15b5   : > { %12429 = vpow2.f32 %v10086_v57 }
0x15b8   : > { %v8827_v58 = vpop.f32.mrf.mxu0  ;;  %v8899_v59 = vpop.f32.mrf.mxu1 }
0x15b9   : > { %v8903_v6 = vadd.f32 %v8899_v59, %v8603_v61  ;;  %v8831_v42 = vadd.f32 %v8827_v58, %v8602_v11  ;;  %v9233_v11 = vld [vmem:[#allocation3 + $0xe8] sm:$0xff] }
0x15ba   : > { %v11935_v7 = vpop.f32.mrf.mxu0  ;;  %v11946_v8 = vpop.f32.mrf.mxu1 }
0x15bb   : > { %v10089_v9 = vmul.f32 -1.442695, %v8903_v6  ;;  %v9232_v7 = vld [vmem:[#allocation3 + $0xe0] sm:$0xff] }
0x15bd   : > { %12431 = vpow2.f32 %v10089_v9 }
0x15be   : > { %12433 = vtanh.f32 %v8831_v42 }
0x15c1   : > { %v12428_v18 = vpop.eup %12427 }
0x15c2   : > { %v12430_v43 = vpop.eup %12429  ;;  %v8681_v62 = vadd.f32 1.0, %v12428_v18 }
0x15c3   : > { %v8758_v13 = vadd.f32 1.0, %v12430_v43 }
0x15c4   : > { %12435 = vrcp.f32 %v8681_v62 }
0x15c5   : > { %12437 = vrcp.f32 %v8758_v13 }
0x15ca   : > { %v12432_v63 = vpop.eup %12431 }
0x15cb   : > { %v12434_v25 = vpop.eup %12433  ;;  %v8907_v23 = vadd.f32 1.0, %v12432_v63 }
0x15cd   : > { %12439 = vrcp.f32 %v8907_v23 }
0x15d1   : > { %v12436_v21 = vpop.eup %12435 }
0x15d2   : > { %v12438_v41 = vpop.eup %12437  ;;  %v8911_v22 = vmul.f32 %v12436_v21, %v12434_v25 }
0x15d3   : > { %v8910_v33 = vmul.f32 %v12438_v41, %v14419_v4  ;;  %v9235_v41 = vld [vmem:[#allocation3 + $0xf8] sm:$0xff] }
0x15d5   : > { %v14494_v0 = vadd.f32 %v8911_v22, %v8910_v33  ;;  %v9234_v33 = vld [vmem:[#allocation3 + $0xf0] sm:$0xff] }
0x15d7   : > { %12441 = vtanh.f32 %v14494_v0 }
0x15da   : > { %v12440_v1 = vpop.eup %12439 }
0x15e4   : > { %v12442_v2 = vpop.eup %12441 }
0x15e5   : > { %v8914_v5 = vmul.f32 %v12442_v2, %v12440_v1 }
0x15e7   : > { %8915 = vst.msk [vmem:[#allocation2 + $0x28] sm:$0xff] %vm367_vm0, %v8914_v5  ;;  %11956 = vmatmul.mubr.msk.f32.vlgmr.msra.gmra.mxu0 %vm367_vm0, %v8914_v5  ;;  %11967 = vmatmul.mubr.msk.f32.vlgmr.msra.gmra.mxu1 %vm367_vm0, %v8914_v5 }
0x15e8   : > { %11970 = vmatpush3.msra.mxu0 %v14501_v49  ;;  %11981 = vmatpush3.msra.mxu1 %v14505_v19 }
0x15e9   : > { %11971 = vmatprep.subr.mxu0 %v12591_v26  ;;  %11982 = vmatprep.subr.mxu1 %v12591_v26 }
0x15ea   : > { %11972 = vmatpush3.msra.mxu0 %v14511_v20  ;;  %11983 = vmatpush3.msra.mxu1 %v14515_v50 }
0x15eb   : > { %11973 = vmatprep.subr.mxu0 %v12591_v26  ;;  %11984 = vmatprep.subr.mxu1 %v12591_v26 }
0x15ec   : > { %11974 = vmatpush3.msra.mxu0 %v14521_v51  ;;  %11985 = vmatpush3.msra.mxu1 %v14525_v52 }
0x15ed   : > { %11975 = vmatprep.subr.mxu0 %v12591_v26  ;;  %11986 = vmatprep.subr.mxu1 %v12591_v26 }
0x15ee   : > { %11976 = vmatpush3.msra.mxu0 %v14531_v54  ;;  %11977 = vmatprep.mubr.msk.f32.mxu0 %vm12592_vm1, %v12591_v26 }
0x15ef   : > { %11987 = vmatpush3.msra.mxu1 %v14537_v55  ;;  %11988 = vmatprep.mubr.msk.f32.mxu1 %vm12592_vm1, %v12591_v26 }
0x15f0   : > { %11978 = vmatmul.mubr.msk.f32.vlgmr.msra.gmra.mxu0 %vm367_vm0, %v8914_v5  ;;  %11989 = vmatmul.mubr.msk.f32.vlgmr.msra.gmra.mxu1 %vm367_vm0, %v8914_v5 }
0x15f1   : > { %11991 = vmatprep.subr.mxu0 %v12591_v26  ;;  %12002 = vmatprep.subr.mxu1 %v12591_v26 }
0x15f2   : > { %11992 = vmatpush3.msra.mxu0 %v14448_v27  ;;  %12003 = vmatpush3.msra.mxu1 %v14452_v36 }
0x15f3   : > { %11993 = vmatprep.subr.mxu0 %v12591_v26  ;;  %12004 = vmatprep.subr.mxu1 %v12591_v26 }
0x15f4   : > { %11994 = vmatpush3.msra.mxu0 %v14458_v44  ;;  %12005 = vmatpush3.msra.mxu1 %v14462_v45  ;;  %v8919_v44 = vld [vmem:[#allocation3 + $0xd8] sm:$0xff] }
0x15f5   : > { %11995 = vmatprep.subr.mxu0 %v12591_v26  ;;  %12006 = vmatprep.subr.mxu1 %v12591_v26 }
0x15f6   : > { %11996 = vmatpush3.msra.mxu0 %v14468_v46  ;;  %12007 = vmatpush3.msra.mxu1 %v14472_v47  ;;  %v8918_v47 = vld [vmem:[#allocation3 + $0xd0] sm:$0xff] }
0x15f7   : > { %11997 = vmatprep.subr.mxu0 %v12591_v26  ;;  %12008 = vmatprep.subr.mxu1 %v12591_v26 }
0x15f8   : > { %11998 = vmatpush3.msra.mxu0 %v14478_v48  ;;  %12009 = vmatpush3.msra.mxu1 %v14482_v30 }
0x15f9   : > { %11999 = vmatprep.mubr.msk.f32.mxu0 %vm12592_vm1, %v12591_v26  ;;  %12010 = vmatprep.mubr.msk.f32.mxu1 %vm12592_vm1, %v12591_v26 }
0x15fa   : > { %12013 = vmatprep.subr.mxu0 %v12591_v26  ;;  %12024 = vmatprep.subr.mxu1 %v12591_v26 }
0x16a7   : > { %v8989_v14 = vpop.f32.mrf.mxu0  ;;  %v9066_v16 = vpop.f32.mrf.mxu1 }
0x16a8   : > { %v8993_v17 = vadd.f32 %v8989_v14, %v8916_v12  ;;  %v9070_v3 = vadd.f32 %v9066_v16, %v8917_v15  ;;  %v12087_v14 = vpop.permute.xlu0 %12086  ;;  %v9574_v16 = vld [vmem:[#allocation2 + $0x8] sm:$0xff] }
0x16a9   : > { %v11957_v4 = vpop.f32.mrf.mxu0  ;;  %v11968_v24 = vpop.f32.mrf.mxu1  ;;  %v12089_v15 = vunpack.i.h.bf16 %v12087_v14 }
0x16aa   : > { %v10091_v31 = vmul.f32 -1.442695, %v8993_v17  ;;  %v10093_v60 = vmul.f32 -1.442695, %v9070_v3  ;;  %v12088_v17 = vunpack.i.l.bf16 %v12087_v14  ;;  %v9573_v3 = vld [vmem:[#allocation2] sm:$0xff]  ;;  %v9575_v24 = vld [vmem:[#allocation2 + $0x10] sm:$0xff] }
0x16ac   : > { %12443 = vpow2.f32 %v10091_v31  ;;  %v9594_v4 = vpop.permute.xlu0 %9593  ;;  %v9599_v31 = vpop.permute.xlu1 %9598 }
0x16ad   : > { %12445 = vpow2.f32 %v10093_v60  ;;  %v9622_v60 = vmul.f32 %v12089_v15, %v9574_v16 }
0x16b0   : > { %v9143_v27 = vpop.f32.mrf.mxu0  ;;  %v9215_v36 = vpop.f32.mrf.mxu1 }
0x16b1   : > { %v9219_v45 = vadd.f32 %v9215_v36, %v8919_v44  ;;  %v9147_v30 = vadd.f32 %v9143_v27, %v8918_v47  ;;  %v9576_v27 = vld [vmem:[#allocation2 + $0x18] sm:$0xff]  ;;  %v9621_v36 = vmul.f32 %v12088_v17, %v9573_v3  ;;  %v9623_v44 = vmul.f32 %v9594_v4, %v9575_v24 }
0x16b2   : > { %v11979_v10 = vpop.f32.mrf.mxu0  ;;  %v11990_v46 = vpop.f32.mrf.mxu1  ;;  %v9630_v47 = vsel %vm367_vm0, %v9622_v60, 0.0 }
0x16b3   : > { %v10096_v48 = vmul.f32 -1.442695, %v9219_v45  ;;  %v9604_v45 = vpop.permute.xlu1 %9603  ;;  %v9577_v10 = vld [vmem:[#allocation2 + $0x20] sm:$0xff] }
0x16b5   : > { %12447 = vpow2.f32 %v10096_v48  ;;  %v9624_v48 = vmul.f32 %v9599_v31, %v9576_v27 }
0x16b6   : > { %12449 = vtanh.f32 %v9147_v30 }
0x16b9   : > { %v12444_v34 = vpop.eup %12443 }
0x16ba   : > { %v12446_v32 = vpop.eup %12445  ;;  %v8997_v35 = vadd.f32 1.0, %v12444_v34  ;;  %v9609_v34 = vpop.permute.xlu0 %9608 }
0x16bb   : > { %v9074_v53 = vadd.f32 1.0, %v12446_v32  ;;  %v9578_v32 = vld [vmem:[#allocation2 + $0x28] sm:$0xff] }
0x16bc   : > { %12451 = vrcp.f32 %v8997_v35  ;;  %v9629_v35 = vsel %vm367_vm0, %v9621_v36, 0.0 }
0x16bd   : > { %12453 = vrcp.f32 %v9074_v53  ;;  %v9632_v53 = vsel %vm367_vm0, %v9623_v44, 0.0 }
0x16c2   : > { %v12448_v28 = vpop.eup %12447 }
0x16c3   : > { %v12450_v37 = vpop.eup %12449  ;;  %v9223_v40 = vadd.f32 1.0, %v12448_v28  ;;  %v9625_v28 = vmul.f32 %v9604_v45, %v9577_v10 }
0x16c5   : > { %12455 = vrcp.f32 %v9223_v40  ;;  %v9634_v40 = vsel %vm367_vm0, %v9624_v48, 0.0 }
0x16c9   : > { %v12452_v29 = vpop.eup %12451 }
0x16ca   : > { %v12454_v38 = vpop.eup %12453  ;;  %v9227_v39 = vmul.f32 %v12452_v29, %v12450_v37  ;;  %v9631_v29 = vadd.f32 %v9630_v47, %v9629_v35 }
0x16cb   : > { %v9226_v57 = vmul.f32 %v12454_v38, %v14494_v0  ;;  %v9614_v38 = vpop.permute.xlu1 %9613 }
0x16cd   : > { %v9228_v58 = vadd.f32 %v9227_v39, %v9226_v57  ;;  %v9626_v57 = vmul.f32 %v9609_v34, %v9578_v32 }
0x16cf   : > { %12457 = vtanh.f32 %v9228_v58 }
0x16d2   : > { %v12456_v59 = vpop.eup %12455 }
0x16dc   : > { %v12458_v61 = vpop.eup %12457 }
0x16dd   : > { %v9230_v6 = vmul.f32 %v12458_v61, %v12456_v59  ;;  %v9636_v59 = vsel %vm367_vm0, %v9625_v28, 0.0 }
0x16df   : > { %9231 = vst.msk [vmem:[#allocation2 + $0x30] sm:$0xff] %vm367_vm0, %v9230_v6  ;;  %12000 = vmatmul.mubr.msk.f32.vlgmr.msra.gmra.mxu0 %vm367_vm0, %v9230_v6  ;;  %12011 = vmatmul.mubr.msk.f32.vlgmr.msra.gmra.mxu1 %vm367_vm0, %v9230_v6 }
0x16e0   : > { %12014 = vmatpush3.msra.mxu0 %v14501_v49  ;;  %12025 = vmatpush3.msra.mxu1 %v14505_v19 }
0x16e1   : > { %12015 = vmatprep.subr.mxu0 %v12591_v26  ;;  %12026 = vmatprep.subr.mxu1 %v12591_v26 }
0x16e2   : > { %12016 = vmatpush3.msra.mxu0 %v14511_v20  ;;  %12027 = vmatpush3.msra.mxu1 %v14515_v50 }
0x16e3   : > { %12017 = vmatprep.subr.mxu0 %v12591_v26  ;;  %12028 = vmatprep.subr.mxu1 %v12591_v26 }
0x16e4   : > { %12018 = vmatpush3.msra.mxu0 %v14521_v51  ;;  %12029 = vmatpush3.msra.mxu1 %v14525_v52 }
0x16e5   : > { %12019 = vmatprep.subr.mxu0 %v12591_v26  ;;  %12030 = vmatprep.subr.mxu1 %v12591_v26 }
0x16e6   : > { %12020 = vmatpush3.msra.mxu0 %v14531_v54  ;;  %12021 = vmatprep.mubr.msk.f32.mxu0 %vm12592_vm1, %v12591_v26  ;;  %v9579_v39 = vld [vmem:[#allocation2 + $0x30] sm:$0xff] }
0x16e7   : > { %12031 = vmatpush3.msra.mxu1 %v14537_v55  ;;  %12032 = vmatprep.mubr.msk.f32.mxu1 %vm12592_vm1, %v12591_v26  ;;  %v9627_v61 = vmul.f32 %v9614_v38, %v9579_v39 }
0x16e8   : > { %12022 = vmatmul.mubr.msk.f32.vlgmr.msra.gmra.mxu0 %vm367_vm0, %v9230_v6  ;;  %12033 = vmatmul.mubr.msk.f32.vlgmr.msra.gmra.mxu1 %vm367_vm0, %v9230_v6 }
0x179f   : > { %v9305_v8 = vpop.f32.mrf.mxu0  ;;  %v9382_v9 = vpop.f32.mrf.mxu1 }
0x17a0   : > { %v9309_v42 = vadd.f32 %v9305_v8, %v9232_v7  ;;  %v9386_v18 = vadd.f32 %v9382_v9, %v9233_v11  ;;  %v9638_v7 = vsel %vm367_vm0, %v9626_v57, 0.0  ;;  %v9640_v11 = vsel %vm367_vm0, %v9627_v61, 0.0 }
0x17a1   : > { %v12001_v43 = vpop.f32.mrf.mxu0  ;;  %v12012_v62 = vpop.f32.mrf.mxu1 }
0x17a2   : > { %v10098_v13 = vmul.f32 -1.442695, %v9309_v42  ;;  %v10100_v63 = vmul.f32 -1.442695, %v9386_v18  ;;  %v9619_v42 = vpop.permute.xlu0 %9618 }
0x17a4   : > { %12459 = vpow2.f32 %v10098_v13 }
0x17a5   : > { %12461 = vpow2.f32 %v10100_v63 }
0x17a8   : > { %v9459_v25 = vpop.f32.mrf.mxu0  ;;  %v9531_v21 = vpop.f32.mrf.mxu1 }
0x17a9   : > { %v9535_v26 = vadd.f32 %v9531_v21, %v9235_v41  ;;  %v9463_v1 = vadd.f32 %v9459_v25, %v9234_v33 }
0x17aa   : > { %v12023_v22 = vpop.f32.mrf.mxu0  ;;  %v12034_v23 = vpop.f32.mrf.mxu1 }
0x17ab   : > { %v10103_v0 = vmul.f32 -1.442695, %v9535_v26 }
0x17ad   : > { %12463 = vpow2.f32 %v10103_v0 }
0x17ae   : > { %12465 = vtanh.f32 %v9463_v1 }
0x17b1   : > { %v12460_v2 = vpop.eup %12459 }
0x17b2   : > { %v12462_v5 = vpop.eup %12461  ;;  %v9313_v49 = vadd.f32 1.0, %v12460_v2 }
0x17b3   : > { %v9390_v19 = vadd.f32 1.0, %v12462_v5 }
0x17b4   : > { %12467 = vrcp.f32 %v9313_v49 }
0x17b5   : > { %12469 = vrcp.f32 %v9390_v19 }
0x17ba   : > { %v12464_v20 = vpop.eup %12463 }
0x17bb   : > { %v12466_v50 = vpop.eup %12465  ;;  %v9539_v55 = vadd.f32 1.0, %v12464_v20 }
0x17bd   : > { %12471 = vrcp.f32 %v9539_v55 }
0x17c1   : > { %v12468_v51 = vpop.eup %12467 }
0x17c2   : > { %v12470_v52 = vpop.eup %12469  ;;  %v9543_v54 = vmul.f32 %v12468_v51, %v12466_v50 }
0x17c3   : > { %v9542_v56 = vmul.f32 %v12470_v52, %v9228_v58  ;;  %v9633_v58 = vadd.f32 %v9632_v53, %v9631_v29 }
0x17c5   : > { %v9544_v12 = vadd.f32 %v9543_v54, %v9542_v56  ;;  %v9635_v6 = vadd.f32 %v9634_v40, %v9633_v58 }
0x17c7   : > { %12473 = vtanh.f32 %v9544_v12  ;;  %v9637_v8 = vadd.f32 %v9636_v59, %v9635_v6 }
0x17c9   : > { %v9639_v9 = vadd.f32 %v9638_v7, %v9637_v8 }
0x17ca   : > { %v12472_v46 = vpop.eup %12471 }
0x17cb   : > { %v9641_v62 = vadd.f32 %v9640_v11, %v9639_v9 }
0x17d4   : > { %v12474_v30 = vpop.eup %12473 }
0x17d5   : > { %v9546_v37 = vmul.f32 %v12474_v30, %v12472_v46 }
0x17d7   : > { %9547 = vst.msk [vmem:[#allocation2 + $0x38] sm:$0xff] %vm367_vm0, %v9546_v37 }
0x17de   : > { %v9580_v18 = vld [vmem:[#allocation2 + $0x38] sm:$0xff] }
0x17df   : > { %v9628_v43 = vmul.f32 %v9619_v42, %v9580_v18 }
0x17e1   : > { %v9642_v13 = vsel %vm367_vm0, %v9628_v43, 0.0 }
0x17e2   : > { %v9643_v63 = vadd.f32 %v9642_v13, %v9641_v62 }
0x17e4   : > { %9644 = vst.msk [vmem:[%s316_s13] sm:$0xff] %vm367_vm0, %v9643_v63 }
0x17e5 PF: > { %p15_p8 = scmp.ge.s32.totalorder %s12646_s23, 4   ;;  %s14631_s18 = smov %s12578_s19 }
0x17e6   : > { %s14632_s19 = smov %s12582_s20  ;;  %s14633_s20 = smov %s12656_s26 }
0x17e7   : > { %s14634_s21 = smov %s12646_s23  ;;  %17 = sbr.rel (!%p15_p8) target bundleno = 3 (0x3), region = 112 }
0x17ec   :  { %9664 = vsyncpa [#allocation5], 1 }
0x17ed   :  { %9666 = vsyncpa [#allocation5 + $0x1], 1 }

</bundles_post_ra>
